<compile_context>
chip_gen: v7x
topology: tpu7x:2x2x1
jax: 0.10.0
libtpu: 0.0.40
codegen_flags: <defaults>
</compile_context>

<pallas_src>
import numpy as np
import jax
import jax.numpy as jnp
from jax.experimental import pallas as pl
from jax.experimental.pallas import tpu as pltpu


def _round_up(n, m):
    return ((n + m - 1) // m) * m


# ---------------------------------------------------------------------------
# Fused Pallas kernel: conv3x3 + bias + ReLU + maxpool2x2 + FC1 + ReLU + FC2
# ---------------------------------------------------------------------------

def fused_cnn_kernel(patches_ref, wc_ref, bc_ref, w1_ref, b1_ref, w2_ref,
                     b2_ref, out_ref, taps32_ref, feat_ref):
    """One batch tile of the whole network.

    patches_ref: (36, Bt, 196) bf16 VMEM  im2col, slab index = tap*4 + pool_pos
    wc_ref:      (8, 9)        f32  SMEM  conv weights (out_ch, tap)
    bc_ref:      (8,)          f32  SMEM  conv bias
    w1_ref:      (2048, 128)   bf16 VMEM  fc1 weights, (ch*256 + pixel, hidden)
                                          rows >=196 per channel and cols >=64 are 0
    b1_ref:      (1, 128)      f32  VMEM  lane-padded (first 64 valid)
    w2_ref:      (128, 128)    bf16 VMEM  fc2 weights, rows>=64 / cols>=10 are 0
    b2_ref:      (1, 128)      f32  VMEM  lane-padded (first 10 valid)
    out_ref:     (Bt, 128)     f32  VMEM  logits (first 10 lanes valid)
    taps32_ref:  (36, Bt, 196) f32  VMEM  scratch: f32 copy of the tap slabs
    feat_ref:    (Bt, 2048)    bf16 VMEM  scratch: pooled features, 256/lane-chunk per ch
    """
    # --- Pre-pass: hoisted bf16 -> f32 cast, one slab at a time (bounded
    # liveness; 36 casts total instead of 8*36 inside the channel loop).
    for kp in range(36):
        taps32_ref[kp] = patches_ref[kp].astype(jnp.float32)

    # Zero the lane-padded feature staging buffer once per grid step so the
    # 60 pad lanes per channel are 0 (uninitialised VMEM may hold NaNs).
    feat_ref[...] = jnp.zeros_like(feat_ref)

    # --- Conv 3x3 as 8*9*4 scalar(SMEM) x vector FMAs on dense (Bt, 196)
    # slabs, 2x2 max-pool as an elementwise maximum tree, then bias + ReLU
    # (bias/ReLU commute with max).  Pooled channel c is staged bf16 into
    # feat_ref lanes [c*256, c*256+196).
    for c in range(8):                               # 8 conv output channels
        pooled = None
        for p in range(4):                           # 2x2 pool positions
            acc = wc_ref[c, 0] * taps32_ref[p]       # tap k = 0
            for k in range(1, 9):                    # taps 1..8
                acc = acc + wc_ref[c, k] * taps32_ref[k * 4 + p]
            pooled = acc if pooled is None else jnp.maximum(pooled, acc)
        pooled = jnp.maximum(pooled + bc_ref[c], 0.0)            # bias + ReLU
        feat_ref[:, c * 256:c * 256 + 196] = pooled.astype(jnp.bfloat16)

    # --- FC1: single MXU matmul, K = 8*256 = 2048 (pad rows are zero-weight),
    # N = 128 (hidden padded 64 -> 128), f32 accumulation.
    h = jnp.dot(feat_ref[...], w1_ref[...], preferred_element_type=jnp.float32)
    h = jnp.maximum(h + b1_ref[...], 0.0)            # (Bt, 128), lanes>=64 == 0

    # --- FC2 on the MXU; logits are lane-padded to 128 (unmasked stores).
    out_ref[...] = (
        jnp.dot(h.astype(jnp.bfloat16), w2_ref[...],
                preferred_element_type=jnp.float32) + b2_ref[...]
    )


# ---------------------------------------------------------------------------
# Parameter repacking (one-time, PyTorch layouts -> kernel layouts)
# ---------------------------------------------------------------------------

def prepare_params(conv_w, conv_b, fc1_w, fc1_b, fc2_w, fc2_b):
    wc = conv_w.reshape(8, 9).astype(jnp.float32)              # (out_ch, tap)
    bc = conv_b.astype(jnp.float32)                            # (8,)
    # nn.Flatten(NCHW): feature f = c*196 + (h*14 + w).
    # Repack to (ch, pixel, hidden), lane-pad pixel 196->256 and hidden 64->128,
    # then flatten to (2048, 128) so row index = c*256 + pixel.
    w1_csh = fc1_w.reshape(64, 8, 196).transpose(1, 2, 0)      # (8, 196, 64)
    w1 = jnp.zeros((8, 256, 128), jnp.float32).at[:, :196, :64].set(
        w1_csh.astype(jnp.float32))
    w1 = w1.reshape(2048, 128).astype(jnp.bfloat16)
    b1 = jnp.zeros((1, 128), jnp.float32).at[:, :64].set(
        fc1_b.astype(jnp.float32))
    w2 = jnp.zeros((128, 128), jnp.float32).at[:64, :10].set(
        fc2_w.T.astype(jnp.float32)).astype(jnp.bfloat16)
    b2 = jnp.zeros((1, 128), jnp.float32).at[:, :10].set(
        fc2_b.astype(jnp.float32))
    return wc, bc, w1, b1, w2, b2


# ---------------------------------------------------------------------------
# Forward wrapper
# ---------------------------------------------------------------------------

def cnn_classifier_forward(x, wc, bc, w1, b1, w2, b2, *, bt_max=128):
    """x: (N, 1, 28, 28) f32 NCHW. Returns logits (N, 10) f32."""
    N = x.shape[0]
    bt = min(bt_max, _round_up(max(N, 1), 8))       # batch tile per grid step
    n_pad = _round_up(N, bt)

    # --- lane-dense im2col: (36, N, 196) bf16, slab index = (di*3+dj)*4 + (pi*2+pj)
    # element [slab, n, ph*14+pw] = xpad[n, 2*ph+pi+di, 2*pw+pj+dj]
    xp = jnp.pad(x[:, 0], ((0, 0), (1, 1), (1, 1)))            # (N, 30, 30)
    slabs = []
    for di in range(3):
        for dj in range(3):
            for pi in range(2):
                for pj in range(2):
                    s = xp[:, pi + di: pi + di + 28: 2, pj + dj: pj + dj + 28: 2]
                    slabs.append(s.reshape(N, 196))
    patches = jnp.stack(slabs, axis=0).astype(jnp.bfloat16)    # (36, N, 196)
    if n_pad != N:
        patches = jnp.pad(patches, ((0, 0), (0, n_pad - N), (0, 0)))

    out = pl.pallas_call(
        fused_cnn_kernel,
        out_shape=jax.ShapeDtypeStruct((n_pad, 128), jnp.float32),
        grid=(n_pad // bt,),
        in_specs=[
            pl.BlockSpec((36, bt, 196), lambda i: (0, i, 0)),
            pl.BlockSpec((8, 9), lambda i: (0, 0),
                         memory_space=pltpu.MemorySpace.SMEM),
            pl.BlockSpec((8,), lambda i: (0,),
                         memory_space=pltpu.MemorySpace.SMEM),
            pl.BlockSpec((2048, 128), lambda i: (0, 0)),
            pl.BlockSpec((1, 128), lambda i: (0, 0)),
            pl.BlockSpec((128, 128), lambda i: (0, 0)),
            pl.BlockSpec((1, 128), lambda i: (0, 0)),
        ],
        out_specs=pl.BlockSpec((bt, 128), lambda i: (i, 0)),
        scratch_shapes=[
            pltpu.VMEM((36, bt, 196), jnp.float32),   # f32 tap slabs
            pltpu.VMEM((bt, 2048), jnp.bfloat16),     # pooled features (FC1 LHS)
        ],
        compiler_params=pltpu.CompilerParams(
            dimension_semantics=("parallel",),
            vmem_limit_bytes=32 * 1024 * 1024,
        ),
    )(patches, wc, bc, w1, b1, w2, b2)

    return out[:N, :10]


# ---------------------------------------------------------------------------
# Pure-numpy reference (matches PyTorch forward semantics)
# ---------------------------------------------------------------------------

def reference_forward_np(x, conv_w, conv_b, fc1_w, fc1_b, fc2_w, fc2_b):
    x, conv_w, conv_b, fc1_w, fc1_b, fc2_w, fc2_b = (
        np.asarray(a, np.float32)
        for a in (x, conv_w, conv_b, fc1_w, fc1_b, fc2_w, fc2_b)
    )
    N = x.shape[0]
    xp = np.pad(x[:, 0], ((0, 0), (1, 1), (1, 1)))
    conv = np.zeros((N, 8, 28, 28), np.float32)
    for co in range(8):
        acc = np.zeros((N, 28, 28), np.float32)
        for di in range(3):
            for dj in range(3):
                acc += conv_w[co, 0, di, dj] * xp[:, di:di + 28, dj:dj + 28]
        conv[:, co] = acc + conv_b[co]
    conv = np.maximum(conv, 0.0)                                # ReLU
    pooled = conv.reshape(N, 8, 14, 2, 14, 2).max(axis=(3, 5))  # MaxPool2d(2,2)
    feat = pooled.reshape(N, 8 * 14 * 14)                       # Flatten (NCHW)
    h = np.maximum(feat @ fc1_w.T + fc1_b, 0.0)
    return h @ fc2_w.T + fc2_b


# ---------------------------------------------------------------------------
# Main
# ---------------------------------------------------------------------------

if __name__ == "__main__":
    key = jax.random.PRNGKey(0)
    kx, k1, k2, k3, k4, k5, k6 = jax.random.split(key, 7)

    N = 2
    x = jax.random.normal(kx, (N, 1, 28, 28), jnp.float32)

    # Deterministic synthetic parameters (PyTorch shape conventions).
    conv_w = jax.random.normal(k1, (8, 1, 3, 3), jnp.float32) * (1.0 / 3.0)
    conv_b = jax.random.normal(k2, (8,), jnp.float32) * 0.1
    fc1_w = jax.random.normal(k3, (64, 8 * 14 * 14), jnp.float32) * (1.0 / np.sqrt(8 * 14 * 14))
    fc1_b = jax.random.normal(k4, (64,), jnp.float32) * 0.1
    fc2_w = jax.random.normal(k5, (10, 64), jnp.float32) * (1.0 / 8.0)
    fc2_b = jax.random.normal(k6, (10,), jnp.float32) * 0.1

    params = prepare_params(conv_w, conv_b, fc1_w, fc1_b, fc2_w, fc2_b)
    fwd = jax.jit(cnn_classifier_forward)
    logits = jax.block_until_ready(fwd(x, *params))

    ref = reference_forward_np(x, conv_w, conv_b, fc1_w, fc1_b, fc2_w, fc2_b)
    assert logits.shape == (N, 10) and logits.dtype == jnp.float32
    # bf16 storage for patches / pooled features / FC weights (f32 accumulation).
    np.testing.assert_allclose(np.asarray(logits), ref, rtol=3e-2, atol=3e-2)

    print("KERNEL_OK")
</pallas_src>

<mosaic_0001>
module attributes {stable_mosaic.version = 11 : i64} {
  func.func @fused_cnn_kernel(%arg0: i32, %arg1: memref<36x8x196xbf16, #tpu.memory_space<vmem>>, %arg2: memref<8x9xf32, #tpu.memory_space<smem>>, %arg3: memref<8xf32, #tpu.memory_space<smem>>, %arg4: memref<2048x128xbf16, #tpu.memory_space<vmem>>, %arg5: memref<1x128xf32, #tpu.memory_space<vmem>>, %arg6: memref<128x128xbf16, #tpu.memory_space<vmem>>, %arg7: memref<1x128xf32, #tpu.memory_space<vmem>>, %arg8: memref<8x128xf32, #tpu.memory_space<vmem>>, %arg9: memref<36x8x196xf32, #tpu.memory_space<vmem>>, %arg10: memref<8x2048xbf16, #tpu.memory_space<vmem>>) attributes {dimension_semantics = [#tpu.dimension_semantics<parallel>], iteration_bounds = array<i64: 1>, scalar_prefetch = 0 : i64, scratch_operands = 2 : i64, tpu.core_type = #tpu.core_type<tc>, window_params = [{transform_indices = @transform_0, window_bounds = array<i64: 36, 8, 196>}, {transform_indices = @transform_1, window_bounds = array<i64: 8, 9>}, {transform_indices = @transform_2, window_bounds = array<i64: 8>}, {pipeline_mode = #tpu.pipeline_mode<synchronous>, transform_indices = @transform_3, window_bounds = array<i64: 2048, 128>}, {pipeline_mode = #tpu.pipeline_mode<synchronous>, transform_indices = @transform_4, window_bounds = array<i64: 1, 128>}, {pipeline_mode = #tpu.pipeline_mode<synchronous>, transform_indices = @transform_5, window_bounds = array<i64: 128, 128>}, {pipeline_mode = #tpu.pipeline_mode<synchronous>, transform_indices = @transform_6, window_bounds = array<i64: 1, 128>}, {transform_indices = @transform_7, window_bounds = array<i64: 8, 128>}]} {
    %c0 = arith.constant 0 : index
    %c0_0 = arith.constant 0 : index
    %c0_1 = arith.constant 0 : index
    %0 = vector.load %arg1[%c0, %c0_0, %c0_1] : memref<36x8x196xbf16, #tpu.memory_space<vmem>>, vector<1x8x196xbf16>
    %1 = vector.shape_cast %0 : vector<1x8x196xbf16> to vector<8x196xbf16>
    %2 = arith.extf %1 : vector<8x196xbf16> to vector<8x196xf32>
    %c0_2 = arith.constant 0 : index
    %c0_3 = arith.constant 0 : index
    %c0_4 = arith.constant 0 : index
    %3 = vector.load %arg9[%c0_2, %c0_3, %c0_4] : memref<36x8x196xf32, #tpu.memory_space<vmem>>, vector<1x8x196xf32>
    %4 = vector.shape_cast %3 : vector<1x8x196xf32> to vector<8x196xf32>
    %5 = vector.shape_cast %2 : vector<8x196xf32> to vector<1x8x196xf32>
    tpu.vector_store %arg9[%c0_2, %c0_3, %c0_4], %5 {strides = array<i32>} : memref<36x8x196xf32, #tpu.memory_space<vmem>>, vector<1x8x196xf32>,
    %c1 = arith.constant 1 : index
    %c0_5 = arith.constant 0 : index
    %c0_6 = arith.constant 0 : index
    %6 = vector.load %arg1[%c1, %c0_5, %c0_6] : memref<36x8x196xbf16, #tpu.memory_space<vmem>>, vector<1x8x196xbf16>
    %7 = vector.shape_cast %6 : vector<1x8x196xbf16> to vector<8x196xbf16>
    %8 = arith.extf %7 : vector<8x196xbf16> to vector<8x196xf32>
    %c1_7 = arith.constant 1 : index
    %c0_8 = arith.constant 0 : index
    %c0_9 = arith.constant 0 : index
    %9 = vector.load %arg9[%c1_7, %c0_8, %c0_9] : memref<36x8x196xf32, #tpu.memory_space<vmem>>, vector<1x8x196xf32>
    %10 = vector.shape_cast %9 : vector<1x8x196xf32> to vector<8x196xf32>
    %11 = vector.shape_cast %8 : vector<8x196xf32> to vector<1x8x196xf32>
    tpu.vector_store %arg9[%c1_7, %c0_8, %c0_9], %11 {strides = array<i32>} : memref<36x8x196xf32, #tpu.memory_space<vmem>>, vector<1x8x196xf32>,
    %c2 = arith.constant 2 : index
    %c0_10 = arith.constant 0 : index
    %c0_11 = arith.constant 0 : index
    %12 = vector.load %arg1[%c2, %c0_10, %c0_11] : memref<36x8x196xbf16, #tpu.memory_space<vmem>>, vector<1x8x196xbf16>
    %13 = vector.shape_cast %12 : vector<1x8x196xbf16> to vector<8x196xbf16>
    %14 = arith.extf %13 : vector<8x196xbf16> to vector<8x196xf32>
    %c2_12 = arith.constant 2 : index
    %c0_13 = arith.constant 0 : index
    %c0_14 = arith.constant 0 : index
    %15 = vector.load %arg9[%c2_12, %c0_13, %c0_14] : memref<36x8x196xf32, #tpu.memory_space<vmem>>, vector<1x8x196xf32>
    %16 = vector.shape_cast %15 : vector<1x8x196xf32> to vector<8x196xf32>
    %17 = vector.shape_cast %14 : vector<8x196xf32> to vector<1x8x196xf32>
    tpu.vector_store %arg9[%c2_12, %c0_13, %c0_14], %17 {strides = array<i32>} : memref<36x8x196xf32, #tpu.memory_space<vmem>>, vector<1x8x196xf32>,
    %c3 = arith.constant 3 : index
    %c0_15 = arith.constant 0 : index
    %c0_16 = arith.constant 0 : index
    %18 = vector.load %arg1[%c3, %c0_15, %c0_16] : memref<36x8x196xbf16, #tpu.memory_space<vmem>>, vector<1x8x196xbf16>
    %19 = vector.shape_cast %18 : vector<1x8x196xbf16> to vector<8x196xbf16>
    %20 = arith.extf %19 : vector<8x196xbf16> to vector<8x196xf32>
    %c3_17 = arith.constant 3 : index
    %c0_18 = arith.constant 0 : index
    %c0_19 = arith.constant 0 : index
    %21 = vector.load %arg9[%c3_17, %c0_18, %c0_19] : memref<36x8x196xf32, #tpu.memory_space<vmem>>, vector<1x8x196xf32>
    %22 = vector.shape_cast %21 : vector<1x8x196xf32> to vector<8x196xf32>
    %23 = vector.shape_cast %20 : vector<8x196xf32> to vector<1x8x196xf32>
    tpu.vector_store %arg9[%c3_17, %c0_18, %c0_19], %23 {strides = array<i32>} : memref<36x8x196xf32, #tpu.memory_space<vmem>>, vector<1x8x196xf32>,
    %c4 = arith.constant 4 : index
    %c0_20 = arith.constant 0 : index
    %c0_21 = arith.constant 0 : index
    %24 = vector.load %arg1[%c4, %c0_20, %c0_21] : memref<36x8x196xbf16, #tpu.memory_space<vmem>>, vector<1x8x196xbf16>
    %25 = vector.shape_cast %24 : vector<1x8x196xbf16> to vector<8x196xbf16>
    %26 = arith.extf %25 : vector<8x196xbf16> to vector<8x196xf32>
    %c4_22 = arith.constant 4 : index
    %c0_23 = arith.constant 0 : index
    %c0_24 = arith.constant 0 : index
    %27 = vector.load %arg9[%c4_22, %c0_23, %c0_24] : memref<36x8x196xf32, #tpu.memory_space<vmem>>, vector<1x8x196xf32>
    %28 = vector.shape_cast %27 : vector<1x8x196xf32> to vector<8x196xf32>
    %29 = vector.shape_cast %26 : vector<8x196xf32> to vector<1x8x196xf32>
    tpu.vector_store %arg9[%c4_22, %c0_23, %c0_24], %29 {strides = array<i32>} : memref<36x8x196xf32, #tpu.memory_space<vmem>>, vector<1x8x196xf32>,
    %c5 = arith.constant 5 : index
    %c0_25 = arith.constant 0 : index
    %c0_26 = arith.constant 0 : index
    %30 = vector.load %arg1[%c5, %c0_25, %c0_26] : memref<36x8x196xbf16, #tpu.memory_space<vmem>>, vector<1x8x196xbf16>
    %31 = vector.shape_cast %30 : vector<1x8x196xbf16> to vector<8x196xbf16>
    %32 = arith.extf %31 : vector<8x196xbf16> to vector<8x196xf32>
    %c5_27 = arith.constant 5 : index
    %c0_28 = arith.constant 0 : index
    %c0_29 = arith.constant 0 : index
    %33 = vector.load %arg9[%c5_27, %c0_28, %c0_29] : memref<36x8x196xf32, #tpu.memory_space<vmem>>, vector<1x8x196xf32>
    %34 = vector.shape_cast %33 : vector<1x8x196xf32> to vector<8x196xf32>
    %35 = vector.shape_cast %32 : vector<8x196xf32> to vector<1x8x196xf32>
    tpu.vector_store %arg9[%c5_27, %c0_28, %c0_29], %35 {strides = array<i32>} : memref<36x8x196xf32, #tpu.memory_space<vmem>>, vector<1x8x196xf32>,
    %c6 = arith.constant 6 : index
    %c0_30 = arith.constant 0 : index
    %c0_31 = arith.constant 0 : index
    %36 = vector.load %arg1[%c6, %c0_30, %c0_31] : memref<36x8x196xbf16, #tpu.memory_space<vmem>>, vector<1x8x196xbf16>
    %37 = vector.shape_cast %36 : vector<1x8x196xbf16> to vector<8x196xbf16>
    %38 = arith.extf %37 : vector<8x196xbf16> to vector<8x196xf32>
    %c6_32 = arith.constant 6 : index
    %c0_33 = arith.constant 0 : index
    %c0_34 = arith.constant 0 : index
    %39 = vector.load %arg9[%c6_32, %c0_33, %c0_34] : memref<36x8x196xf32, #tpu.memory_space<vmem>>, vector<1x8x196xf32>
    %40 = vector.shape_cast %39 : vector<1x8x196xf32> to vector<8x196xf32>
    %41 = vector.shape_cast %38 : vector<8x196xf32> to vector<1x8x196xf32>
    tpu.vector_store %arg9[%c6_32, %c0_33, %c0_34], %41 {strides = array<i32>} : memref<36x8x196xf32, #tpu.memory_space<vmem>>, vector<1x8x196xf32>,
    %c7 = arith.constant 7 : index
    %c0_35 = arith.constant 0 : index
    %c0_36 = arith.constant 0 : index
    %42 = vector.load %arg1[%c7, %c0_35, %c0_36] : memref<36x8x196xbf16, #tpu.memory_space<vmem>>, vector<1x8x196xbf16>
    %43 = vector.shape_cast %42 : vector<1x8x196xbf16> to vector<8x196xbf16>
    %44 = arith.extf %43 : vector<8x196xbf16> to vector<8x196xf32>
    %c7_37 = arith.constant 7 : index
    %c0_38 = arith.constant 0 : index
    %c0_39 = arith.constant 0 : index
    %45 = vector.load %arg9[%c7_37, %c0_38, %c0_39] : memref<36x8x196xf32, #tpu.memory_space<vmem>>, vector<1x8x196xf32>
    %46 = vector.shape_cast %45 : vector<1x8x196xf32> to vector<8x196xf32>
    %47 = vector.shape_cast %44 : vector<8x196xf32> to vector<1x8x196xf32>
    tpu.vector_store %arg9[%c7_37, %c0_38, %c0_39], %47 {strides = array<i32>} : memref<36x8x196xf32, #tpu.memory_space<vmem>>, vector<1x8x196xf32>,
    %c8 = arith.constant 8 : index
    %c0_40 = arith.constant 0 : index
    %c0_41 = arith.constant 0 : index
    %48 = vector.load %arg1[%c8, %c0_40, %c0_41] : memref<36x8x196xbf16, #tpu.memory_space<vmem>>, vector<1x8x196xbf16>
    %49 = vector.shape_cast %48 : vector<1x8x196xbf16> to vector<8x196xbf16>
    %50 = arith.extf %49 : vector<8x196xbf16> to vector<8x196xf32>
    %c8_42 = arith.constant 8 : index
    %c0_43 = arith.constant 0 : index
    %c0_44 = arith.constant 0 : index
    %51 = vector.load %arg9[%c8_42, %c0_43, %c0_44] : memref<36x8x196xf32, #tpu.memory_space<vmem>>, vector<1x8x196xf32>
    %52 = vector.shape_cast %51 : vector<1x8x196xf32> to vector<8x196xf32>
    %53 = vector.shape_cast %50 : vector<8x196xf32> to vector<1x8x196xf32>
    tpu.vector_store %arg9[%c8_42, %c0_43, %c0_44], %53 {strides = array<i32>} : memref<36x8x196xf32, #tpu.memory_space<vmem>>, vector<1x8x196xf32>,
    %c9 = arith.constant 9 : index
    %c0_45 = arith.constant 0 : index
    %c0_46 = arith.constant 0 : index
    %54 = vector.load %arg1[%c9, %c0_45, %c0_46] : memref<36x8x196xbf16, #tpu.memory_space<vmem>>, vector<1x8x196xbf16>
    %55 = vector.shape_cast %54 : vector<1x8x196xbf16> to vector<8x196xbf16>
    %56 = arith.extf %55 : vector<8x196xbf16> to vector<8x196xf32>
    %c9_47 = arith.constant 9 : index
    %c0_48 = arith.constant 0 : index
    %c0_49 = arith.constant 0 : index
    %57 = vector.load %arg9[%c9_47, %c0_48, %c0_49] : memref<36x8x196xf32, #tpu.memory_space<vmem>>, vector<1x8x196xf32>
    %58 = vector.shape_cast %57 : vector<1x8x196xf32> to vector<8x196xf32>
    %59 = vector.shape_cast %56 : vector<8x196xf32> to vector<1x8x196xf32>
    tpu.vector_store %arg9[%c9_47, %c0_48, %c0_49], %59 {strides = array<i32>} : memref<36x8x196xf32, #tpu.memory_space<vmem>>, vector<1x8x196xf32>,
    %c10 = arith.constant 10 : index
    %c0_50 = arith.constant 0 : index
    %c0_51 = arith.constant 0 : index
    %60 = vector.load %arg1[%c10, %c0_50, %c0_51] : memref<36x8x196xbf16, #tpu.memory_space<vmem>>, vector<1x8x196xbf16>
    %61 = vector.shape_cast %60 : vector<1x8x196xbf16> to vector<8x196xbf16>
    %62 = arith.extf %61 : vector<8x196xbf16> to vector<8x196xf32>
    %c10_52 = arith.constant 10 : index
    %c0_53 = arith.constant 0 : index
    %c0_54 = arith.constant 0 : index
    %63 = vector.load %arg9[%c10_52, %c0_53, %c0_54] : memref<36x8x196xf32, #tpu.memory_space<vmem>>, vector<1x8x196xf32>
    %64 = vector.shape_cast %63 : vector<1x8x196xf32> to vector<8x196xf32>
    %65 = vector.shape_cast %62 : vector<8x196xf32> to vector<1x8x196xf32>
    tpu.vector_store %arg9[%c10_52, %c0_53, %c0_54], %65 {strides = array<i32>} : memref<36x8x196xf32, #tpu.memory_space<vmem>>, vector<1x8x196xf32>,
    %c11 = arith.constant 11 : index
    %c0_55 = arith.constant 0 : index
    %c0_56 = arith.constant 0 : index
    %66 = vector.load %arg1[%c11, %c0_55, %c0_56] : memref<36x8x196xbf16, #tpu.memory_space<vmem>>, vector<1x8x196xbf16>
    %67 = vector.shape_cast %66 : vector<1x8x196xbf16> to vector<8x196xbf16>
    %68 = arith.extf %67 : vector<8x196xbf16> to vector<8x196xf32>
    %c11_57 = arith.constant 11 : index
    %c0_58 = arith.constant 0 : index
    %c0_59 = arith.constant 0 : index
    %69 = vector.load %arg9[%c11_57, %c0_58, %c0_59] : memref<36x8x196xf32, #tpu.memory_space<vmem>>, vector<1x8x196xf32>
    %70 = vector.shape_cast %69 : vector<1x8x196xf32> to vector<8x196xf32>
    %71 = vector.shape_cast %68 : vector<8x196xf32> to vector<1x8x196xf32>
    tpu.vector_store %arg9[%c11_57, %c0_58, %c0_59], %71 {strides = array<i32>} : memref<36x8x196xf32, #tpu.memory_space<vmem>>, vector<1x8x196xf32>,
    %c12 = arith.constant 12 : index
    %c0_60 = arith.constant 0 : index
    %c0_61 = arith.constant 0 : index
    %72 = vector.load %arg1[%c12, %c0_60, %c0_61] : memref<36x8x196xbf16, #tpu.memory_space<vmem>>, vector<1x8x196xbf16>
    %73 = vector.shape_cast %72 : vector<1x8x196xbf16> to vector<8x196xbf16>
    %74 = arith.extf %73 : vector<8x196xbf16> to vector<8x196xf32>
    %c12_62 = arith.constant 12 : index
    %c0_63 = arith.constant 0 : index
    %c0_64 = arith.constant 0 : index
    %75 = vector.load %arg9[%c12_62, %c0_63, %c0_64] : memref<36x8x196xf32, #tpu.memory_space<vmem>>, vector<1x8x196xf32>
    %76 = vector.shape_cast %75 : vector<1x8x196xf32> to vector<8x196xf32>
    %77 = vector.shape_cast %74 : vector<8x196xf32> to vector<1x8x196xf32>
    tpu.vector_store %arg9[%c12_62, %c0_63, %c0_64], %77 {strides = array<i32>} : memref<36x8x196xf32, #tpu.memory_space<vmem>>, vector<1x8x196xf32>,
    %c13 = arith.constant 13 : index
    %c0_65 = arith.constant 0 : index
    %c0_66 = arith.constant 0 : index
    %78 = vector.load %arg1[%c13, %c0_65, %c0_66] : memref<36x8x196xbf16, #tpu.memory_space<vmem>>, vector<1x8x196xbf16>
    %79 = vector.shape_cast %78 : vector<1x8x196xbf16> to vector<8x196xbf16>
    %80 = arith.extf %79 : vector<8x196xbf16> to vector<8x196xf32>
    %c13_67 = arith.constant 13 : index
    %c0_68 = arith.constant 0 : index
    %c0_69 = arith.constant 0 : index
    %81 = vector.load %arg9[%c13_67, %c0_68, %c0_69] : memref<36x8x196xf32, #tpu.memory_space<vmem>>, vector<1x8x196xf32>
    %82 = vector.shape_cast %81 : vector<1x8x196xf32> to vector<8x196xf32>
    %83 = vector.shape_cast %80 : vector<8x196xf32> to vector<1x8x196xf32>
    tpu.vector_store %arg9[%c13_67, %c0_68, %c0_69], %83 {strides = array<i32>} : memref<36x8x196xf32, #tpu.memory_space<vmem>>, vector<1x8x196xf32>,
    %c14 = arith.constant 14 : index
    %c0_70 = arith.constant 0 : index
    %c0_71 = arith.constant 0 : index
    %84 = vector.load %arg1[%c14, %c0_70, %c0_71] : memref<36x8x196xbf16, #tpu.memory_space<vmem>>, vector<1x8x196xbf16>
    %85 = vector.shape_cast %84 : vector<1x8x196xbf16> to vector<8x196xbf16>
    %86 = arith.extf %85 : vector<8x196xbf16> to vector<8x196xf32>
    %c14_72 = arith.constant 14 : index
    %c0_73 = arith.constant 0 : index
    %c0_74 = arith.constant 0 : index
    %87 = vector.load %arg9[%c14_72, %c0_73, %c0_74] : memref<36x8x196xf32, #tpu.memory_space<vmem>>, vector<1x8x196xf32>
    %88 = vector.shape_cast %87 : vector<1x8x196xf32> to vector<8x196xf32>
    %89 = vector.shape_cast %86 : vector<8x196xf32> to vector<1x8x196xf32>
    tpu.vector_store %arg9[%c14_72, %c0_73, %c0_74], %89 {strides = array<i32>} : memref<36x8x196xf32, #tpu.memory_space<vmem>>, vector<1x8x196xf32>,
    %c15 = arith.constant 15 : index
    %c0_75 = arith.constant 0 : index
    %c0_76 = arith.constant 0 : index
    %90 = vector.load %arg1[%c15, %c0_75, %c0_76] : memref<36x8x196xbf16, #tpu.memory_space<vmem>>, vector<1x8x196xbf16>
    %91 = vector.shape_cast %90 : vector<1x8x196xbf16> to vector<8x196xbf16>
    %92 = arith.extf %91 : vector<8x196xbf16> to vector<8x196xf32>
    %c15_77 = arith.constant 15 : index
    %c0_78 = arith.constant 0 : index
    %c0_79 = arith.constant 0 : index
    %93 = vector.load %arg9[%c15_77, %c0_78, %c0_79] : memref<36x8x196xf32, #tpu.memory_space<vmem>>, vector<1x8x196xf32>
    %94 = vector.shape_cast %93 : vector<1x8x196xf32> to vector<8x196xf32>
    %95 = vector.shape_cast %92 : vector<8x196xf32> to vector<1x8x196xf32>
    tpu.vector_store %arg9[%c15_77, %c0_78, %c0_79], %95 {strides = array<i32>} : memref<36x8x196xf32, #tpu.memory_space<vmem>>, vector<1x8x196xf32>,
    %c16 = arith.constant 16 : index
    %c0_80 = arith.constant 0 : index
    %c0_81 = arith.constant 0 : index
    %96 = vector.load %arg1[%c16, %c0_80, %c0_81] : memref<36x8x196xbf16, #tpu.memory_space<vmem>>, vector<1x8x196xbf16>
    %97 = vector.shape_cast %96 : vector<1x8x196xbf16> to vector<8x196xbf16>
    %98 = arith.extf %97 : vector<8x196xbf16> to vector<8x196xf32>
    %c16_82 = arith.constant 16 : index
    %c0_83 = arith.constant 0 : index
    %c0_84 = arith.constant 0 : index
    %99 = vector.load %arg9[%c16_82, %c0_83, %c0_84] : memref<36x8x196xf32, #tpu.memory_space<vmem>>, vector<1x8x196xf32>
    %100 = vector.shape_cast %99 : vector<1x8x196xf32> to vector<8x196xf32>
    %101 = vector.shape_cast %98 : vector<8x196xf32> to vector<1x8x196xf32>
    tpu.vector_store %arg9[%c16_82, %c0_83, %c0_84], %101 {strides = array<i32>} : memref<36x8x196xf32, #tpu.memory_space<vmem>>, vector<1x8x196xf32>,
    %c17 = arith.constant 17 : index
    %c0_85 = arith.constant 0 : index
    %c0_86 = arith.constant 0 : index
    %102 = vector.load %arg1[%c17, %c0_85, %c0_86] : memref<36x8x196xbf16, #tpu.memory_space<vmem>>, vector<1x8x196xbf16>
    %103 = vector.shape_cast %102 : vector<1x8x196xbf16> to vector<8x196xbf16>
    %104 = arith.extf %103 : vector<8x196xbf16> to vector<8x196xf32>
    %c17_87 = arith.constant 17 : index
    %c0_88 = arith.constant 0 : index
    %c0_89 = arith.constant 0 : index
    %105 = vector.load %arg9[%c17_87, %c0_88, %c0_89] : memref<36x8x196xf32, #tpu.memory_space<vmem>>, vector<1x8x196xf32>
    %106 = vector.shape_cast %105 : vector<1x8x196xf32> to vector<8x196xf32>
    %107 = vector.shape_cast %104 : vector<8x196xf32> to vector<1x8x196xf32>
    tpu.vector_store %arg9[%c17_87, %c0_88, %c0_89], %107 {strides = array<i32>} : memref<36x8x196xf32, #tpu.memory_space<vmem>>, vector<1x8x196xf32>,
    %c18 = arith.constant 18 : index
    %c0_90 = arith.constant 0 : index
    %c0_91 = arith.constant 0 : index
    %108 = vector.load %arg1[%c18, %c0_90, %c0_91] : memref<36x8x196xbf16, #tpu.memory_space<vmem>>, vector<1x8x196xbf16>
    %109 = vector.shape_cast %108 : vector<1x8x196xbf16> to vector<8x196xbf16>
    %110 = arith.extf %109 : vector<8x196xbf16> to vector<8x196xf32>
    %c18_92 = arith.constant 18 : index
    %c0_93 = arith.constant 0 : index
    %c0_94 = arith.constant 0 : index
    %111 = vector.load %arg9[%c18_92, %c0_93, %c0_94] : memref<36x8x196xf32, #tpu.memory_space<vmem>>, vector<1x8x196xf32>
    %112 = vector.shape_cast %111 : vector<1x8x196xf32> to vector<8x196xf32>
    %113 = vector.shape_cast %110 : vector<8x196xf32> to vector<1x8x196xf32>
    tpu.vector_store %arg9[%c18_92, %c0_93, %c0_94], %113 {strides = array<i32>} : memref<36x8x196xf32, #tpu.memory_space<vmem>>, vector<1x8x196xf32>,
    %c19 = arith.constant 19 : index
    %c0_95 = arith.constant 0 : index
    %c0_96 = arith.constant 0 : index
    %114 = vector.load %arg1[%c19, %c0_95, %c0_96] : memref<36x8x196xbf16, #tpu.memory_space<vmem>>, vector<1x8x196xbf16>
    %115 = vector.shape_cast %114 : vector<1x8x196xbf16> to vector<8x196xbf16>
    %116 = arith.extf %115 : vector<8x196xbf16> to vector<8x196xf32>
    %c19_97 = arith.constant 19 : index
    %c0_98 = arith.constant 0 : index
    %c0_99 = arith.constant 0 : index
    %117 = vector.load %arg9[%c19_97, %c0_98, %c0_99] : memref<36x8x196xf32, #tpu.memory_space<vmem>>, vector<1x8x196xf32>
    %118 = vector.shape_cast %117 : vector<1x8x196xf32> to vector<8x196xf32>
    %119 = vector.shape_cast %116 : vector<8x196xf32> to vector<1x8x196xf32>
    tpu.vector_store %arg9[%c19_97, %c0_98, %c0_99], %119 {strides = array<i32>} : memref<36x8x196xf32, #tpu.memory_space<vmem>>, vector<1x8x196xf32>,
    %c20 = arith.constant 20 : index
    %c0_100 = arith.constant 0 : index
    %c0_101 = arith.constant 0 : index
    %120 = vector.load %arg1[%c20, %c0_100, %c0_101] : memref<36x8x196xbf16, #tpu.memory_space<vmem>>, vector<1x8x196xbf16>
    %121 = vector.shape_cast %120 : vector<1x8x196xbf16> to vector<8x196xbf16>
    %122 = arith.extf %121 : vector<8x196xbf16> to vector<8x196xf32>
    %c20_102 = arith.constant 20 : index
    %c0_103 = arith.constant 0 : index
    %c0_104 = arith.constant 0 : index
    %123 = vector.load %arg9[%c20_102, %c0_103, %c0_104] : memref<36x8x196xf32, #tpu.memory_space<vmem>>, vector<1x8x196xf32>
    %124 = vector.shape_cast %123 : vector<1x8x196xf32> to vector<8x196xf32>
    %125 = vector.shape_cast %122 : vector<8x196xf32> to vector<1x8x196xf32>
    tpu.vector_store %arg9[%c20_102, %c0_103, %c0_104], %125 {strides = array<i32>} : memref<36x8x196xf32, #tpu.memory_space<vmem>>, vector<1x8x196xf32>,
    %c21 = arith.constant 21 : index
    %c0_105 = arith.constant 0 : index
    %c0_106 = arith.constant 0 : index
    %126 = vector.load %arg1[%c21, %c0_105, %c0_106] : memref<36x8x196xbf16, #tpu.memory_space<vmem>>, vector<1x8x196xbf16>
    %127 = vector.shape_cast %126 : vector<1x8x196xbf16> to vector<8x196xbf16>
    %128 = arith.extf %127 : vector<8x196xbf16> to vector<8x196xf32>
    %c21_107 = arith.constant 21 : index
    %c0_108 = arith.constant 0 : index
    %c0_109 = arith.constant 0 : index
    %129 = vector.load %arg9[%c21_107, %c0_108, %c0_109] : memref<36x8x196xf32, #tpu.memory_space<vmem>>, vector<1x8x196xf32>
    %130 = vector.shape_cast %129 : vector<1x8x196xf32> to vector<8x196xf32>
    %131 = vector.shape_cast %128 : vector<8x196xf32> to vector<1x8x196xf32>
    tpu.vector_store %arg9[%c21_107, %c0_108, %c0_109], %131 {strides = array<i32>} : memref<36x8x196xf32, #tpu.memory_space<vmem>>, vector<1x8x196xf32>,
    %c22 = arith.constant 22 : index
    %c0_110 = arith.constant 0 : index
    %c0_111 = arith.constant 0 : index
    %132 = vector.load %arg1[%c22, %c0_110, %c0_111] : memref<36x8x196xbf16, #tpu.memory_space<vmem>>, vector<1x8x196xbf16>
    %133 = vector.shape_cast %132 : vector<1x8x196xbf16> to vector<8x196xbf16>
    %134 = arith.extf %133 : vector<8x196xbf16> to vector<8x196xf32>
    %c22_112 = arith.constant 22 : index
    %c0_113 = arith.constant 0 : index
    %c0_114 = arith.constant 0 : index
    %135 = vector.load %arg9[%c22_112, %c0_113, %c0_114] : memref<36x8x196xf32, #tpu.memory_space<vmem>>, vector<1x8x196xf32>
    %136 = vector.shape_cast %135 : vector<1x8x196xf32> to vector<8x196xf32>
    %137 = vector.shape_cast %134 : vector<8x196xf32> to vector<1x8x196xf32>
    tpu.vector_store %arg9[%c22_112, %c0_113, %c0_114], %137 {strides = array<i32>} : memref<36x8x196xf32, #tpu.memory_space<vmem>>, vector<1x8x196xf32>,
    %c23 = arith.constant 23 : index
    %c0_115 = arith.constant 0 : index
    %c0_116 = arith.constant 0 : index
    %138 = vector.load %arg1[%c23, %c0_115, %c0_116] : memref<36x8x196xbf16, #tpu.memory_space<vmem>>, vector<1x8x196xbf16>
    %139 = vector.shape_cast %138 : vector<1x8x196xbf16> to vector<8x196xbf16>
    %140 = arith.extf %139 : vector<8x196xbf16> to vector<8x196xf32>
    %c23_117 = arith.constant 23 : index
    %c0_118 = arith.constant 0 : index
    %c0_119 = arith.constant 0 : index
    %141 = vector.load %arg9[%c23_117, %c0_118, %c0_119] : memref<36x8x196xf32, #tpu.memory_space<vmem>>, vector<1x8x196xf32>
    %142 = vector.shape_cast %141 : vector<1x8x196xf32> to vector<8x196xf32>
    %143 = vector.shape_cast %140 : vector<8x196xf32> to vector<1x8x196xf32>
    tpu.vector_store %arg9[%c23_117, %c0_118, %c0_119], %143 {strides = array<i32>} : memref<36x8x196xf32, #tpu.memory_space<vmem>>, vector<1x8x196xf32>,
    %c24 = arith.constant 24 : index
    %c0_120 = arith.constant 0 : index
    %c0_121 = arith.constant 0 : index
    %144 = vector.load %arg1[%c24, %c0_120, %c0_121] : memref<36x8x196xbf16, #tpu.memory_space<vmem>>, vector<1x8x196xbf16>
    %145 = vector.shape_cast %144 : vector<1x8x196xbf16> to vector<8x196xbf16>
    %146 = arith.extf %145 : vector<8x196xbf16> to vector<8x196xf32>
    %c24_122 = arith.constant 24 : index
    %c0_123 = arith.constant 0 : index
    %c0_124 = arith.constant 0 : index
    %147 = vector.load %arg9[%c24_122, %c0_123, %c0_124] : memref<36x8x196xf32, #tpu.memory_space<vmem>>, vector<1x8x196xf32>
    %148 = vector.shape_cast %147 : vector<1x8x196xf32> to vector<8x196xf32>
    %149 = vector.shape_cast %146 : vector<8x196xf32> to vector<1x8x196xf32>
    tpu.vector_store %arg9[%c24_122, %c0_123, %c0_124], %149 {strides = array<i32>} : memref<36x8x196xf32, #tpu.memory_space<vmem>>, vector<1x8x196xf32>,
    %c25 = arith.constant 25 : index
    %c0_125 = arith.constant 0 : index
    %c0_126 = arith.constant 0 : index
    %150 = vector.load %arg1[%c25, %c0_125, %c0_126] : memref<36x8x196xbf16, #tpu.memory_space<vmem>>, vector<1x8x196xbf16>
    %151 = vector.shape_cast %150 : vector<1x8x196xbf16> to vector<8x196xbf16>
    %152 = arith.extf %151 : vector<8x196xbf16> to vector<8x196xf32>
    %c25_127 = arith.constant 25 : index
    %c0_128 = arith.constant 0 : index
    %c0_129 = arith.constant 0 : index
    %153 = vector.load %arg9[%c25_127, %c0_128, %c0_129] : memref<36x8x196xf32, #tpu.memory_space<vmem>>, vector<1x8x196xf32>
    %154 = vector.shape_cast %153 : vector<1x8x196xf32> to vector<8x196xf32>
    %155 = vector.shape_cast %152 : vector<8x196xf32> to vector<1x8x196xf32>
    tpu.vector_store %arg9[%c25_127, %c0_128, %c0_129], %155 {strides = array<i32>} : memref<36x8x196xf32, #tpu.memory_space<vmem>>, vector<1x8x196xf32>,
    %c26 = arith.constant 26 : index
    %c0_130 = arith.constant 0 : index
    %c0_131 = arith.constant 0 : index
    %156 = vector.load %arg1[%c26, %c0_130, %c0_131] : memref<36x8x196xbf16, #tpu.memory_space<vmem>>, vector<1x8x196xbf16>
    %157 = vector.shape_cast %156 : vector<1x8x196xbf16> to vector<8x196xbf16>
    %158 = arith.extf %157 : vector<8x196xbf16> to vector<8x196xf32>
    %c26_132 = arith.constant 26 : index
    %c0_133 = arith.constant 0 : index
    %c0_134 = arith.constant 0 : index
    %159 = vector.load %arg9[%c26_132, %c0_133, %c0_134] : memref<36x8x196xf32, #tpu.memory_space<vmem>>, vector<1x8x196xf32>
    %160 = vector.shape_cast %159 : vector<1x8x196xf32> to vector<8x196xf32>
    %161 = vector.shape_cast %158 : vector<8x196xf32> to vector<1x8x196xf32>
    tpu.vector_store %arg9[%c26_132, %c0_133, %c0_134], %161 {strides = array<i32>} : memref<36x8x196xf32, #tpu.memory_space<vmem>>, vector<1x8x196xf32>,
    %c27 = arith.constant 27 : index
    %c0_135 = arith.constant 0 : index
    %c0_136 = arith.constant 0 : index
    %162 = vector.load %arg1[%c27, %c0_135, %c0_136] : memref<36x8x196xbf16, #tpu.memory_space<vmem>>, vector<1x8x196xbf16>
    %163 = vector.shape_cast %162 : vector<1x8x196xbf16> to vector<8x196xbf16>
    %164 = arith.extf %163 : vector<8x196xbf16> to vector<8x196xf32>
    %c27_137 = arith.constant 27 : index
    %c0_138 = arith.constant 0 : index
    %c0_139 = arith.constant 0 : index
    %165 = vector.load %arg9[%c27_137, %c0_138, %c0_139] : memref<36x8x196xf32, #tpu.memory_space<vmem>>, vector<1x8x196xf32>
    %166 = vector.shape_cast %165 : vector<1x8x196xf32> to vector<8x196xf32>
    %167 = vector.shape_cast %164 : vector<8x196xf32> to vector<1x8x196xf32>
    tpu.vector_store %arg9[%c27_137, %c0_138, %c0_139], %167 {strides = array<i32>} : memref<36x8x196xf32, #tpu.memory_space<vmem>>, vector<1x8x196xf32>,
    %c28 = arith.constant 28 : index
    %c0_140 = arith.constant 0 : index
    %c0_141 = arith.constant 0 : index
    %168 = vector.load %arg1[%c28, %c0_140, %c0_141] : memref<36x8x196xbf16, #tpu.memory_space<vmem>>, vector<1x8x196xbf16>
    %169 = vector.shape_cast %168 : vector<1x8x196xbf16> to vector<8x196xbf16>
    %170 = arith.extf %169 : vector<8x196xbf16> to vector<8x196xf32>
    %c28_142 = arith.constant 28 : index
    %c0_143 = arith.constant 0 : index
    %c0_144 = arith.constant 0 : index
    %171 = vector.load %arg9[%c28_142, %c0_143, %c0_144] : memref<36x8x196xf32, #tpu.memory_space<vmem>>, vector<1x8x196xf32>
    %172 = vector.shape_cast %171 : vector<1x8x196xf32> to vector<8x196xf32>
    %173 = vector.shape_cast %170 : vector<8x196xf32> to vector<1x8x196xf32>
    tpu.vector_store %arg9[%c28_142, %c0_143, %c0_144], %173 {strides = array<i32>} : memref<36x8x196xf32, #tpu.memory_space<vmem>>, vector<1x8x196xf32>,
    %c29 = arith.constant 29 : index
    %c0_145 = arith.constant 0 : index
    %c0_146 = arith.constant 0 : index
    %174 = vector.load %arg1[%c29, %c0_145, %c0_146] : memref<36x8x196xbf16, #tpu.memory_space<vmem>>, vector<1x8x196xbf16>
    %175 = vector.shape_cast %174 : vector<1x8x196xbf16> to vector<8x196xbf16>
    %176 = arith.extf %175 : vector<8x196xbf16> to vector<8x196xf32>
    %c29_147 = arith.constant 29 : index
    %c0_148 = arith.constant 0 : index
    %c0_149 = arith.constant 0 : index
    %177 = vector.load %arg9[%c29_147, %c0_148, %c0_149] : memref<36x8x196xf32, #tpu.memory_space<vmem>>, vector<1x8x196xf32>
    %178 = vector.shape_cast %177 : vector<1x8x196xf32> to vector<8x196xf32>
    %179 = vector.shape_cast %176 : vector<8x196xf32> to vector<1x8x196xf32>
    tpu.vector_store %arg9[%c29_147, %c0_148, %c0_149], %179 {strides = array<i32>} : memref<36x8x196xf32, #tpu.memory_space<vmem>>, vector<1x8x196xf32>,
    %c30 = arith.constant 30 : index
    %c0_150 = arith.constant 0 : index
    %c0_151 = arith.constant 0 : index
    %180 = vector.load %arg1[%c30, %c0_150, %c0_151] : memref<36x8x196xbf16, #tpu.memory_space<vmem>>, vector<1x8x196xbf16>
    %181 = vector.shape_cast %180 : vector<1x8x196xbf16> to vector<8x196xbf16>
    %182 = arith.extf %181 : vector<8x196xbf16> to vector<8x196xf32>
    %c30_152 = arith.constant 30 : index
    %c0_153 = arith.constant 0 : index
    %c0_154 = arith.constant 0 : index
    %183 = vector.load %arg9[%c30_152, %c0_153, %c0_154] : memref<36x8x196xf32, #tpu.memory_space<vmem>>, vector<1x8x196xf32>
    %184 = vector.shape_cast %183 : vector<1x8x196xf32> to vector<8x196xf32>
    %185 = vector.shape_cast %182 : vector<8x196xf32> to vector<1x8x196xf32>
    tpu.vector_store %arg9[%c30_152, %c0_153, %c0_154], %185 {strides = array<i32>} : memref<36x8x196xf32, #tpu.memory_space<vmem>>, vector<1x8x196xf32>,
    %c31 = arith.constant 31 : index
    %c0_155 = arith.constant 0 : index
    %c0_156 = arith.constant 0 : index
    %186 = vector.load %arg1[%c31, %c0_155, %c0_156] : memref<36x8x196xbf16, #tpu.memory_space<vmem>>, vector<1x8x196xbf16>
    %187 = vector.shape_cast %186 : vector<1x8x196xbf16> to vector<8x196xbf16>
    %188 = arith.extf %187 : vector<8x196xbf16> to vector<8x196xf32>
    %c31_157 = arith.constant 31 : index
    %c0_158 = arith.constant 0 : index
    %c0_159 = arith.constant 0 : index
    %189 = vector.load %arg9[%c31_157, %c0_158, %c0_159] : memref<36x8x196xf32, #tpu.memory_space<vmem>>, vector<1x8x196xf32>
    %190 = vector.shape_cast %189 : vector<1x8x196xf32> to vector<8x196xf32>
    %191 = vector.shape_cast %188 : vector<8x196xf32> to vector<1x8x196xf32>
    tpu.vector_store %arg9[%c31_157, %c0_158, %c0_159], %191 {strides = array<i32>} : memref<36x8x196xf32, #tpu.memory_space<vmem>>, vector<1x8x196xf32>,
    %c32 = arith.constant 32 : index
    %c0_160 = arith.constant 0 : index
    %c0_161 = arith.constant 0 : index
    %192 = vector.load %arg1[%c32, %c0_160, %c0_161] : memref<36x8x196xbf16, #tpu.memory_space<vmem>>, vector<1x8x196xbf16>
    %193 = vector.shape_cast %192 : vector<1x8x196xbf16> to vector<8x196xbf16>
    %194 = arith.extf %193 : vector<8x196xbf16> to vector<8x196xf32>
    %c32_162 = arith.constant 32 : index
    %c0_163 = arith.constant 0 : index
    %c0_164 = arith.constant 0 : index
    %195 = vector.load %arg9[%c32_162, %c0_163, %c0_164] : memref<36x8x196xf32, #tpu.memory_space<vmem>>, vector<1x8x196xf32>
    %196 = vector.shape_cast %195 : vector<1x8x196xf32> to vector<8x196xf32>
    %197 = vector.shape_cast %194 : vector<8x196xf32> to vector<1x8x196xf32>
    tpu.vector_store %arg9[%c32_162, %c0_163, %c0_164], %197 {strides = array<i32>} : memref<36x8x196xf32, #tpu.memory_space<vmem>>, vector<1x8x196xf32>,
    %c33 = arith.constant 33 : index
    %c0_165 = arith.constant 0 : index
    %c0_166 = arith.constant 0 : index
    %198 = vector.load %arg1[%c33, %c0_165, %c0_166] : memref<36x8x196xbf16, #tpu.memory_space<vmem>>, vector<1x8x196xbf16>
    %199 = vector.shape_cast %198 : vector<1x8x196xbf16> to vector<8x196xbf16>
    %200 = arith.extf %199 : vector<8x196xbf16> to vector<8x196xf32>
    %c33_167 = arith.constant 33 : index
    %c0_168 = arith.constant 0 : index
    %c0_169 = arith.constant 0 : index
    %201 = vector.load %arg9[%c33_167, %c0_168, %c0_169] : memref<36x8x196xf32, #tpu.memory_space<vmem>>, vector<1x8x196xf32>
    %202 = vector.shape_cast %201 : vector<1x8x196xf32> to vector<8x196xf32>
    %203 = vector.shape_cast %200 : vector<8x196xf32> to vector<1x8x196xf32>
    tpu.vector_store %arg9[%c33_167, %c0_168, %c0_169], %203 {strides = array<i32>} : memref<36x8x196xf32, #tpu.memory_space<vmem>>, vector<1x8x196xf32>,
    %c34 = arith.constant 34 : index
    %c0_170 = arith.constant 0 : index
    %c0_171 = arith.constant 0 : index
    %204 = vector.load %arg1[%c34, %c0_170, %c0_171] : memref<36x8x196xbf16, #tpu.memory_space<vmem>>, vector<1x8x196xbf16>
    %205 = vector.shape_cast %204 : vector<1x8x196xbf16> to vector<8x196xbf16>
    %206 = arith.extf %205 : vector<8x196xbf16> to vector<8x196xf32>
    %c34_172 = arith.constant 34 : index
    %c0_173 = arith.constant 0 : index
    %c0_174 = arith.constant 0 : index
    %207 = vector.load %arg9[%c34_172, %c0_173, %c0_174] : memref<36x8x196xf32, #tpu.memory_space<vmem>>, vector<1x8x196xf32>
    %208 = vector.shape_cast %207 : vector<1x8x196xf32> to vector<8x196xf32>
    %209 = vector.shape_cast %206 : vector<8x196xf32> to vector<1x8x196xf32>
    tpu.vector_store %arg9[%c34_172, %c0_173, %c0_174], %209 {strides = array<i32>} : memref<36x8x196xf32, #tpu.memory_space<vmem>>, vector<1x8x196xf32>,
    %c35 = arith.constant 35 : index
    %c0_175 = arith.constant 0 : index
    %c0_176 = arith.constant 0 : index
    %210 = vector.load %arg1[%c35, %c0_175, %c0_176] : memref<36x8x196xbf16, #tpu.memory_space<vmem>>, vector<1x8x196xbf16>
    %211 = vector.shape_cast %210 : vector<1x8x196xbf16> to vector<8x196xbf16>
    %212 = arith.extf %211 : vector<8x196xbf16> to vector<8x196xf32>
    %c35_177 = arith.constant 35 : index
    %c0_178 = arith.constant 0 : index
    %c0_179 = arith.constant 0 : index
    %213 = vector.load %arg9[%c35_177, %c0_178, %c0_179] : memref<36x8x196xf32, #tpu.memory_space<vmem>>, vector<1x8x196xf32>
    %214 = vector.shape_cast %213 : vector<1x8x196xf32> to vector<8x196xf32>
    %215 = vector.shape_cast %212 : vector<8x196xf32> to vector<1x8x196xf32>
    tpu.vector_store %arg9[%c35_177, %c0_178, %c0_179], %215 {strides = array<i32>} : memref<36x8x196xf32, #tpu.memory_space<vmem>>, vector<1x8x196xf32>,
    %cst = arith.constant 0.000000e+00 : bf16
    %216 = vector.broadcast %cst : bf16 to vector<8x2048xbf16>
    %c0_180 = arith.constant 0 : index
    %c0_181 = arith.constant 0 : index
    %217 = vector.load %arg10[%c0_180, %c0_181] : memref<8x2048xbf16, #tpu.memory_space<vmem>>, vector<8x2048xbf16>
    tpu.vector_store %arg10[%c0_180, %c0_181], %216 {strides = array<i32>} : memref<8x2048xbf16, #tpu.memory_space<vmem>>, vector<8x2048xbf16>,
    %c0_182 = arith.constant 0 : index
    %c0_183 = arith.constant 0 : index
    %218 = memref.load %arg2[%c0_182, %c0_183] : memref<8x9xf32, #tpu.memory_space<smem>>
    %c0_184 = arith.constant 0 : index
    %c0_185 = arith.constant 0 : index
    %c0_186 = arith.constant 0 : index
    %219 = vector.load %arg9[%c0_184, %c0_185, %c0_186] : memref<36x8x196xf32, #tpu.memory_space<vmem>>, vector<1x8x196xf32>
    %220 = vector.shape_cast %219 : vector<1x8x196xf32> to vector<8x196xf32>
    %221 = vector.broadcast %218 : f32 to vector<8x196xf32>
    %222 = arith.mulf %221, %220 : vector<8x196xf32>
    %c0_187 = arith.constant 0 : index
    %c1_188 = arith.constant 1 : index
    %223 = memref.load %arg2[%c0_187, %c1_188] : memref<8x9xf32, #tpu.memory_space<smem>>
    %c4_189 = arith.constant 4 : index
    %c0_190 = arith.constant 0 : index
    %c0_191 = arith.constant 0 : index
    %224 = vector.load %arg9[%c4_189, %c0_190, %c0_191] : memref<36x8x196xf32, #tpu.memory_space<vmem>>, vector<1x8x196xf32>
    %225 = vector.shape_cast %224 : vector<1x8x196xf32> to vector<8x196xf32>
    %226 = vector.broadcast %223 : f32 to vector<8x196xf32>
    %227 = arith.mulf %226, %225 : vector<8x196xf32>
    %228 = arith.addf %222, %227 : vector<8x196xf32>
    %c0_192 = arith.constant 0 : index
    %c2_193 = arith.constant 2 : index
    %229 = memref.load %arg2[%c0_192, %c2_193] : memref<8x9xf32, #tpu.memory_space<smem>>
    %c8_194 = arith.constant 8 : index
    %c0_195 = arith.constant 0 : index
    %c0_196 = arith.constant 0 : index
    %230 = vector.load %arg9[%c8_194, %c0_195, %c0_196] : memref<36x8x196xf32, #tpu.memory_space<vmem>>, vector<1x8x196xf32>
    %231 = vector.shape_cast %230 : vector<1x8x196xf32> to vector<8x196xf32>
    %232 = vector.broadcast %229 : f32 to vector<8x196xf32>
    %233 = arith.mulf %232, %231 : vector<8x196xf32>
    %234 = arith.addf %228, %233 : vector<8x196xf32>
    %c0_197 = arith.constant 0 : index
    %c3_198 = arith.constant 3 : index
    %235 = memref.load %arg2[%c0_197, %c3_198] : memref<8x9xf32, #tpu.memory_space<smem>>
    %c12_199 = arith.constant 12 : index
    %c0_200 = arith.constant 0 : index
    %c0_201 = arith.constant 0 : index
    %236 = vector.load %arg9[%c12_199, %c0_200, %c0_201] : memref<36x8x196xf32, #tpu.memory_space<vmem>>, vector<1x8x196xf32>
    %237 = vector.shape_cast %236 : vector<1x8x196xf32> to vector<8x196xf32>
    %238 = vector.broadcast %235 : f32 to vector<8x196xf32>
    %239 = arith.mulf %238, %237 : vector<8x196xf32>
    %240 = arith.addf %234, %239 : vector<8x196xf32>
    %c0_202 = arith.constant 0 : index
    %c4_203 = arith.constant 4 : index
    %241 = memref.load %arg2[%c0_202, %c4_203] : memref<8x9xf32, #tpu.memory_space<smem>>
    %c16_204 = arith.constant 16 : index
    %c0_205 = arith.constant 0 : index
    %c0_206 = arith.constant 0 : index
    %242 = vector.load %arg9[%c16_204, %c0_205, %c0_206] : memref<36x8x196xf32, #tpu.memory_space<vmem>>, vector<1x8x196xf32>
    %243 = vector.shape_cast %242 : vector<1x8x196xf32> to vector<8x196xf32>
    %244 = vector.broadcast %241 : f32 to vector<8x196xf32>
    %245 = arith.mulf %244, %243 : vector<8x196xf32>
    %246 = arith.addf %240, %245 : vector<8x196xf32>
    %c0_207 = arith.constant 0 : index
    %c5_208 = arith.constant 5 : index
    %247 = memref.load %arg2[%c0_207, %c5_208] : memref<8x9xf32, #tpu.memory_space<smem>>
    %c20_209 = arith.constant 20 : index
    %c0_210 = arith.constant 0 : index
    %c0_211 = arith.constant 0 : index
    %248 = vector.load %arg9[%c20_209, %c0_210, %c0_211] : memref<36x8x196xf32, #tpu.memory_space<vmem>>, vector<1x8x196xf32>
    %249 = vector.shape_cast %248 : vector<1x8x196xf32> to vector<8x196xf32>
    %250 = vector.broadcast %247 : f32 to vector<8x196xf32>
    %251 = arith.mulf %250, %249 : vector<8x196xf32>
    %252 = arith.addf %246, %251 : vector<8x196xf32>
    %c0_212 = arith.constant 0 : index
    %c6_213 = arith.constant 6 : index
    %253 = memref.load %arg2[%c0_212, %c6_213] : memref<8x9xf32, #tpu.memory_space<smem>>
    %c24_214 = arith.constant 24 : index
    %c0_215 = arith.constant 0 : index
    %c0_216 = arith.constant 0 : index
    %254 = vector.load %arg9[%c24_214, %c0_215, %c0_216] : memref<36x8x196xf32, #tpu.memory_space<vmem>>, vector<1x8x196xf32>
    %255 = vector.shape_cast %254 : vector<1x8x196xf32> to vector<8x196xf32>
    %256 = vector.broadcast %253 : f32 to vector<8x196xf32>
    %257 = arith.mulf %256, %255 : vector<8x196xf32>
    %258 = arith.addf %252, %257 : vector<8x196xf32>
    %c0_217 = arith.constant 0 : index
    %c7_218 = arith.constant 7 : index
    %259 = memref.load %arg2[%c0_217, %c7_218] : memref<8x9xf32, #tpu.memory_space<smem>>
    %c28_219 = arith.constant 28 : index
    %c0_220 = arith.constant 0 : index
    %c0_221 = arith.constant 0 : index
    %260 = vector.load %arg9[%c28_219, %c0_220, %c0_221] : memref<36x8x196xf32, #tpu.memory_space<vmem>>, vector<1x8x196xf32>
    %261 = vector.shape_cast %260 : vector<1x8x196xf32> to vector<8x196xf32>
    %262 = vector.broadcast %259 : f32 to vector<8x196xf32>
    %263 = arith.mulf %262, %261 : vector<8x196xf32>
    %264 = arith.addf %258, %263 : vector<8x196xf32>
    %c0_222 = arith.constant 0 : index
    %c8_223 = arith.constant 8 : index
    %265 = memref.load %arg2[%c0_222, %c8_223] : memref<8x9xf32, #tpu.memory_space<smem>>
    %c32_224 = arith.constant 32 : index
    %c0_225 = arith.constant 0 : index
    %c0_226 = arith.constant 0 : index
    %266 = vector.load %arg9[%c32_224, %c0_225, %c0_226] : memref<36x8x196xf32, #tpu.memory_space<vmem>>, vector<1x8x196xf32>
    %267 = vector.shape_cast %266 : vector<1x8x196xf32> to vector<8x196xf32>
    %268 = vector.broadcast %265 : f32 to vector<8x196xf32>
    %269 = arith.mulf %268, %267 : vector<8x196xf32>
    %270 = arith.addf %264, %269 : vector<8x196xf32>
    %c0_227 = arith.constant 0 : index
    %c0_228 = arith.constant 0 : index
    %271 = memref.load %arg2[%c0_227, %c0_228] : memref<8x9xf32, #tpu.memory_space<smem>>
    %c1_229 = arith.constant 1 : index
    %c0_230 = arith.constant 0 : index
    %c0_231 = arith.constant 0 : index
    %272 = vector.load %arg9[%c1_229, %c0_230, %c0_231] : memref<36x8x196xf32, #tpu.memory_space<vmem>>, vector<1x8x196xf32>
    %273 = vector.shape_cast %272 : vector<1x8x196xf32> to vector<8x196xf32>
    %274 = vector.broadcast %271 : f32 to vector<8x196xf32>
    %275 = arith.mulf %274, %273 : vector<8x196xf32>
    %c0_232 = arith.constant 0 : index
    %c1_233 = arith.constant 1 : index
    %276 = memref.load %arg2[%c0_232, %c1_233] : memref<8x9xf32, #tpu.memory_space<smem>>
    %c5_234 = arith.constant 5 : index
    %c0_235 = arith.constant 0 : index
    %c0_236 = arith.constant 0 : index
    %277 = vector.load %arg9[%c5_234, %c0_235, %c0_236] : memref<36x8x196xf32, #tpu.memory_space<vmem>>, vector<1x8x196xf32>
    %278 = vector.shape_cast %277 : vector<1x8x196xf32> to vector<8x196xf32>
    %279 = vector.broadcast %276 : f32 to vector<8x196xf32>
    %280 = arith.mulf %279, %278 : vector<8x196xf32>
    %281 = arith.addf %275, %280 : vector<8x196xf32>
    %c0_237 = arith.constant 0 : index
    %c2_238 = arith.constant 2 : index
    %282 = memref.load %arg2[%c0_237, %c2_238] : memref<8x9xf32, #tpu.memory_space<smem>>
    %c9_239 = arith.constant 9 : index
    %c0_240 = arith.constant 0 : index
    %c0_241 = arith.constant 0 : index
    %283 = vector.load %arg9[%c9_239, %c0_240, %c0_241] : memref<36x8x196xf32, #tpu.memory_space<vmem>>, vector<1x8x196xf32>
    %284 = vector.shape_cast %283 : vector<1x8x196xf32> to vector<8x196xf32>
    %285 = vector.broadcast %282 : f32 to vector<8x196xf32>
    %286 = arith.mulf %285, %284 : vector<8x196xf32>
    %287 = arith.addf %281, %286 : vector<8x196xf32>
    %c0_242 = arith.constant 0 : index
    %c3_243 = arith.constant 3 : index
    %288 = memref.load %arg2[%c0_242, %c3_243] : memref<8x9xf32, #tpu.memory_space<smem>>
    %c13_244 = arith.constant 13 : index
    %c0_245 = arith.constant 0 : index
    %c0_246 = arith.constant 0 : index
    %289 = vector.load %arg9[%c13_244, %c0_245, %c0_246] : memref<36x8x196xf32, #tpu.memory_space<vmem>>, vector<1x8x196xf32>
    %290 = vector.shape_cast %289 : vector<1x8x196xf32> to vector<8x196xf32>
    %291 = vector.broadcast %288 : f32 to vector<8x196xf32>
    %292 = arith.mulf %291, %290 : vector<8x196xf32>
    %293 = arith.addf %287, %292 : vector<8x196xf32>
    %c0_247 = arith.constant 0 : index
    %c4_248 = arith.constant 4 : index
    %294 = memref.load %arg2[%c0_247, %c4_248] : memref<8x9xf32, #tpu.memory_space<smem>>
    %c17_249 = arith.constant 17 : index
    %c0_250 = arith.constant 0 : index
    %c0_251 = arith.constant 0 : index
    %295 = vector.load %arg9[%c17_249, %c0_250, %c0_251] : memref<36x8x196xf32, #tpu.memory_space<vmem>>, vector<1x8x196xf32>
    %296 = vector.shape_cast %295 : vector<1x8x196xf32> to vector<8x196xf32>
    %297 = vector.broadcast %294 : f32 to vector<8x196xf32>
    %298 = arith.mulf %297, %296 : vector<8x196xf32>
    %299 = arith.addf %293, %298 : vector<8x196xf32>
    %c0_252 = arith.constant 0 : index
    %c5_253 = arith.constant 5 : index
    %300 = memref.load %arg2[%c0_252, %c5_253] : memref<8x9xf32, #tpu.memory_space<smem>>
    %c21_254 = arith.constant 21 : index
    %c0_255 = arith.constant 0 : index
    %c0_256 = arith.constant 0 : index
    %301 = vector.load %arg9[%c21_254, %c0_255, %c0_256] : memref<36x8x196xf32, #tpu.memory_space<vmem>>, vector<1x8x196xf32>
    %302 = vector.shape_cast %301 : vector<1x8x196xf32> to vector<8x196xf32>
    %303 = vector.broadcast %300 : f32 to vector<8x196xf32>
    %304 = arith.mulf %303, %302 : vector<8x196xf32>
    %305 = arith.addf %299, %304 : vector<8x196xf32>
    %c0_257 = arith.constant 0 : index
    %c6_258 = arith.constant 6 : index
    %306 = memref.load %arg2[%c0_257, %c6_258] : memref<8x9xf32, #tpu.memory_space<smem>>
    %c25_259 = arith.constant 25 : index
    %c0_260 = arith.constant 0 : index
    %c0_261 = arith.constant 0 : index
    %307 = vector.load %arg9[%c25_259, %c0_260, %c0_261] : memref<36x8x196xf32, #tpu.memory_space<vmem>>, vector<1x8x196xf32>
    %308 = vector.shape_cast %307 : vector<1x8x196xf32> to vector<8x196xf32>
    %309 = vector.broadcast %306 : f32 to vector<8x196xf32>
    %310 = arith.mulf %309, %308 : vector<8x196xf32>
    %311 = arith.addf %305, %310 : vector<8x196xf32>
    %c0_262 = arith.constant 0 : index
    %c7_263 = arith.constant 7 : index
    %312 = memref.load %arg2[%c0_262, %c7_263] : memref<8x9xf32, #tpu.memory_space<smem>>
    %c29_264 = arith.constant 29 : index
    %c0_265 = arith.constant 0 : index
    %c0_266 = arith.constant 0 : index
    %313 = vector.load %arg9[%c29_264, %c0_265, %c0_266] : memref<36x8x196xf32, #tpu.memory_space<vmem>>, vector<1x8x196xf32>
    %314 = vector.shape_cast %313 : vector<1x8x196xf32> to vector<8x196xf32>
    %315 = vector.broadcast %312 : f32 to vector<8x196xf32>
    %316 = arith.mulf %315, %314 : vector<8x196xf32>
    %317 = arith.addf %311, %316 : vector<8x196xf32>
    %c0_267 = arith.constant 0 : index
    %c8_268 = arith.constant 8 : index
    %318 = memref.load %arg2[%c0_267, %c8_268] : memref<8x9xf32, #tpu.memory_space<smem>>
    %c33_269 = arith.constant 33 : index
    %c0_270 = arith.constant 0 : index
    %c0_271 = arith.constant 0 : index
    %319 = vector.load %arg9[%c33_269, %c0_270, %c0_271] : memref<36x8x196xf32, #tpu.memory_space<vmem>>, vector<1x8x196xf32>
    %320 = vector.shape_cast %319 : vector<1x8x196xf32> to vector<8x196xf32>
    %321 = vector.broadcast %318 : f32 to vector<8x196xf32>
    %322 = arith.mulf %321, %320 : vector<8x196xf32>
    %323 = arith.addf %317, %322 : vector<8x196xf32>
    %324 = arith.maximumf %270, %323 : vector<8x196xf32>
    %c0_272 = arith.constant 0 : index
    %c0_273 = arith.constant 0 : index
    %325 = memref.load %arg2[%c0_272, %c0_273] : memref<8x9xf32, #tpu.memory_space<smem>>
    %c2_274 = arith.constant 2 : index
    %c0_275 = arith.constant 0 : index
    %c0_276 = arith.constant 0 : index
    %326 = vector.load %arg9[%c2_274, %c0_275, %c0_276] : memref<36x8x196xf32, #tpu.memory_space<vmem>>, vector<1x8x196xf32>
    %327 = vector.shape_cast %326 : vector<1x8x196xf32> to vector<8x196xf32>
    %328 = vector.broadcast %325 : f32 to vector<8x196xf32>
    %329 = arith.mulf %328, %327 : vector<8x196xf32>
    %c0_277 = arith.constant 0 : index
    %c1_278 = arith.constant 1 : index
    %330 = memref.load %arg2[%c0_277, %c1_278] : memref<8x9xf32, #tpu.memory_space<smem>>
    %c6_279 = arith.constant 6 : index
    %c0_280 = arith.constant 0 : index
    %c0_281 = arith.constant 0 : index
    %331 = vector.load %arg9[%c6_279, %c0_280, %c0_281] : memref<36x8x196xf32, #tpu.memory_space<vmem>>, vector<1x8x196xf32>
    %332 = vector.shape_cast %331 : vector<1x8x196xf32> to vector<8x196xf32>
    %333 = vector.broadcast %330 : f32 to vector<8x196xf32>
    %334 = arith.mulf %333, %332 : vector<8x196xf32>
    %335 = arith.addf %329, %334 : vector<8x196xf32>
    %c0_282 = arith.constant 0 : index
    %c2_283 = arith.constant 2 : index
    %336 = memref.load %arg2[%c0_282, %c2_283] : memref<8x9xf32, #tpu.memory_space<smem>>
    %c10_284 = arith.constant 10 : index
    %c0_285 = arith.constant 0 : index
    %c0_286 = arith.constant 0 : index
    %337 = vector.load %arg9[%c10_284, %c0_285, %c0_286] : memref<36x8x196xf32, #tpu.memory_space<vmem>>, vector<1x8x196xf32>
    %338 = vector.shape_cast %337 : vector<1x8x196xf32> to vector<8x196xf32>
    %339 = vector.broadcast %336 : f32 to vector<8x196xf32>
    %340 = arith.mulf %339, %338 : vector<8x196xf32>
    %341 = arith.addf %335, %340 : vector<8x196xf32>
    %c0_287 = arith.constant 0 : index
    %c3_288 = arith.constant 3 : index
    %342 = memref.load %arg2[%c0_287, %c3_288] : memref<8x9xf32, #tpu.memory_space<smem>>
    %c14_289 = arith.constant 14 : index
    %c0_290 = arith.constant 0 : index
    %c0_291 = arith.constant 0 : index
    %343 = vector.load %arg9[%c14_289, %c0_290, %c0_291] : memref<36x8x196xf32, #tpu.memory_space<vmem>>, vector<1x8x196xf32>
    %344 = vector.shape_cast %343 : vector<1x8x196xf32> to vector<8x196xf32>
    %345 = vector.broadcast %342 : f32 to vector<8x196xf32>
    %346 = arith.mulf %345, %344 : vector<8x196xf32>
    %347 = arith.addf %341, %346 : vector<8x196xf32>
    %c0_292 = arith.constant 0 : index
    %c4_293 = arith.constant 4 : index
    %348 = memref.load %arg2[%c0_292, %c4_293] : memref<8x9xf32, #tpu.memory_space<smem>>
    %c18_294 = arith.constant 18 : index
    %c0_295 = arith.constant 0 : index
    %c0_296 = arith.constant 0 : index
    %349 = vector.load %arg9[%c18_294, %c0_295, %c0_296] : memref<36x8x196xf32, #tpu.memory_space<vmem>>, vector<1x8x196xf32>
    %350 = vector.shape_cast %349 : vector<1x8x196xf32> to vector<8x196xf32>
    %351 = vector.broadcast %348 : f32 to vector<8x196xf32>
    %352 = arith.mulf %351, %350 : vector<8x196xf32>
    %353 = arith.addf %347, %352 : vector<8x196xf32>
    %c0_297 = arith.constant 0 : index
    %c5_298 = arith.constant 5 : index
    %354 = memref.load %arg2[%c0_297, %c5_298] : memref<8x9xf32, #tpu.memory_space<smem>>
    %c22_299 = arith.constant 22 : index
    %c0_300 = arith.constant 0 : index
    %c0_301 = arith.constant 0 : index
    %355 = vector.load %arg9[%c22_299, %c0_300, %c0_301] : memref<36x8x196xf32, #tpu.memory_space<vmem>>, vector<1x8x196xf32>
    %356 = vector.shape_cast %355 : vector<1x8x196xf32> to vector<8x196xf32>
    %357 = vector.broadcast %354 : f32 to vector<8x196xf32>
    %358 = arith.mulf %357, %356 : vector<8x196xf32>
    %359 = arith.addf %353, %358 : vector<8x196xf32>
    %c0_302 = arith.constant 0 : index
    %c6_303 = arith.constant 6 : index
    %360 = memref.load %arg2[%c0_302, %c6_303] : memref<8x9xf32, #tpu.memory_space<smem>>
    %c26_304 = arith.constant 26 : index
    %c0_305 = arith.constant 0 : index
    %c0_306 = arith.constant 0 : index
    %361 = vector.load %arg9[%c26_304, %c0_305, %c0_306] : memref<36x8x196xf32, #tpu.memory_space<vmem>>, vector<1x8x196xf32>
    %362 = vector.shape_cast %361 : vector<1x8x196xf32> to vector<8x196xf32>
    %363 = vector.broadcast %360 : f32 to vector<8x196xf32>
    %364 = arith.mulf %363, %362 : vector<8x196xf32>
    %365 = arith.addf %359, %364 : vector<8x196xf32>
    %c0_307 = arith.constant 0 : index
    %c7_308 = arith.constant 7 : index
    %366 = memref.load %arg2[%c0_307, %c7_308] : memref<8x9xf32, #tpu.memory_space<smem>>
    %c30_309 = arith.constant 30 : index
    %c0_310 = arith.constant 0 : index
    %c0_311 = arith.constant 0 : index
    %367 = vector.load %arg9[%c30_309, %c0_310, %c0_311] : memref<36x8x196xf32, #tpu.memory_space<vmem>>, vector<1x8x196xf32>
    %368 = vector.shape_cast %367 : vector<1x8x196xf32> to vector<8x196xf32>
    %369 = vector.broadcast %366 : f32 to vector<8x196xf32>
    %370 = arith.mulf %369, %368 : vector<8x196xf32>
    %371 = arith.addf %365, %370 : vector<8x196xf32>
    %c0_312 = arith.constant 0 : index
    %c8_313 = arith.constant 8 : index
    %372 = memref.load %arg2[%c0_312, %c8_313] : memref<8x9xf32, #tpu.memory_space<smem>>
    %c34_314 = arith.constant 34 : index
    %c0_315 = arith.constant 0 : index
    %c0_316 = arith.constant 0 : index
    %373 = vector.load %arg9[%c34_314, %c0_315, %c0_316] : memref<36x8x196xf32, #tpu.memory_space<vmem>>, vector<1x8x196xf32>
    %374 = vector.shape_cast %373 : vector<1x8x196xf32> to vector<8x196xf32>
    %375 = vector.broadcast %372 : f32 to vector<8x196xf32>
    %376 = arith.mulf %375, %374 : vector<8x196xf32>
    %377 = arith.addf %371, %376 : vector<8x196xf32>
    %378 = arith.maximumf %324, %377 : vector<8x196xf32>
    %c0_317 = arith.constant 0 : index
    %c0_318 = arith.constant 0 : index
    %379 = memref.load %arg2[%c0_317, %c0_318] : memref<8x9xf32, #tpu.memory_space<smem>>
    %c3_319 = arith.constant 3 : index
    %c0_320 = arith.constant 0 : index
    %c0_321 = arith.constant 0 : index
    %380 = vector.load %arg9[%c3_319, %c0_320, %c0_321] : memref<36x8x196xf32, #tpu.memory_space<vmem>>, vector<1x8x196xf32>
    %381 = vector.shape_cast %380 : vector<1x8x196xf32> to vector<8x196xf32>
    %382 = vector.broadcast %379 : f32 to vector<8x196xf32>
    %383 = arith.mulf %382, %381 : vector<8x196xf32>
    %c0_322 = arith.constant 0 : index
    %c1_323 = arith.constant 1 : index
    %384 = memref.load %arg2[%c0_322, %c1_323] : memref<8x9xf32, #tpu.memory_space<smem>>
    %c7_324 = arith.constant 7 : index
    %c0_325 = arith.constant 0 : index
    %c0_326 = arith.constant 0 : index
    %385 = vector.load %arg9[%c7_324, %c0_325, %c0_326] : memref<36x8x196xf32, #tpu.memory_space<vmem>>, vector<1x8x196xf32>
    %386 = vector.shape_cast %385 : vector<1x8x196xf32> to vector<8x196xf32>
    %387 = vector.broadcast %384 : f32 to vector<8x196xf32>
    %388 = arith.mulf %387, %386 : vector<8x196xf32>
    %389 = arith.addf %383, %388 : vector<8x196xf32>
    %c0_327 = arith.constant 0 : index
    %c2_328 = arith.constant 2 : index
    %390 = memref.load %arg2[%c0_327, %c2_328] : memref<8x9xf32, #tpu.memory_space<smem>>
    %c11_329 = arith.constant 11 : index
    %c0_330 = arith.constant 0 : index
    %c0_331 = arith.constant 0 : index
    %391 = vector.load %arg9[%c11_329, %c0_330, %c0_331] : memref<36x8x196xf32, #tpu.memory_space<vmem>>, vector<1x8x196xf32>
    %392 = vector.shape_cast %391 : vector<1x8x196xf32> to vector<8x196xf32>
    %393 = vector.broadcast %390 : f32 to vector<8x196xf32>
    %394 = arith.mulf %393, %392 : vector<8x196xf32>
    %395 = arith.addf %389, %394 : vector<8x196xf32>
    %c0_332 = arith.constant 0 : index
    %c3_333 = arith.constant 3 : index
    %396 = memref.load %arg2[%c0_332, %c3_333] : memref<8x9xf32, #tpu.memory_space<smem>>
    %c15_334 = arith.constant 15 : index
    %c0_335 = arith.constant 0 : index
    %c0_336 = arith.constant 0 : index
    %397 = vector.load %arg9[%c15_334, %c0_335, %c0_336] : memref<36x8x196xf32, #tpu.memory_space<vmem>>, vector<1x8x196xf32>
    %398 = vector.shape_cast %397 : vector<1x8x196xf32> to vector<8x196xf32>
    %399 = vector.broadcast %396 : f32 to vector<8x196xf32>
    %400 = arith.mulf %399, %398 : vector<8x196xf32>
    %401 = arith.addf %395, %400 : vector<8x196xf32>
    %c0_337 = arith.constant 0 : index
    %c4_338 = arith.constant 4 : index
    %402 = memref.load %arg2[%c0_337, %c4_338] : memref<8x9xf32, #tpu.memory_space<smem>>
    %c19_339 = arith.constant 19 : index
    %c0_340 = arith.constant 0 : index
    %c0_341 = arith.constant 0 : index
    %403 = vector.load %arg9[%c19_339, %c0_340, %c0_341] : memref<36x8x196xf32, #tpu.memory_space<vmem>>, vector<1x8x196xf32>
    %404 = vector.shape_cast %403 : vector<1x8x196xf32> to vector<8x196xf32>
    %405 = vector.broadcast %402 : f32 to vector<8x196xf32>
    %406 = arith.mulf %405, %404 : vector<8x196xf32>
    %407 = arith.addf %401, %406 : vector<8x196xf32>
    %c0_342 = arith.constant 0 : index
    %c5_343 = arith.constant 5 : index
    %408 = memref.load %arg2[%c0_342, %c5_343] : memref<8x9xf32, #tpu.memory_space<smem>>
    %c23_344 = arith.constant 23 : index
    %c0_345 = arith.constant 0 : index
    %c0_346 = arith.constant 0 : index
    %409 = vector.load %arg9[%c23_344, %c0_345, %c0_346] : memref<36x8x196xf32, #tpu.memory_space<vmem>>, vector<1x8x196xf32>
    %410 = vector.shape_cast %409 : vector<1x8x196xf32> to vector<8x196xf32>
    %411 = vector.broadcast %408 : f32 to vector<8x196xf32>
    %412 = arith.mulf %411, %410 : vector<8x196xf32>
    %413 = arith.addf %407, %412 : vector<8x196xf32>
    %c0_347 = arith.constant 0 : index
    %c6_348 = arith.constant 6 : index
    %414 = memref.load %arg2[%c0_347, %c6_348] : memref<8x9xf32, #tpu.memory_space<smem>>
    %c27_349 = arith.constant 27 : index
    %c0_350 = arith.constant 0 : index
    %c0_351 = arith.constant 0 : index
    %415 = vector.load %arg9[%c27_349, %c0_350, %c0_351] : memref<36x8x196xf32, #tpu.memory_space<vmem>>, vector<1x8x196xf32>
    %416 = vector.shape_cast %415 : vector<1x8x196xf32> to vector<8x196xf32>
    %417 = vector.broadcast %414 : f32 to vector<8x196xf32>
    %418 = arith.mulf %417, %416 : vector<8x196xf32>
    %419 = arith.addf %413, %418 : vector<8x196xf32>
    %c0_352 = arith.constant 0 : index
    %c7_353 = arith.constant 7 : index
    %420 = memref.load %arg2[%c0_352, %c7_353] : memref<8x9xf32, #tpu.memory_space<smem>>
    %c31_354 = arith.constant 31 : index
    %c0_355 = arith.constant 0 : index
    %c0_356 = arith.constant 0 : index
    %421 = vector.load %arg9[%c31_354, %c0_355, %c0_356] : memref<36x8x196xf32, #tpu.memory_space<vmem>>, vector<1x8x196xf32>
    %422 = vector.shape_cast %421 : vector<1x8x196xf32> to vector<8x196xf32>
    %423 = vector.broadcast %420 : f32 to vector<8x196xf32>
    %424 = arith.mulf %423, %422 : vector<8x196xf32>
    %425 = arith.addf %419, %424 : vector<8x196xf32>
    %c0_357 = arith.constant 0 : index
    %c8_358 = arith.constant 8 : index
    %426 = memref.load %arg2[%c0_357, %c8_358] : memref<8x9xf32, #tpu.memory_space<smem>>
    %c35_359 = arith.constant 35 : index
    %c0_360 = arith.constant 0 : index
    %c0_361 = arith.constant 0 : index
    %427 = vector.load %arg9[%c35_359, %c0_360, %c0_361] : memref<36x8x196xf32, #tpu.memory_space<vmem>>, vector<1x8x196xf32>
    %428 = vector.shape_cast %427 : vector<1x8x196xf32> to vector<8x196xf32>
    %429 = vector.broadcast %426 : f32 to vector<8x196xf32>
    %430 = arith.mulf %429, %428 : vector<8x196xf32>
    %431 = arith.addf %425, %430 : vector<8x196xf32>
    %432 = arith.maximumf %378, %431 : vector<8x196xf32>
    %c0_362 = arith.constant 0 : index
    %433 = memref.load %arg3[%c0_362] : memref<8xf32, #tpu.memory_space<smem>>
    %434 = vector.broadcast %433 : f32 to vector<8x196xf32>
    %435 = arith.addf %432, %434 : vector<8x196xf32>
    %cst_363 = arith.constant 0.000000e+00 : f32
    %436 = vector.broadcast %cst_363 : f32 to vector<8x196xf32>
    %437 = arith.maximumf %435, %436 : vector<8x196xf32>
    %438 = arith.truncf %437 : vector<8x196xf32> to vector<8x196xbf16>
    %c0_364 = arith.constant 0 : index
    %c0_365 = arith.constant 0 : index
    %439 = vector.load %arg10[%c0_364, %c0_365] : memref<8x2048xbf16, #tpu.memory_space<vmem>>, vector<8x196xbf16>
    tpu.vector_store %arg10[%c0_364, %c0_365], %438 {strides = array<i32>} : memref<8x2048xbf16, #tpu.memory_space<vmem>>, vector<8x196xbf16>,
    %c1_366 = arith.constant 1 : index
    %c0_367 = arith.constant 0 : index
    %440 = memref.load %arg2[%c1_366, %c0_367] : memref<8x9xf32, #tpu.memory_space<smem>>
    %c0_368 = arith.constant 0 : index
    %c0_369 = arith.constant 0 : index
    %c0_370 = arith.constant 0 : index
    %441 = vector.load %arg9[%c0_368, %c0_369, %c0_370] : memref<36x8x196xf32, #tpu.memory_space<vmem>>, vector<1x8x196xf32>
    %442 = vector.shape_cast %441 : vector<1x8x196xf32> to vector<8x196xf32>
    %443 = vector.broadcast %440 : f32 to vector<8x196xf32>
    %444 = arith.mulf %443, %442 : vector<8x196xf32>
    %c1_371 = arith.constant 1 : index
    %c1_372 = arith.constant 1 : index
    %445 = memref.load %arg2[%c1_371, %c1_372] : memref<8x9xf32, #tpu.memory_space<smem>>
    %c4_373 = arith.constant 4 : index
    %c0_374 = arith.constant 0 : index
    %c0_375 = arith.constant 0 : index
    %446 = vector.load %arg9[%c4_373, %c0_374, %c0_375] : memref<36x8x196xf32, #tpu.memory_space<vmem>>, vector<1x8x196xf32>
    %447 = vector.shape_cast %446 : vector<1x8x196xf32> to vector<8x196xf32>
    %448 = vector.broadcast %445 : f32 to vector<8x196xf32>
    %449 = arith.mulf %448, %447 : vector<8x196xf32>
    %450 = arith.addf %444, %449 : vector<8x196xf32>
    %c1_376 = arith.constant 1 : index
    %c2_377 = arith.constant 2 : index
    %451 = memref.load %arg2[%c1_376, %c2_377] : memref<8x9xf32, #tpu.memory_space<smem>>
    %c8_378 = arith.constant 8 : index
    %c0_379 = arith.constant 0 : index
    %c0_380 = arith.constant 0 : index
    %452 = vector.load %arg9[%c8_378, %c0_379, %c0_380] : memref<36x8x196xf32, #tpu.memory_space<vmem>>, vector<1x8x196xf32>
    %453 = vector.shape_cast %452 : vector<1x8x196xf32> to vector<8x196xf32>
    %454 = vector.broadcast %451 : f32 to vector<8x196xf32>
    %455 = arith.mulf %454, %453 : vector<8x196xf32>
    %456 = arith.addf %450, %455 : vector<8x196xf32>
    %c1_381 = arith.constant 1 : index
    %c3_382 = arith.constant 3 : index
    %457 = memref.load %arg2[%c1_381, %c3_382] : memref<8x9xf32, #tpu.memory_space<smem>>
    %c12_383 = arith.constant 12 : index
    %c0_384 = arith.constant 0 : index
    %c0_385 = arith.constant 0 : index
    %458 = vector.load %arg9[%c12_383, %c0_384, %c0_385] : memref<36x8x196xf32, #tpu.memory_space<vmem>>, vector<1x8x196xf32>
    %459 = vector.shape_cast %458 : vector<1x8x196xf32> to vector<8x196xf32>
    %460 = vector.broadcast %457 : f32 to vector<8x196xf32>
    %461 = arith.mulf %460, %459 : vector<8x196xf32>
    %462 = arith.addf %456, %461 : vector<8x196xf32>
    %c1_386 = arith.constant 1 : index
    %c4_387 = arith.constant 4 : index
    %463 = memref.load %arg2[%c1_386, %c4_387] : memref<8x9xf32, #tpu.memory_space<smem>>
    %c16_388 = arith.constant 16 : index
    %c0_389 = arith.constant 0 : index
    %c0_390 = arith.constant 0 : index
    %464 = vector.load %arg9[%c16_388, %c0_389, %c0_390] : memref<36x8x196xf32, #tpu.memory_space<vmem>>, vector<1x8x196xf32>
    %465 = vector.shape_cast %464 : vector<1x8x196xf32> to vector<8x196xf32>
    %466 = vector.broadcast %463 : f32 to vector<8x196xf32>
    %467 = arith.mulf %466, %465 : vector<8x196xf32>
    %468 = arith.addf %462, %467 : vector<8x196xf32>
    %c1_391 = arith.constant 1 : index
    %c5_392 = arith.constant 5 : index
    %469 = memref.load %arg2[%c1_391, %c5_392] : memref<8x9xf32, #tpu.memory_space<smem>>
    %c20_393 = arith.constant 20 : index
    %c0_394 = arith.constant 0 : index
    %c0_395 = arith.constant 0 : index
    %470 = vector.load %arg9[%c20_393, %c0_394, %c0_395] : memref<36x8x196xf32, #tpu.memory_space<vmem>>, vector<1x8x196xf32>
    %471 = vector.shape_cast %470 : vector<1x8x196xf32> to vector<8x196xf32>
    %472 = vector.broadcast %469 : f32 to vector<8x196xf32>
    %473 = arith.mulf %472, %471 : vector<8x196xf32>
    %474 = arith.addf %468, %473 : vector<8x196xf32>
    %c1_396 = arith.constant 1 : index
    %c6_397 = arith.constant 6 : index
    %475 = memref.load %arg2[%c1_396, %c6_397] : memref<8x9xf32, #tpu.memory_space<smem>>
    %c24_398 = arith.constant 24 : index
    %c0_399 = arith.constant 0 : index
    %c0_400 = arith.constant 0 : index
    %476 = vector.load %arg9[%c24_398, %c0_399, %c0_400] : memref<36x8x196xf32, #tpu.memory_space<vmem>>, vector<1x8x196xf32>
    %477 = vector.shape_cast %476 : vector<1x8x196xf32> to vector<8x196xf32>
    %478 = vector.broadcast %475 : f32 to vector<8x196xf32>
    %479 = arith.mulf %478, %477 : vector<8x196xf32>
    %480 = arith.addf %474, %479 : vector<8x196xf32>
    %c1_401 = arith.constant 1 : index
    %c7_402 = arith.constant 7 : index
    %481 = memref.load %arg2[%c1_401, %c7_402] : memref<8x9xf32, #tpu.memory_space<smem>>
    %c28_403 = arith.constant 28 : index
    %c0_404 = arith.constant 0 : index
    %c0_405 = arith.constant 0 : index
    %482 = vector.load %arg9[%c28_403, %c0_404, %c0_405] : memref<36x8x196xf32, #tpu.memory_space<vmem>>, vector<1x8x196xf32>
    %483 = vector.shape_cast %482 : vector<1x8x196xf32> to vector<8x196xf32>
    %484 = vector.broadcast %481 : f32 to vector<8x196xf32>
    %485 = arith.mulf %484, %483 : vector<8x196xf32>
    %486 = arith.addf %480, %485 : vector<8x196xf32>
    %c1_406 = arith.constant 1 : index
    %c8_407 = arith.constant 8 : index
    %487 = memref.load %arg2[%c1_406, %c8_407] : memref<8x9xf32, #tpu.memory_space<smem>>
    %c32_408 = arith.constant 32 : index
    %c0_409 = arith.constant 0 : index
    %c0_410 = arith.constant 0 : index
    %488 = vector.load %arg9[%c32_408, %c0_409, %c0_410] : memref<36x8x196xf32, #tpu.memory_space<vmem>>, vector<1x8x196xf32>
    %489 = vector.shape_cast %488 : vector<1x8x196xf32> to vector<8x196xf32>
    %490 = vector.broadcast %487 : f32 to vector<8x196xf32>
    %491 = arith.mulf %490, %489 : vector<8x196xf32>
    %492 = arith.addf %486, %491 : vector<8x196xf32>
    %c1_411 = arith.constant 1 : index
    %c0_412 = arith.constant 0 : index
    %493 = memref.load %arg2[%c1_411, %c0_412] : memref<8x9xf32, #tpu.memory_space<smem>>
    %c1_413 = arith.constant 1 : index
    %c0_414 = arith.constant 0 : index
    %c0_415 = arith.constant 0 : index
    %494 = vector.load %arg9[%c1_413, %c0_414, %c0_415] : memref<36x8x196xf32, #tpu.memory_space<vmem>>, vector<1x8x196xf32>
    %495 = vector.shape_cast %494 : vector<1x8x196xf32> to vector<8x196xf32>
    %496 = vector.broadcast %493 : f32 to vector<8x196xf32>
    %497 = arith.mulf %496, %495 : vector<8x196xf32>
    %c1_416 = arith.constant 1 : index
    %c1_417 = arith.constant 1 : index
    %498 = memref.load %arg2[%c1_416, %c1_417] : memref<8x9xf32, #tpu.memory_space<smem>>
    %c5_418 = arith.constant 5 : index
    %c0_419 = arith.constant 0 : index
    %c0_420 = arith.constant 0 : index
    %499 = vector.load %arg9[%c5_418, %c0_419, %c0_420] : memref<36x8x196xf32, #tpu.memory_space<vmem>>, vector<1x8x196xf32>
    %500 = vector.shape_cast %499 : vector<1x8x196xf32> to vector<8x196xf32>
    %501 = vector.broadcast %498 : f32 to vector<8x196xf32>
    %502 = arith.mulf %501, %500 : vector<8x196xf32>
    %503 = arith.addf %497, %502 : vector<8x196xf32>
    %c1_421 = arith.constant 1 : index
    %c2_422 = arith.constant 2 : index
    %504 = memref.load %arg2[%c1_421, %c2_422] : memref<8x9xf32, #tpu.memory_space<smem>>
    %c9_423 = arith.constant 9 : index
    %c0_424 = arith.constant 0 : index
    %c0_425 = arith.constant 0 : index
    %505 = vector.load %arg9[%c9_423, %c0_424, %c0_425] : memref<36x8x196xf32, #tpu.memory_space<vmem>>, vector<1x8x196xf32>
    %506 = vector.shape_cast %505 : vector<1x8x196xf32> to vector<8x196xf32>
    %507 = vector.broadcast %504 : f32 to vector<8x196xf32>
    %508 = arith.mulf %507, %506 : vector<8x196xf32>
    %509 = arith.addf %503, %508 : vector<8x196xf32>
    %c1_426 = arith.constant 1 : index
    %c3_427 = arith.constant 3 : index
    %510 = memref.load %arg2[%c1_426, %c3_427] : memref<8x9xf32, #tpu.memory_space<smem>>
    %c13_428 = arith.constant 13 : index
    %c0_429 = arith.constant 0 : index
    %c0_430 = arith.constant 0 : index
    %511 = vector.load %arg9[%c13_428, %c0_429, %c0_430] : memref<36x8x196xf32, #tpu.memory_space<vmem>>, vector<1x8x196xf32>
    %512 = vector.shape_cast %511 : vector<1x8x196xf32> to vector<8x196xf32>
    %513 = vector.broadcast %510 : f32 to vector<8x196xf32>
    %514 = arith.mulf %513, %512 : vector<8x196xf32>
    %515 = arith.addf %509, %514 : vector<8x196xf32>
    %c1_431 = arith.constant 1 : index
    %c4_432 = arith.constant 4 : index
    %516 = memref.load %arg2[%c1_431, %c4_432] : memref<8x9xf32, #tpu.memory_space<smem>>
    %c17_433 = arith.constant 17 : index
    %c0_434 = arith.constant 0 : index
    %c0_435 = arith.constant 0 : index
    %517 = vector.load %arg9[%c17_433, %c0_434, %c0_435] : memref<36x8x196xf32, #tpu.memory_space<vmem>>, vector<1x8x196xf32>
    %518 = vector.shape_cast %517 : vector<1x8x196xf32> to vector<8x196xf32>
    %519 = vector.broadcast %516 : f32 to vector<8x196xf32>
    %520 = arith.mulf %519, %518 : vector<8x196xf32>
    %521 = arith.addf %515, %520 : vector<8x196xf32>
    %c1_436 = arith.constant 1 : index
    %c5_437 = arith.constant 5 : index
    %522 = memref.load %arg2[%c1_436, %c5_437] : memref<8x9xf32, #tpu.memory_space<smem>>
    %c21_438 = arith.constant 21 : index
    %c0_439 = arith.constant 0 : index
    %c0_440 = arith.constant 0 : index
    %523 = vector.load %arg9[%c21_438, %c0_439, %c0_440] : memref<36x8x196xf32, #tpu.memory_space<vmem>>, vector<1x8x196xf32>
    %524 = vector.shape_cast %523 : vector<1x8x196xf32> to vector<8x196xf32>
    %525 = vector.broadcast %522 : f32 to vector<8x196xf32>
    %526 = arith.mulf %525, %524 : vector<8x196xf32>
    %527 = arith.addf %521, %526 : vector<8x196xf32>
    %c1_441 = arith.constant 1 : index
    %c6_442 = arith.constant 6 : index
    %528 = memref.load %arg2[%c1_441, %c6_442] : memref<8x9xf32, #tpu.memory_space<smem>>
    %c25_443 = arith.constant 25 : index
    %c0_444 = arith.constant 0 : index
    %c0_445 = arith.constant 0 : index
    %529 = vector.load %arg9[%c25_443, %c0_444, %c0_445] : memref<36x8x196xf32, #tpu.memory_space<vmem>>, vector<1x8x196xf32>
    %530 = vector.shape_cast %529 : vector<1x8x196xf32> to vector<8x196xf32>
    %531 = vector.broadcast %528 : f32 to vector<8x196xf32>
    %532 = arith.mulf %531, %530 : vector<8x196xf32>
    %533 = arith.addf %527, %532 : vector<8x196xf32>
    %c1_446 = arith.constant 1 : index
    %c7_447 = arith.constant 7 : index
    %534 = memref.load %arg2[%c1_446, %c7_447] : memref<8x9xf32, #tpu.memory_space<smem>>
    %c29_448 = arith.constant 29 : index
    %c0_449 = arith.constant 0 : index
    %c0_450 = arith.constant 0 : index
    %535 = vector.load %arg9[%c29_448, %c0_449, %c0_450] : memref<36x8x196xf32, #tpu.memory_space<vmem>>, vector<1x8x196xf32>
    %536 = vector.shape_cast %535 : vector<1x8x196xf32> to vector<8x196xf32>
    %537 = vector.broadcast %534 : f32 to vector<8x196xf32>
    %538 = arith.mulf %537, %536 : vector<8x196xf32>
    %539 = arith.addf %533, %538 : vector<8x196xf32>
    %c1_451 = arith.constant 1 : index
    %c8_452 = arith.constant 8 : index
    %540 = memref.load %arg2[%c1_451, %c8_452] : memref<8x9xf32, #tpu.memory_space<smem>>
    %c33_453 = arith.constant 33 : index
    %c0_454 = arith.constant 0 : index
    %c0_455 = arith.constant 0 : index
    %541 = vector.load %arg9[%c33_453, %c0_454, %c0_455] : memref<36x8x196xf32, #tpu.memory_space<vmem>>, vector<1x8x196xf32>
    %542 = vector.shape_cast %541 : vector<1x8x196xf32> to vector<8x196xf32>
    %543 = vector.broadcast %540 : f32 to vector<8x196xf32>
    %544 = arith.mulf %543, %542 : vector<8x196xf32>
    %545 = arith.addf %539, %544 : vector<8x196xf32>
    %546 = arith.maximumf %492, %545 : vector<8x196xf32>
    %c1_456 = arith.constant 1 : index
    %c0_457 = arith.constant 0 : index
    %547 = memref.load %arg2[%c1_456, %c0_457] : memref<8x9xf32, #tpu.memory_space<smem>>
    %c2_458 = arith.constant 2 : index
    %c0_459 = arith.constant 0 : index
    %c0_460 = arith.constant 0 : index
    %548 = vector.load %arg9[%c2_458, %c0_459, %c0_460] : memref<36x8x196xf32, #tpu.memory_space<vmem>>, vector<1x8x196xf32>
    %549 = vector.shape_cast %548 : vector<1x8x196xf32> to vector<8x196xf32>
    %550 = vector.broadcast %547 : f32 to vector<8x196xf32>
    %551 = arith.mulf %550, %549 : vector<8x196xf32>
    %c1_461 = arith.constant 1 : index
    %c1_462 = arith.constant 1 : index
    %552 = memref.load %arg2[%c1_461, %c1_462] : memref<8x9xf32, #tpu.memory_space<smem>>
    %c6_463 = arith.constant 6 : index
    %c0_464 = arith.constant 0 : index
    %c0_465 = arith.constant 0 : index
    %553 = vector.load %arg9[%c6_463, %c0_464, %c0_465] : memref<36x8x196xf32, #tpu.memory_space<vmem>>, vector<1x8x196xf32>
    %554 = vector.shape_cast %553 : vector<1x8x196xf32> to vector<8x196xf32>
    %555 = vector.broadcast %552 : f32 to vector<8x196xf32>
    %556 = arith.mulf %555, %554 : vector<8x196xf32>
    %557 = arith.addf %551, %556 : vector<8x196xf32>
    %c1_466 = arith.constant 1 : index
    %c2_467 = arith.constant 2 : index
    %558 = memref.load %arg2[%c1_466, %c2_467] : memref<8x9xf32, #tpu.memory_space<smem>>
    %c10_468 = arith.constant 10 : index
    %c0_469 = arith.constant 0 : index
    %c0_470 = arith.constant 0 : index
    %559 = vector.load %arg9[%c10_468, %c0_469, %c0_470] : memref<36x8x196xf32, #tpu.memory_space<vmem>>, vector<1x8x196xf32>
    %560 = vector.shape_cast %559 : vector<1x8x196xf32> to vector<8x196xf32>
    %561 = vector.broadcast %558 : f32 to vector<8x196xf32>
    %562 = arith.mulf %561, %560 : vector<8x196xf32>
    %563 = arith.addf %557, %562 : vector<8x196xf32>
    %c1_471 = arith.constant 1 : index
    %c3_472 = arith.constant 3 : index
    %564 = memref.load %arg2[%c1_471, %c3_472] : memref<8x9xf32, #tpu.memory_space<smem>>
    %c14_473 = arith.constant 14 : index
    %c0_474 = arith.constant 0 : index
    %c0_475 = arith.constant 0 : index
    %565 = vector.load %arg9[%c14_473, %c0_474, %c0_475] : memref<36x8x196xf32, #tpu.memory_space<vmem>>, vector<1x8x196xf32>
    %566 = vector.shape_cast %565 : vector<1x8x196xf32> to vector<8x196xf32>
    %567 = vector.broadcast %564 : f32 to vector<8x196xf32>
    %568 = arith.mulf %567, %566 : vector<8x196xf32>
    %569 = arith.addf %563, %568 : vector<8x196xf32>
    %c1_476 = arith.constant 1 : index
    %c4_477 = arith.constant 4 : index
    %570 = memref.load %arg2[%c1_476, %c4_477] : memref<8x9xf32, #tpu.memory_space<smem>>
    %c18_478 = arith.constant 18 : index
    %c0_479 = arith.constant 0 : index
    %c0_480 = arith.constant 0 : index
    %571 = vector.load %arg9[%c18_478, %c0_479, %c0_480] : memref<36x8x196xf32, #tpu.memory_space<vmem>>, vector<1x8x196xf32>
    %572 = vector.shape_cast %571 : vector<1x8x196xf32> to vector<8x196xf32>
    %573 = vector.broadcast %570 : f32 to vector<8x196xf32>
    %574 = arith.mulf %573, %572 : vector<8x196xf32>
    %575 = arith.addf %569, %574 : vector<8x196xf32>
    %c1_481 = arith.constant 1 : index
    %c5_482 = arith.constant 5 : index
    %576 = memref.load %arg2[%c1_481, %c5_482] : memref<8x9xf32, #tpu.memory_space<smem>>
    %c22_483 = arith.constant 22 : index
    %c0_484 = arith.constant 0 : index
    %c0_485 = arith.constant 0 : index
    %577 = vector.load %arg9[%c22_483, %c0_484, %c0_485] : memref<36x8x196xf32, #tpu.memory_space<vmem>>, vector<1x8x196xf32>
    %578 = vector.shape_cast %577 : vector<1x8x196xf32> to vector<8x196xf32>
    %579 = vector.broadcast %576 : f32 to vector<8x196xf32>
    %580 = arith.mulf %579, %578 : vector<8x196xf32>
    %581 = arith.addf %575, %580 : vector<8x196xf32>
    %c1_486 = arith.constant 1 : index
    %c6_487 = arith.constant 6 : index
    %582 = memref.load %arg2[%c1_486, %c6_487] : memref<8x9xf32, #tpu.memory_space<smem>>
    %c26_488 = arith.constant 26 : index
    %c0_489 = arith.constant 0 : index
    %c0_490 = arith.constant 0 : index
    %583 = vector.load %arg9[%c26_488, %c0_489, %c0_490] : memref<36x8x196xf32, #tpu.memory_space<vmem>>, vector<1x8x196xf32>
    %584 = vector.shape_cast %583 : vector<1x8x196xf32> to vector<8x196xf32>
    %585 = vector.broadcast %582 : f32 to vector<8x196xf32>
    %586 = arith.mulf %585, %584 : vector<8x196xf32>
    %587 = arith.addf %581, %586 : vector<8x196xf32>
    %c1_491 = arith.constant 1 : index
    %c7_492 = arith.constant 7 : index
    %588 = memref.load %arg2[%c1_491, %c7_492] : memref<8x9xf32, #tpu.memory_space<smem>>
    %c30_493 = arith.constant 30 : index
    %c0_494 = arith.constant 0 : index
    %c0_495 = arith.constant 0 : index
    %589 = vector.load %arg9[%c30_493, %c0_494, %c0_495] : memref<36x8x196xf32, #tpu.memory_space<vmem>>, vector<1x8x196xf32>
    %590 = vector.shape_cast %589 : vector<1x8x196xf32> to vector<8x196xf32>
    %591 = vector.broadcast %588 : f32 to vector<8x196xf32>
    %592 = arith.mulf %591, %590 : vector<8x196xf32>
    %593 = arith.addf %587, %592 : vector<8x196xf32>
    %c1_496 = arith.constant 1 : index
    %c8_497 = arith.constant 8 : index
    %594 = memref.load %arg2[%c1_496, %c8_497] : memref<8x9xf32, #tpu.memory_space<smem>>
    %c34_498 = arith.constant 34 : index
    %c0_499 = arith.constant 0 : index
    %c0_500 = arith.constant 0 : index
    %595 = vector.load %arg9[%c34_498, %c0_499, %c0_500] : memref<36x8x196xf32, #tpu.memory_space<vmem>>, vector<1x8x196xf32>
    %596 = vector.shape_cast %595 : vector<1x8x196xf32> to vector<8x196xf32>
    %597 = vector.broadcast %594 : f32 to vector<8x196xf32>
    %598 = arith.mulf %597, %596 : vector<8x196xf32>
    %599 = arith.addf %593, %598 : vector<8x196xf32>
    %600 = arith.maximumf %546, %599 : vector<8x196xf32>
    %c1_501 = arith.constant 1 : index
    %c0_502 = arith.constant 0 : index
    %601 = memref.load %arg2[%c1_501, %c0_502] : memref<8x9xf32, #tpu.memory_space<smem>>
    %c3_503 = arith.constant 3 : index
    %c0_504 = arith.constant 0 : index
    %c0_505 = arith.constant 0 : index
    %602 = vector.load %arg9[%c3_503, %c0_504, %c0_505] : memref<36x8x196xf32, #tpu.memory_space<vmem>>, vector<1x8x196xf32>
    %603 = vector.shape_cast %602 : vector<1x8x196xf32> to vector<8x196xf32>
    %604 = vector.broadcast %601 : f32 to vector<8x196xf32>
    %605 = arith.mulf %604, %603 : vector<8x196xf32>
    %c1_506 = arith.constant 1 : index
    %c1_507 = arith.constant 1 : index
    %606 = memref.load %arg2[%c1_506, %c1_507] : memref<8x9xf32, #tpu.memory_space<smem>>
    %c7_508 = arith.constant 7 : index
    %c0_509 = arith.constant 0 : index
    %c0_510 = arith.constant 0 : index
    %607 = vector.load %arg9[%c7_508, %c0_509, %c0_510] : memref<36x8x196xf32, #tpu.memory_space<vmem>>, vector<1x8x196xf32>
    %608 = vector.shape_cast %607 : vector<1x8x196xf32> to vector<8x196xf32>
    %609 = vector.broadcast %606 : f32 to vector<8x196xf32>
    %610 = arith.mulf %609, %608 : vector<8x196xf32>
    %611 = arith.addf %605, %610 : vector<8x196xf32>
    %c1_511 = arith.constant 1 : index
    %c2_512 = arith.constant 2 : index
    %612 = memref.load %arg2[%c1_511, %c2_512] : memref<8x9xf32, #tpu.memory_space<smem>>
    %c11_513 = arith.constant 11 : index
    %c0_514 = arith.constant 0 : index
    %c0_515 = arith.constant 0 : index
    %613 = vector.load %arg9[%c11_513, %c0_514, %c0_515] : memref<36x8x196xf32, #tpu.memory_space<vmem>>, vector<1x8x196xf32>
    %614 = vector.shape_cast %613 : vector<1x8x196xf32> to vector<8x196xf32>
    %615 = vector.broadcast %612 : f32 to vector<8x196xf32>
    %616 = arith.mulf %615, %614 : vector<8x196xf32>
    %617 = arith.addf %611, %616 : vector<8x196xf32>
    %c1_516 = arith.constant 1 : index
    %c3_517 = arith.constant 3 : index
    %618 = memref.load %arg2[%c1_516, %c3_517] : memref<8x9xf32, #tpu.memory_space<smem>>
    %c15_518 = arith.constant 15 : index
    %c0_519 = arith.constant 0 : index
    %c0_520 = arith.constant 0 : index
    %619 = vector.load %arg9[%c15_518, %c0_519, %c0_520] : memref<36x8x196xf32, #tpu.memory_space<vmem>>, vector<1x8x196xf32>
    %620 = vector.shape_cast %619 : vector<1x8x196xf32> to vector<8x196xf32>
    %621 = vector.broadcast %618 : f32 to vector<8x196xf32>
    %622 = arith.mulf %621, %620 : vector<8x196xf32>
    %623 = arith.addf %617, %622 : vector<8x196xf32>
    %c1_521 = arith.constant 1 : index
    %c4_522 = arith.constant 4 : index
    %624 = memref.load %arg2[%c1_521, %c4_522] : memref<8x9xf32, #tpu.memory_space<smem>>
    %c19_523 = arith.constant 19 : index
    %c0_524 = arith.constant 0 : index
    %c0_525 = arith.constant 0 : index
    %625 = vector.load %arg9[%c19_523, %c0_524, %c0_525] : memref<36x8x196xf32, #tpu.memory_space<vmem>>, vector<1x8x196xf32>
    %626 = vector.shape_cast %625 : vector<1x8x196xf32> to vector<8x196xf32>
    %627 = vector.broadcast %624 : f32 to vector<8x196xf32>
    %628 = arith.mulf %627, %626 : vector<8x196xf32>
    %629 = arith.addf %623, %628 : vector<8x196xf32>
    %c1_526 = arith.constant 1 : index
    %c5_527 = arith.constant 5 : index
    %630 = memref.load %arg2[%c1_526, %c5_527] : memref<8x9xf32, #tpu.memory_space<smem>>
    %c23_528 = arith.constant 23 : index
    %c0_529 = arith.constant 0 : index
    %c0_530 = arith.constant 0 : index
    %631 = vector.load %arg9[%c23_528, %c0_529, %c0_530] : memref<36x8x196xf32, #tpu.memory_space<vmem>>, vector<1x8x196xf32>
    %632 = vector.shape_cast %631 : vector<1x8x196xf32> to vector<8x196xf32>
    %633 = vector.broadcast %630 : f32 to vector<8x196xf32>
    %634 = arith.mulf %633, %632 : vector<8x196xf32>
    %635 = arith.addf %629, %634 : vector<8x196xf32>
    %c1_531 = arith.constant 1 : index
    %c6_532 = arith.constant 6 : index
    %636 = memref.load %arg2[%c1_531, %c6_532] : memref<8x9xf32, #tpu.memory_space<smem>>
    %c27_533 = arith.constant 27 : index
    %c0_534 = arith.constant 0 : index
    %c0_535 = arith.constant 0 : index
    %637 = vector.load %arg9[%c27_533, %c0_534, %c0_535] : memref<36x8x196xf32, #tpu.memory_space<vmem>>, vector<1x8x196xf32>
    %638 = vector.shape_cast %637 : vector<1x8x196xf32> to vector<8x196xf32>
    %639 = vector.broadcast %636 : f32 to vector<8x196xf32>
    %640 = arith.mulf %639, %638 : vector<8x196xf32>
    %641 = arith.addf %635, %640 : vector<8x196xf32>
    %c1_536 = arith.constant 1 : index
    %c7_537 = arith.constant 7 : index
    %642 = memref.load %arg2[%c1_536, %c7_537] : memref<8x9xf32, #tpu.memory_space<smem>>
    %c31_538 = arith.constant 31 : index
    %c0_539 = arith.constant 0 : index
    %c0_540 = arith.constant 0 : index
    %643 = vector.load %arg9[%c31_538, %c0_539, %c0_540] : memref<36x8x196xf32, #tpu.memory_space<vmem>>, vector<1x8x196xf32>
    %644 = vector.shape_cast %643 : vector<1x8x196xf32> to vector<8x196xf32>
    %645 = vector.broadcast %642 : f32 to vector<8x196xf32>
    %646 = arith.mulf %645, %644 : vector<8x196xf32>
    %647 = arith.addf %641, %646 : vector<8x196xf32>
    %c1_541 = arith.constant 1 : index
    %c8_542 = arith.constant 8 : index
    %648 = memref.load %arg2[%c1_541, %c8_542] : memref<8x9xf32, #tpu.memory_space<smem>>
    %c35_543 = arith.constant 35 : index
    %c0_544 = arith.constant 0 : index
    %c0_545 = arith.constant 0 : index
    %649 = vector.load %arg9[%c35_543, %c0_544, %c0_545] : memref<36x8x196xf32, #tpu.memory_space<vmem>>, vector<1x8x196xf32>
    %650 = vector.shape_cast %649 : vector<1x8x196xf32> to vector<8x196xf32>
    %651 = vector.broadcast %648 : f32 to vector<8x196xf32>
    %652 = arith.mulf %651, %650 : vector<8x196xf32>
    %653 = arith.addf %647, %652 : vector<8x196xf32>
    %654 = arith.maximumf %600, %653 : vector<8x196xf32>
    %c1_546 = arith.constant 1 : index
    %655 = memref.load %arg3[%c1_546] : memref<8xf32, #tpu.memory_space<smem>>
    %656 = vector.broadcast %655 : f32 to vector<8x196xf32>
    %657 = arith.addf %654, %656 : vector<8x196xf32>
    %cst_547 = arith.constant 0.000000e+00 : f32
    %658 = vector.broadcast %cst_547 : f32 to vector<8x196xf32>
    %659 = arith.maximumf %657, %658 : vector<8x196xf32>
    %660 = arith.truncf %659 : vector<8x196xf32> to vector<8x196xbf16>
    %c0_548 = arith.constant 0 : index
    %c256 = arith.constant 256 : index
    %661 = vector.load %arg10[%c0_548, %c256] : memref<8x2048xbf16, #tpu.memory_space<vmem>>, vector<8x196xbf16>
    tpu.vector_store %arg10[%c0_548, %c256], %660 {strides = array<i32>} : memref<8x2048xbf16, #tpu.memory_space<vmem>>, vector<8x196xbf16>,
    %c2_549 = arith.constant 2 : index
    %c0_550 = arith.constant 0 : index
    %662 = memref.load %arg2[%c2_549, %c0_550] : memref<8x9xf32, #tpu.memory_space<smem>>
    %c0_551 = arith.constant 0 : index
    %c0_552 = arith.constant 0 : index
    %c0_553 = arith.constant 0 : index
    %663 = vector.load %arg9[%c0_551, %c0_552, %c0_553] : memref<36x8x196xf32, #tpu.memory_space<vmem>>, vector<1x8x196xf32>
    %664 = vector.shape_cast %663 : vector<1x8x196xf32> to vector<8x196xf32>
    %665 = vector.broadcast %662 : f32 to vector<8x196xf32>
    %666 = arith.mulf %665, %664 : vector<8x196xf32>
    %c2_554 = arith.constant 2 : index
    %c1_555 = arith.constant 1 : index
    %667 = memref.load %arg2[%c2_554, %c1_555] : memref<8x9xf32, #tpu.memory_space<smem>>
    %c4_556 = arith.constant 4 : index
    %c0_557 = arith.constant 0 : index
    %c0_558 = arith.constant 0 : index
    %668 = vector.load %arg9[%c4_556, %c0_557, %c0_558] : memref<36x8x196xf32, #tpu.memory_space<vmem>>, vector<1x8x196xf32>
    %669 = vector.shape_cast %668 : vector<1x8x196xf32> to vector<8x196xf32>
    %670 = vector.broadcast %667 : f32 to vector<8x196xf32>
    %671 = arith.mulf %670, %669 : vector<8x196xf32>
    %672 = arith.addf %666, %671 : vector<8x196xf32>
    %c2_559 = arith.constant 2 : index
    %c2_560 = arith.constant 2 : index
    %673 = memref.load %arg2[%c2_559, %c2_560] : memref<8x9xf32, #tpu.memory_space<smem>>
    %c8_561 = arith.constant 8 : index
    %c0_562 = arith.constant 0 : index
    %c0_563 = arith.constant 0 : index
    %674 = vector.load %arg9[%c8_561, %c0_562, %c0_563] : memref<36x8x196xf32, #tpu.memory_space<vmem>>, vector<1x8x196xf32>
    %675 = vector.shape_cast %674 : vector<1x8x196xf32> to vector<8x196xf32>
    %676 = vector.broadcast %673 : f32 to vector<8x196xf32>
    %677 = arith.mulf %676, %675 : vector<8x196xf32>
    %678 = arith.addf %672, %677 : vector<8x196xf32>
    %c2_564 = arith.constant 2 : index
    %c3_565 = arith.constant 3 : index
    %679 = memref.load %arg2[%c2_564, %c3_565] : memref<8x9xf32, #tpu.memory_space<smem>>
    %c12_566 = arith.constant 12 : index
    %c0_567 = arith.constant 0 : index
    %c0_568 = arith.constant 0 : index
    %680 = vector.load %arg9[%c12_566, %c0_567, %c0_568] : memref<36x8x196xf32, #tpu.memory_space<vmem>>, vector<1x8x196xf32>
    %681 = vector.shape_cast %680 : vector<1x8x196xf32> to vector<8x196xf32>
    %682 = vector.broadcast %679 : f32 to vector<8x196xf32>
    %683 = arith.mulf %682, %681 : vector<8x196xf32>
    %684 = arith.addf %678, %683 : vector<8x196xf32>
    %c2_569 = arith.constant 2 : index
    %c4_570 = arith.constant 4 : index
    %685 = memref.load %arg2[%c2_569, %c4_570] : memref<8x9xf32, #tpu.memory_space<smem>>
    %c16_571 = arith.constant 16 : index
    %c0_572 = arith.constant 0 : index
    %c0_573 = arith.constant 0 : index
    %686 = vector.load %arg9[%c16_571, %c0_572, %c0_573] : memref<36x8x196xf32, #tpu.memory_space<vmem>>, vector<1x8x196xf32>
    %687 = vector.shape_cast %686 : vector<1x8x196xf32> to vector<8x196xf32>
    %688 = vector.broadcast %685 : f32 to vector<8x196xf32>
    %689 = arith.mulf %688, %687 : vector<8x196xf32>
    %690 = arith.addf %684, %689 : vector<8x196xf32>
    %c2_574 = arith.constant 2 : index
    %c5_575 = arith.constant 5 : index
    %691 = memref.load %arg2[%c2_574, %c5_575] : memref<8x9xf32, #tpu.memory_space<smem>>
    %c20_576 = arith.constant 20 : index
    %c0_577 = arith.constant 0 : index
    %c0_578 = arith.constant 0 : index
    %692 = vector.load %arg9[%c20_576, %c0_577, %c0_578] : memref<36x8x196xf32, #tpu.memory_space<vmem>>, vector<1x8x196xf32>
    %693 = vector.shape_cast %692 : vector<1x8x196xf32> to vector<8x196xf32>
    %694 = vector.broadcast %691 : f32 to vector<8x196xf32>
    %695 = arith.mulf %694, %693 : vector<8x196xf32>
    %696 = arith.addf %690, %695 : vector<8x196xf32>
    %c2_579 = arith.constant 2 : index
    %c6_580 = arith.constant 6 : index
    %697 = memref.load %arg2[%c2_579, %c6_580] : memref<8x9xf32, #tpu.memory_space<smem>>
    %c24_581 = arith.constant 24 : index
    %c0_582 = arith.constant 0 : index
    %c0_583 = arith.constant 0 : index
    %698 = vector.load %arg9[%c24_581, %c0_582, %c0_583] : memref<36x8x196xf32, #tpu.memory_space<vmem>>, vector<1x8x196xf32>
    %699 = vector.shape_cast %698 : vector<1x8x196xf32> to vector<8x196xf32>
    %700 = vector.broadcast %697 : f32 to vector<8x196xf32>
    %701 = arith.mulf %700, %699 : vector<8x196xf32>
    %702 = arith.addf %696, %701 : vector<8x196xf32>
    %c2_584 = arith.constant 2 : index
    %c7_585 = arith.constant 7 : index
    %703 = memref.load %arg2[%c2_584, %c7_585] : memref<8x9xf32, #tpu.memory_space<smem>>
    %c28_586 = arith.constant 28 : index
    %c0_587 = arith.constant 0 : index
    %c0_588 = arith.constant 0 : index
    %704 = vector.load %arg9[%c28_586, %c0_587, %c0_588] : memref<36x8x196xf32, #tpu.memory_space<vmem>>, vector<1x8x196xf32>
    %705 = vector.shape_cast %704 : vector<1x8x196xf32> to vector<8x196xf32>
    %706 = vector.broadcast %703 : f32 to vector<8x196xf32>
    %707 = arith.mulf %706, %705 : vector<8x196xf32>
    %708 = arith.addf %702, %707 : vector<8x196xf32>
    %c2_589 = arith.constant 2 : index
    %c8_590 = arith.constant 8 : index
    %709 = memref.load %arg2[%c2_589, %c8_590] : memref<8x9xf32, #tpu.memory_space<smem>>
    %c32_591 = arith.constant 32 : index
    %c0_592 = arith.constant 0 : index
    %c0_593 = arith.constant 0 : index
    %710 = vector.load %arg9[%c32_591, %c0_592, %c0_593] : memref<36x8x196xf32, #tpu.memory_space<vmem>>, vector<1x8x196xf32>
    %711 = vector.shape_cast %710 : vector<1x8x196xf32> to vector<8x196xf32>
    %712 = vector.broadcast %709 : f32 to vector<8x196xf32>
    %713 = arith.mulf %712, %711 : vector<8x196xf32>
    %714 = arith.addf %708, %713 : vector<8x196xf32>
    %c2_594 = arith.constant 2 : index
    %c0_595 = arith.constant 0 : index
    %715 = memref.load %arg2[%c2_594, %c0_595] : memref<8x9xf32, #tpu.memory_space<smem>>
    %c1_596 = arith.constant 1 : index
    %c0_597 = arith.constant 0 : index
    %c0_598 = arith.constant 0 : index
    %716 = vector.load %arg9[%c1_596, %c0_597, %c0_598] : memref<36x8x196xf32, #tpu.memory_space<vmem>>, vector<1x8x196xf32>
    %717 = vector.shape_cast %716 : vector<1x8x196xf32> to vector<8x196xf32>
    %718 = vector.broadcast %715 : f32 to vector<8x196xf32>
    %719 = arith.mulf %718, %717 : vector<8x196xf32>
    %c2_599 = arith.constant 2 : index
    %c1_600 = arith.constant 1 : index
    %720 = memref.load %arg2[%c2_599, %c1_600] : memref<8x9xf32, #tpu.memory_space<smem>>
    %c5_601 = arith.constant 5 : index
    %c0_602 = arith.constant 0 : index
    %c0_603 = arith.constant 0 : index
    %721 = vector.load %arg9[%c5_601, %c0_602, %c0_603] : memref<36x8x196xf32, #tpu.memory_space<vmem>>, vector<1x8x196xf32>
    %722 = vector.shape_cast %721 : vector<1x8x196xf32> to vector<8x196xf32>
    %723 = vector.broadcast %720 : f32 to vector<8x196xf32>
    %724 = arith.mulf %723, %722 : vector<8x196xf32>
    %725 = arith.addf %719, %724 : vector<8x196xf32>
    %c2_604 = arith.constant 2 : index
    %c2_605 = arith.constant 2 : index
    %726 = memref.load %arg2[%c2_604, %c2_605] : memref<8x9xf32, #tpu.memory_space<smem>>
    %c9_606 = arith.constant 9 : index
    %c0_607 = arith.constant 0 : index
    %c0_608 = arith.constant 0 : index
    %727 = vector.load %arg9[%c9_606, %c0_607, %c0_608] : memref<36x8x196xf32, #tpu.memory_space<vmem>>, vector<1x8x196xf32>
    %728 = vector.shape_cast %727 : vector<1x8x196xf32> to vector<8x196xf32>
    %729 = vector.broadcast %726 : f32 to vector<8x196xf32>
    %730 = arith.mulf %729, %728 : vector<8x196xf32>
    %731 = arith.addf %725, %730 : vector<8x196xf32>
    %c2_609 = arith.constant 2 : index
    %c3_610 = arith.constant 3 : index
    %732 = memref.load %arg2[%c2_609, %c3_610] : memref<8x9xf32, #tpu.memory_space<smem>>
    %c13_611 = arith.constant 13 : index
    %c0_612 = arith.constant 0 : index
    %c0_613 = arith.constant 0 : index
    %733 = vector.load %arg9[%c13_611, %c0_612, %c0_613] : memref<36x8x196xf32, #tpu.memory_space<vmem>>, vector<1x8x196xf32>
    %734 = vector.shape_cast %733 : vector<1x8x196xf32> to vector<8x196xf32>
    %735 = vector.broadcast %732 : f32 to vector<8x196xf32>
    %736 = arith.mulf %735, %734 : vector<8x196xf32>
    %737 = arith.addf %731, %736 : vector<8x196xf32>
    %c2_614 = arith.constant 2 : index
    %c4_615 = arith.constant 4 : index
    %738 = memref.load %arg2[%c2_614, %c4_615] : memref<8x9xf32, #tpu.memory_space<smem>>
    %c17_616 = arith.constant 17 : index
    %c0_617 = arith.constant 0 : index
    %c0_618 = arith.constant 0 : index
    %739 = vector.load %arg9[%c17_616, %c0_617, %c0_618] : memref<36x8x196xf32, #tpu.memory_space<vmem>>, vector<1x8x196xf32>
    %740 = vector.shape_cast %739 : vector<1x8x196xf32> to vector<8x196xf32>
    %741 = vector.broadcast %738 : f32 to vector<8x196xf32>
    %742 = arith.mulf %741, %740 : vector<8x196xf32>
    %743 = arith.addf %737, %742 : vector<8x196xf32>
    %c2_619 = arith.constant 2 : index
    %c5_620 = arith.constant 5 : index
    %744 = memref.load %arg2[%c2_619, %c5_620] : memref<8x9xf32, #tpu.memory_space<smem>>
    %c21_621 = arith.constant 21 : index
    %c0_622 = arith.constant 0 : index
    %c0_623 = arith.constant 0 : index
    %745 = vector.load %arg9[%c21_621, %c0_622, %c0_623] : memref<36x8x196xf32, #tpu.memory_space<vmem>>, vector<1x8x196xf32>
    %746 = vector.shape_cast %745 : vector<1x8x196xf32> to vector<8x196xf32>
    %747 = vector.broadcast %744 : f32 to vector<8x196xf32>
    %748 = arith.mulf %747, %746 : vector<8x196xf32>
    %749 = arith.addf %743, %748 : vector<8x196xf32>
    %c2_624 = arith.constant 2 : index
    %c6_625 = arith.constant 6 : index
    %750 = memref.load %arg2[%c2_624, %c6_625] : memref<8x9xf32, #tpu.memory_space<smem>>
    %c25_626 = arith.constant 25 : index
    %c0_627 = arith.constant 0 : index
    %c0_628 = arith.constant 0 : index
    %751 = vector.load %arg9[%c25_626, %c0_627, %c0_628] : memref<36x8x196xf32, #tpu.memory_space<vmem>>, vector<1x8x196xf32>
    %752 = vector.shape_cast %751 : vector<1x8x196xf32> to vector<8x196xf32>
    %753 = vector.broadcast %750 : f32 to vector<8x196xf32>
    %754 = arith.mulf %753, %752 : vector<8x196xf32>
    %755 = arith.addf %749, %754 : vector<8x196xf32>
    %c2_629 = arith.constant 2 : index
    %c7_630 = arith.constant 7 : index
    %756 = memref.load %arg2[%c2_629, %c7_630] : memref<8x9xf32, #tpu.memory_space<smem>>
    %c29_631 = arith.constant 29 : index
    %c0_632 = arith.constant 0 : index
    %c0_633 = arith.constant 0 : index
    %757 = vector.load %arg9[%c29_631, %c0_632, %c0_633] : memref<36x8x196xf32, #tpu.memory_space<vmem>>, vector<1x8x196xf32>
    %758 = vector.shape_cast %757 : vector<1x8x196xf32> to vector<8x196xf32>
    %759 = vector.broadcast %756 : f32 to vector<8x196xf32>
    %760 = arith.mulf %759, %758 : vector<8x196xf32>
    %761 = arith.addf %755, %760 : vector<8x196xf32>
    %c2_634 = arith.constant 2 : index
    %c8_635 = arith.constant 8 : index
    %762 = memref.load %arg2[%c2_634, %c8_635] : memref<8x9xf32, #tpu.memory_space<smem>>
    %c33_636 = arith.constant 33 : index
    %c0_637 = arith.constant 0 : index
    %c0_638 = arith.constant 0 : index
    %763 = vector.load %arg9[%c33_636, %c0_637, %c0_638] : memref<36x8x196xf32, #tpu.memory_space<vmem>>, vector<1x8x196xf32>
    %764 = vector.shape_cast %763 : vector<1x8x196xf32> to vector<8x196xf32>
    %765 = vector.broadcast %762 : f32 to vector<8x196xf32>
    %766 = arith.mulf %765, %764 : vector<8x196xf32>
    %767 = arith.addf %761, %766 : vector<8x196xf32>
    %768 = arith.maximumf %714, %767 : vector<8x196xf32>
    %c2_639 = arith.constant 2 : index
    %c0_640 = arith.constant 0 : index
    %769 = memref.load %arg2[%c2_639, %c0_640] : memref<8x9xf32, #tpu.memory_space<smem>>
    %c2_641 = arith.constant 2 : index
    %c0_642 = arith.constant 0 : index
    %c0_643 = arith.constant 0 : index
    %770 = vector.load %arg9[%c2_641, %c0_642, %c0_643] : memref<36x8x196xf32, #tpu.memory_space<vmem>>, vector<1x8x196xf32>
    %771 = vector.shape_cast %770 : vector<1x8x196xf32> to vector<8x196xf32>
    %772 = vector.broadcast %769 : f32 to vector<8x196xf32>
    %773 = arith.mulf %772, %771 : vector<8x196xf32>
    %c2_644 = arith.constant 2 : index
    %c1_645 = arith.constant 1 : index
    %774 = memref.load %arg2[%c2_644, %c1_645] : memref<8x9xf32, #tpu.memory_space<smem>>
    %c6_646 = arith.constant 6 : index
    %c0_647 = arith.constant 0 : index
    %c0_648 = arith.constant 0 : index
    %775 = vector.load %arg9[%c6_646, %c0_647, %c0_648] : memref<36x8x196xf32, #tpu.memory_space<vmem>>, vector<1x8x196xf32>
    %776 = vector.shape_cast %775 : vector<1x8x196xf32> to vector<8x196xf32>
    %777 = vector.broadcast %774 : f32 to vector<8x196xf32>
    %778 = arith.mulf %777, %776 : vector<8x196xf32>
    %779 = arith.addf %773, %778 : vector<8x196xf32>
    %c2_649 = arith.constant 2 : index
    %c2_650 = arith.constant 2 : index
    %780 = memref.load %arg2[%c2_649, %c2_650] : memref<8x9xf32, #tpu.memory_space<smem>>
    %c10_651 = arith.constant 10 : index
    %c0_652 = arith.constant 0 : index
    %c0_653 = arith.constant 0 : index
    %781 = vector.load %arg9[%c10_651, %c0_652, %c0_653] : memref<36x8x196xf32, #tpu.memory_space<vmem>>, vector<1x8x196xf32>
    %782 = vector.shape_cast %781 : vector<1x8x196xf32> to vector<8x196xf32>
    %783 = vector.broadcast %780 : f32 to vector<8x196xf32>
    %784 = arith.mulf %783, %782 : vector<8x196xf32>
    %785 = arith.addf %779, %784 : vector<8x196xf32>
    %c2_654 = arith.constant 2 : index
    %c3_655 = arith.constant 3 : index
    %786 = memref.load %arg2[%c2_654, %c3_655] : memref<8x9xf32, #tpu.memory_space<smem>>
    %c14_656 = arith.constant 14 : index
    %c0_657 = arith.constant 0 : index
    %c0_658 = arith.constant 0 : index
    %787 = vector.load %arg9[%c14_656, %c0_657, %c0_658] : memref<36x8x196xf32, #tpu.memory_space<vmem>>, vector<1x8x196xf32>
    %788 = vector.shape_cast %787 : vector<1x8x196xf32> to vector<8x196xf32>
    %789 = vector.broadcast %786 : f32 to vector<8x196xf32>
    %790 = arith.mulf %789, %788 : vector<8x196xf32>
    %791 = arith.addf %785, %790 : vector<8x196xf32>
    %c2_659 = arith.constant 2 : index
    %c4_660 = arith.constant 4 : index
    %792 = memref.load %arg2[%c2_659, %c4_660] : memref<8x9xf32, #tpu.memory_space<smem>>
    %c18_661 = arith.constant 18 : index
    %c0_662 = arith.constant 0 : index
    %c0_663 = arith.constant 0 : index
    %793 = vector.load %arg9[%c18_661, %c0_662, %c0_663] : memref<36x8x196xf32, #tpu.memory_space<vmem>>, vector<1x8x196xf32>
    %794 = vector.shape_cast %793 : vector<1x8x196xf32> to vector<8x196xf32>
    %795 = vector.broadcast %792 : f32 to vector<8x196xf32>
    %796 = arith.mulf %795, %794 : vector<8x196xf32>
    %797 = arith.addf %791, %796 : vector<8x196xf32>
    %c2_664 = arith.constant 2 : index
    %c5_665 = arith.constant 5 : index
    %798 = memref.load %arg2[%c2_664, %c5_665] : memref<8x9xf32, #tpu.memory_space<smem>>
    %c22_666 = arith.constant 22 : index
    %c0_667 = arith.constant 0 : index
    %c0_668 = arith.constant 0 : index
    %799 = vector.load %arg9[%c22_666, %c0_667, %c0_668] : memref<36x8x196xf32, #tpu.memory_space<vmem>>, vector<1x8x196xf32>
    %800 = vector.shape_cast %799 : vector<1x8x196xf32> to vector<8x196xf32>
    %801 = vector.broadcast %798 : f32 to vector<8x196xf32>
    %802 = arith.mulf %801, %800 : vector<8x196xf32>
    %803 = arith.addf %797, %802 : vector<8x196xf32>
    %c2_669 = arith.constant 2 : index
    %c6_670 = arith.constant 6 : index
    %804 = memref.load %arg2[%c2_669, %c6_670] : memref<8x9xf32, #tpu.memory_space<smem>>
    %c26_671 = arith.constant 26 : index
    %c0_672 = arith.constant 0 : index
    %c0_673 = arith.constant 0 : index
    %805 = vector.load %arg9[%c26_671, %c0_672, %c0_673] : memref<36x8x196xf32, #tpu.memory_space<vmem>>, vector<1x8x196xf32>
    %806 = vector.shape_cast %805 : vector<1x8x196xf32> to vector<8x196xf32>
    %807 = vector.broadcast %804 : f32 to vector<8x196xf32>
    %808 = arith.mulf %807, %806 : vector<8x196xf32>
    %809 = arith.addf %803, %808 : vector<8x196xf32>
    %c2_674 = arith.constant 2 : index
    %c7_675 = arith.constant 7 : index
    %810 = memref.load %arg2[%c2_674, %c7_675] : memref<8x9xf32, #tpu.memory_space<smem>>
    %c30_676 = arith.constant 30 : index
    %c0_677 = arith.constant 0 : index
    %c0_678 = arith.constant 0 : index
    %811 = vector.load %arg9[%c30_676, %c0_677, %c0_678] : memref<36x8x196xf32, #tpu.memory_space<vmem>>, vector<1x8x196xf32>
    %812 = vector.shape_cast %811 : vector<1x8x196xf32> to vector<8x196xf32>
    %813 = vector.broadcast %810 : f32 to vector<8x196xf32>
    %814 = arith.mulf %813, %812 : vector<8x196xf32>
    %815 = arith.addf %809, %814 : vector<8x196xf32>
    %c2_679 = arith.constant 2 : index
    %c8_680 = arith.constant 8 : index
    %816 = memref.load %arg2[%c2_679, %c8_680] : memref<8x9xf32, #tpu.memory_space<smem>>
    %c34_681 = arith.constant 34 : index
    %c0_682 = arith.constant 0 : index
    %c0_683 = arith.constant 0 : index
    %817 = vector.load %arg9[%c34_681, %c0_682, %c0_683] : memref<36x8x196xf32, #tpu.memory_space<vmem>>, vector<1x8x196xf32>
    %818 = vector.shape_cast %817 : vector<1x8x196xf32> to vector<8x196xf32>
    %819 = vector.broadcast %816 : f32 to vector<8x196xf32>
    %820 = arith.mulf %819, %818 : vector<8x196xf32>
    %821 = arith.addf %815, %820 : vector<8x196xf32>
    %822 = arith.maximumf %768, %821 : vector<8x196xf32>
    %c2_684 = arith.constant 2 : index
    %c0_685 = arith.constant 0 : index
    %823 = memref.load %arg2[%c2_684, %c0_685] : memref<8x9xf32, #tpu.memory_space<smem>>
    %c3_686 = arith.constant 3 : index
    %c0_687 = arith.constant 0 : index
    %c0_688 = arith.constant 0 : index
    %824 = vector.load %arg9[%c3_686, %c0_687, %c0_688] : memref<36x8x196xf32, #tpu.memory_space<vmem>>, vector<1x8x196xf32>
    %825 = vector.shape_cast %824 : vector<1x8x196xf32> to vector<8x196xf32>
    %826 = vector.broadcast %823 : f32 to vector<8x196xf32>
    %827 = arith.mulf %826, %825 : vector<8x196xf32>
    %c2_689 = arith.constant 2 : index
    %c1_690 = arith.constant 1 : index
    %828 = memref.load %arg2[%c2_689, %c1_690] : memref<8x9xf32, #tpu.memory_space<smem>>
    %c7_691 = arith.constant 7 : index
    %c0_692 = arith.constant 0 : index
    %c0_693 = arith.constant 0 : index
    %829 = vector.load %arg9[%c7_691, %c0_692, %c0_693] : memref<36x8x196xf32, #tpu.memory_space<vmem>>, vector<1x8x196xf32>
    %830 = vector.shape_cast %829 : vector<1x8x196xf32> to vector<8x196xf32>
    %831 = vector.broadcast %828 : f32 to vector<8x196xf32>
    %832 = arith.mulf %831, %830 : vector<8x196xf32>
    %833 = arith.addf %827, %832 : vector<8x196xf32>
    %c2_694 = arith.constant 2 : index
    %c2_695 = arith.constant 2 : index
    %834 = memref.load %arg2[%c2_694, %c2_695] : memref<8x9xf32, #tpu.memory_space<smem>>
    %c11_696 = arith.constant 11 : index
    %c0_697 = arith.constant 0 : index
    %c0_698 = arith.constant 0 : index
    %835 = vector.load %arg9[%c11_696, %c0_697, %c0_698] : memref<36x8x196xf32, #tpu.memory_space<vmem>>, vector<1x8x196xf32>
    %836 = vector.shape_cast %835 : vector<1x8x196xf32> to vector<8x196xf32>
    %837 = vector.broadcast %834 : f32 to vector<8x196xf32>
    %838 = arith.mulf %837, %836 : vector<8x196xf32>
    %839 = arith.addf %833, %838 : vector<8x196xf32>
    %c2_699 = arith.constant 2 : index
    %c3_700 = arith.constant 3 : index
    %840 = memref.load %arg2[%c2_699, %c3_700] : memref<8x9xf32, #tpu.memory_space<smem>>
    %c15_701 = arith.constant 15 : index
    %c0_702 = arith.constant 0 : index
    %c0_703 = arith.constant 0 : index
    %841 = vector.load %arg9[%c15_701, %c0_702, %c0_703] : memref<36x8x196xf32, #tpu.memory_space<vmem>>, vector<1x8x196xf32>
    %842 = vector.shape_cast %841 : vector<1x8x196xf32> to vector<8x196xf32>
    %843 = vector.broadcast %840 : f32 to vector<8x196xf32>
    %844 = arith.mulf %843, %842 : vector<8x196xf32>
    %845 = arith.addf %839, %844 : vector<8x196xf32>
    %c2_704 = arith.constant 2 : index
    %c4_705 = arith.constant 4 : index
    %846 = memref.load %arg2[%c2_704, %c4_705] : memref<8x9xf32, #tpu.memory_space<smem>>
    %c19_706 = arith.constant 19 : index
    %c0_707 = arith.constant 0 : index
    %c0_708 = arith.constant 0 : index
    %847 = vector.load %arg9[%c19_706, %c0_707, %c0_708] : memref<36x8x196xf32, #tpu.memory_space<vmem>>, vector<1x8x196xf32>
    %848 = vector.shape_cast %847 : vector<1x8x196xf32> to vector<8x196xf32>
    %849 = vector.broadcast %846 : f32 to vector<8x196xf32>
    %850 = arith.mulf %849, %848 : vector<8x196xf32>
    %851 = arith.addf %845, %850 : vector<8x196xf32>
    %c2_709 = arith.constant 2 : index
    %c5_710 = arith.constant 5 : index
    %852 = memref.load %arg2[%c2_709, %c5_710] : memref<8x9xf32, #tpu.memory_space<smem>>
    %c23_711 = arith.constant 23 : index
    %c0_712 = arith.constant 0 : index
    %c0_713 = arith.constant 0 : index
    %853 = vector.load %arg9[%c23_711, %c0_712, %c0_713] : memref<36x8x196xf32, #tpu.memory_space<vmem>>, vector<1x8x196xf32>
    %854 = vector.shape_cast %853 : vector<1x8x196xf32> to vector<8x196xf32>
    %855 = vector.broadcast %852 : f32 to vector<8x196xf32>
    %856 = arith.mulf %855, %854 : vector<8x196xf32>
    %857 = arith.addf %851, %856 : vector<8x196xf32>
    %c2_714 = arith.constant 2 : index
    %c6_715 = arith.constant 6 : index
    %858 = memref.load %arg2[%c2_714, %c6_715] : memref<8x9xf32, #tpu.memory_space<smem>>
    %c27_716 = arith.constant 27 : index
    %c0_717 = arith.constant 0 : index
    %c0_718 = arith.constant 0 : index
    %859 = vector.load %arg9[%c27_716, %c0_717, %c0_718] : memref<36x8x196xf32, #tpu.memory_space<vmem>>, vector<1x8x196xf32>
    %860 = vector.shape_cast %859 : vector<1x8x196xf32> to vector<8x196xf32>
    %861 = vector.broadcast %858 : f32 to vector<8x196xf32>
    %862 = arith.mulf %861, %860 : vector<8x196xf32>
    %863 = arith.addf %857, %862 : vector<8x196xf32>
    %c2_719 = arith.constant 2 : index
    %c7_720 = arith.constant 7 : index
    %864 = memref.load %arg2[%c2_719, %c7_720] : memref<8x9xf32, #tpu.memory_space<smem>>
    %c31_721 = arith.constant 31 : index
    %c0_722 = arith.constant 0 : index
    %c0_723 = arith.constant 0 : index
    %865 = vector.load %arg9[%c31_721, %c0_722, %c0_723] : memref<36x8x196xf32, #tpu.memory_space<vmem>>, vector<1x8x196xf32>
    %866 = vector.shape_cast %865 : vector<1x8x196xf32> to vector<8x196xf32>
    %867 = vector.broadcast %864 : f32 to vector<8x196xf32>
    %868 = arith.mulf %867, %866 : vector<8x196xf32>
    %869 = arith.addf %863, %868 : vector<8x196xf32>
    %c2_724 = arith.constant 2 : index
    %c8_725 = arith.constant 8 : index
    %870 = memref.load %arg2[%c2_724, %c8_725] : memref<8x9xf32, #tpu.memory_space<smem>>
    %c35_726 = arith.constant 35 : index
    %c0_727 = arith.constant 0 : index
    %c0_728 = arith.constant 0 : index
    %871 = vector.load %arg9[%c35_726, %c0_727, %c0_728] : memref<36x8x196xf32, #tpu.memory_space<vmem>>, vector<1x8x196xf32>
    %872 = vector.shape_cast %871 : vector<1x8x196xf32> to vector<8x196xf32>
    %873 = vector.broadcast %870 : f32 to vector<8x196xf32>
    %874 = arith.mulf %873, %872 : vector<8x196xf32>
    %875 = arith.addf %869, %874 : vector<8x196xf32>
    %876 = arith.maximumf %822, %875 : vector<8x196xf32>
    %c2_729 = arith.constant 2 : index
    %877 = memref.load %arg3[%c2_729] : memref<8xf32, #tpu.memory_space<smem>>
    %878 = vector.broadcast %877 : f32 to vector<8x196xf32>
    %879 = arith.addf %876, %878 : vector<8x196xf32>
    %cst_730 = arith.constant 0.000000e+00 : f32
    %880 = vector.broadcast %cst_730 : f32 to vector<8x196xf32>
    %881 = arith.maximumf %879, %880 : vector<8x196xf32>
    %882 = arith.truncf %881 : vector<8x196xf32> to vector<8x196xbf16>
    %c0_731 = arith.constant 0 : index
    %c512 = arith.constant 512 : index
    %883 = vector.load %arg10[%c0_731, %c512] : memref<8x2048xbf16, #tpu.memory_space<vmem>>, vector<8x196xbf16>
    tpu.vector_store %arg10[%c0_731, %c512], %882 {strides = array<i32>} : memref<8x2048xbf16, #tpu.memory_space<vmem>>, vector<8x196xbf16>,
    %c3_732 = arith.constant 3 : index
    %c0_733 = arith.constant 0 : index
    %884 = memref.load %arg2[%c3_732, %c0_733] : memref<8x9xf32, #tpu.memory_space<smem>>
    %c0_734 = arith.constant 0 : index
    %c0_735 = arith.constant 0 : index
    %c0_736 = arith.constant 0 : index
    %885 = vector.load %arg9[%c0_734, %c0_735, %c0_736] : memref<36x8x196xf32, #tpu.memory_space<vmem>>, vector<1x8x196xf32>
    %886 = vector.shape_cast %885 : vector<1x8x196xf32> to vector<8x196xf32>
    %887 = vector.broadcast %884 : f32 to vector<8x196xf32>
    %888 = arith.mulf %887, %886 : vector<8x196xf32>
    %c3_737 = arith.constant 3 : index
    %c1_738 = arith.constant 1 : index
    %889 = memref.load %arg2[%c3_737, %c1_738] : memref<8x9xf32, #tpu.memory_space<smem>>
    %c4_739 = arith.constant 4 : index
    %c0_740 = arith.constant 0 : index
    %c0_741 = arith.constant 0 : index
    %890 = vector.load %arg9[%c4_739, %c0_740, %c0_741] : memref<36x8x196xf32, #tpu.memory_space<vmem>>, vector<1x8x196xf32>
    %891 = vector.shape_cast %890 : vector<1x8x196xf32> to vector<8x196xf32>
    %892 = vector.broadcast %889 : f32 to vector<8x196xf32>
    %893 = arith.mulf %892, %891 : vector<8x196xf32>
    %894 = arith.addf %888, %893 : vector<8x196xf32>
    %c3_742 = arith.constant 3 : index
    %c2_743 = arith.constant 2 : index
    %895 = memref.load %arg2[%c3_742, %c2_743] : memref<8x9xf32, #tpu.memory_space<smem>>
    %c8_744 = arith.constant 8 : index
    %c0_745 = arith.constant 0 : index
    %c0_746 = arith.constant 0 : index
    %896 = vector.load %arg9[%c8_744, %c0_745, %c0_746] : memref<36x8x196xf32, #tpu.memory_space<vmem>>, vector<1x8x196xf32>
    %897 = vector.shape_cast %896 : vector<1x8x196xf32> to vector<8x196xf32>
    %898 = vector.broadcast %895 : f32 to vector<8x196xf32>
    %899 = arith.mulf %898, %897 : vector<8x196xf32>
    %900 = arith.addf %894, %899 : vector<8x196xf32>
    %c3_747 = arith.constant 3 : index
    %c3_748 = arith.constant 3 : index
    %901 = memref.load %arg2[%c3_747, %c3_748] : memref<8x9xf32, #tpu.memory_space<smem>>
    %c12_749 = arith.constant 12 : index
    %c0_750 = arith.constant 0 : index
    %c0_751 = arith.constant 0 : index
    %902 = vector.load %arg9[%c12_749, %c0_750, %c0_751] : memref<36x8x196xf32, #tpu.memory_space<vmem>>, vector<1x8x196xf32>
    %903 = vector.shape_cast %902 : vector<1x8x196xf32> to vector<8x196xf32>
    %904 = vector.broadcast %901 : f32 to vector<8x196xf32>
    %905 = arith.mulf %904, %903 : vector<8x196xf32>
    %906 = arith.addf %900, %905 : vector<8x196xf32>
    %c3_752 = arith.constant 3 : index
    %c4_753 = arith.constant 4 : index
    %907 = memref.load %arg2[%c3_752, %c4_753] : memref<8x9xf32, #tpu.memory_space<smem>>
    %c16_754 = arith.constant 16 : index
    %c0_755 = arith.constant 0 : index
    %c0_756 = arith.constant 0 : index
    %908 = vector.load %arg9[%c16_754, %c0_755, %c0_756] : memref<36x8x196xf32, #tpu.memory_space<vmem>>, vector<1x8x196xf32>
    %909 = vector.shape_cast %908 : vector<1x8x196xf32> to vector<8x196xf32>
    %910 = vector.broadcast %907 : f32 to vector<8x196xf32>
    %911 = arith.mulf %910, %909 : vector<8x196xf32>
    %912 = arith.addf %906, %911 : vector<8x196xf32>
    %c3_757 = arith.constant 3 : index
    %c5_758 = arith.constant 5 : index
    %913 = memref.load %arg2[%c3_757, %c5_758] : memref<8x9xf32, #tpu.memory_space<smem>>
    %c20_759 = arith.constant 20 : index
    %c0_760 = arith.constant 0 : index
    %c0_761 = arith.constant 0 : index
    %914 = vector.load %arg9[%c20_759, %c0_760, %c0_761] : memref<36x8x196xf32, #tpu.memory_space<vmem>>, vector<1x8x196xf32>
    %915 = vector.shape_cast %914 : vector<1x8x196xf32> to vector<8x196xf32>
    %916 = vector.broadcast %913 : f32 to vector<8x196xf32>
    %917 = arith.mulf %916, %915 : vector<8x196xf32>
    %918 = arith.addf %912, %917 : vector<8x196xf32>
    %c3_762 = arith.constant 3 : index
    %c6_763 = arith.constant 6 : index
    %919 = memref.load %arg2[%c3_762, %c6_763] : memref<8x9xf32, #tpu.memory_space<smem>>
    %c24_764 = arith.constant 24 : index
    %c0_765 = arith.constant 0 : index
    %c0_766 = arith.constant 0 : index
    %920 = vector.load %arg9[%c24_764, %c0_765, %c0_766] : memref<36x8x196xf32, #tpu.memory_space<vmem>>, vector<1x8x196xf32>
    %921 = vector.shape_cast %920 : vector<1x8x196xf32> to vector<8x196xf32>
    %922 = vector.broadcast %919 : f32 to vector<8x196xf32>
    %923 = arith.mulf %922, %921 : vector<8x196xf32>
    %924 = arith.addf %918, %923 : vector<8x196xf32>
    %c3_767 = arith.constant 3 : index
    %c7_768 = arith.constant 7 : index
    %925 = memref.load %arg2[%c3_767, %c7_768] : memref<8x9xf32, #tpu.memory_space<smem>>
    %c28_769 = arith.constant 28 : index
    %c0_770 = arith.constant 0 : index
    %c0_771 = arith.constant 0 : index
    %926 = vector.load %arg9[%c28_769, %c0_770, %c0_771] : memref<36x8x196xf32, #tpu.memory_space<vmem>>, vector<1x8x196xf32>
    %927 = vector.shape_cast %926 : vector<1x8x196xf32> to vector<8x196xf32>
    %928 = vector.broadcast %925 : f32 to vector<8x196xf32>
    %929 = arith.mulf %928, %927 : vector<8x196xf32>
    %930 = arith.addf %924, %929 : vector<8x196xf32>
    %c3_772 = arith.constant 3 : index
    %c8_773 = arith.constant 8 : index
    %931 = memref.load %arg2[%c3_772, %c8_773] : memref<8x9xf32, #tpu.memory_space<smem>>
    %c32_774 = arith.constant 32 : index
    %c0_775 = arith.constant 0 : index
    %c0_776 = arith.constant 0 : index
    %932 = vector.load %arg9[%c32_774, %c0_775, %c0_776] : memref<36x8x196xf32, #tpu.memory_space<vmem>>, vector<1x8x196xf32>
    %933 = vector.shape_cast %932 : vector<1x8x196xf32> to vector<8x196xf32>
    %934 = vector.broadcast %931 : f32 to vector<8x196xf32>
    %935 = arith.mulf %934, %933 : vector<8x196xf32>
    %936 = arith.addf %930, %935 : vector<8x196xf32>
    %c3_777 = arith.constant 3 : index
    %c0_778 = arith.constant 0 : index
    %937 = memref.load %arg2[%c3_777, %c0_778] : memref<8x9xf32, #tpu.memory_space<smem>>
    %c1_779 = arith.constant 1 : index
    %c0_780 = arith.constant 0 : index
    %c0_781 = arith.constant 0 : index
    %938 = vector.load %arg9[%c1_779, %c0_780, %c0_781] : memref<36x8x196xf32, #tpu.memory_space<vmem>>, vector<1x8x196xf32>
    %939 = vector.shape_cast %938 : vector<1x8x196xf32> to vector<8x196xf32>
    %940 = vector.broadcast %937 : f32 to vector<8x196xf32>
    %941 = arith.mulf %940, %939 : vector<8x196xf32>
    %c3_782 = arith.constant 3 : index
    %c1_783 = arith.constant 1 : index
    %942 = memref.load %arg2[%c3_782, %c1_783] : memref<8x9xf32, #tpu.memory_space<smem>>
    %c5_784 = arith.constant 5 : index
    %c0_785 = arith.constant 0 : index
    %c0_786 = arith.constant 0 : index
    %943 = vector.load %arg9[%c5_784, %c0_785, %c0_786] : memref<36x8x196xf32, #tpu.memory_space<vmem>>, vector<1x8x196xf32>
    %944 = vector.shape_cast %943 : vector<1x8x196xf32> to vector<8x196xf32>
    %945 = vector.broadcast %942 : f32 to vector<8x196xf32>
    %946 = arith.mulf %945, %944 : vector<8x196xf32>
    %947 = arith.addf %941, %946 : vector<8x196xf32>
    %c3_787 = arith.constant 3 : index
    %c2_788 = arith.constant 2 : index
    %948 = memref.load %arg2[%c3_787, %c2_788] : memref<8x9xf32, #tpu.memory_space<smem>>
    %c9_789 = arith.constant 9 : index
    %c0_790 = arith.constant 0 : index
    %c0_791 = arith.constant 0 : index
    %949 = vector.load %arg9[%c9_789, %c0_790, %c0_791] : memref<36x8x196xf32, #tpu.memory_space<vmem>>, vector<1x8x196xf32>
    %950 = vector.shape_cast %949 : vector<1x8x196xf32> to vector<8x196xf32>
    %951 = vector.broadcast %948 : f32 to vector<8x196xf32>
    %952 = arith.mulf %951, %950 : vector<8x196xf32>
    %953 = arith.addf %947, %952 : vector<8x196xf32>
    %c3_792 = arith.constant 3 : index
    %c3_793 = arith.constant 3 : index
    %954 = memref.load %arg2[%c3_792, %c3_793] : memref<8x9xf32, #tpu.memory_space<smem>>
    %c13_794 = arith.constant 13 : index
    %c0_795 = arith.constant 0 : index
    %c0_796 = arith.constant 0 : index
    %955 = vector.load %arg9[%c13_794, %c0_795, %c0_796] : memref<36x8x196xf32, #tpu.memory_space<vmem>>, vector<1x8x196xf32>
    %956 = vector.shape_cast %955 : vector<1x8x196xf32> to vector<8x196xf32>
    %957 = vector.broadcast %954 : f32 to vector<8x196xf32>
    %958 = arith.mulf %957, %956 : vector<8x196xf32>
    %959 = arith.addf %953, %958 : vector<8x196xf32>
    %c3_797 = arith.constant 3 : index
    %c4_798 = arith.constant 4 : index
    %960 = memref.load %arg2[%c3_797, %c4_798] : memref<8x9xf32, #tpu.memory_space<smem>>
    %c17_799 = arith.constant 17 : index
    %c0_800 = arith.constant 0 : index
    %c0_801 = arith.constant 0 : index
    %961 = vector.load %arg9[%c17_799, %c0_800, %c0_801] : memref<36x8x196xf32, #tpu.memory_space<vmem>>, vector<1x8x196xf32>
    %962 = vector.shape_cast %961 : vector<1x8x196xf32> to vector<8x196xf32>
    %963 = vector.broadcast %960 : f32 to vector<8x196xf32>
    %964 = arith.mulf %963, %962 : vector<8x196xf32>
    %965 = arith.addf %959, %964 : vector<8x196xf32>
    %c3_802 = arith.constant 3 : index
    %c5_803 = arith.constant 5 : index
    %966 = memref.load %arg2[%c3_802, %c5_803] : memref<8x9xf32, #tpu.memory_space<smem>>
    %c21_804 = arith.constant 21 : index
    %c0_805 = arith.constant 0 : index
    %c0_806 = arith.constant 0 : index
    %967 = vector.load %arg9[%c21_804, %c0_805, %c0_806] : memref<36x8x196xf32, #tpu.memory_space<vmem>>, vector<1x8x196xf32>
    %968 = vector.shape_cast %967 : vector<1x8x196xf32> to vector<8x196xf32>
    %969 = vector.broadcast %966 : f32 to vector<8x196xf32>
    %970 = arith.mulf %969, %968 : vector<8x196xf32>
    %971 = arith.addf %965, %970 : vector<8x196xf32>
    %c3_807 = arith.constant 3 : index
    %c6_808 = arith.constant 6 : index
    %972 = memref.load %arg2[%c3_807, %c6_808] : memref<8x9xf32, #tpu.memory_space<smem>>
    %c25_809 = arith.constant 25 : index
    %c0_810 = arith.constant 0 : index
    %c0_811 = arith.constant 0 : index
    %973 = vector.load %arg9[%c25_809, %c0_810, %c0_811] : memref<36x8x196xf32, #tpu.memory_space<vmem>>, vector<1x8x196xf32>
    %974 = vector.shape_cast %973 : vector<1x8x196xf32> to vector<8x196xf32>
    %975 = vector.broadcast %972 : f32 to vector<8x196xf32>
    %976 = arith.mulf %975, %974 : vector<8x196xf32>
    %977 = arith.addf %971, %976 : vector<8x196xf32>
    %c3_812 = arith.constant 3 : index
    %c7_813 = arith.constant 7 : index
    %978 = memref.load %arg2[%c3_812, %c7_813] : memref<8x9xf32, #tpu.memory_space<smem>>
    %c29_814 = arith.constant 29 : index
    %c0_815 = arith.constant 0 : index
    %c0_816 = arith.constant 0 : index
    %979 = vector.load %arg9[%c29_814, %c0_815, %c0_816] : memref<36x8x196xf32, #tpu.memory_space<vmem>>, vector<1x8x196xf32>
    %980 = vector.shape_cast %979 : vector<1x8x196xf32> to vector<8x196xf32>
    %981 = vector.broadcast %978 : f32 to vector<8x196xf32>
    %982 = arith.mulf %981, %980 : vector<8x196xf32>
    %983 = arith.addf %977, %982 : vector<8x196xf32>
    %c3_817 = arith.constant 3 : index
    %c8_818 = arith.constant 8 : index
    %984 = memref.load %arg2[%c3_817, %c8_818] : memref<8x9xf32, #tpu.memory_space<smem>>
    %c33_819 = arith.constant 33 : index
    %c0_820 = arith.constant 0 : index
    %c0_821 = arith.constant 0 : index
    %985 = vector.load %arg9[%c33_819, %c0_820, %c0_821] : memref<36x8x196xf32, #tpu.memory_space<vmem>>, vector<1x8x196xf32>
    %986 = vector.shape_cast %985 : vector<1x8x196xf32> to vector<8x196xf32>
    %987 = vector.broadcast %984 : f32 to vector<8x196xf32>
    %988 = arith.mulf %987, %986 : vector<8x196xf32>
    %989 = arith.addf %983, %988 : vector<8x196xf32>
    %990 = arith.maximumf %936, %989 : vector<8x196xf32>
    %c3_822 = arith.constant 3 : index
    %c0_823 = arith.constant 0 : index
    %991 = memref.load %arg2[%c3_822, %c0_823] : memref<8x9xf32, #tpu.memory_space<smem>>
    %c2_824 = arith.constant 2 : index
    %c0_825 = arith.constant 0 : index
    %c0_826 = arith.constant 0 : index
    %992 = vector.load %arg9[%c2_824, %c0_825, %c0_826] : memref<36x8x196xf32, #tpu.memory_space<vmem>>, vector<1x8x196xf32>
    %993 = vector.shape_cast %992 : vector<1x8x196xf32> to vector<8x196xf32>
    %994 = vector.broadcast %991 : f32 to vector<8x196xf32>
    %995 = arith.mulf %994, %993 : vector<8x196xf32>
    %c3_827 = arith.constant 3 : index
    %c1_828 = arith.constant 1 : index
    %996 = memref.load %arg2[%c3_827, %c1_828] : memref<8x9xf32, #tpu.memory_space<smem>>
    %c6_829 = arith.constant 6 : index
    %c0_830 = arith.constant 0 : index
    %c0_831 = arith.constant 0 : index
    %997 = vector.load %arg9[%c6_829, %c0_830, %c0_831] : memref<36x8x196xf32, #tpu.memory_space<vmem>>, vector<1x8x196xf32>
    %998 = vector.shape_cast %997 : vector<1x8x196xf32> to vector<8x196xf32>
    %999 = vector.broadcast %996 : f32 to vector<8x196xf32>
    %1000 = arith.mulf %999, %998 : vector<8x196xf32>
    %1001 = arith.addf %995, %1000 : vector<8x196xf32>
    %c3_832 = arith.constant 3 : index
    %c2_833 = arith.constant 2 : index
    %1002 = memref.load %arg2[%c3_832, %c2_833] : memref<8x9xf32, #tpu.memory_space<smem>>
    %c10_834 = arith.constant 10 : index
    %c0_835 = arith.constant 0 : index
    %c0_836 = arith.constant 0 : index
    %1003 = vector.load %arg9[%c10_834, %c0_835, %c0_836] : memref<36x8x196xf32, #tpu.memory_space<vmem>>, vector<1x8x196xf32>
    %1004 = vector.shape_cast %1003 : vector<1x8x196xf32> to vector<8x196xf32>
    %1005 = vector.broadcast %1002 : f32 to vector<8x196xf32>
    %1006 = arith.mulf %1005, %1004 : vector<8x196xf32>
    %1007 = arith.addf %1001, %1006 : vector<8x196xf32>
    %c3_837 = arith.constant 3 : index
    %c3_838 = arith.constant 3 : index
    %1008 = memref.load %arg2[%c3_837, %c3_838] : memref<8x9xf32, #tpu.memory_space<smem>>
    %c14_839 = arith.constant 14 : index
    %c0_840 = arith.constant 0 : index
    %c0_841 = arith.constant 0 : index
    %1009 = vector.load %arg9[%c14_839, %c0_840, %c0_841] : memref<36x8x196xf32, #tpu.memory_space<vmem>>, vector<1x8x196xf32>
    %1010 = vector.shape_cast %1009 : vector<1x8x196xf32> to vector<8x196xf32>
    %1011 = vector.broadcast %1008 : f32 to vector<8x196xf32>
    %1012 = arith.mulf %1011, %1010 : vector<8x196xf32>
    %1013 = arith.addf %1007, %1012 : vector<8x196xf32>
    %c3_842 = arith.constant 3 : index
    %c4_843 = arith.constant 4 : index
    %1014 = memref.load %arg2[%c3_842, %c4_843] : memref<8x9xf32, #tpu.memory_space<smem>>
    %c18_844 = arith.constant 18 : index
    %c0_845 = arith.constant 0 : index
    %c0_846 = arith.constant 0 : index
    %1015 = vector.load %arg9[%c18_844, %c0_845, %c0_846] : memref<36x8x196xf32, #tpu.memory_space<vmem>>, vector<1x8x196xf32>
    %1016 = vector.shape_cast %1015 : vector<1x8x196xf32> to vector<8x196xf32>
    %1017 = vector.broadcast %1014 : f32 to vector<8x196xf32>
    %1018 = arith.mulf %1017, %1016 : vector<8x196xf32>
    %1019 = arith.addf %1013, %1018 : vector<8x196xf32>
    %c3_847 = arith.constant 3 : index
    %c5_848 = arith.constant 5 : index
    %1020 = memref.load %arg2[%c3_847, %c5_848] : memref<8x9xf32, #tpu.memory_space<smem>>
    %c22_849 = arith.constant 22 : index
    %c0_850 = arith.constant 0 : index
    %c0_851 = arith.constant 0 : index
    %1021 = vector.load %arg9[%c22_849, %c0_850, %c0_851] : memref<36x8x196xf32, #tpu.memory_space<vmem>>, vector<1x8x196xf32>
    %1022 = vector.shape_cast %1021 : vector<1x8x196xf32> to vector<8x196xf32>
    %1023 = vector.broadcast %1020 : f32 to vector<8x196xf32>
    %1024 = arith.mulf %1023, %1022 : vector<8x196xf32>
    %1025 = arith.addf %1019, %1024 : vector<8x196xf32>
    %c3_852 = arith.constant 3 : index
    %c6_853 = arith.constant 6 : index
    %1026 = memref.load %arg2[%c3_852, %c6_853] : memref<8x9xf32, #tpu.memory_space<smem>>
    %c26_854 = arith.constant 26 : index
    %c0_855 = arith.constant 0 : index
    %c0_856 = arith.constant 0 : index
    %1027 = vector.load %arg9[%c26_854, %c0_855, %c0_856] : memref<36x8x196xf32, #tpu.memory_space<vmem>>, vector<1x8x196xf32>
    %1028 = vector.shape_cast %1027 : vector<1x8x196xf32> to vector<8x196xf32>
    %1029 = vector.broadcast %1026 : f32 to vector<8x196xf32>
    %1030 = arith.mulf %1029, %1028 : vector<8x196xf32>
    %1031 = arith.addf %1025, %1030 : vector<8x196xf32>
    %c3_857 = arith.constant 3 : index
    %c7_858 = arith.constant 7 : index
    %1032 = memref.load %arg2[%c3_857, %c7_858] : memref<8x9xf32, #tpu.memory_space<smem>>
    %c30_859 = arith.constant 30 : index
    %c0_860 = arith.constant 0 : index
    %c0_861 = arith.constant 0 : index
    %1033 = vector.load %arg9[%c30_859, %c0_860, %c0_861] : memref<36x8x196xf32, #tpu.memory_space<vmem>>, vector<1x8x196xf32>
    %1034 = vector.shape_cast %1033 : vector<1x8x196xf32> to vector<8x196xf32>
    %1035 = vector.broadcast %1032 : f32 to vector<8x196xf32>
    %1036 = arith.mulf %1035, %1034 : vector<8x196xf32>
    %1037 = arith.addf %1031, %1036 : vector<8x196xf32>
    %c3_862 = arith.constant 3 : index
    %c8_863 = arith.constant 8 : index
    %1038 = memref.load %arg2[%c3_862, %c8_863] : memref<8x9xf32, #tpu.memory_space<smem>>
    %c34_864 = arith.constant 34 : index
    %c0_865 = arith.constant 0 : index
    %c0_866 = arith.constant 0 : index
    %1039 = vector.load %arg9[%c34_864, %c0_865, %c0_866] : memref<36x8x196xf32, #tpu.memory_space<vmem>>, vector<1x8x196xf32>
    %1040 = vector.shape_cast %1039 : vector<1x8x196xf32> to vector<8x196xf32>
    %1041 = vector.broadcast %1038 : f32 to vector<8x196xf32>
    %1042 = arith.mulf %1041, %1040 : vector<8x196xf32>
    %1043 = arith.addf %1037, %1042 : vector<8x196xf32>
    %1044 = arith.maximumf %990, %1043 : vector<8x196xf32>
    %c3_867 = arith.constant 3 : index
    %c0_868 = arith.constant 0 : index
    %1045 = memref.load %arg2[%c3_867, %c0_868] : memref<8x9xf32, #tpu.memory_space<smem>>
    %c3_869 = arith.constant 3 : index
    %c0_870 = arith.constant 0 : index
    %c0_871 = arith.constant 0 : index
    %1046 = vector.load %arg9[%c3_869, %c0_870, %c0_871] : memref<36x8x196xf32, #tpu.memory_space<vmem>>, vector<1x8x196xf32>
    %1047 = vector.shape_cast %1046 : vector<1x8x196xf32> to vector<8x196xf32>
    %1048 = vector.broadcast %1045 : f32 to vector<8x196xf32>
    %1049 = arith.mulf %1048, %1047 : vector<8x196xf32>
    %c3_872 = arith.constant 3 : index
    %c1_873 = arith.constant 1 : index
    %1050 = memref.load %arg2[%c3_872, %c1_873] : memref<8x9xf32, #tpu.memory_space<smem>>
    %c7_874 = arith.constant 7 : index
    %c0_875 = arith.constant 0 : index
    %c0_876 = arith.constant 0 : index
    %1051 = vector.load %arg9[%c7_874, %c0_875, %c0_876] : memref<36x8x196xf32, #tpu.memory_space<vmem>>, vector<1x8x196xf32>
    %1052 = vector.shape_cast %1051 : vector<1x8x196xf32> to vector<8x196xf32>
    %1053 = vector.broadcast %1050 : f32 to vector<8x196xf32>
    %1054 = arith.mulf %1053, %1052 : vector<8x196xf32>
    %1055 = arith.addf %1049, %1054 : vector<8x196xf32>
    %c3_877 = arith.constant 3 : index
    %c2_878 = arith.constant 2 : index
    %1056 = memref.load %arg2[%c3_877, %c2_878] : memref<8x9xf32, #tpu.memory_space<smem>>
    %c11_879 = arith.constant 11 : index
    %c0_880 = arith.constant 0 : index
    %c0_881 = arith.constant 0 : index
    %1057 = vector.load %arg9[%c11_879, %c0_880, %c0_881] : memref<36x8x196xf32, #tpu.memory_space<vmem>>, vector<1x8x196xf32>
    %1058 = vector.shape_cast %1057 : vector<1x8x196xf32> to vector<8x196xf32>
    %1059 = vector.broadcast %1056 : f32 to vector<8x196xf32>
    %1060 = arith.mulf %1059, %1058 : vector<8x196xf32>
    %1061 = arith.addf %1055, %1060 : vector<8x196xf32>
    %c3_882 = arith.constant 3 : index
    %c3_883 = arith.constant 3 : index
    %1062 = memref.load %arg2[%c3_882, %c3_883] : memref<8x9xf32, #tpu.memory_space<smem>>
    %c15_884 = arith.constant 15 : index
    %c0_885 = arith.constant 0 : index
    %c0_886 = arith.constant 0 : index
    %1063 = vector.load %arg9[%c15_884, %c0_885, %c0_886] : memref<36x8x196xf32, #tpu.memory_space<vmem>>, vector<1x8x196xf32>
    %1064 = vector.shape_cast %1063 : vector<1x8x196xf32> to vector<8x196xf32>
    %1065 = vector.broadcast %1062 : f32 to vector<8x196xf32>
    %1066 = arith.mulf %1065, %1064 : vector<8x196xf32>
    %1067 = arith.addf %1061, %1066 : vector<8x196xf32>
    %c3_887 = arith.constant 3 : index
    %c4_888 = arith.constant 4 : index
    %1068 = memref.load %arg2[%c3_887, %c4_888] : memref<8x9xf32, #tpu.memory_space<smem>>
    %c19_889 = arith.constant 19 : index
    %c0_890 = arith.constant 0 : index
    %c0_891 = arith.constant 0 : index
    %1069 = vector.load %arg9[%c19_889, %c0_890, %c0_891] : memref<36x8x196xf32, #tpu.memory_space<vmem>>, vector<1x8x196xf32>
    %1070 = vector.shape_cast %1069 : vector<1x8x196xf32> to vector<8x196xf32>
    %1071 = vector.broadcast %1068 : f32 to vector<8x196xf32>
    %1072 = arith.mulf %1071, %1070 : vector<8x196xf32>
    %1073 = arith.addf %1067, %1072 : vector<8x196xf32>
    %c3_892 = arith.constant 3 : index
    %c5_893 = arith.constant 5 : index
    %1074 = memref.load %arg2[%c3_892, %c5_893] : memref<8x9xf32, #tpu.memory_space<smem>>
    %c23_894 = arith.constant 23 : index
    %c0_895 = arith.constant 0 : index
    %c0_896 = arith.constant 0 : index
    %1075 = vector.load %arg9[%c23_894, %c0_895, %c0_896] : memref<36x8x196xf32, #tpu.memory_space<vmem>>, vector<1x8x196xf32>
    %1076 = vector.shape_cast %1075 : vector<1x8x196xf32> to vector<8x196xf32>
    %1077 = vector.broadcast %1074 : f32 to vector<8x196xf32>
    %1078 = arith.mulf %1077, %1076 : vector<8x196xf32>
    %1079 = arith.addf %1073, %1078 : vector<8x196xf32>
    %c3_897 = arith.constant 3 : index
    %c6_898 = arith.constant 6 : index
    %1080 = memref.load %arg2[%c3_897, %c6_898] : memref<8x9xf32, #tpu.memory_space<smem>>
    %c27_899 = arith.constant 27 : index
    %c0_900 = arith.constant 0 : index
    %c0_901 = arith.constant 0 : index
    %1081 = vector.load %arg9[%c27_899, %c0_900, %c0_901] : memref<36x8x196xf32, #tpu.memory_space<vmem>>, vector<1x8x196xf32>
    %1082 = vector.shape_cast %1081 : vector<1x8x196xf32> to vector<8x196xf32>
    %1083 = vector.broadcast %1080 : f32 to vector<8x196xf32>
    %1084 = arith.mulf %1083, %1082 : vector<8x196xf32>
    %1085 = arith.addf %1079, %1084 : vector<8x196xf32>
    %c3_902 = arith.constant 3 : index
    %c7_903 = arith.constant 7 : index
    %1086 = memref.load %arg2[%c3_902, %c7_903] : memref<8x9xf32, #tpu.memory_space<smem>>
    %c31_904 = arith.constant 31 : index
    %c0_905 = arith.constant 0 : index
    %c0_906 = arith.constant 0 : index
    %1087 = vector.load %arg9[%c31_904, %c0_905, %c0_906] : memref<36x8x196xf32, #tpu.memory_space<vmem>>, vector<1x8x196xf32>
    %1088 = vector.shape_cast %1087 : vector<1x8x196xf32> to vector<8x196xf32>
    %1089 = vector.broadcast %1086 : f32 to vector<8x196xf32>
    %1090 = arith.mulf %1089, %1088 : vector<8x196xf32>
    %1091 = arith.addf %1085, %1090 : vector<8x196xf32>
    %c3_907 = arith.constant 3 : index
    %c8_908 = arith.constant 8 : index
    %1092 = memref.load %arg2[%c3_907, %c8_908] : memref<8x9xf32, #tpu.memory_space<smem>>
    %c35_909 = arith.constant 35 : index
    %c0_910 = arith.constant 0 : index
    %c0_911 = arith.constant 0 : index
    %1093 = vector.load %arg9[%c35_909, %c0_910, %c0_911] : memref<36x8x196xf32, #tpu.memory_space<vmem>>, vector<1x8x196xf32>
    %1094 = vector.shape_cast %1093 : vector<1x8x196xf32> to vector<8x196xf32>
    %1095 = vector.broadcast %1092 : f32 to vector<8x196xf32>
    %1096 = arith.mulf %1095, %1094 : vector<8x196xf32>
    %1097 = arith.addf %1091, %1096 : vector<8x196xf32>
    %1098 = arith.maximumf %1044, %1097 : vector<8x196xf32>
    %c3_912 = arith.constant 3 : index
    %1099 = memref.load %arg3[%c3_912] : memref<8xf32, #tpu.memory_space<smem>>
    %1100 = vector.broadcast %1099 : f32 to vector<8x196xf32>
    %1101 = arith.addf %1098, %1100 : vector<8x196xf32>
    %cst_913 = arith.constant 0.000000e+00 : f32
    %1102 = vector.broadcast %cst_913 : f32 to vector<8x196xf32>
    %1103 = arith.maximumf %1101, %1102 : vector<8x196xf32>
    %1104 = arith.truncf %1103 : vector<8x196xf32> to vector<8x196xbf16>
    %c0_914 = arith.constant 0 : index
    %c768 = arith.constant 768 : index
    %1105 = vector.load %arg10[%c0_914, %c768] : memref<8x2048xbf16, #tpu.memory_space<vmem>>, vector<8x196xbf16>
    tpu.vector_store %arg10[%c0_914, %c768], %1104 {strides = array<i32>} : memref<8x2048xbf16, #tpu.memory_space<vmem>>, vector<8x196xbf16>,
    %c4_915 = arith.constant 4 : index
    %c0_916 = arith.constant 0 : index
    %1106 = memref.load %arg2[%c4_915, %c0_916] : memref<8x9xf32, #tpu.memory_space<smem>>
    %c0_917 = arith.constant 0 : index
    %c0_918 = arith.constant 0 : index
    %c0_919 = arith.constant 0 : index
    %1107 = vector.load %arg9[%c0_917, %c0_918, %c0_919] : memref<36x8x196xf32, #tpu.memory_space<vmem>>, vector<1x8x196xf32>
    %1108 = vector.shape_cast %1107 : vector<1x8x196xf32> to vector<8x196xf32>
    %1109 = vector.broadcast %1106 : f32 to vector<8x196xf32>
    %1110 = arith.mulf %1109, %1108 : vector<8x196xf32>
    %c4_920 = arith.constant 4 : index
    %c1_921 = arith.constant 1 : index
    %1111 = memref.load %arg2[%c4_920, %c1_921] : memref<8x9xf32, #tpu.memory_space<smem>>
    %c4_922 = arith.constant 4 : index
    %c0_923 = arith.constant 0 : index
    %c0_924 = arith.constant 0 : index
    %1112 = vector.load %arg9[%c4_922, %c0_923, %c0_924] : memref<36x8x196xf32, #tpu.memory_space<vmem>>, vector<1x8x196xf32>
    %1113 = vector.shape_cast %1112 : vector<1x8x196xf32> to vector<8x196xf32>
    %1114 = vector.broadcast %1111 : f32 to vector<8x196xf32>
    %1115 = arith.mulf %1114, %1113 : vector<8x196xf32>
    %1116 = arith.addf %1110, %1115 : vector<8x196xf32>
    %c4_925 = arith.constant 4 : index
    %c2_926 = arith.constant 2 : index
    %1117 = memref.load %arg2[%c4_925, %c2_926] : memref<8x9xf32, #tpu.memory_space<smem>>
    %c8_927 = arith.constant 8 : index
    %c0_928 = arith.constant 0 : index
    %c0_929 = arith.constant 0 : index
    %1118 = vector.load %arg9[%c8_927, %c0_928, %c0_929] : memref<36x8x196xf32, #tpu.memory_space<vmem>>, vector<1x8x196xf32>
    %1119 = vector.shape_cast %1118 : vector<1x8x196xf32> to vector<8x196xf32>
    %1120 = vector.broadcast %1117 : f32 to vector<8x196xf32>
    %1121 = arith.mulf %1120, %1119 : vector<8x196xf32>
    %1122 = arith.addf %1116, %1121 : vector<8x196xf32>
    %c4_930 = arith.constant 4 : index
    %c3_931 = arith.constant 3 : index
    %1123 = memref.load %arg2[%c4_930, %c3_931] : memref<8x9xf32, #tpu.memory_space<smem>>
    %c12_932 = arith.constant 12 : index
    %c0_933 = arith.constant 0 : index
    %c0_934 = arith.constant 0 : index
    %1124 = vector.load %arg9[%c12_932, %c0_933, %c0_934] : memref<36x8x196xf32, #tpu.memory_space<vmem>>, vector<1x8x196xf32>
    %1125 = vector.shape_cast %1124 : vector<1x8x196xf32> to vector<8x196xf32>
    %1126 = vector.broadcast %1123 : f32 to vector<8x196xf32>
    %1127 = arith.mulf %1126, %1125 : vector<8x196xf32>
    %1128 = arith.addf %1122, %1127 : vector<8x196xf32>
    %c4_935 = arith.constant 4 : index
    %c4_936 = arith.constant 4 : index
    %1129 = memref.load %arg2[%c4_935, %c4_936] : memref<8x9xf32, #tpu.memory_space<smem>>
    %c16_937 = arith.constant 16 : index
    %c0_938 = arith.constant 0 : index
    %c0_939 = arith.constant 0 : index
    %1130 = vector.load %arg9[%c16_937, %c0_938, %c0_939] : memref<36x8x196xf32, #tpu.memory_space<vmem>>, vector<1x8x196xf32>
    %1131 = vector.shape_cast %1130 : vector<1x8x196xf32> to vector<8x196xf32>
    %1132 = vector.broadcast %1129 : f32 to vector<8x196xf32>
    %1133 = arith.mulf %1132, %1131 : vector<8x196xf32>
    %1134 = arith.addf %1128, %1133 : vector<8x196xf32>
    %c4_940 = arith.constant 4 : index
    %c5_941 = arith.constant 5 : index
    %1135 = memref.load %arg2[%c4_940, %c5_941] : memref<8x9xf32, #tpu.memory_space<smem>>
    %c20_942 = arith.constant 20 : index
    %c0_943 = arith.constant 0 : index
    %c0_944 = arith.constant 0 : index
    %1136 = vector.load %arg9[%c20_942, %c0_943, %c0_944] : memref<36x8x196xf32, #tpu.memory_space<vmem>>, vector<1x8x196xf32>
    %1137 = vector.shape_cast %1136 : vector<1x8x196xf32> to vector<8x196xf32>
    %1138 = vector.broadcast %1135 : f32 to vector<8x196xf32>
    %1139 = arith.mulf %1138, %1137 : vector<8x196xf32>
    %1140 = arith.addf %1134, %1139 : vector<8x196xf32>
    %c4_945 = arith.constant 4 : index
    %c6_946 = arith.constant 6 : index
    %1141 = memref.load %arg2[%c4_945, %c6_946] : memref<8x9xf32, #tpu.memory_space<smem>>
    %c24_947 = arith.constant 24 : index
    %c0_948 = arith.constant 0 : index
    %c0_949 = arith.constant 0 : index
    %1142 = vector.load %arg9[%c24_947, %c0_948, %c0_949] : memref<36x8x196xf32, #tpu.memory_space<vmem>>, vector<1x8x196xf32>
    %1143 = vector.shape_cast %1142 : vector<1x8x196xf32> to vector<8x196xf32>
    %1144 = vector.broadcast %1141 : f32 to vector<8x196xf32>
    %1145 = arith.mulf %1144, %1143 : vector<8x196xf32>
    %1146 = arith.addf %1140, %1145 : vector<8x196xf32>
    %c4_950 = arith.constant 4 : index
    %c7_951 = arith.constant 7 : index
    %1147 = memref.load %arg2[%c4_950, %c7_951] : memref<8x9xf32, #tpu.memory_space<smem>>
    %c28_952 = arith.constant 28 : index
    %c0_953 = arith.constant 0 : index
    %c0_954 = arith.constant 0 : index
    %1148 = vector.load %arg9[%c28_952, %c0_953, %c0_954] : memref<36x8x196xf32, #tpu.memory_space<vmem>>, vector<1x8x196xf32>
    %1149 = vector.shape_cast %1148 : vector<1x8x196xf32> to vector<8x196xf32>
    %1150 = vector.broadcast %1147 : f32 to vector<8x196xf32>
    %1151 = arith.mulf %1150, %1149 : vector<8x196xf32>
    %1152 = arith.addf %1146, %1151 : vector<8x196xf32>
    %c4_955 = arith.constant 4 : index
    %c8_956 = arith.constant 8 : index
    %1153 = memref.load %arg2[%c4_955, %c8_956] : memref<8x9xf32, #tpu.memory_space<smem>>
    %c32_957 = arith.constant 32 : index
    %c0_958 = arith.constant 0 : index
    %c0_959 = arith.constant 0 : index
    %1154 = vector.load %arg9[%c32_957, %c0_958, %c0_959] : memref<36x8x196xf32, #tpu.memory_space<vmem>>, vector<1x8x196xf32>
    %1155 = vector.shape_cast %1154 : vector<1x8x196xf32> to vector<8x196xf32>
    %1156 = vector.broadcast %1153 : f32 to vector<8x196xf32>
    %1157 = arith.mulf %1156, %1155 : vector<8x196xf32>
    %1158 = arith.addf %1152, %1157 : vector<8x196xf32>
    %c4_960 = arith.constant 4 : index
    %c0_961 = arith.constant 0 : index
    %1159 = memref.load %arg2[%c4_960, %c0_961] : memref<8x9xf32, #tpu.memory_space<smem>>
    %c1_962 = arith.constant 1 : index
    %c0_963 = arith.constant 0 : index
    %c0_964 = arith.constant 0 : index
    %1160 = vector.load %arg9[%c1_962, %c0_963, %c0_964] : memref<36x8x196xf32, #tpu.memory_space<vmem>>, vector<1x8x196xf32>
    %1161 = vector.shape_cast %1160 : vector<1x8x196xf32> to vector<8x196xf32>
    %1162 = vector.broadcast %1159 : f32 to vector<8x196xf32>
    %1163 = arith.mulf %1162, %1161 : vector<8x196xf32>
    %c4_965 = arith.constant 4 : index
    %c1_966 = arith.constant 1 : index
    %1164 = memref.load %arg2[%c4_965, %c1_966] : memref<8x9xf32, #tpu.memory_space<smem>>
    %c5_967 = arith.constant 5 : index
    %c0_968 = arith.constant 0 : index
    %c0_969 = arith.constant 0 : index
    %1165 = vector.load %arg9[%c5_967, %c0_968, %c0_969] : memref<36x8x196xf32, #tpu.memory_space<vmem>>, vector<1x8x196xf32>
    %1166 = vector.shape_cast %1165 : vector<1x8x196xf32> to vector<8x196xf32>
    %1167 = vector.broadcast %1164 : f32 to vector<8x196xf32>
    %1168 = arith.mulf %1167, %1166 : vector<8x196xf32>
    %1169 = arith.addf %1163, %1168 : vector<8x196xf32>
    %c4_970 = arith.constant 4 : index
    %c2_971 = arith.constant 2 : index
    %1170 = memref.load %arg2[%c4_970, %c2_971] : memref<8x9xf32, #tpu.memory_space<smem>>
    %c9_972 = arith.constant 9 : index
    %c0_973 = arith.constant 0 : index
    %c0_974 = arith.constant 0 : index
    %1171 = vector.load %arg9[%c9_972, %c0_973, %c0_974] : memref<36x8x196xf32, #tpu.memory_space<vmem>>, vector<1x8x196xf32>
    %1172 = vector.shape_cast %1171 : vector<1x8x196xf32> to vector<8x196xf32>
    %1173 = vector.broadcast %1170 : f32 to vector<8x196xf32>
    %1174 = arith.mulf %1173, %1172 : vector<8x196xf32>
    %1175 = arith.addf %1169, %1174 : vector<8x196xf32>
    %c4_975 = arith.constant 4 : index
    %c3_976 = arith.constant 3 : index
    %1176 = memref.load %arg2[%c4_975, %c3_976] : memref<8x9xf32, #tpu.memory_space<smem>>
    %c13_977 = arith.constant 13 : index
    %c0_978 = arith.constant 0 : index
    %c0_979 = arith.constant 0 : index
    %1177 = vector.load %arg9[%c13_977, %c0_978, %c0_979] : memref<36x8x196xf32, #tpu.memory_space<vmem>>, vector<1x8x196xf32>
    %1178 = vector.shape_cast %1177 : vector<1x8x196xf32> to vector<8x196xf32>
    %1179 = vector.broadcast %1176 : f32 to vector<8x196xf32>
    %1180 = arith.mulf %1179, %1178 : vector<8x196xf32>
    %1181 = arith.addf %1175, %1180 : vector<8x196xf32>
    %c4_980 = arith.constant 4 : index
    %c4_981 = arith.constant 4 : index
    %1182 = memref.load %arg2[%c4_980, %c4_981] : memref<8x9xf32, #tpu.memory_space<smem>>
    %c17_982 = arith.constant 17 : index
    %c0_983 = arith.constant 0 : index
    %c0_984 = arith.constant 0 : index
    %1183 = vector.load %arg9[%c17_982, %c0_983, %c0_984] : memref<36x8x196xf32, #tpu.memory_space<vmem>>, vector<1x8x196xf32>
    %1184 = vector.shape_cast %1183 : vector<1x8x196xf32> to vector<8x196xf32>
    %1185 = vector.broadcast %1182 : f32 to vector<8x196xf32>
    %1186 = arith.mulf %1185, %1184 : vector<8x196xf32>
    %1187 = arith.addf %1181, %1186 : vector<8x196xf32>
    %c4_985 = arith.constant 4 : index
    %c5_986 = arith.constant 5 : index
    %1188 = memref.load %arg2[%c4_985, %c5_986] : memref<8x9xf32, #tpu.memory_space<smem>>
    %c21_987 = arith.constant 21 : index
    %c0_988 = arith.constant 0 : index
    %c0_989 = arith.constant 0 : index
    %1189 = vector.load %arg9[%c21_987, %c0_988, %c0_989] : memref<36x8x196xf32, #tpu.memory_space<vmem>>, vector<1x8x196xf32>
    %1190 = vector.shape_cast %1189 : vector<1x8x196xf32> to vector<8x196xf32>
    %1191 = vector.broadcast %1188 : f32 to vector<8x196xf32>
    %1192 = arith.mulf %1191, %1190 : vector<8x196xf32>
    %1193 = arith.addf %1187, %1192 : vector<8x196xf32>
    %c4_990 = arith.constant 4 : index
    %c6_991 = arith.constant 6 : index
    %1194 = memref.load %arg2[%c4_990, %c6_991] : memref<8x9xf32, #tpu.memory_space<smem>>
    %c25_992 = arith.constant 25 : index
    %c0_993 = arith.constant 0 : index
    %c0_994 = arith.constant 0 : index
    %1195 = vector.load %arg9[%c25_992, %c0_993, %c0_994] : memref<36x8x196xf32, #tpu.memory_space<vmem>>, vector<1x8x196xf32>
    %1196 = vector.shape_cast %1195 : vector<1x8x196xf32> to vector<8x196xf32>
    %1197 = vector.broadcast %1194 : f32 to vector<8x196xf32>
    %1198 = arith.mulf %1197, %1196 : vector<8x196xf32>
    %1199 = arith.addf %1193, %1198 : vector<8x196xf32>
    %c4_995 = arith.constant 4 : index
    %c7_996 = arith.constant 7 : index
    %1200 = memref.load %arg2[%c4_995, %c7_996] : memref<8x9xf32, #tpu.memory_space<smem>>
    %c29_997 = arith.constant 29 : index
    %c0_998 = arith.constant 0 : index
    %c0_999 = arith.constant 0 : index
    %1201 = vector.load %arg9[%c29_997, %c0_998, %c0_999] : memref<36x8x196xf32, #tpu.memory_space<vmem>>, vector<1x8x196xf32>
    %1202 = vector.shape_cast %1201 : vector<1x8x196xf32> to vector<8x196xf32>
    %1203 = vector.broadcast %1200 : f32 to vector<8x196xf32>
    %1204 = arith.mulf %1203, %1202 : vector<8x196xf32>
    %1205 = arith.addf %1199, %1204 : vector<8x196xf32>
    %c4_1000 = arith.constant 4 : index
    %c8_1001 = arith.constant 8 : index
    %1206 = memref.load %arg2[%c4_1000, %c8_1001] : memref<8x9xf32, #tpu.memory_space<smem>>
    %c33_1002 = arith.constant 33 : index
    %c0_1003 = arith.constant 0 : index
    %c0_1004 = arith.constant 0 : index
    %1207 = vector.load %arg9[%c33_1002, %c0_1003, %c0_1004] : memref<36x8x196xf32, #tpu.memory_space<vmem>>, vector<1x8x196xf32>
    %1208 = vector.shape_cast %1207 : vector<1x8x196xf32> to vector<8x196xf32>
    %1209 = vector.broadcast %1206 : f32 to vector<8x196xf32>
    %1210 = arith.mulf %1209, %1208 : vector<8x196xf32>
    %1211 = arith.addf %1205, %1210 : vector<8x196xf32>
    %1212 = arith.maximumf %1158, %1211 : vector<8x196xf32>
    %c4_1005 = arith.constant 4 : index
    %c0_1006 = arith.constant 0 : index
    %1213 = memref.load %arg2[%c4_1005, %c0_1006] : memref<8x9xf32, #tpu.memory_space<smem>>
    %c2_1007 = arith.constant 2 : index
    %c0_1008 = arith.constant 0 : index
    %c0_1009 = arith.constant 0 : index
    %1214 = vector.load %arg9[%c2_1007, %c0_1008, %c0_1009] : memref<36x8x196xf32, #tpu.memory_space<vmem>>, vector<1x8x196xf32>
    %1215 = vector.shape_cast %1214 : vector<1x8x196xf32> to vector<8x196xf32>
    %1216 = vector.broadcast %1213 : f32 to vector<8x196xf32>
    %1217 = arith.mulf %1216, %1215 : vector<8x196xf32>
    %c4_1010 = arith.constant 4 : index
    %c1_1011 = arith.constant 1 : index
    %1218 = memref.load %arg2[%c4_1010, %c1_1011] : memref<8x9xf32, #tpu.memory_space<smem>>
    %c6_1012 = arith.constant 6 : index
    %c0_1013 = arith.constant 0 : index
    %c0_1014 = arith.constant 0 : index
    %1219 = vector.load %arg9[%c6_1012, %c0_1013, %c0_1014] : memref<36x8x196xf32, #tpu.memory_space<vmem>>, vector<1x8x196xf32>
    %1220 = vector.shape_cast %1219 : vector<1x8x196xf32> to vector<8x196xf32>
    %1221 = vector.broadcast %1218 : f32 to vector<8x196xf32>
    %1222 = arith.mulf %1221, %1220 : vector<8x196xf32>
    %1223 = arith.addf %1217, %1222 : vector<8x196xf32>
    %c4_1015 = arith.constant 4 : index
    %c2_1016 = arith.constant 2 : index
    %1224 = memref.load %arg2[%c4_1015, %c2_1016] : memref<8x9xf32, #tpu.memory_space<smem>>
    %c10_1017 = arith.constant 10 : index
    %c0_1018 = arith.constant 0 : index
    %c0_1019 = arith.constant 0 : index
    %1225 = vector.load %arg9[%c10_1017, %c0_1018, %c0_1019] : memref<36x8x196xf32, #tpu.memory_space<vmem>>, vector<1x8x196xf32>
    %1226 = vector.shape_cast %1225 : vector<1x8x196xf32> to vector<8x196xf32>
    %1227 = vector.broadcast %1224 : f32 to vector<8x196xf32>
    %1228 = arith.mulf %1227, %1226 : vector<8x196xf32>
    %1229 = arith.addf %1223, %1228 : vector<8x196xf32>
    %c4_1020 = arith.constant 4 : index
    %c3_1021 = arith.constant 3 : index
    %1230 = memref.load %arg2[%c4_1020, %c3_1021] : memref<8x9xf32, #tpu.memory_space<smem>>
    %c14_1022 = arith.constant 14 : index
    %c0_1023 = arith.constant 0 : index
    %c0_1024 = arith.constant 0 : index
    %1231 = vector.load %arg9[%c14_1022, %c0_1023, %c0_1024] : memref<36x8x196xf32, #tpu.memory_space<vmem>>, vector<1x8x196xf32>
    %1232 = vector.shape_cast %1231 : vector<1x8x196xf32> to vector<8x196xf32>
    %1233 = vector.broadcast %1230 : f32 to vector<8x196xf32>
    %1234 = arith.mulf %1233, %1232 : vector<8x196xf32>
    %1235 = arith.addf %1229, %1234 : vector<8x196xf32>
    %c4_1025 = arith.constant 4 : index
    %c4_1026 = arith.constant 4 : index
    %1236 = memref.load %arg2[%c4_1025, %c4_1026] : memref<8x9xf32, #tpu.memory_space<smem>>
    %c18_1027 = arith.constant 18 : index
    %c0_1028 = arith.constant 0 : index
    %c0_1029 = arith.constant 0 : index
    %1237 = vector.load %arg9[%c18_1027, %c0_1028, %c0_1029] : memref<36x8x196xf32, #tpu.memory_space<vmem>>, vector<1x8x196xf32>
    %1238 = vector.shape_cast %1237 : vector<1x8x196xf32> to vector<8x196xf32>
    %1239 = vector.broadcast %1236 : f32 to vector<8x196xf32>
    %1240 = arith.mulf %1239, %1238 : vector<8x196xf32>
    %1241 = arith.addf %1235, %1240 : vector<8x196xf32>
    %c4_1030 = arith.constant 4 : index
    %c5_1031 = arith.constant 5 : index
    %1242 = memref.load %arg2[%c4_1030, %c5_1031] : memref<8x9xf32, #tpu.memory_space<smem>>
    %c22_1032 = arith.constant 22 : index
    %c0_1033 = arith.constant 0 : index
    %c0_1034 = arith.constant 0 : index
    %1243 = vector.load %arg9[%c22_1032, %c0_1033, %c0_1034] : memref<36x8x196xf32, #tpu.memory_space<vmem>>, vector<1x8x196xf32>
    %1244 = vector.shape_cast %1243 : vector<1x8x196xf32> to vector<8x196xf32>
    %1245 = vector.broadcast %1242 : f32 to vector<8x196xf32>
    %1246 = arith.mulf %1245, %1244 : vector<8x196xf32>
    %1247 = arith.addf %1241, %1246 : vector<8x196xf32>
    %c4_1035 = arith.constant 4 : index
    %c6_1036 = arith.constant 6 : index
    %1248 = memref.load %arg2[%c4_1035, %c6_1036] : memref<8x9xf32, #tpu.memory_space<smem>>
    %c26_1037 = arith.constant 26 : index
    %c0_1038 = arith.constant 0 : index
    %c0_1039 = arith.constant 0 : index
    %1249 = vector.load %arg9[%c26_1037, %c0_1038, %c0_1039] : memref<36x8x196xf32, #tpu.memory_space<vmem>>, vector<1x8x196xf32>
    %1250 = vector.shape_cast %1249 : vector<1x8x196xf32> to vector<8x196xf32>
    %1251 = vector.broadcast %1248 : f32 to vector<8x196xf32>
    %1252 = arith.mulf %1251, %1250 : vector<8x196xf32>
    %1253 = arith.addf %1247, %1252 : vector<8x196xf32>
    %c4_1040 = arith.constant 4 : index
    %c7_1041 = arith.constant 7 : index
    %1254 = memref.load %arg2[%c4_1040, %c7_1041] : memref<8x9xf32, #tpu.memory_space<smem>>
    %c30_1042 = arith.constant 30 : index
    %c0_1043 = arith.constant 0 : index
    %c0_1044 = arith.constant 0 : index
    %1255 = vector.load %arg9[%c30_1042, %c0_1043, %c0_1044] : memref<36x8x196xf32, #tpu.memory_space<vmem>>, vector<1x8x196xf32>
    %1256 = vector.shape_cast %1255 : vector<1x8x196xf32> to vector<8x196xf32>
    %1257 = vector.broadcast %1254 : f32 to vector<8x196xf32>
    %1258 = arith.mulf %1257, %1256 : vector<8x196xf32>
    %1259 = arith.addf %1253, %1258 : vector<8x196xf32>
    %c4_1045 = arith.constant 4 : index
    %c8_1046 = arith.constant 8 : index
    %1260 = memref.load %arg2[%c4_1045, %c8_1046] : memref<8x9xf32, #tpu.memory_space<smem>>
    %c34_1047 = arith.constant 34 : index
    %c0_1048 = arith.constant 0 : index
    %c0_1049 = arith.constant 0 : index
    %1261 = vector.load %arg9[%c34_1047, %c0_1048, %c0_1049] : memref<36x8x196xf32, #tpu.memory_space<vmem>>, vector<1x8x196xf32>
    %1262 = vector.shape_cast %1261 : vector<1x8x196xf32> to vector<8x196xf32>
    %1263 = vector.broadcast %1260 : f32 to vector<8x196xf32>
    %1264 = arith.mulf %1263, %1262 : vector<8x196xf32>
    %1265 = arith.addf %1259, %1264 : vector<8x196xf32>
    %1266 = arith.maximumf %1212, %1265 : vector<8x196xf32>
    %c4_1050 = arith.constant 4 : index
    %c0_1051 = arith.constant 0 : index
    %1267 = memref.load %arg2[%c4_1050, %c0_1051] : memref<8x9xf32, #tpu.memory_space<smem>>
    %c3_1052 = arith.constant 3 : index
    %c0_1053 = arith.constant 0 : index
    %c0_1054 = arith.constant 0 : index
    %1268 = vector.load %arg9[%c3_1052, %c0_1053, %c0_1054] : memref<36x8x196xf32, #tpu.memory_space<vmem>>, vector<1x8x196xf32>
    %1269 = vector.shape_cast %1268 : vector<1x8x196xf32> to vector<8x196xf32>
    %1270 = vector.broadcast %1267 : f32 to vector<8x196xf32>
    %1271 = arith.mulf %1270, %1269 : vector<8x196xf32>
    %c4_1055 = arith.constant 4 : index
    %c1_1056 = arith.constant 1 : index
    %1272 = memref.load %arg2[%c4_1055, %c1_1056] : memref<8x9xf32, #tpu.memory_space<smem>>
    %c7_1057 = arith.constant 7 : index
    %c0_1058 = arith.constant 0 : index
    %c0_1059 = arith.constant 0 : index
    %1273 = vector.load %arg9[%c7_1057, %c0_1058, %c0_1059] : memref<36x8x196xf32, #tpu.memory_space<vmem>>, vector<1x8x196xf32>
    %1274 = vector.shape_cast %1273 : vector<1x8x196xf32> to vector<8x196xf32>
    %1275 = vector.broadcast %1272 : f32 to vector<8x196xf32>
    %1276 = arith.mulf %1275, %1274 : vector<8x196xf32>
    %1277 = arith.addf %1271, %1276 : vector<8x196xf32>
    %c4_1060 = arith.constant 4 : index
    %c2_1061 = arith.constant 2 : index
    %1278 = memref.load %arg2[%c4_1060, %c2_1061] : memref<8x9xf32, #tpu.memory_space<smem>>
    %c11_1062 = arith.constant 11 : index
    %c0_1063 = arith.constant 0 : index
    %c0_1064 = arith.constant 0 : index
    %1279 = vector.load %arg9[%c11_1062, %c0_1063, %c0_1064] : memref<36x8x196xf32, #tpu.memory_space<vmem>>, vector<1x8x196xf32>
    %1280 = vector.shape_cast %1279 : vector<1x8x196xf32> to vector<8x196xf32>
    %1281 = vector.broadcast %1278 : f32 to vector<8x196xf32>
    %1282 = arith.mulf %1281, %1280 : vector<8x196xf32>
    %1283 = arith.addf %1277, %1282 : vector<8x196xf32>
    %c4_1065 = arith.constant 4 : index
    %c3_1066 = arith.constant 3 : index
    %1284 = memref.load %arg2[%c4_1065, %c3_1066] : memref<8x9xf32, #tpu.memory_space<smem>>
    %c15_1067 = arith.constant 15 : index
    %c0_1068 = arith.constant 0 : index
    %c0_1069 = arith.constant 0 : index
    %1285 = vector.load %arg9[%c15_1067, %c0_1068, %c0_1069] : memref<36x8x196xf32, #tpu.memory_space<vmem>>, vector<1x8x196xf32>
    %1286 = vector.shape_cast %1285 : vector<1x8x196xf32> to vector<8x196xf32>
    %1287 = vector.broadcast %1284 : f32 to vector<8x196xf32>
    %1288 = arith.mulf %1287, %1286 : vector<8x196xf32>
    %1289 = arith.addf %1283, %1288 : vector<8x196xf32>
    %c4_1070 = arith.constant 4 : index
    %c4_1071 = arith.constant 4 : index
    %1290 = memref.load %arg2[%c4_1070, %c4_1071] : memref<8x9xf32, #tpu.memory_space<smem>>
    %c19_1072 = arith.constant 19 : index
    %c0_1073 = arith.constant 0 : index
    %c0_1074 = arith.constant 0 : index
    %1291 = vector.load %arg9[%c19_1072, %c0_1073, %c0_1074] : memref<36x8x196xf32, #tpu.memory_space<vmem>>, vector<1x8x196xf32>
    %1292 = vector.shape_cast %1291 : vector<1x8x196xf32> to vector<8x196xf32>
    %1293 = vector.broadcast %1290 : f32 to vector<8x196xf32>
    %1294 = arith.mulf %1293, %1292 : vector<8x196xf32>
    %1295 = arith.addf %1289, %1294 : vector<8x196xf32>
    %c4_1075 = arith.constant 4 : index
    %c5_1076 = arith.constant 5 : index
    %1296 = memref.load %arg2[%c4_1075, %c5_1076] : memref<8x9xf32, #tpu.memory_space<smem>>
    %c23_1077 = arith.constant 23 : index
    %c0_1078 = arith.constant 0 : index
    %c0_1079 = arith.constant 0 : index
    %1297 = vector.load %arg9[%c23_1077, %c0_1078, %c0_1079] : memref<36x8x196xf32, #tpu.memory_space<vmem>>, vector<1x8x196xf32>
    %1298 = vector.shape_cast %1297 : vector<1x8x196xf32> to vector<8x196xf32>
    %1299 = vector.broadcast %1296 : f32 to vector<8x196xf32>
    %1300 = arith.mulf %1299, %1298 : vector<8x196xf32>
    %1301 = arith.addf %1295, %1300 : vector<8x196xf32>
    %c4_1080 = arith.constant 4 : index
    %c6_1081 = arith.constant 6 : index
    %1302 = memref.load %arg2[%c4_1080, %c6_1081] : memref<8x9xf32, #tpu.memory_space<smem>>
    %c27_1082 = arith.constant 27 : index
    %c0_1083 = arith.constant 0 : index
    %c0_1084 = arith.constant 0 : index
    %1303 = vector.load %arg9[%c27_1082, %c0_1083, %c0_1084] : memref<36x8x196xf32, #tpu.memory_space<vmem>>, vector<1x8x196xf32>
    %1304 = vector.shape_cast %1303 : vector<1x8x196xf32> to vector<8x196xf32>
    %1305 = vector.broadcast %1302 : f32 to vector<8x196xf32>
    %1306 = arith.mulf %1305, %1304 : vector<8x196xf32>
    %1307 = arith.addf %1301, %1306 : vector<8x196xf32>
    %c4_1085 = arith.constant 4 : index
    %c7_1086 = arith.constant 7 : index
    %1308 = memref.load %arg2[%c4_1085, %c7_1086] : memref<8x9xf32, #tpu.memory_space<smem>>
    %c31_1087 = arith.constant 31 : index
    %c0_1088 = arith.constant 0 : index
    %c0_1089 = arith.constant 0 : index
    %1309 = vector.load %arg9[%c31_1087, %c0_1088, %c0_1089] : memref<36x8x196xf32, #tpu.memory_space<vmem>>, vector<1x8x196xf32>
    %1310 = vector.shape_cast %1309 : vector<1x8x196xf32> to vector<8x196xf32>
    %1311 = vector.broadcast %1308 : f32 to vector<8x196xf32>
    %1312 = arith.mulf %1311, %1310 : vector<8x196xf32>
    %1313 = arith.addf %1307, %1312 : vector<8x196xf32>
    %c4_1090 = arith.constant 4 : index
    %c8_1091 = arith.constant 8 : index
    %1314 = memref.load %arg2[%c4_1090, %c8_1091] : memref<8x9xf32, #tpu.memory_space<smem>>
    %c35_1092 = arith.constant 35 : index
    %c0_1093 = arith.constant 0 : index
    %c0_1094 = arith.constant 0 : index
    %1315 = vector.load %arg9[%c35_1092, %c0_1093, %c0_1094] : memref<36x8x196xf32, #tpu.memory_space<vmem>>, vector<1x8x196xf32>
    %1316 = vector.shape_cast %1315 : vector<1x8x196xf32> to vector<8x196xf32>
    %1317 = vector.broadcast %1314 : f32 to vector<8x196xf32>
    %1318 = arith.mulf %1317, %1316 : vector<8x196xf32>
    %1319 = arith.addf %1313, %1318 : vector<8x196xf32>
    %1320 = arith.maximumf %1266, %1319 : vector<8x196xf32>
    %c4_1095 = arith.constant 4 : index
    %1321 = memref.load %arg3[%c4_1095] : memref<8xf32, #tpu.memory_space<smem>>
    %1322 = vector.broadcast %1321 : f32 to vector<8x196xf32>
    %1323 = arith.addf %1320, %1322 : vector<8x196xf32>
    %cst_1096 = arith.constant 0.000000e+00 : f32
    %1324 = vector.broadcast %cst_1096 : f32 to vector<8x196xf32>
    %1325 = arith.maximumf %1323, %1324 : vector<8x196xf32>
    %1326 = arith.truncf %1325 : vector<8x196xf32> to vector<8x196xbf16>
    %c0_1097 = arith.constant 0 : index
    %c1024 = arith.constant 1024 : index
    %1327 = vector.load %arg10[%c0_1097, %c1024] : memref<8x2048xbf16, #tpu.memory_space<vmem>>, vector<8x196xbf16>
    tpu.vector_store %arg10[%c0_1097, %c1024], %1326 {strides = array<i32>} : memref<8x2048xbf16, #tpu.memory_space<vmem>>, vector<8x196xbf16>,
    %c5_1098 = arith.constant 5 : index
    %c0_1099 = arith.constant 0 : index
    %1328 = memref.load %arg2[%c5_1098, %c0_1099] : memref<8x9xf32, #tpu.memory_space<smem>>
    %c0_1100 = arith.constant 0 : index
    %c0_1101 = arith.constant 0 : index
    %c0_1102 = arith.constant 0 : index
    %1329 = vector.load %arg9[%c0_1100, %c0_1101, %c0_1102] : memref<36x8x196xf32, #tpu.memory_space<vmem>>, vector<1x8x196xf32>
    %1330 = vector.shape_cast %1329 : vector<1x8x196xf32> to vector<8x196xf32>
    %1331 = vector.broadcast %1328 : f32 to vector<8x196xf32>
    %1332 = arith.mulf %1331, %1330 : vector<8x196xf32>
    %c5_1103 = arith.constant 5 : index
    %c1_1104 = arith.constant 1 : index
    %1333 = memref.load %arg2[%c5_1103, %c1_1104] : memref<8x9xf32, #tpu.memory_space<smem>>
    %c4_1105 = arith.constant 4 : index
    %c0_1106 = arith.constant 0 : index
    %c0_1107 = arith.constant 0 : index
    %1334 = vector.load %arg9[%c4_1105, %c0_1106, %c0_1107] : memref<36x8x196xf32, #tpu.memory_space<vmem>>, vector<1x8x196xf32>
    %1335 = vector.shape_cast %1334 : vector<1x8x196xf32> to vector<8x196xf32>
    %1336 = vector.broadcast %1333 : f32 to vector<8x196xf32>
    %1337 = arith.mulf %1336, %1335 : vector<8x196xf32>
    %1338 = arith.addf %1332, %1337 : vector<8x196xf32>
    %c5_1108 = arith.constant 5 : index
    %c2_1109 = arith.constant 2 : index
    %1339 = memref.load %arg2[%c5_1108, %c2_1109] : memref<8x9xf32, #tpu.memory_space<smem>>
    %c8_1110 = arith.constant 8 : index
    %c0_1111 = arith.constant 0 : index
    %c0_1112 = arith.constant 0 : index
    %1340 = vector.load %arg9[%c8_1110, %c0_1111, %c0_1112] : memref<36x8x196xf32, #tpu.memory_space<vmem>>, vector<1x8x196xf32>
    %1341 = vector.shape_cast %1340 : vector<1x8x196xf32> to vector<8x196xf32>
    %1342 = vector.broadcast %1339 : f32 to vector<8x196xf32>
    %1343 = arith.mulf %1342, %1341 : vector<8x196xf32>
    %1344 = arith.addf %1338, %1343 : vector<8x196xf32>
    %c5_1113 = arith.constant 5 : index
    %c3_1114 = arith.constant 3 : index
    %1345 = memref.load %arg2[%c5_1113, %c3_1114] : memref<8x9xf32, #tpu.memory_space<smem>>
    %c12_1115 = arith.constant 12 : index
    %c0_1116 = arith.constant 0 : index
    %c0_1117 = arith.constant 0 : index
    %1346 = vector.load %arg9[%c12_1115, %c0_1116, %c0_1117] : memref<36x8x196xf32, #tpu.memory_space<vmem>>, vector<1x8x196xf32>
    %1347 = vector.shape_cast %1346 : vector<1x8x196xf32> to vector<8x196xf32>
    %1348 = vector.broadcast %1345 : f32 to vector<8x196xf32>
    %1349 = arith.mulf %1348, %1347 : vector<8x196xf32>
    %1350 = arith.addf %1344, %1349 : vector<8x196xf32>
    %c5_1118 = arith.constant 5 : index
    %c4_1119 = arith.constant 4 : index
    %1351 = memref.load %arg2[%c5_1118, %c4_1119] : memref<8x9xf32, #tpu.memory_space<smem>>
    %c16_1120 = arith.constant 16 : index
    %c0_1121 = arith.constant 0 : index
    %c0_1122 = arith.constant 0 : index
    %1352 = vector.load %arg9[%c16_1120, %c0_1121, %c0_1122] : memref<36x8x196xf32, #tpu.memory_space<vmem>>, vector<1x8x196xf32>
    %1353 = vector.shape_cast %1352 : vector<1x8x196xf32> to vector<8x196xf32>
    %1354 = vector.broadcast %1351 : f32 to vector<8x196xf32>
    %1355 = arith.mulf %1354, %1353 : vector<8x196xf32>
    %1356 = arith.addf %1350, %1355 : vector<8x196xf32>
    %c5_1123 = arith.constant 5 : index
    %c5_1124 = arith.constant 5 : index
    %1357 = memref.load %arg2[%c5_1123, %c5_1124] : memref<8x9xf32, #tpu.memory_space<smem>>
    %c20_1125 = arith.constant 20 : index
    %c0_1126 = arith.constant 0 : index
    %c0_1127 = arith.constant 0 : index
    %1358 = vector.load %arg9[%c20_1125, %c0_1126, %c0_1127] : memref<36x8x196xf32, #tpu.memory_space<vmem>>, vector<1x8x196xf32>
    %1359 = vector.shape_cast %1358 : vector<1x8x196xf32> to vector<8x196xf32>
    %1360 = vector.broadcast %1357 : f32 to vector<8x196xf32>
    %1361 = arith.mulf %1360, %1359 : vector<8x196xf32>
    %1362 = arith.addf %1356, %1361 : vector<8x196xf32>
    %c5_1128 = arith.constant 5 : index
    %c6_1129 = arith.constant 6 : index
    %1363 = memref.load %arg2[%c5_1128, %c6_1129] : memref<8x9xf32, #tpu.memory_space<smem>>
    %c24_1130 = arith.constant 24 : index
    %c0_1131 = arith.constant 0 : index
    %c0_1132 = arith.constant 0 : index
    %1364 = vector.load %arg9[%c24_1130, %c0_1131, %c0_1132] : memref<36x8x196xf32, #tpu.memory_space<vmem>>, vector<1x8x196xf32>
    %1365 = vector.shape_cast %1364 : vector<1x8x196xf32> to vector<8x196xf32>
    %1366 = vector.broadcast %1363 : f32 to vector<8x196xf32>
    %1367 = arith.mulf %1366, %1365 : vector<8x196xf32>
    %1368 = arith.addf %1362, %1367 : vector<8x196xf32>
    %c5_1133 = arith.constant 5 : index
    %c7_1134 = arith.constant 7 : index
    %1369 = memref.load %arg2[%c5_1133, %c7_1134] : memref<8x9xf32, #tpu.memory_space<smem>>
    %c28_1135 = arith.constant 28 : index
    %c0_1136 = arith.constant 0 : index
    %c0_1137 = arith.constant 0 : index
    %1370 = vector.load %arg9[%c28_1135, %c0_1136, %c0_1137] : memref<36x8x196xf32, #tpu.memory_space<vmem>>, vector<1x8x196xf32>
    %1371 = vector.shape_cast %1370 : vector<1x8x196xf32> to vector<8x196xf32>
    %1372 = vector.broadcast %1369 : f32 to vector<8x196xf32>
    %1373 = arith.mulf %1372, %1371 : vector<8x196xf32>
    %1374 = arith.addf %1368, %1373 : vector<8x196xf32>
    %c5_1138 = arith.constant 5 : index
    %c8_1139 = arith.constant 8 : index
    %1375 = memref.load %arg2[%c5_1138, %c8_1139] : memref<8x9xf32, #tpu.memory_space<smem>>
    %c32_1140 = arith.constant 32 : index
    %c0_1141 = arith.constant 0 : index
    %c0_1142 = arith.constant 0 : index
    %1376 = vector.load %arg9[%c32_1140, %c0_1141, %c0_1142] : memref<36x8x196xf32, #tpu.memory_space<vmem>>, vector<1x8x196xf32>
    %1377 = vector.shape_cast %1376 : vector<1x8x196xf32> to vector<8x196xf32>
    %1378 = vector.broadcast %1375 : f32 to vector<8x196xf32>
    %1379 = arith.mulf %1378, %1377 : vector<8x196xf32>
    %1380 = arith.addf %1374, %1379 : vector<8x196xf32>
    %c5_1143 = arith.constant 5 : index
    %c0_1144 = arith.constant 0 : index
    %1381 = memref.load %arg2[%c5_1143, %c0_1144] : memref<8x9xf32, #tpu.memory_space<smem>>
    %c1_1145 = arith.constant 1 : index
    %c0_1146 = arith.constant 0 : index
    %c0_1147 = arith.constant 0 : index
    %1382 = vector.load %arg9[%c1_1145, %c0_1146, %c0_1147] : memref<36x8x196xf32, #tpu.memory_space<vmem>>, vector<1x8x196xf32>
    %1383 = vector.shape_cast %1382 : vector<1x8x196xf32> to vector<8x196xf32>
    %1384 = vector.broadcast %1381 : f32 to vector<8x196xf32>
    %1385 = arith.mulf %1384, %1383 : vector<8x196xf32>
    %c5_1148 = arith.constant 5 : index
    %c1_1149 = arith.constant 1 : index
    %1386 = memref.load %arg2[%c5_1148, %c1_1149] : memref<8x9xf32, #tpu.memory_space<smem>>
    %c5_1150 = arith.constant 5 : index
    %c0_1151 = arith.constant 0 : index
    %c0_1152 = arith.constant 0 : index
    %1387 = vector.load %arg9[%c5_1150, %c0_1151, %c0_1152] : memref<36x8x196xf32, #tpu.memory_space<vmem>>, vector<1x8x196xf32>
    %1388 = vector.shape_cast %1387 : vector<1x8x196xf32> to vector<8x196xf32>
    %1389 = vector.broadcast %1386 : f32 to vector<8x196xf32>
    %1390 = arith.mulf %1389, %1388 : vector<8x196xf32>
    %1391 = arith.addf %1385, %1390 : vector<8x196xf32>
    %c5_1153 = arith.constant 5 : index
    %c2_1154 = arith.constant 2 : index
    %1392 = memref.load %arg2[%c5_1153, %c2_1154] : memref<8x9xf32, #tpu.memory_space<smem>>
    %c9_1155 = arith.constant 9 : index
    %c0_1156 = arith.constant 0 : index
    %c0_1157 = arith.constant 0 : index
    %1393 = vector.load %arg9[%c9_1155, %c0_1156, %c0_1157] : memref<36x8x196xf32, #tpu.memory_space<vmem>>, vector<1x8x196xf32>
    %1394 = vector.shape_cast %1393 : vector<1x8x196xf32> to vector<8x196xf32>
    %1395 = vector.broadcast %1392 : f32 to vector<8x196xf32>
    %1396 = arith.mulf %1395, %1394 : vector<8x196xf32>
    %1397 = arith.addf %1391, %1396 : vector<8x196xf32>
    %c5_1158 = arith.constant 5 : index
    %c3_1159 = arith.constant 3 : index
    %1398 = memref.load %arg2[%c5_1158, %c3_1159] : memref<8x9xf32, #tpu.memory_space<smem>>
    %c13_1160 = arith.constant 13 : index
    %c0_1161 = arith.constant 0 : index
    %c0_1162 = arith.constant 0 : index
    %1399 = vector.load %arg9[%c13_1160, %c0_1161, %c0_1162] : memref<36x8x196xf32, #tpu.memory_space<vmem>>, vector<1x8x196xf32>
    %1400 = vector.shape_cast %1399 : vector<1x8x196xf32> to vector<8x196xf32>
    %1401 = vector.broadcast %1398 : f32 to vector<8x196xf32>
    %1402 = arith.mulf %1401, %1400 : vector<8x196xf32>
    %1403 = arith.addf %1397, %1402 : vector<8x196xf32>
    %c5_1163 = arith.constant 5 : index
    %c4_1164 = arith.constant 4 : index
    %1404 = memref.load %arg2[%c5_1163, %c4_1164] : memref<8x9xf32, #tpu.memory_space<smem>>
    %c17_1165 = arith.constant 17 : index
    %c0_1166 = arith.constant 0 : index
    %c0_1167 = arith.constant 0 : index
    %1405 = vector.load %arg9[%c17_1165, %c0_1166, %c0_1167] : memref<36x8x196xf32, #tpu.memory_space<vmem>>, vector<1x8x196xf32>
    %1406 = vector.shape_cast %1405 : vector<1x8x196xf32> to vector<8x196xf32>
    %1407 = vector.broadcast %1404 : f32 to vector<8x196xf32>
    %1408 = arith.mulf %1407, %1406 : vector<8x196xf32>
    %1409 = arith.addf %1403, %1408 : vector<8x196xf32>
    %c5_1168 = arith.constant 5 : index
    %c5_1169 = arith.constant 5 : index
    %1410 = memref.load %arg2[%c5_1168, %c5_1169] : memref<8x9xf32, #tpu.memory_space<smem>>
    %c21_1170 = arith.constant 21 : index
    %c0_1171 = arith.constant 0 : index
    %c0_1172 = arith.constant 0 : index
    %1411 = vector.load %arg9[%c21_1170, %c0_1171, %c0_1172] : memref<36x8x196xf32, #tpu.memory_space<vmem>>, vector<1x8x196xf32>
    %1412 = vector.shape_cast %1411 : vector<1x8x196xf32> to vector<8x196xf32>
    %1413 = vector.broadcast %1410 : f32 to vector<8x196xf32>
    %1414 = arith.mulf %1413, %1412 : vector<8x196xf32>
    %1415 = arith.addf %1409, %1414 : vector<8x196xf32>
    %c5_1173 = arith.constant 5 : index
    %c6_1174 = arith.constant 6 : index
    %1416 = memref.load %arg2[%c5_1173, %c6_1174] : memref<8x9xf32, #tpu.memory_space<smem>>
    %c25_1175 = arith.constant 25 : index
    %c0_1176 = arith.constant 0 : index
    %c0_1177 = arith.constant 0 : index
    %1417 = vector.load %arg9[%c25_1175, %c0_1176, %c0_1177] : memref<36x8x196xf32, #tpu.memory_space<vmem>>, vector<1x8x196xf32>
    %1418 = vector.shape_cast %1417 : vector<1x8x196xf32> to vector<8x196xf32>
    %1419 = vector.broadcast %1416 : f32 to vector<8x196xf32>
    %1420 = arith.mulf %1419, %1418 : vector<8x196xf32>
    %1421 = arith.addf %1415, %1420 : vector<8x196xf32>
    %c5_1178 = arith.constant 5 : index
    %c7_1179 = arith.constant 7 : index
    %1422 = memref.load %arg2[%c5_1178, %c7_1179] : memref<8x9xf32, #tpu.memory_space<smem>>
    %c29_1180 = arith.constant 29 : index
    %c0_1181 = arith.constant 0 : index
    %c0_1182 = arith.constant 0 : index
    %1423 = vector.load %arg9[%c29_1180, %c0_1181, %c0_1182] : memref<36x8x196xf32, #tpu.memory_space<vmem>>, vector<1x8x196xf32>
    %1424 = vector.shape_cast %1423 : vector<1x8x196xf32> to vector<8x196xf32>
    %1425 = vector.broadcast %1422 : f32 to vector<8x196xf32>
    %1426 = arith.mulf %1425, %1424 : vector<8x196xf32>
    %1427 = arith.addf %1421, %1426 : vector<8x196xf32>
    %c5_1183 = arith.constant 5 : index
    %c8_1184 = arith.constant 8 : index
    %1428 = memref.load %arg2[%c5_1183, %c8_1184] : memref<8x9xf32, #tpu.memory_space<smem>>
    %c33_1185 = arith.constant 33 : index
    %c0_1186 = arith.constant 0 : index
    %c0_1187 = arith.constant 0 : index
    %1429 = vector.load %arg9[%c33_1185, %c0_1186, %c0_1187] : memref<36x8x196xf32, #tpu.memory_space<vmem>>, vector<1x8x196xf32>
    %1430 = vector.shape_cast %1429 : vector<1x8x196xf32> to vector<8x196xf32>
    %1431 = vector.broadcast %1428 : f32 to vector<8x196xf32>
    %1432 = arith.mulf %1431, %1430 : vector<8x196xf32>
    %1433 = arith.addf %1427, %1432 : vector<8x196xf32>
    %1434 = arith.maximumf %1380, %1433 : vector<8x196xf32>
    %c5_1188 = arith.constant 5 : index
    %c0_1189 = arith.constant 0 : index
    %1435 = memref.load %arg2[%c5_1188, %c0_1189] : memref<8x9xf32, #tpu.memory_space<smem>>
    %c2_1190 = arith.constant 2 : index
    %c0_1191 = arith.constant 0 : index
    %c0_1192 = arith.constant 0 : index
    %1436 = vector.load %arg9[%c2_1190, %c0_1191, %c0_1192] : memref<36x8x196xf32, #tpu.memory_space<vmem>>, vector<1x8x196xf32>
    %1437 = vector.shape_cast %1436 : vector<1x8x196xf32> to vector<8x196xf32>
    %1438 = vector.broadcast %1435 : f32 to vector<8x196xf32>
    %1439 = arith.mulf %1438, %1437 : vector<8x196xf32>
    %c5_1193 = arith.constant 5 : index
    %c1_1194 = arith.constant 1 : index
    %1440 = memref.load %arg2[%c5_1193, %c1_1194] : memref<8x9xf32, #tpu.memory_space<smem>>
    %c6_1195 = arith.constant 6 : index
    %c0_1196 = arith.constant 0 : index
    %c0_1197 = arith.constant 0 : index
    %1441 = vector.load %arg9[%c6_1195, %c0_1196, %c0_1197] : memref<36x8x196xf32, #tpu.memory_space<vmem>>, vector<1x8x196xf32>
    %1442 = vector.shape_cast %1441 : vector<1x8x196xf32> to vector<8x196xf32>
    %1443 = vector.broadcast %1440 : f32 to vector<8x196xf32>
    %1444 = arith.mulf %1443, %1442 : vector<8x196xf32>
    %1445 = arith.addf %1439, %1444 : vector<8x196xf32>
    %c5_1198 = arith.constant 5 : index
    %c2_1199 = arith.constant 2 : index
    %1446 = memref.load %arg2[%c5_1198, %c2_1199] : memref<8x9xf32, #tpu.memory_space<smem>>
    %c10_1200 = arith.constant 10 : index
    %c0_1201 = arith.constant 0 : index
    %c0_1202 = arith.constant 0 : index
    %1447 = vector.load %arg9[%c10_1200, %c0_1201, %c0_1202] : memref<36x8x196xf32, #tpu.memory_space<vmem>>, vector<1x8x196xf32>
    %1448 = vector.shape_cast %1447 : vector<1x8x196xf32> to vector<8x196xf32>
    %1449 = vector.broadcast %1446 : f32 to vector<8x196xf32>
    %1450 = arith.mulf %1449, %1448 : vector<8x196xf32>
    %1451 = arith.addf %1445, %1450 : vector<8x196xf32>
    %c5_1203 = arith.constant 5 : index
    %c3_1204 = arith.constant 3 : index
    %1452 = memref.load %arg2[%c5_1203, %c3_1204] : memref<8x9xf32, #tpu.memory_space<smem>>
    %c14_1205 = arith.constant 14 : index
    %c0_1206 = arith.constant 0 : index
    %c0_1207 = arith.constant 0 : index
    %1453 = vector.load %arg9[%c14_1205, %c0_1206, %c0_1207] : memref<36x8x196xf32, #tpu.memory_space<vmem>>, vector<1x8x196xf32>
    %1454 = vector.shape_cast %1453 : vector<1x8x196xf32> to vector<8x196xf32>
    %1455 = vector.broadcast %1452 : f32 to vector<8x196xf32>
    %1456 = arith.mulf %1455, %1454 : vector<8x196xf32>
    %1457 = arith.addf %1451, %1456 : vector<8x196xf32>
    %c5_1208 = arith.constant 5 : index
    %c4_1209 = arith.constant 4 : index
    %1458 = memref.load %arg2[%c5_1208, %c4_1209] : memref<8x9xf32, #tpu.memory_space<smem>>
    %c18_1210 = arith.constant 18 : index
    %c0_1211 = arith.constant 0 : index
    %c0_1212 = arith.constant 0 : index
    %1459 = vector.load %arg9[%c18_1210, %c0_1211, %c0_1212] : memref<36x8x196xf32, #tpu.memory_space<vmem>>, vector<1x8x196xf32>
    %1460 = vector.shape_cast %1459 : vector<1x8x196xf32> to vector<8x196xf32>
    %1461 = vector.broadcast %1458 : f32 to vector<8x196xf32>
    %1462 = arith.mulf %1461, %1460 : vector<8x196xf32>
    %1463 = arith.addf %1457, %1462 : vector<8x196xf32>
    %c5_1213 = arith.constant 5 : index
    %c5_1214 = arith.constant 5 : index
    %1464 = memref.load %arg2[%c5_1213, %c5_1214] : memref<8x9xf32, #tpu.memory_space<smem>>
    %c22_1215 = arith.constant 22 : index
    %c0_1216 = arith.constant 0 : index
    %c0_1217 = arith.constant 0 : index
    %1465 = vector.load %arg9[%c22_1215, %c0_1216, %c0_1217] : memref<36x8x196xf32, #tpu.memory_space<vmem>>, vector<1x8x196xf32>
    %1466 = vector.shape_cast %1465 : vector<1x8x196xf32> to vector<8x196xf32>
    %1467 = vector.broadcast %1464 : f32 to vector<8x196xf32>
    %1468 = arith.mulf %1467, %1466 : vector<8x196xf32>
    %1469 = arith.addf %1463, %1468 : vector<8x196xf32>
    %c5_1218 = arith.constant 5 : index
    %c6_1219 = arith.constant 6 : index
    %1470 = memref.load %arg2[%c5_1218, %c6_1219] : memref<8x9xf32, #tpu.memory_space<smem>>
    %c26_1220 = arith.constant 26 : index
    %c0_1221 = arith.constant 0 : index
    %c0_1222 = arith.constant 0 : index
    %1471 = vector.load %arg9[%c26_1220, %c0_1221, %c0_1222] : memref<36x8x196xf32, #tpu.memory_space<vmem>>, vector<1x8x196xf32>
    %1472 = vector.shape_cast %1471 : vector<1x8x196xf32> to vector<8x196xf32>
    %1473 = vector.broadcast %1470 : f32 to vector<8x196xf32>
    %1474 = arith.mulf %1473, %1472 : vector<8x196xf32>
    %1475 = arith.addf %1469, %1474 : vector<8x196xf32>
    %c5_1223 = arith.constant 5 : index
    %c7_1224 = arith.constant 7 : index
    %1476 = memref.load %arg2[%c5_1223, %c7_1224] : memref<8x9xf32, #tpu.memory_space<smem>>
    %c30_1225 = arith.constant 30 : index
    %c0_1226 = arith.constant 0 : index
    %c0_1227 = arith.constant 0 : index
    %1477 = vector.load %arg9[%c30_1225, %c0_1226, %c0_1227] : memref<36x8x196xf32, #tpu.memory_space<vmem>>, vector<1x8x196xf32>
    %1478 = vector.shape_cast %1477 : vector<1x8x196xf32> to vector<8x196xf32>
    %1479 = vector.broadcast %1476 : f32 to vector<8x196xf32>
    %1480 = arith.mulf %1479, %1478 : vector<8x196xf32>
    %1481 = arith.addf %1475, %1480 : vector<8x196xf32>
    %c5_1228 = arith.constant 5 : index
    %c8_1229 = arith.constant 8 : index
    %1482 = memref.load %arg2[%c5_1228, %c8_1229] : memref<8x9xf32, #tpu.memory_space<smem>>
    %c34_1230 = arith.constant 34 : index
    %c0_1231 = arith.constant 0 : index
    %c0_1232 = arith.constant 0 : index
    %1483 = vector.load %arg9[%c34_1230, %c0_1231, %c0_1232] : memref<36x8x196xf32, #tpu.memory_space<vmem>>, vector<1x8x196xf32>
    %1484 = vector.shape_cast %1483 : vector<1x8x196xf32> to vector<8x196xf32>
    %1485 = vector.broadcast %1482 : f32 to vector<8x196xf32>
    %1486 = arith.mulf %1485, %1484 : vector<8x196xf32>
    %1487 = arith.addf %1481, %1486 : vector<8x196xf32>
    %1488 = arith.maximumf %1434, %1487 : vector<8x196xf32>
    %c5_1233 = arith.constant 5 : index
    %c0_1234 = arith.constant 0 : index
    %1489 = memref.load %arg2[%c5_1233, %c0_1234] : memref<8x9xf32, #tpu.memory_space<smem>>
    %c3_1235 = arith.constant 3 : index
    %c0_1236 = arith.constant 0 : index
    %c0_1237 = arith.constant 0 : index
    %1490 = vector.load %arg9[%c3_1235, %c0_1236, %c0_1237] : memref<36x8x196xf32, #tpu.memory_space<vmem>>, vector<1x8x196xf32>
    %1491 = vector.shape_cast %1490 : vector<1x8x196xf32> to vector<8x196xf32>
    %1492 = vector.broadcast %1489 : f32 to vector<8x196xf32>
    %1493 = arith.mulf %1492, %1491 : vector<8x196xf32>
    %c5_1238 = arith.constant 5 : index
    %c1_1239 = arith.constant 1 : index
    %1494 = memref.load %arg2[%c5_1238, %c1_1239] : memref<8x9xf32, #tpu.memory_space<smem>>
    %c7_1240 = arith.constant 7 : index
    %c0_1241 = arith.constant 0 : index
    %c0_1242 = arith.constant 0 : index
    %1495 = vector.load %arg9[%c7_1240, %c0_1241, %c0_1242] : memref<36x8x196xf32, #tpu.memory_space<vmem>>, vector<1x8x196xf32>
    %1496 = vector.shape_cast %1495 : vector<1x8x196xf32> to vector<8x196xf32>
    %1497 = vector.broadcast %1494 : f32 to vector<8x196xf32>
    %1498 = arith.mulf %1497, %1496 : vector<8x196xf32>
    %1499 = arith.addf %1493, %1498 : vector<8x196xf32>
    %c5_1243 = arith.constant 5 : index
    %c2_1244 = arith.constant 2 : index
    %1500 = memref.load %arg2[%c5_1243, %c2_1244] : memref<8x9xf32, #tpu.memory_space<smem>>
    %c11_1245 = arith.constant 11 : index
    %c0_1246 = arith.constant 0 : index
    %c0_1247 = arith.constant 0 : index
    %1501 = vector.load %arg9[%c11_1245, %c0_1246, %c0_1247] : memref<36x8x196xf32, #tpu.memory_space<vmem>>, vector<1x8x196xf32>
    %1502 = vector.shape_cast %1501 : vector<1x8x196xf32> to vector<8x196xf32>
    %1503 = vector.broadcast %1500 : f32 to vector<8x196xf32>
    %1504 = arith.mulf %1503, %1502 : vector<8x196xf32>
    %1505 = arith.addf %1499, %1504 : vector<8x196xf32>
    %c5_1248 = arith.constant 5 : index
    %c3_1249 = arith.constant 3 : index
    %1506 = memref.load %arg2[%c5_1248, %c3_1249] : memref<8x9xf32, #tpu.memory_space<smem>>
    %c15_1250 = arith.constant 15 : index
    %c0_1251 = arith.constant 0 : index
    %c0_1252 = arith.constant 0 : index
    %1507 = vector.load %arg9[%c15_1250, %c0_1251, %c0_1252] : memref<36x8x196xf32, #tpu.memory_space<vmem>>, vector<1x8x196xf32>
    %1508 = vector.shape_cast %1507 : vector<1x8x196xf32> to vector<8x196xf32>
    %1509 = vector.broadcast %1506 : f32 to vector<8x196xf32>
    %1510 = arith.mulf %1509, %1508 : vector<8x196xf32>
    %1511 = arith.addf %1505, %1510 : vector<8x196xf32>
    %c5_1253 = arith.constant 5 : index
    %c4_1254 = arith.constant 4 : index
    %1512 = memref.load %arg2[%c5_1253, %c4_1254] : memref<8x9xf32, #tpu.memory_space<smem>>
    %c19_1255 = arith.constant 19 : index
    %c0_1256 = arith.constant 0 : index
    %c0_1257 = arith.constant 0 : index
    %1513 = vector.load %arg9[%c19_1255, %c0_1256, %c0_1257] : memref<36x8x196xf32, #tpu.memory_space<vmem>>, vector<1x8x196xf32>
    %1514 = vector.shape_cast %1513 : vector<1x8x196xf32> to vector<8x196xf32>
    %1515 = vector.broadcast %1512 : f32 to vector<8x196xf32>
    %1516 = arith.mulf %1515, %1514 : vector<8x196xf32>
    %1517 = arith.addf %1511, %1516 : vector<8x196xf32>
    %c5_1258 = arith.constant 5 : index
    %c5_1259 = arith.constant 5 : index
    %1518 = memref.load %arg2[%c5_1258, %c5_1259] : memref<8x9xf32, #tpu.memory_space<smem>>
    %c23_1260 = arith.constant 23 : index
    %c0_1261 = arith.constant 0 : index
    %c0_1262 = arith.constant 0 : index
    %1519 = vector.load %arg9[%c23_1260, %c0_1261, %c0_1262] : memref<36x8x196xf32, #tpu.memory_space<vmem>>, vector<1x8x196xf32>
    %1520 = vector.shape_cast %1519 : vector<1x8x196xf32> to vector<8x196xf32>
    %1521 = vector.broadcast %1518 : f32 to vector<8x196xf32>
    %1522 = arith.mulf %1521, %1520 : vector<8x196xf32>
    %1523 = arith.addf %1517, %1522 : vector<8x196xf32>
    %c5_1263 = arith.constant 5 : index
    %c6_1264 = arith.constant 6 : index
    %1524 = memref.load %arg2[%c5_1263, %c6_1264] : memref<8x9xf32, #tpu.memory_space<smem>>
    %c27_1265 = arith.constant 27 : index
    %c0_1266 = arith.constant 0 : index
    %c0_1267 = arith.constant 0 : index
    %1525 = vector.load %arg9[%c27_1265, %c0_1266, %c0_1267] : memref<36x8x196xf32, #tpu.memory_space<vmem>>, vector<1x8x196xf32>
    %1526 = vector.shape_cast %1525 : vector<1x8x196xf32> to vector<8x196xf32>
    %1527 = vector.broadcast %1524 : f32 to vector<8x196xf32>
    %1528 = arith.mulf %1527, %1526 : vector<8x196xf32>
    %1529 = arith.addf %1523, %1528 : vector<8x196xf32>
    %c5_1268 = arith.constant 5 : index
    %c7_1269 = arith.constant 7 : index
    %1530 = memref.load %arg2[%c5_1268, %c7_1269] : memref<8x9xf32, #tpu.memory_space<smem>>
    %c31_1270 = arith.constant 31 : index
    %c0_1271 = arith.constant 0 : index
    %c0_1272 = arith.constant 0 : index
    %1531 = vector.load %arg9[%c31_1270, %c0_1271, %c0_1272] : memref<36x8x196xf32, #tpu.memory_space<vmem>>, vector<1x8x196xf32>
    %1532 = vector.shape_cast %1531 : vector<1x8x196xf32> to vector<8x196xf32>
    %1533 = vector.broadcast %1530 : f32 to vector<8x196xf32>
    %1534 = arith.mulf %1533, %1532 : vector<8x196xf32>
    %1535 = arith.addf %1529, %1534 : vector<8x196xf32>
    %c5_1273 = arith.constant 5 : index
    %c8_1274 = arith.constant 8 : index
    %1536 = memref.load %arg2[%c5_1273, %c8_1274] : memref<8x9xf32, #tpu.memory_space<smem>>
    %c35_1275 = arith.constant 35 : index
    %c0_1276 = arith.constant 0 : index
    %c0_1277 = arith.constant 0 : index
    %1537 = vector.load %arg9[%c35_1275, %c0_1276, %c0_1277] : memref<36x8x196xf32, #tpu.memory_space<vmem>>, vector<1x8x196xf32>
    %1538 = vector.shape_cast %1537 : vector<1x8x196xf32> to vector<8x196xf32>
    %1539 = vector.broadcast %1536 : f32 to vector<8x196xf32>
    %1540 = arith.mulf %1539, %1538 : vector<8x196xf32>
    %1541 = arith.addf %1535, %1540 : vector<8x196xf32>
    %1542 = arith.maximumf %1488, %1541 : vector<8x196xf32>
    %c5_1278 = arith.constant 5 : index
    %1543 = memref.load %arg3[%c5_1278] : memref<8xf32, #tpu.memory_space<smem>>
    %1544 = vector.broadcast %1543 : f32 to vector<8x196xf32>
    %1545 = arith.addf %1542, %1544 : vector<8x196xf32>
    %cst_1279 = arith.constant 0.000000e+00 : f32
    %1546 = vector.broadcast %cst_1279 : f32 to vector<8x196xf32>
    %1547 = arith.maximumf %1545, %1546 : vector<8x196xf32>
    %1548 = arith.truncf %1547 : vector<8x196xf32> to vector<8x196xbf16>
    %c0_1280 = arith.constant 0 : index
    %c1280 = arith.constant 1280 : index
    %1549 = vector.load %arg10[%c0_1280, %c1280] : memref<8x2048xbf16, #tpu.memory_space<vmem>>, vector<8x196xbf16>
    tpu.vector_store %arg10[%c0_1280, %c1280], %1548 {strides = array<i32>} : memref<8x2048xbf16, #tpu.memory_space<vmem>>, vector<8x196xbf16>,
    %c6_1281 = arith.constant 6 : index
    %c0_1282 = arith.constant 0 : index
    %1550 = memref.load %arg2[%c6_1281, %c0_1282] : memref<8x9xf32, #tpu.memory_space<smem>>
    %c0_1283 = arith.constant 0 : index
    %c0_1284 = arith.constant 0 : index
    %c0_1285 = arith.constant 0 : index
    %1551 = vector.load %arg9[%c0_1283, %c0_1284, %c0_1285] : memref<36x8x196xf32, #tpu.memory_space<vmem>>, vector<1x8x196xf32>
    %1552 = vector.shape_cast %1551 : vector<1x8x196xf32> to vector<8x196xf32>
    %1553 = vector.broadcast %1550 : f32 to vector<8x196xf32>
    %1554 = arith.mulf %1553, %1552 : vector<8x196xf32>
    %c6_1286 = arith.constant 6 : index
    %c1_1287 = arith.constant 1 : index
    %1555 = memref.load %arg2[%c6_1286, %c1_1287] : memref<8x9xf32, #tpu.memory_space<smem>>
    %c4_1288 = arith.constant 4 : index
    %c0_1289 = arith.constant 0 : index
    %c0_1290 = arith.constant 0 : index
    %1556 = vector.load %arg9[%c4_1288, %c0_1289, %c0_1290] : memref<36x8x196xf32, #tpu.memory_space<vmem>>, vector<1x8x196xf32>
    %1557 = vector.shape_cast %1556 : vector<1x8x196xf32> to vector<8x196xf32>
    %1558 = vector.broadcast %1555 : f32 to vector<8x196xf32>
    %1559 = arith.mulf %1558, %1557 : vector<8x196xf32>
    %1560 = arith.addf %1554, %1559 : vector<8x196xf32>
    %c6_1291 = arith.constant 6 : index
    %c2_1292 = arith.constant 2 : index
    %1561 = memref.load %arg2[%c6_1291, %c2_1292] : memref<8x9xf32, #tpu.memory_space<smem>>
    %c8_1293 = arith.constant 8 : index
    %c0_1294 = arith.constant 0 : index
    %c0_1295 = arith.constant 0 : index
    %1562 = vector.load %arg9[%c8_1293, %c0_1294, %c0_1295] : memref<36x8x196xf32, #tpu.memory_space<vmem>>, vector<1x8x196xf32>
    %1563 = vector.shape_cast %1562 : vector<1x8x196xf32> to vector<8x196xf32>
    %1564 = vector.broadcast %1561 : f32 to vector<8x196xf32>
    %1565 = arith.mulf %1564, %1563 : vector<8x196xf32>
    %1566 = arith.addf %1560, %1565 : vector<8x196xf32>
    %c6_1296 = arith.constant 6 : index
    %c3_1297 = arith.constant 3 : index
    %1567 = memref.load %arg2[%c6_1296, %c3_1297] : memref<8x9xf32, #tpu.memory_space<smem>>
    %c12_1298 = arith.constant 12 : index
    %c0_1299 = arith.constant 0 : index
    %c0_1300 = arith.constant 0 : index
    %1568 = vector.load %arg9[%c12_1298, %c0_1299, %c0_1300] : memref<36x8x196xf32, #tpu.memory_space<vmem>>, vector<1x8x196xf32>
    %1569 = vector.shape_cast %1568 : vector<1x8x196xf32> to vector<8x196xf32>
    %1570 = vector.broadcast %1567 : f32 to vector<8x196xf32>
    %1571 = arith.mulf %1570, %1569 : vector<8x196xf32>
    %1572 = arith.addf %1566, %1571 : vector<8x196xf32>
    %c6_1301 = arith.constant 6 : index
    %c4_1302 = arith.constant 4 : index
    %1573 = memref.load %arg2[%c6_1301, %c4_1302] : memref<8x9xf32, #tpu.memory_space<smem>>
    %c16_1303 = arith.constant 16 : index
    %c0_1304 = arith.constant 0 : index
    %c0_1305 = arith.constant 0 : index
    %1574 = vector.load %arg9[%c16_1303, %c0_1304, %c0_1305] : memref<36x8x196xf32, #tpu.memory_space<vmem>>, vector<1x8x196xf32>
    %1575 = vector.shape_cast %1574 : vector<1x8x196xf32> to vector<8x196xf32>
    %1576 = vector.broadcast %1573 : f32 to vector<8x196xf32>
    %1577 = arith.mulf %1576, %1575 : vector<8x196xf32>
    %1578 = arith.addf %1572, %1577 : vector<8x196xf32>
    %c6_1306 = arith.constant 6 : index
    %c5_1307 = arith.constant 5 : index
    %1579 = memref.load %arg2[%c6_1306, %c5_1307] : memref<8x9xf32, #tpu.memory_space<smem>>
    %c20_1308 = arith.constant 20 : index
    %c0_1309 = arith.constant 0 : index
    %c0_1310 = arith.constant 0 : index
    %1580 = vector.load %arg9[%c20_1308, %c0_1309, %c0_1310] : memref<36x8x196xf32, #tpu.memory_space<vmem>>, vector<1x8x196xf32>
    %1581 = vector.shape_cast %1580 : vector<1x8x196xf32> to vector<8x196xf32>
    %1582 = vector.broadcast %1579 : f32 to vector<8x196xf32>
    %1583 = arith.mulf %1582, %1581 : vector<8x196xf32>
    %1584 = arith.addf %1578, %1583 : vector<8x196xf32>
    %c6_1311 = arith.constant 6 : index
    %c6_1312 = arith.constant 6 : index
    %1585 = memref.load %arg2[%c6_1311, %c6_1312] : memref<8x9xf32, #tpu.memory_space<smem>>
    %c24_1313 = arith.constant 24 : index
    %c0_1314 = arith.constant 0 : index
    %c0_1315 = arith.constant 0 : index
    %1586 = vector.load %arg9[%c24_1313, %c0_1314, %c0_1315] : memref<36x8x196xf32, #tpu.memory_space<vmem>>, vector<1x8x196xf32>
    %1587 = vector.shape_cast %1586 : vector<1x8x196xf32> to vector<8x196xf32>
    %1588 = vector.broadcast %1585 : f32 to vector<8x196xf32>
    %1589 = arith.mulf %1588, %1587 : vector<8x196xf32>
    %1590 = arith.addf %1584, %1589 : vector<8x196xf32>
    %c6_1316 = arith.constant 6 : index
    %c7_1317 = arith.constant 7 : index
    %1591 = memref.load %arg2[%c6_1316, %c7_1317] : memref<8x9xf32, #tpu.memory_space<smem>>
    %c28_1318 = arith.constant 28 : index
    %c0_1319 = arith.constant 0 : index
    %c0_1320 = arith.constant 0 : index
    %1592 = vector.load %arg9[%c28_1318, %c0_1319, %c0_1320] : memref<36x8x196xf32, #tpu.memory_space<vmem>>, vector<1x8x196xf32>
    %1593 = vector.shape_cast %1592 : vector<1x8x196xf32> to vector<8x196xf32>
    %1594 = vector.broadcast %1591 : f32 to vector<8x196xf32>
    %1595 = arith.mulf %1594, %1593 : vector<8x196xf32>
    %1596 = arith.addf %1590, %1595 : vector<8x196xf32>
    %c6_1321 = arith.constant 6 : index
    %c8_1322 = arith.constant 8 : index
    %1597 = memref.load %arg2[%c6_1321, %c8_1322] : memref<8x9xf32, #tpu.memory_space<smem>>
    %c32_1323 = arith.constant 32 : index
    %c0_1324 = arith.constant 0 : index
    %c0_1325 = arith.constant 0 : index
    %1598 = vector.load %arg9[%c32_1323, %c0_1324, %c0_1325] : memref<36x8x196xf32, #tpu.memory_space<vmem>>, vector<1x8x196xf32>
    %1599 = vector.shape_cast %1598 : vector<1x8x196xf32> to vector<8x196xf32>
    %1600 = vector.broadcast %1597 : f32 to vector<8x196xf32>
    %1601 = arith.mulf %1600, %1599 : vector<8x196xf32>
    %1602 = arith.addf %1596, %1601 : vector<8x196xf32>
    %c6_1326 = arith.constant 6 : index
    %c0_1327 = arith.constant 0 : index
    %1603 = memref.load %arg2[%c6_1326, %c0_1327] : memref<8x9xf32, #tpu.memory_space<smem>>
    %c1_1328 = arith.constant 1 : index
    %c0_1329 = arith.constant 0 : index
    %c0_1330 = arith.constant 0 : index
    %1604 = vector.load %arg9[%c1_1328, %c0_1329, %c0_1330] : memref<36x8x196xf32, #tpu.memory_space<vmem>>, vector<1x8x196xf32>
    %1605 = vector.shape_cast %1604 : vector<1x8x196xf32> to vector<8x196xf32>
    %1606 = vector.broadcast %1603 : f32 to vector<8x196xf32>
    %1607 = arith.mulf %1606, %1605 : vector<8x196xf32>
    %c6_1331 = arith.constant 6 : index
    %c1_1332 = arith.constant 1 : index
    %1608 = memref.load %arg2[%c6_1331, %c1_1332] : memref<8x9xf32, #tpu.memory_space<smem>>
    %c5_1333 = arith.constant 5 : index
    %c0_1334 = arith.constant 0 : index
    %c0_1335 = arith.constant 0 : index
    %1609 = vector.load %arg9[%c5_1333, %c0_1334, %c0_1335] : memref<36x8x196xf32, #tpu.memory_space<vmem>>, vector<1x8x196xf32>
    %1610 = vector.shape_cast %1609 : vector<1x8x196xf32> to vector<8x196xf32>
    %1611 = vector.broadcast %1608 : f32 to vector<8x196xf32>
    %1612 = arith.mulf %1611, %1610 : vector<8x196xf32>
    %1613 = arith.addf %1607, %1612 : vector<8x196xf32>
    %c6_1336 = arith.constant 6 : index
    %c2_1337 = arith.constant 2 : index
    %1614 = memref.load %arg2[%c6_1336, %c2_1337] : memref<8x9xf32, #tpu.memory_space<smem>>
    %c9_1338 = arith.constant 9 : index
    %c0_1339 = arith.constant 0 : index
    %c0_1340 = arith.constant 0 : index
    %1615 = vector.load %arg9[%c9_1338, %c0_1339, %c0_1340] : memref<36x8x196xf32, #tpu.memory_space<vmem>>, vector<1x8x196xf32>
    %1616 = vector.shape_cast %1615 : vector<1x8x196xf32> to vector<8x196xf32>
    %1617 = vector.broadcast %1614 : f32 to vector<8x196xf32>
    %1618 = arith.mulf %1617, %1616 : vector<8x196xf32>
    %1619 = arith.addf %1613, %1618 : vector<8x196xf32>
    %c6_1341 = arith.constant 6 : index
    %c3_1342 = arith.constant 3 : index
    %1620 = memref.load %arg2[%c6_1341, %c3_1342] : memref<8x9xf32, #tpu.memory_space<smem>>
    %c13_1343 = arith.constant 13 : index
    %c0_1344 = arith.constant 0 : index
    %c0_1345 = arith.constant 0 : index
    %1621 = vector.load %arg9[%c13_1343, %c0_1344, %c0_1345] : memref<36x8x196xf32, #tpu.memory_space<vmem>>, vector<1x8x196xf32>
    %1622 = vector.shape_cast %1621 : vector<1x8x196xf32> to vector<8x196xf32>
    %1623 = vector.broadcast %1620 : f32 to vector<8x196xf32>
    %1624 = arith.mulf %1623, %1622 : vector<8x196xf32>
    %1625 = arith.addf %1619, %1624 : vector<8x196xf32>
    %c6_1346 = arith.constant 6 : index
    %c4_1347 = arith.constant 4 : index
    %1626 = memref.load %arg2[%c6_1346, %c4_1347] : memref<8x9xf32, #tpu.memory_space<smem>>
    %c17_1348 = arith.constant 17 : index
    %c0_1349 = arith.constant 0 : index
    %c0_1350 = arith.constant 0 : index
    %1627 = vector.load %arg9[%c17_1348, %c0_1349, %c0_1350] : memref<36x8x196xf32, #tpu.memory_space<vmem>>, vector<1x8x196xf32>
    %1628 = vector.shape_cast %1627 : vector<1x8x196xf32> to vector<8x196xf32>
    %1629 = vector.broadcast %1626 : f32 to vector<8x196xf32>
    %1630 = arith.mulf %1629, %1628 : vector<8x196xf32>
    %1631 = arith.addf %1625, %1630 : vector<8x196xf32>
    %c6_1351 = arith.constant 6 : index
    %c5_1352 = arith.constant 5 : index
    %1632 = memref.load %arg2[%c6_1351, %c5_1352] : memref<8x9xf32, #tpu.memory_space<smem>>
    %c21_1353 = arith.constant 21 : index
    %c0_1354 = arith.constant 0 : index
    %c0_1355 = arith.constant 0 : index
    %1633 = vector.load %arg9[%c21_1353, %c0_1354, %c0_1355] : memref<36x8x196xf32, #tpu.memory_space<vmem>>, vector<1x8x196xf32>
    %1634 = vector.shape_cast %1633 : vector<1x8x196xf32> to vector<8x196xf32>
    %1635 = vector.broadcast %1632 : f32 to vector<8x196xf32>
    %1636 = arith.mulf %1635, %1634 : vector<8x196xf32>
    %1637 = arith.addf %1631, %1636 : vector<8x196xf32>
    %c6_1356 = arith.constant 6 : index
    %c6_1357 = arith.constant 6 : index
    %1638 = memref.load %arg2[%c6_1356, %c6_1357] : memref<8x9xf32, #tpu.memory_space<smem>>
    %c25_1358 = arith.constant 25 : index
    %c0_1359 = arith.constant 0 : index
    %c0_1360 = arith.constant 0 : index
    %1639 = vector.load %arg9[%c25_1358, %c0_1359, %c0_1360] : memref<36x8x196xf32, #tpu.memory_space<vmem>>, vector<1x8x196xf32>
    %1640 = vector.shape_cast %1639 : vector<1x8x196xf32> to vector<8x196xf32>
    %1641 = vector.broadcast %1638 : f32 to vector<8x196xf32>
    %1642 = arith.mulf %1641, %1640 : vector<8x196xf32>
    %1643 = arith.addf %1637, %1642 : vector<8x196xf32>
    %c6_1361 = arith.constant 6 : index
    %c7_1362 = arith.constant 7 : index
    %1644 = memref.load %arg2[%c6_1361, %c7_1362] : memref<8x9xf32, #tpu.memory_space<smem>>
    %c29_1363 = arith.constant 29 : index
    %c0_1364 = arith.constant 0 : index
    %c0_1365 = arith.constant 0 : index
    %1645 = vector.load %arg9[%c29_1363, %c0_1364, %c0_1365] : memref<36x8x196xf32, #tpu.memory_space<vmem>>, vector<1x8x196xf32>
    %1646 = vector.shape_cast %1645 : vector<1x8x196xf32> to vector<8x196xf32>
    %1647 = vector.broadcast %1644 : f32 to vector<8x196xf32>
    %1648 = arith.mulf %1647, %1646 : vector<8x196xf32>
    %1649 = arith.addf %1643, %1648 : vector<8x196xf32>
    %c6_1366 = arith.constant 6 : index
    %c8_1367 = arith.constant 8 : index
    %1650 = memref.load %arg2[%c6_1366, %c8_1367] : memref<8x9xf32, #tpu.memory_space<smem>>
    %c33_1368 = arith.constant 33 : index
    %c0_1369 = arith.constant 0 : index
    %c0_1370 = arith.constant 0 : index
    %1651 = vector.load %arg9[%c33_1368, %c0_1369, %c0_1370] : memref<36x8x196xf32, #tpu.memory_space<vmem>>, vector<1x8x196xf32>
    %1652 = vector.shape_cast %1651 : vector<1x8x196xf32> to vector<8x196xf32>
    %1653 = vector.broadcast %1650 : f32 to vector<8x196xf32>
    %1654 = arith.mulf %1653, %1652 : vector<8x196xf32>
    %1655 = arith.addf %1649, %1654 : vector<8x196xf32>
    %1656 = arith.maximumf %1602, %1655 : vector<8x196xf32>
    %c6_1371 = arith.constant 6 : index
    %c0_1372 = arith.constant 0 : index
    %1657 = memref.load %arg2[%c6_1371, %c0_1372] : memref<8x9xf32, #tpu.memory_space<smem>>
    %c2_1373 = arith.constant 2 : index
    %c0_1374 = arith.constant 0 : index
    %c0_1375 = arith.constant 0 : index
    %1658 = vector.load %arg9[%c2_1373, %c0_1374, %c0_1375] : memref<36x8x196xf32, #tpu.memory_space<vmem>>, vector<1x8x196xf32>
    %1659 = vector.shape_cast %1658 : vector<1x8x196xf32> to vector<8x196xf32>
    %1660 = vector.broadcast %1657 : f32 to vector<8x196xf32>
    %1661 = arith.mulf %1660, %1659 : vector<8x196xf32>
    %c6_1376 = arith.constant 6 : index
    %c1_1377 = arith.constant 1 : index
    %1662 = memref.load %arg2[%c6_1376, %c1_1377] : memref<8x9xf32, #tpu.memory_space<smem>>
    %c6_1378 = arith.constant 6 : index
    %c0_1379 = arith.constant 0 : index
    %c0_1380 = arith.constant 0 : index
    %1663 = vector.load %arg9[%c6_1378, %c0_1379, %c0_1380] : memref<36x8x196xf32, #tpu.memory_space<vmem>>, vector<1x8x196xf32>
    %1664 = vector.shape_cast %1663 : vector<1x8x196xf32> to vector<8x196xf32>
    %1665 = vector.broadcast %1662 : f32 to vector<8x196xf32>
    %1666 = arith.mulf %1665, %1664 : vector<8x196xf32>
    %1667 = arith.addf %1661, %1666 : vector<8x196xf32>
    %c6_1381 = arith.constant 6 : index
    %c2_1382 = arith.constant 2 : index
    %1668 = memref.load %arg2[%c6_1381, %c2_1382] : memref<8x9xf32, #tpu.memory_space<smem>>
    %c10_1383 = arith.constant 10 : index
    %c0_1384 = arith.constant 0 : index
    %c0_1385 = arith.constant 0 : index
    %1669 = vector.load %arg9[%c10_1383, %c0_1384, %c0_1385] : memref<36x8x196xf32, #tpu.memory_space<vmem>>, vector<1x8x196xf32>
    %1670 = vector.shape_cast %1669 : vector<1x8x196xf32> to vector<8x196xf32>
    %1671 = vector.broadcast %1668 : f32 to vector<8x196xf32>
    %1672 = arith.mulf %1671, %1670 : vector<8x196xf32>
    %1673 = arith.addf %1667, %1672 : vector<8x196xf32>
    %c6_1386 = arith.constant 6 : index
    %c3_1387 = arith.constant 3 : index
    %1674 = memref.load %arg2[%c6_1386, %c3_1387] : memref<8x9xf32, #tpu.memory_space<smem>>
    %c14_1388 = arith.constant 14 : index
    %c0_1389 = arith.constant 0 : index
    %c0_1390 = arith.constant 0 : index
    %1675 = vector.load %arg9[%c14_1388, %c0_1389, %c0_1390] : memref<36x8x196xf32, #tpu.memory_space<vmem>>, vector<1x8x196xf32>
    %1676 = vector.shape_cast %1675 : vector<1x8x196xf32> to vector<8x196xf32>
    %1677 = vector.broadcast %1674 : f32 to vector<8x196xf32>
    %1678 = arith.mulf %1677, %1676 : vector<8x196xf32>
    %1679 = arith.addf %1673, %1678 : vector<8x196xf32>
    %c6_1391 = arith.constant 6 : index
    %c4_1392 = arith.constant 4 : index
    %1680 = memref.load %arg2[%c6_1391, %c4_1392] : memref<8x9xf32, #tpu.memory_space<smem>>
    %c18_1393 = arith.constant 18 : index
    %c0_1394 = arith.constant 0 : index
    %c0_1395 = arith.constant 0 : index
    %1681 = vector.load %arg9[%c18_1393, %c0_1394, %c0_1395] : memref<36x8x196xf32, #tpu.memory_space<vmem>>, vector<1x8x196xf32>
    %1682 = vector.shape_cast %1681 : vector<1x8x196xf32> to vector<8x196xf32>
    %1683 = vector.broadcast %1680 : f32 to vector<8x196xf32>
    %1684 = arith.mulf %1683, %1682 : vector<8x196xf32>
    %1685 = arith.addf %1679, %1684 : vector<8x196xf32>
    %c6_1396 = arith.constant 6 : index
    %c5_1397 = arith.constant 5 : index
    %1686 = memref.load %arg2[%c6_1396, %c5_1397] : memref<8x9xf32, #tpu.memory_space<smem>>
    %c22_1398 = arith.constant 22 : index
    %c0_1399 = arith.constant 0 : index
    %c0_1400 = arith.constant 0 : index
    %1687 = vector.load %arg9[%c22_1398, %c0_1399, %c0_1400] : memref<36x8x196xf32, #tpu.memory_space<vmem>>, vector<1x8x196xf32>
    %1688 = vector.shape_cast %1687 : vector<1x8x196xf32> to vector<8x196xf32>
    %1689 = vector.broadcast %1686 : f32 to vector<8x196xf32>
    %1690 = arith.mulf %1689, %1688 : vector<8x196xf32>
    %1691 = arith.addf %1685, %1690 : vector<8x196xf32>
    %c6_1401 = arith.constant 6 : index
    %c6_1402 = arith.constant 6 : index
    %1692 = memref.load %arg2[%c6_1401, %c6_1402] : memref<8x9xf32, #tpu.memory_space<smem>>
    %c26_1403 = arith.constant 26 : index
    %c0_1404 = arith.constant 0 : index
    %c0_1405 = arith.constant 0 : index
    %1693 = vector.load %arg9[%c26_1403, %c0_1404, %c0_1405] : memref<36x8x196xf32, #tpu.memory_space<vmem>>, vector<1x8x196xf32>
    %1694 = vector.shape_cast %1693 : vector<1x8x196xf32> to vector<8x196xf32>
    %1695 = vector.broadcast %1692 : f32 to vector<8x196xf32>
    %1696 = arith.mulf %1695, %1694 : vector<8x196xf32>
    %1697 = arith.addf %1691, %1696 : vector<8x196xf32>
    %c6_1406 = arith.constant 6 : index
    %c7_1407 = arith.constant 7 : index
    %1698 = memref.load %arg2[%c6_1406, %c7_1407] : memref<8x9xf32, #tpu.memory_space<smem>>
    %c30_1408 = arith.constant 30 : index
    %c0_1409 = arith.constant 0 : index
    %c0_1410 = arith.constant 0 : index
    %1699 = vector.load %arg9[%c30_1408, %c0_1409, %c0_1410] : memref<36x8x196xf32, #tpu.memory_space<vmem>>, vector<1x8x196xf32>
    %1700 = vector.shape_cast %1699 : vector<1x8x196xf32> to vector<8x196xf32>
    %1701 = vector.broadcast %1698 : f32 to vector<8x196xf32>
    %1702 = arith.mulf %1701, %1700 : vector<8x196xf32>
    %1703 = arith.addf %1697, %1702 : vector<8x196xf32>
    %c6_1411 = arith.constant 6 : index
    %c8_1412 = arith.constant 8 : index
    %1704 = memref.load %arg2[%c6_1411, %c8_1412] : memref<8x9xf32, #tpu.memory_space<smem>>
    %c34_1413 = arith.constant 34 : index
    %c0_1414 = arith.constant 0 : index
    %c0_1415 = arith.constant 0 : index
    %1705 = vector.load %arg9[%c34_1413, %c0_1414, %c0_1415] : memref<36x8x196xf32, #tpu.memory_space<vmem>>, vector<1x8x196xf32>
    %1706 = vector.shape_cast %1705 : vector<1x8x196xf32> to vector<8x196xf32>
    %1707 = vector.broadcast %1704 : f32 to vector<8x196xf32>
    %1708 = arith.mulf %1707, %1706 : vector<8x196xf32>
    %1709 = arith.addf %1703, %1708 : vector<8x196xf32>
    %1710 = arith.maximumf %1656, %1709 : vector<8x196xf32>
    %c6_1416 = arith.constant 6 : index
    %c0_1417 = arith.constant 0 : index
    %1711 = memref.load %arg2[%c6_1416, %c0_1417] : memref<8x9xf32, #tpu.memory_space<smem>>
    %c3_1418 = arith.constant 3 : index
    %c0_1419 = arith.constant 0 : index
    %c0_1420 = arith.constant 0 : index
    %1712 = vector.load %arg9[%c3_1418, %c0_1419, %c0_1420] : memref<36x8x196xf32, #tpu.memory_space<vmem>>, vector<1x8x196xf32>
    %1713 = vector.shape_cast %1712 : vector<1x8x196xf32> to vector<8x196xf32>
    %1714 = vector.broadcast %1711 : f32 to vector<8x196xf32>
    %1715 = arith.mulf %1714, %1713 : vector<8x196xf32>
    %c6_1421 = arith.constant 6 : index
    %c1_1422 = arith.constant 1 : index
    %1716 = memref.load %arg2[%c6_1421, %c1_1422] : memref<8x9xf32, #tpu.memory_space<smem>>
    %c7_1423 = arith.constant 7 : index
    %c0_1424 = arith.constant 0 : index
    %c0_1425 = arith.constant 0 : index
    %1717 = vector.load %arg9[%c7_1423, %c0_1424, %c0_1425] : memref<36x8x196xf32, #tpu.memory_space<vmem>>, vector<1x8x196xf32>
    %1718 = vector.shape_cast %1717 : vector<1x8x196xf32> to vector<8x196xf32>
    %1719 = vector.broadcast %1716 : f32 to vector<8x196xf32>
    %1720 = arith.mulf %1719, %1718 : vector<8x196xf32>
    %1721 = arith.addf %1715, %1720 : vector<8x196xf32>
    %c6_1426 = arith.constant 6 : index
    %c2_1427 = arith.constant 2 : index
    %1722 = memref.load %arg2[%c6_1426, %c2_1427] : memref<8x9xf32, #tpu.memory_space<smem>>
    %c11_1428 = arith.constant 11 : index
    %c0_1429 = arith.constant 0 : index
    %c0_1430 = arith.constant 0 : index
    %1723 = vector.load %arg9[%c11_1428, %c0_1429, %c0_1430] : memref<36x8x196xf32, #tpu.memory_space<vmem>>, vector<1x8x196xf32>
    %1724 = vector.shape_cast %1723 : vector<1x8x196xf32> to vector<8x196xf32>
    %1725 = vector.broadcast %1722 : f32 to vector<8x196xf32>
    %1726 = arith.mulf %1725, %1724 : vector<8x196xf32>
    %1727 = arith.addf %1721, %1726 : vector<8x196xf32>
    %c6_1431 = arith.constant 6 : index
    %c3_1432 = arith.constant 3 : index
    %1728 = memref.load %arg2[%c6_1431, %c3_1432] : memref<8x9xf32, #tpu.memory_space<smem>>
    %c15_1433 = arith.constant 15 : index
    %c0_1434 = arith.constant 0 : index
    %c0_1435 = arith.constant 0 : index
    %1729 = vector.load %arg9[%c15_1433, %c0_1434, %c0_1435] : memref<36x8x196xf32, #tpu.memory_space<vmem>>, vector<1x8x196xf32>
    %1730 = vector.shape_cast %1729 : vector<1x8x196xf32> to vector<8x196xf32>
    %1731 = vector.broadcast %1728 : f32 to vector<8x196xf32>
    %1732 = arith.mulf %1731, %1730 : vector<8x196xf32>
    %1733 = arith.addf %1727, %1732 : vector<8x196xf32>
    %c6_1436 = arith.constant 6 : index
    %c4_1437 = arith.constant 4 : index
    %1734 = memref.load %arg2[%c6_1436, %c4_1437] : memref<8x9xf32, #tpu.memory_space<smem>>
    %c19_1438 = arith.constant 19 : index
    %c0_1439 = arith.constant 0 : index
    %c0_1440 = arith.constant 0 : index
    %1735 = vector.load %arg9[%c19_1438, %c0_1439, %c0_1440] : memref<36x8x196xf32, #tpu.memory_space<vmem>>, vector<1x8x196xf32>
    %1736 = vector.shape_cast %1735 : vector<1x8x196xf32> to vector<8x196xf32>
    %1737 = vector.broadcast %1734 : f32 to vector<8x196xf32>
    %1738 = arith.mulf %1737, %1736 : vector<8x196xf32>
    %1739 = arith.addf %1733, %1738 : vector<8x196xf32>
    %c6_1441 = arith.constant 6 : index
    %c5_1442 = arith.constant 5 : index
    %1740 = memref.load %arg2[%c6_1441, %c5_1442] : memref<8x9xf32, #tpu.memory_space<smem>>
    %c23_1443 = arith.constant 23 : index
    %c0_1444 = arith.constant 0 : index
    %c0_1445 = arith.constant 0 : index
    %1741 = vector.load %arg9[%c23_1443, %c0_1444, %c0_1445] : memref<36x8x196xf32, #tpu.memory_space<vmem>>, vector<1x8x196xf32>
    %1742 = vector.shape_cast %1741 : vector<1x8x196xf32> to vector<8x196xf32>
    %1743 = vector.broadcast %1740 : f32 to vector<8x196xf32>
    %1744 = arith.mulf %1743, %1742 : vector<8x196xf32>
    %1745 = arith.addf %1739, %1744 : vector<8x196xf32>
    %c6_1446 = arith.constant 6 : index
    %c6_1447 = arith.constant 6 : index
    %1746 = memref.load %arg2[%c6_1446, %c6_1447] : memref<8x9xf32, #tpu.memory_space<smem>>
    %c27_1448 = arith.constant 27 : index
    %c0_1449 = arith.constant 0 : index
    %c0_1450 = arith.constant 0 : index
    %1747 = vector.load %arg9[%c27_1448, %c0_1449, %c0_1450] : memref<36x8x196xf32, #tpu.memory_space<vmem>>, vector<1x8x196xf32>
    %1748 = vector.shape_cast %1747 : vector<1x8x196xf32> to vector<8x196xf32>
    %1749 = vector.broadcast %1746 : f32 to vector<8x196xf32>
    %1750 = arith.mulf %1749, %1748 : vector<8x196xf32>
    %1751 = arith.addf %1745, %1750 : vector<8x196xf32>
    %c6_1451 = arith.constant 6 : index
    %c7_1452 = arith.constant 7 : index
    %1752 = memref.load %arg2[%c6_1451, %c7_1452] : memref<8x9xf32, #tpu.memory_space<smem>>
    %c31_1453 = arith.constant 31 : index
    %c0_1454 = arith.constant 0 : index
    %c0_1455 = arith.constant 0 : index
    %1753 = vector.load %arg9[%c31_1453, %c0_1454, %c0_1455] : memref<36x8x196xf32, #tpu.memory_space<vmem>>, vector<1x8x196xf32>
    %1754 = vector.shape_cast %1753 : vector<1x8x196xf32> to vector<8x196xf32>
    %1755 = vector.broadcast %1752 : f32 to vector<8x196xf32>
    %1756 = arith.mulf %1755, %1754 : vector<8x196xf32>
    %1757 = arith.addf %1751, %1756 : vector<8x196xf32>
    %c6_1456 = arith.constant 6 : index
    %c8_1457 = arith.constant 8 : index
    %1758 = memref.load %arg2[%c6_1456, %c8_1457] : memref<8x9xf32, #tpu.memory_space<smem>>
    %c35_1458 = arith.constant 35 : index
    %c0_1459 = arith.constant 0 : index
    %c0_1460 = arith.constant 0 : index
    %1759 = vector.load %arg9[%c35_1458, %c0_1459, %c0_1460] : memref<36x8x196xf32, #tpu.memory_space<vmem>>, vector<1x8x196xf32>
    %1760 = vector.shape_cast %1759 : vector<1x8x196xf32> to vector<8x196xf32>
    %1761 = vector.broadcast %1758 : f32 to vector<8x196xf32>
    %1762 = arith.mulf %1761, %1760 : vector<8x196xf32>
    %1763 = arith.addf %1757, %1762 : vector<8x196xf32>
    %1764 = arith.maximumf %1710, %1763 : vector<8x196xf32>
    %c6_1461 = arith.constant 6 : index
    %1765 = memref.load %arg3[%c6_1461] : memref<8xf32, #tpu.memory_space<smem>>
    %1766 = vector.broadcast %1765 : f32 to vector<8x196xf32>
    %1767 = arith.addf %1764, %1766 : vector<8x196xf32>
    %cst_1462 = arith.constant 0.000000e+00 : f32
    %1768 = vector.broadcast %cst_1462 : f32 to vector<8x196xf32>
    %1769 = arith.maximumf %1767, %1768 : vector<8x196xf32>
    %1770 = arith.truncf %1769 : vector<8x196xf32> to vector<8x196xbf16>
    %c0_1463 = arith.constant 0 : index
    %c1536 = arith.constant 1536 : index
    %1771 = vector.load %arg10[%c0_1463, %c1536] : memref<8x2048xbf16, #tpu.memory_space<vmem>>, vector<8x196xbf16>
    tpu.vector_store %arg10[%c0_1463, %c1536], %1770 {strides = array<i32>} : memref<8x2048xbf16, #tpu.memory_space<vmem>>, vector<8x196xbf16>,
    %c7_1464 = arith.constant 7 : index
    %c0_1465 = arith.constant 0 : index
    %1772 = memref.load %arg2[%c7_1464, %c0_1465] : memref<8x9xf32, #tpu.memory_space<smem>>
    %c0_1466 = arith.constant 0 : index
    %c0_1467 = arith.constant 0 : index
    %c0_1468 = arith.constant 0 : index
    %1773 = vector.load %arg9[%c0_1466, %c0_1467, %c0_1468] : memref<36x8x196xf32, #tpu.memory_space<vmem>>, vector<1x8x196xf32>
    %1774 = vector.shape_cast %1773 : vector<1x8x196xf32> to vector<8x196xf32>
    %1775 = vector.broadcast %1772 : f32 to vector<8x196xf32>
    %1776 = arith.mulf %1775, %1774 : vector<8x196xf32>
    %c7_1469 = arith.constant 7 : index
    %c1_1470 = arith.constant 1 : index
    %1777 = memref.load %arg2[%c7_1469, %c1_1470] : memref<8x9xf32, #tpu.memory_space<smem>>
    %c4_1471 = arith.constant 4 : index
    %c0_1472 = arith.constant 0 : index
    %c0_1473 = arith.constant 0 : index
    %1778 = vector.load %arg9[%c4_1471, %c0_1472, %c0_1473] : memref<36x8x196xf32, #tpu.memory_space<vmem>>, vector<1x8x196xf32>
    %1779 = vector.shape_cast %1778 : vector<1x8x196xf32> to vector<8x196xf32>
    %1780 = vector.broadcast %1777 : f32 to vector<8x196xf32>
    %1781 = arith.mulf %1780, %1779 : vector<8x196xf32>
    %1782 = arith.addf %1776, %1781 : vector<8x196xf32>
    %c7_1474 = arith.constant 7 : index
    %c2_1475 = arith.constant 2 : index
    %1783 = memref.load %arg2[%c7_1474, %c2_1475] : memref<8x9xf32, #tpu.memory_space<smem>>
    %c8_1476 = arith.constant 8 : index
    %c0_1477 = arith.constant 0 : index
    %c0_1478 = arith.constant 0 : index
    %1784 = vector.load %arg9[%c8_1476, %c0_1477, %c0_1478] : memref<36x8x196xf32, #tpu.memory_space<vmem>>, vector<1x8x196xf32>
    %1785 = vector.shape_cast %1784 : vector<1x8x196xf32> to vector<8x196xf32>
    %1786 = vector.broadcast %1783 : f32 to vector<8x196xf32>
    %1787 = arith.mulf %1786, %1785 : vector<8x196xf32>
    %1788 = arith.addf %1782, %1787 : vector<8x196xf32>
    %c7_1479 = arith.constant 7 : index
    %c3_1480 = arith.constant 3 : index
    %1789 = memref.load %arg2[%c7_1479, %c3_1480] : memref<8x9xf32, #tpu.memory_space<smem>>
    %c12_1481 = arith.constant 12 : index
    %c0_1482 = arith.constant 0 : index
    %c0_1483 = arith.constant 0 : index
    %1790 = vector.load %arg9[%c12_1481, %c0_1482, %c0_1483] : memref<36x8x196xf32, #tpu.memory_space<vmem>>, vector<1x8x196xf32>
    %1791 = vector.shape_cast %1790 : vector<1x8x196xf32> to vector<8x196xf32>
    %1792 = vector.broadcast %1789 : f32 to vector<8x196xf32>
    %1793 = arith.mulf %1792, %1791 : vector<8x196xf32>
    %1794 = arith.addf %1788, %1793 : vector<8x196xf32>
    %c7_1484 = arith.constant 7 : index
    %c4_1485 = arith.constant 4 : index
    %1795 = memref.load %arg2[%c7_1484, %c4_1485] : memref<8x9xf32, #tpu.memory_space<smem>>
    %c16_1486 = arith.constant 16 : index
    %c0_1487 = arith.constant 0 : index
    %c0_1488 = arith.constant 0 : index
    %1796 = vector.load %arg9[%c16_1486, %c0_1487, %c0_1488] : memref<36x8x196xf32, #tpu.memory_space<vmem>>, vector<1x8x196xf32>
    %1797 = vector.shape_cast %1796 : vector<1x8x196xf32> to vector<8x196xf32>
    %1798 = vector.broadcast %1795 : f32 to vector<8x196xf32>
    %1799 = arith.mulf %1798, %1797 : vector<8x196xf32>
    %1800 = arith.addf %1794, %1799 : vector<8x196xf32>
    %c7_1489 = arith.constant 7 : index
    %c5_1490 = arith.constant 5 : index
    %1801 = memref.load %arg2[%c7_1489, %c5_1490] : memref<8x9xf32, #tpu.memory_space<smem>>
    %c20_1491 = arith.constant 20 : index
    %c0_1492 = arith.constant 0 : index
    %c0_1493 = arith.constant 0 : index
    %1802 = vector.load %arg9[%c20_1491, %c0_1492, %c0_1493] : memref<36x8x196xf32, #tpu.memory_space<vmem>>, vector<1x8x196xf32>
    %1803 = vector.shape_cast %1802 : vector<1x8x196xf32> to vector<8x196xf32>
    %1804 = vector.broadcast %1801 : f32 to vector<8x196xf32>
    %1805 = arith.mulf %1804, %1803 : vector<8x196xf32>
    %1806 = arith.addf %1800, %1805 : vector<8x196xf32>
    %c7_1494 = arith.constant 7 : index
    %c6_1495 = arith.constant 6 : index
    %1807 = memref.load %arg2[%c7_1494, %c6_1495] : memref<8x9xf32, #tpu.memory_space<smem>>
    %c24_1496 = arith.constant 24 : index
    %c0_1497 = arith.constant 0 : index
    %c0_1498 = arith.constant 0 : index
    %1808 = vector.load %arg9[%c24_1496, %c0_1497, %c0_1498] : memref<36x8x196xf32, #tpu.memory_space<vmem>>, vector<1x8x196xf32>
    %1809 = vector.shape_cast %1808 : vector<1x8x196xf32> to vector<8x196xf32>
    %1810 = vector.broadcast %1807 : f32 to vector<8x196xf32>
    %1811 = arith.mulf %1810, %1809 : vector<8x196xf32>
    %1812 = arith.addf %1806, %1811 : vector<8x196xf32>
    %c7_1499 = arith.constant 7 : index
    %c7_1500 = arith.constant 7 : index
    %1813 = memref.load %arg2[%c7_1499, %c7_1500] : memref<8x9xf32, #tpu.memory_space<smem>>
    %c28_1501 = arith.constant 28 : index
    %c0_1502 = arith.constant 0 : index
    %c0_1503 = arith.constant 0 : index
    %1814 = vector.load %arg9[%c28_1501, %c0_1502, %c0_1503] : memref<36x8x196xf32, #tpu.memory_space<vmem>>, vector<1x8x196xf32>
    %1815 = vector.shape_cast %1814 : vector<1x8x196xf32> to vector<8x196xf32>
    %1816 = vector.broadcast %1813 : f32 to vector<8x196xf32>
    %1817 = arith.mulf %1816, %1815 : vector<8x196xf32>
    %1818 = arith.addf %1812, %1817 : vector<8x196xf32>
    %c7_1504 = arith.constant 7 : index
    %c8_1505 = arith.constant 8 : index
    %1819 = memref.load %arg2[%c7_1504, %c8_1505] : memref<8x9xf32, #tpu.memory_space<smem>>
    %c32_1506 = arith.constant 32 : index
    %c0_1507 = arith.constant 0 : index
    %c0_1508 = arith.constant 0 : index
    %1820 = vector.load %arg9[%c32_1506, %c0_1507, %c0_1508] : memref<36x8x196xf32, #tpu.memory_space<vmem>>, vector<1x8x196xf32>
    %1821 = vector.shape_cast %1820 : vector<1x8x196xf32> to vector<8x196xf32>
    %1822 = vector.broadcast %1819 : f32 to vector<8x196xf32>
    %1823 = arith.mulf %1822, %1821 : vector<8x196xf32>
    %1824 = arith.addf %1818, %1823 : vector<8x196xf32>
    %c7_1509 = arith.constant 7 : index
    %c0_1510 = arith.constant 0 : index
    %1825 = memref.load %arg2[%c7_1509, %c0_1510] : memref<8x9xf32, #tpu.memory_space<smem>>
    %c1_1511 = arith.constant 1 : index
    %c0_1512 = arith.constant 0 : index
    %c0_1513 = arith.constant 0 : index
    %1826 = vector.load %arg9[%c1_1511, %c0_1512, %c0_1513] : memref<36x8x196xf32, #tpu.memory_space<vmem>>, vector<1x8x196xf32>
    %1827 = vector.shape_cast %1826 : vector<1x8x196xf32> to vector<8x196xf32>
    %1828 = vector.broadcast %1825 : f32 to vector<8x196xf32>
    %1829 = arith.mulf %1828, %1827 : vector<8x196xf32>
    %c7_1514 = arith.constant 7 : index
    %c1_1515 = arith.constant 1 : index
    %1830 = memref.load %arg2[%c7_1514, %c1_1515] : memref<8x9xf32, #tpu.memory_space<smem>>
    %c5_1516 = arith.constant 5 : index
    %c0_1517 = arith.constant 0 : index
    %c0_1518 = arith.constant 0 : index
    %1831 = vector.load %arg9[%c5_1516, %c0_1517, %c0_1518] : memref<36x8x196xf32, #tpu.memory_space<vmem>>, vector<1x8x196xf32>
    %1832 = vector.shape_cast %1831 : vector<1x8x196xf32> to vector<8x196xf32>
    %1833 = vector.broadcast %1830 : f32 to vector<8x196xf32>
    %1834 = arith.mulf %1833, %1832 : vector<8x196xf32>
    %1835 = arith.addf %1829, %1834 : vector<8x196xf32>
    %c7_1519 = arith.constant 7 : index
    %c2_1520 = arith.constant 2 : index
    %1836 = memref.load %arg2[%c7_1519, %c2_1520] : memref<8x9xf32, #tpu.memory_space<smem>>
    %c9_1521 = arith.constant 9 : index
    %c0_1522 = arith.constant 0 : index
    %c0_1523 = arith.constant 0 : index
    %1837 = vector.load %arg9[%c9_1521, %c0_1522, %c0_1523] : memref<36x8x196xf32, #tpu.memory_space<vmem>>, vector<1x8x196xf32>
    %1838 = vector.shape_cast %1837 : vector<1x8x196xf32> to vector<8x196xf32>
    %1839 = vector.broadcast %1836 : f32 to vector<8x196xf32>
    %1840 = arith.mulf %1839, %1838 : vector<8x196xf32>
    %1841 = arith.addf %1835, %1840 : vector<8x196xf32>
    %c7_1524 = arith.constant 7 : index
    %c3_1525 = arith.constant 3 : index
    %1842 = memref.load %arg2[%c7_1524, %c3_1525] : memref<8x9xf32, #tpu.memory_space<smem>>
    %c13_1526 = arith.constant 13 : index
    %c0_1527 = arith.constant 0 : index
    %c0_1528 = arith.constant 0 : index
    %1843 = vector.load %arg9[%c13_1526, %c0_1527, %c0_1528] : memref<36x8x196xf32, #tpu.memory_space<vmem>>, vector<1x8x196xf32>
    %1844 = vector.shape_cast %1843 : vector<1x8x196xf32> to vector<8x196xf32>
    %1845 = vector.broadcast %1842 : f32 to vector<8x196xf32>
    %1846 = arith.mulf %1845, %1844 : vector<8x196xf32>
    %1847 = arith.addf %1841, %1846 : vector<8x196xf32>
    %c7_1529 = arith.constant 7 : index
    %c4_1530 = arith.constant 4 : index
    %1848 = memref.load %arg2[%c7_1529, %c4_1530] : memref<8x9xf32, #tpu.memory_space<smem>>
    %c17_1531 = arith.constant 17 : index
    %c0_1532 = arith.constant 0 : index
    %c0_1533 = arith.constant 0 : index
    %1849 = vector.load %arg9[%c17_1531, %c0_1532, %c0_1533] : memref<36x8x196xf32, #tpu.memory_space<vmem>>, vector<1x8x196xf32>
    %1850 = vector.shape_cast %1849 : vector<1x8x196xf32> to vector<8x196xf32>
    %1851 = vector.broadcast %1848 : f32 to vector<8x196xf32>
    %1852 = arith.mulf %1851, %1850 : vector<8x196xf32>
    %1853 = arith.addf %1847, %1852 : vector<8x196xf32>
    %c7_1534 = arith.constant 7 : index
    %c5_1535 = arith.constant 5 : index
    %1854 = memref.load %arg2[%c7_1534, %c5_1535] : memref<8x9xf32, #tpu.memory_space<smem>>
    %c21_1536 = arith.constant 21 : index
    %c0_1537 = arith.constant 0 : index
    %c0_1538 = arith.constant 0 : index
    %1855 = vector.load %arg9[%c21_1536, %c0_1537, %c0_1538] : memref<36x8x196xf32, #tpu.memory_space<vmem>>, vector<1x8x196xf32>
    %1856 = vector.shape_cast %1855 : vector<1x8x196xf32> to vector<8x196xf32>
    %1857 = vector.broadcast %1854 : f32 to vector<8x196xf32>
    %1858 = arith.mulf %1857, %1856 : vector<8x196xf32>
    %1859 = arith.addf %1853, %1858 : vector<8x196xf32>
    %c7_1539 = arith.constant 7 : index
    %c6_1540 = arith.constant 6 : index
    %1860 = memref.load %arg2[%c7_1539, %c6_1540] : memref<8x9xf32, #tpu.memory_space<smem>>
    %c25_1541 = arith.constant 25 : index
    %c0_1542 = arith.constant 0 : index
    %c0_1543 = arith.constant 0 : index
    %1861 = vector.load %arg9[%c25_1541, %c0_1542, %c0_1543] : memref<36x8x196xf32, #tpu.memory_space<vmem>>, vector<1x8x196xf32>
    %1862 = vector.shape_cast %1861 : vector<1x8x196xf32> to vector<8x196xf32>
    %1863 = vector.broadcast %1860 : f32 to vector<8x196xf32>
    %1864 = arith.mulf %1863, %1862 : vector<8x196xf32>
    %1865 = arith.addf %1859, %1864 : vector<8x196xf32>
    %c7_1544 = arith.constant 7 : index
    %c7_1545 = arith.constant 7 : index
    %1866 = memref.load %arg2[%c7_1544, %c7_1545] : memref<8x9xf32, #tpu.memory_space<smem>>
    %c29_1546 = arith.constant 29 : index
    %c0_1547 = arith.constant 0 : index
    %c0_1548 = arith.constant 0 : index
    %1867 = vector.load %arg9[%c29_1546, %c0_1547, %c0_1548] : memref<36x8x196xf32, #tpu.memory_space<vmem>>, vector<1x8x196xf32>
    %1868 = vector.shape_cast %1867 : vector<1x8x196xf32> to vector<8x196xf32>
    %1869 = vector.broadcast %1866 : f32 to vector<8x196xf32>
    %1870 = arith.mulf %1869, %1868 : vector<8x196xf32>
    %1871 = arith.addf %1865, %1870 : vector<8x196xf32>
    %c7_1549 = arith.constant 7 : index
    %c8_1550 = arith.constant 8 : index
    %1872 = memref.load %arg2[%c7_1549, %c8_1550] : memref<8x9xf32, #tpu.memory_space<smem>>
    %c33_1551 = arith.constant 33 : index
    %c0_1552 = arith.constant 0 : index
    %c0_1553 = arith.constant 0 : index
    %1873 = vector.load %arg9[%c33_1551, %c0_1552, %c0_1553] : memref<36x8x196xf32, #tpu.memory_space<vmem>>, vector<1x8x196xf32>
    %1874 = vector.shape_cast %1873 : vector<1x8x196xf32> to vector<8x196xf32>
    %1875 = vector.broadcast %1872 : f32 to vector<8x196xf32>
    %1876 = arith.mulf %1875, %1874 : vector<8x196xf32>
    %1877 = arith.addf %1871, %1876 : vector<8x196xf32>
    %1878 = arith.maximumf %1824, %1877 : vector<8x196xf32>
    %c7_1554 = arith.constant 7 : index
    %c0_1555 = arith.constant 0 : index
    %1879 = memref.load %arg2[%c7_1554, %c0_1555] : memref<8x9xf32, #tpu.memory_space<smem>>
    %c2_1556 = arith.constant 2 : index
    %c0_1557 = arith.constant 0 : index
    %c0_1558 = arith.constant 0 : index
    %1880 = vector.load %arg9[%c2_1556, %c0_1557, %c0_1558] : memref<36x8x196xf32, #tpu.memory_space<vmem>>, vector<1x8x196xf32>
    %1881 = vector.shape_cast %1880 : vector<1x8x196xf32> to vector<8x196xf32>
    %1882 = vector.broadcast %1879 : f32 to vector<8x196xf32>
    %1883 = arith.mulf %1882, %1881 : vector<8x196xf32>
    %c7_1559 = arith.constant 7 : index
    %c1_1560 = arith.constant 1 : index
    %1884 = memref.load %arg2[%c7_1559, %c1_1560] : memref<8x9xf32, #tpu.memory_space<smem>>
    %c6_1561 = arith.constant 6 : index
    %c0_1562 = arith.constant 0 : index
    %c0_1563 = arith.constant 0 : index
    %1885 = vector.load %arg9[%c6_1561, %c0_1562, %c0_1563] : memref<36x8x196xf32, #tpu.memory_space<vmem>>, vector<1x8x196xf32>
    %1886 = vector.shape_cast %1885 : vector<1x8x196xf32> to vector<8x196xf32>
    %1887 = vector.broadcast %1884 : f32 to vector<8x196xf32>
    %1888 = arith.mulf %1887, %1886 : vector<8x196xf32>
    %1889 = arith.addf %1883, %1888 : vector<8x196xf32>
    %c7_1564 = arith.constant 7 : index
    %c2_1565 = arith.constant 2 : index
    %1890 = memref.load %arg2[%c7_1564, %c2_1565] : memref<8x9xf32, #tpu.memory_space<smem>>
    %c10_1566 = arith.constant 10 : index
    %c0_1567 = arith.constant 0 : index
    %c0_1568 = arith.constant 0 : index
    %1891 = vector.load %arg9[%c10_1566, %c0_1567, %c0_1568] : memref<36x8x196xf32, #tpu.memory_space<vmem>>, vector<1x8x196xf32>
    %1892 = vector.shape_cast %1891 : vector<1x8x196xf32> to vector<8x196xf32>
    %1893 = vector.broadcast %1890 : f32 to vector<8x196xf32>
    %1894 = arith.mulf %1893, %1892 : vector<8x196xf32>
    %1895 = arith.addf %1889, %1894 : vector<8x196xf32>
    %c7_1569 = arith.constant 7 : index
    %c3_1570 = arith.constant 3 : index
    %1896 = memref.load %arg2[%c7_1569, %c3_1570] : memref<8x9xf32, #tpu.memory_space<smem>>
    %c14_1571 = arith.constant 14 : index
    %c0_1572 = arith.constant 0 : index
    %c0_1573 = arith.constant 0 : index
    %1897 = vector.load %arg9[%c14_1571, %c0_1572, %c0_1573] : memref<36x8x196xf32, #tpu.memory_space<vmem>>, vector<1x8x196xf32>
    %1898 = vector.shape_cast %1897 : vector<1x8x196xf32> to vector<8x196xf32>
    %1899 = vector.broadcast %1896 : f32 to vector<8x196xf32>
    %1900 = arith.mulf %1899, %1898 : vector<8x196xf32>
    %1901 = arith.addf %1895, %1900 : vector<8x196xf32>
    %c7_1574 = arith.constant 7 : index
    %c4_1575 = arith.constant 4 : index
    %1902 = memref.load %arg2[%c7_1574, %c4_1575] : memref<8x9xf32, #tpu.memory_space<smem>>
    %c18_1576 = arith.constant 18 : index
    %c0_1577 = arith.constant 0 : index
    %c0_1578 = arith.constant 0 : index
    %1903 = vector.load %arg9[%c18_1576, %c0_1577, %c0_1578] : memref<36x8x196xf32, #tpu.memory_space<vmem>>, vector<1x8x196xf32>
    %1904 = vector.shape_cast %1903 : vector<1x8x196xf32> to vector<8x196xf32>
    %1905 = vector.broadcast %1902 : f32 to vector<8x196xf32>
    %1906 = arith.mulf %1905, %1904 : vector<8x196xf32>
    %1907 = arith.addf %1901, %1906 : vector<8x196xf32>
    %c7_1579 = arith.constant 7 : index
    %c5_1580 = arith.constant 5 : index
    %1908 = memref.load %arg2[%c7_1579, %c5_1580] : memref<8x9xf32, #tpu.memory_space<smem>>
    %c22_1581 = arith.constant 22 : index
    %c0_1582 = arith.constant 0 : index
    %c0_1583 = arith.constant 0 : index
    %1909 = vector.load %arg9[%c22_1581, %c0_1582, %c0_1583] : memref<36x8x196xf32, #tpu.memory_space<vmem>>, vector<1x8x196xf32>
    %1910 = vector.shape_cast %1909 : vector<1x8x196xf32> to vector<8x196xf32>
    %1911 = vector.broadcast %1908 : f32 to vector<8x196xf32>
    %1912 = arith.mulf %1911, %1910 : vector<8x196xf32>
    %1913 = arith.addf %1907, %1912 : vector<8x196xf32>
    %c7_1584 = arith.constant 7 : index
    %c6_1585 = arith.constant 6 : index
    %1914 = memref.load %arg2[%c7_1584, %c6_1585] : memref<8x9xf32, #tpu.memory_space<smem>>
    %c26_1586 = arith.constant 26 : index
    %c0_1587 = arith.constant 0 : index
    %c0_1588 = arith.constant 0 : index
    %1915 = vector.load %arg9[%c26_1586, %c0_1587, %c0_1588] : memref<36x8x196xf32, #tpu.memory_space<vmem>>, vector<1x8x196xf32>
    %1916 = vector.shape_cast %1915 : vector<1x8x196xf32> to vector<8x196xf32>
    %1917 = vector.broadcast %1914 : f32 to vector<8x196xf32>
    %1918 = arith.mulf %1917, %1916 : vector<8x196xf32>
    %1919 = arith.addf %1913, %1918 : vector<8x196xf32>
    %c7_1589 = arith.constant 7 : index
    %c7_1590 = arith.constant 7 : index
    %1920 = memref.load %arg2[%c7_1589, %c7_1590] : memref<8x9xf32, #tpu.memory_space<smem>>
    %c30_1591 = arith.constant 30 : index
    %c0_1592 = arith.constant 0 : index
    %c0_1593 = arith.constant 0 : index
    %1921 = vector.load %arg9[%c30_1591, %c0_1592, %c0_1593] : memref<36x8x196xf32, #tpu.memory_space<vmem>>, vector<1x8x196xf32>
    %1922 = vector.shape_cast %1921 : vector<1x8x196xf32> to vector<8x196xf32>
    %1923 = vector.broadcast %1920 : f32 to vector<8x196xf32>
    %1924 = arith.mulf %1923, %1922 : vector<8x196xf32>
    %1925 = arith.addf %1919, %1924 : vector<8x196xf32>
    %c7_1594 = arith.constant 7 : index
    %c8_1595 = arith.constant 8 : index
    %1926 = memref.load %arg2[%c7_1594, %c8_1595] : memref<8x9xf32, #tpu.memory_space<smem>>
    %c34_1596 = arith.constant 34 : index
    %c0_1597 = arith.constant 0 : index
    %c0_1598 = arith.constant 0 : index
    %1927 = vector.load %arg9[%c34_1596, %c0_1597, %c0_1598] : memref<36x8x196xf32, #tpu.memory_space<vmem>>, vector<1x8x196xf32>
    %1928 = vector.shape_cast %1927 : vector<1x8x196xf32> to vector<8x196xf32>
    %1929 = vector.broadcast %1926 : f32 to vector<8x196xf32>
    %1930 = arith.mulf %1929, %1928 : vector<8x196xf32>
    %1931 = arith.addf %1925, %1930 : vector<8x196xf32>
    %1932 = arith.maximumf %1878, %1931 : vector<8x196xf32>
    %c7_1599 = arith.constant 7 : index
    %c0_1600 = arith.constant 0 : index
    %1933 = memref.load %arg2[%c7_1599, %c0_1600] : memref<8x9xf32, #tpu.memory_space<smem>>
    %c3_1601 = arith.constant 3 : index
    %c0_1602 = arith.constant 0 : index
    %c0_1603 = arith.constant 0 : index
    %1934 = vector.load %arg9[%c3_1601, %c0_1602, %c0_1603] : memref<36x8x196xf32, #tpu.memory_space<vmem>>, vector<1x8x196xf32>
    %1935 = vector.shape_cast %1934 : vector<1x8x196xf32> to vector<8x196xf32>
    %1936 = vector.broadcast %1933 : f32 to vector<8x196xf32>
    %1937 = arith.mulf %1936, %1935 : vector<8x196xf32>
    %c7_1604 = arith.constant 7 : index
    %c1_1605 = arith.constant 1 : index
    %1938 = memref.load %arg2[%c7_1604, %c1_1605] : memref<8x9xf32, #tpu.memory_space<smem>>
    %c7_1606 = arith.constant 7 : index
    %c0_1607 = arith.constant 0 : index
    %c0_1608 = arith.constant 0 : index
    %1939 = vector.load %arg9[%c7_1606, %c0_1607, %c0_1608] : memref<36x8x196xf32, #tpu.memory_space<vmem>>, vector<1x8x196xf32>
    %1940 = vector.shape_cast %1939 : vector<1x8x196xf32> to vector<8x196xf32>
    %1941 = vector.broadcast %1938 : f32 to vector<8x196xf32>
    %1942 = arith.mulf %1941, %1940 : vector<8x196xf32>
    %1943 = arith.addf %1937, %1942 : vector<8x196xf32>
    %c7_1609 = arith.constant 7 : index
    %c2_1610 = arith.constant 2 : index
    %1944 = memref.load %arg2[%c7_1609, %c2_1610] : memref<8x9xf32, #tpu.memory_space<smem>>
    %c11_1611 = arith.constant 11 : index
    %c0_1612 = arith.constant 0 : index
    %c0_1613 = arith.constant 0 : index
    %1945 = vector.load %arg9[%c11_1611, %c0_1612, %c0_1613] : memref<36x8x196xf32, #tpu.memory_space<vmem>>, vector<1x8x196xf32>
    %1946 = vector.shape_cast %1945 : vector<1x8x196xf32> to vector<8x196xf32>
    %1947 = vector.broadcast %1944 : f32 to vector<8x196xf32>
    %1948 = arith.mulf %1947, %1946 : vector<8x196xf32>
    %1949 = arith.addf %1943, %1948 : vector<8x196xf32>
    %c7_1614 = arith.constant 7 : index
    %c3_1615 = arith.constant 3 : index
    %1950 = memref.load %arg2[%c7_1614, %c3_1615] : memref<8x9xf32, #tpu.memory_space<smem>>
    %c15_1616 = arith.constant 15 : index
    %c0_1617 = arith.constant 0 : index
    %c0_1618 = arith.constant 0 : index
    %1951 = vector.load %arg9[%c15_1616, %c0_1617, %c0_1618] : memref<36x8x196xf32, #tpu.memory_space<vmem>>, vector<1x8x196xf32>
    %1952 = vector.shape_cast %1951 : vector<1x8x196xf32> to vector<8x196xf32>
    %1953 = vector.broadcast %1950 : f32 to vector<8x196xf32>
    %1954 = arith.mulf %1953, %1952 : vector<8x196xf32>
    %1955 = arith.addf %1949, %1954 : vector<8x196xf32>
    %c7_1619 = arith.constant 7 : index
    %c4_1620 = arith.constant 4 : index
    %1956 = memref.load %arg2[%c7_1619, %c4_1620] : memref<8x9xf32, #tpu.memory_space<smem>>
    %c19_1621 = arith.constant 19 : index
    %c0_1622 = arith.constant 0 : index
    %c0_1623 = arith.constant 0 : index
    %1957 = vector.load %arg9[%c19_1621, %c0_1622, %c0_1623] : memref<36x8x196xf32, #tpu.memory_space<vmem>>, vector<1x8x196xf32>
    %1958 = vector.shape_cast %1957 : vector<1x8x196xf32> to vector<8x196xf32>
    %1959 = vector.broadcast %1956 : f32 to vector<8x196xf32>
    %1960 = arith.mulf %1959, %1958 : vector<8x196xf32>
    %1961 = arith.addf %1955, %1960 : vector<8x196xf32>
    %c7_1624 = arith.constant 7 : index
    %c5_1625 = arith.constant 5 : index
    %1962 = memref.load %arg2[%c7_1624, %c5_1625] : memref<8x9xf32, #tpu.memory_space<smem>>
    %c23_1626 = arith.constant 23 : index
    %c0_1627 = arith.constant 0 : index
    %c0_1628 = arith.constant 0 : index
    %1963 = vector.load %arg9[%c23_1626, %c0_1627, %c0_1628] : memref<36x8x196xf32, #tpu.memory_space<vmem>>, vector<1x8x196xf32>
    %1964 = vector.shape_cast %1963 : vector<1x8x196xf32> to vector<8x196xf32>
    %1965 = vector.broadcast %1962 : f32 to vector<8x196xf32>
    %1966 = arith.mulf %1965, %1964 : vector<8x196xf32>
    %1967 = arith.addf %1961, %1966 : vector<8x196xf32>
    %c7_1629 = arith.constant 7 : index
    %c6_1630 = arith.constant 6 : index
    %1968 = memref.load %arg2[%c7_1629, %c6_1630] : memref<8x9xf32, #tpu.memory_space<smem>>
    %c27_1631 = arith.constant 27 : index
    %c0_1632 = arith.constant 0 : index
    %c0_1633 = arith.constant 0 : index
    %1969 = vector.load %arg9[%c27_1631, %c0_1632, %c0_1633] : memref<36x8x196xf32, #tpu.memory_space<vmem>>, vector<1x8x196xf32>
    %1970 = vector.shape_cast %1969 : vector<1x8x196xf32> to vector<8x196xf32>
    %1971 = vector.broadcast %1968 : f32 to vector<8x196xf32>
    %1972 = arith.mulf %1971, %1970 : vector<8x196xf32>
    %1973 = arith.addf %1967, %1972 : vector<8x196xf32>
    %c7_1634 = arith.constant 7 : index
    %c7_1635 = arith.constant 7 : index
    %1974 = memref.load %arg2[%c7_1634, %c7_1635] : memref<8x9xf32, #tpu.memory_space<smem>>
    %c31_1636 = arith.constant 31 : index
    %c0_1637 = arith.constant 0 : index
    %c0_1638 = arith.constant 0 : index
    %1975 = vector.load %arg9[%c31_1636, %c0_1637, %c0_1638] : memref<36x8x196xf32, #tpu.memory_space<vmem>>, vector<1x8x196xf32>
    %1976 = vector.shape_cast %1975 : vector<1x8x196xf32> to vector<8x196xf32>
    %1977 = vector.broadcast %1974 : f32 to vector<8x196xf32>
    %1978 = arith.mulf %1977, %1976 : vector<8x196xf32>
    %1979 = arith.addf %1973, %1978 : vector<8x196xf32>
    %c7_1639 = arith.constant 7 : index
    %c8_1640 = arith.constant 8 : index
    %1980 = memref.load %arg2[%c7_1639, %c8_1640] : memref<8x9xf32, #tpu.memory_space<smem>>
    %c35_1641 = arith.constant 35 : index
    %c0_1642 = arith.constant 0 : index
    %c0_1643 = arith.constant 0 : index
    %1981 = vector.load %arg9[%c35_1641, %c0_1642, %c0_1643] : memref<36x8x196xf32, #tpu.memory_space<vmem>>, vector<1x8x196xf32>
    %1982 = vector.shape_cast %1981 : vector<1x8x196xf32> to vector<8x196xf32>
    %1983 = vector.broadcast %1980 : f32 to vector<8x196xf32>
    %1984 = arith.mulf %1983, %1982 : vector<8x196xf32>
    %1985 = arith.addf %1979, %1984 : vector<8x196xf32>
    %1986 = arith.maximumf %1932, %1985 : vector<8x196xf32>
    %c7_1644 = arith.constant 7 : index
    %1987 = memref.load %arg3[%c7_1644] : memref<8xf32, #tpu.memory_space<smem>>
    %1988 = vector.broadcast %1987 : f32 to vector<8x196xf32>
    %1989 = arith.addf %1986, %1988 : vector<8x196xf32>
    %cst_1645 = arith.constant 0.000000e+00 : f32
    %1990 = vector.broadcast %cst_1645 : f32 to vector<8x196xf32>
    %1991 = arith.maximumf %1989, %1990 : vector<8x196xf32>
    %1992 = arith.truncf %1991 : vector<8x196xf32> to vector<8x196xbf16>
    %c0_1646 = arith.constant 0 : index
    %c1792 = arith.constant 1792 : index
    %1993 = vector.load %arg10[%c0_1646, %c1792] : memref<8x2048xbf16, #tpu.memory_space<vmem>>, vector<8x196xbf16>
    tpu.vector_store %arg10[%c0_1646, %c1792], %1992 {strides = array<i32>} : memref<8x2048xbf16, #tpu.memory_space<vmem>>, vector<8x196xbf16>,
    %c0_1647 = arith.constant 0 : index
    %c0_1648 = arith.constant 0 : index
    %1994 = vector.load %arg10[%c0_1647, %c0_1648] : memref<8x2048xbf16, #tpu.memory_space<vmem>>, vector<8x2048xbf16>
    %c0_1649 = arith.constant 0 : index
    %c0_1650 = arith.constant 0 : index
    %1995 = vector.load %arg4[%c0_1649, %c0_1650] : memref<2048x128xbf16, #tpu.memory_space<vmem>>, vector<2048x128xbf16>
    %cst_1651 = arith.constant dense<0.000000e+00> : vector<8x128xf32>
    %1996 = tpu.matmul %1994, %1995, %cst_1651 {dimension_numbers = #tpu.dot_dimension_numbers<[1], [0], [0], [1], [0, 0, 1, 1], [], []>} : vector<8x2048xbf16>, vector<2048x128xbf16>, vector<8x128xf32> -> vector<8x128xf32>
    %c0_1652 = arith.constant 0 : index
    %c0_1653 = arith.constant 0 : index
    %1997 = vector.load %arg5[%c0_1652, %c0_1653] : memref<1x128xf32, #tpu.memory_space<vmem>>, vector<1x128xf32>
    %1998 = vector.broadcast %1997 : vector<1x128xf32> to vector<8x128xf32>
    %1999 = arith.addf %1996, %1998 : vector<8x128xf32>
    %cst_1654 = arith.constant 0.000000e+00 : f32
    %2000 = vector.broadcast %cst_1654 : f32 to vector<8x128xf32>
    %2001 = arith.maximumf %1999, %2000 : vector<8x128xf32>
    %2002 = arith.truncf %2001 : vector<8x128xf32> to vector<8x128xbf16>
    %c0_1655 = arith.constant 0 : index
    %c0_1656 = arith.constant 0 : index
    %2003 = vector.load %arg6[%c0_1655, %c0_1656] : memref<128x128xbf16, #tpu.memory_space<vmem>>, vector<128x128xbf16>
    %cst_1657 = arith.constant dense<0.000000e+00> : vector<8x128xf32>
    %2004 = tpu.matmul %2002, %2003, %cst_1657 {dimension_numbers = #tpu.dot_dimension_numbers<[1], [0], [0], [1], [0, 0, 1, 1], [], []>} : vector<8x128xbf16>, vector<128x128xbf16>, vector<8x128xf32> -> vector<8x128xf32>
    %c0_1658 = arith.constant 0 : index
    %c0_1659 = arith.constant 0 : index
    %2005 = vector.load %arg7[%c0_1658, %c0_1659] : memref<1x128xf32, #tpu.memory_space<vmem>>, vector<1x128xf32>
    %2006 = vector.broadcast %2005 : vector<1x128xf32> to vector<8x128xf32>
    %2007 = arith.addf %2004, %2006 : vector<8x128xf32>
    %c0_1660 = arith.constant 0 : index
    %c0_1661 = arith.constant 0 : index
    %2008 = vector.load %arg8[%c0_1660, %c0_1661] : memref<8x128xf32, #tpu.memory_space<vmem>>, vector<8x128xf32>
    tpu.vector_store %arg8[%c0_1660, %c0_1661], %2007 {strides = array<i32>} : memref<8x128xf32, #tpu.memory_space<vmem>>, vector<8x128xf32>,
    return
  }
  func.func @transform_0(%arg0: i32) -> (i32, i32, i32) {
    %c0_i32 = arith.constant 0 : i32
    %c0_i32_0 = arith.constant 0 : i32
    %c0_i32_1 = arith.constant 0 : i32
    return %c0_i32, %arg0, %c0_i32_0 : i32, i32, i32
  }
  func.func @transform_1(%arg0: i32) -> (i32, i32) {
    %c0_i32 = arith.constant 0 : i32
    %c0_i32_0 = arith.constant 0 : i32
    %c0_i32_1 = arith.constant 0 : i32
    return %c0_i32, %c0_i32_0 : i32, i32
  }
  func.func @transform_2(%arg0: i32) -> i32 {
    %c0_i32 = arith.constant 0 : i32
    %c0_i32_0 = arith.constant 0 : i32
    return %c0_i32 : i32
  }
  func.func @transform_3(%arg0: i32) -> (i32, i32) {
    %c0_i32 = arith.constant 0 : i32
    %c0_i32_0 = arith.constant 0 : i32
    %c0_i32_1 = arith.constant 0 : i32
    return %c0_i32, %c0_i32_0 : i32, i32
  }
  func.func @transform_4(%arg0: i32) -> (i32, i32) {
    %c0_i32 = arith.constant 0 : i32
    %c0_i32_0 = arith.constant 0 : i32
    %c0_i32_1 = arith.constant 0 : i32
    return %c0_i32, %c0_i32_0 : i32, i32
  }
  func.func @transform_5(%arg0: i32) -> (i32, i32) {
    %c0_i32 = arith.constant 0 : i32
    %c0_i32_0 = arith.constant 0 : i32
    %c0_i32_1 = arith.constant 0 : i32
    return %c0_i32, %c0_i32_0 : i32, i32
  }
  func.func @transform_6(%arg0: i32) -> (i32, i32) {
    %c0_i32 = arith.constant 0 : i32
    %c0_i32_0 = arith.constant 0 : i32
    %c0_i32_1 = arith.constant 0 : i32
    return %c0_i32, %c0_i32_0 : i32, i32
  }
  func.func @transform_7(%arg0: i32) -> (i32, i32) {
    %c0_i32 = arith.constant 0 : i32
    %c0_i32_0 = arith.constant 0 : i32
    return %arg0, %c0_i32 : i32, i32
  }
}

</mosaic_0001>

<bundles_post_ra>
// kernel: cnn_classifier_forward.1
= control target key start
LH: loop header
LB: loop body
LE: loop exit
PB: predicated region body
PF: predicated region fallthrough
CT: control target
= control target key end

     0   :  { %12 = vsyncpa [#allocation5], 0  ;;  %s7431_s0 = inlined_call_operand.vmem [shape: bf16[36,8,196], index: 0, kind: input, shape index: {}]   ;;  %s7432_s1 = inlined_call_operand.vmem [shape: f32[8,9], index: 1, kind: input, shape index: {}]   ;;  %s7433_s2 = inlined_call_operand.vmem [shape: f32[8], index: 2, kind: input, shape index: {}]   ;;  %s7434_s3 = inlined_call_operand.vmem [shape: bf16[2048,128], index: 3, kind: input, shape index: {}]   ;;  %s7435_s4 = inlined_call_operand.vmem [shape: f32[1,128], index: 4, kind: input, shape index: {}]   ;;  %s7436_s5 = inlined_call_operand.vmem [shape: bf16[128,128], index: 5, kind: input, shape index: {}]   ;;  %s7437_s6 = inlined_call_operand.vmem [shape: f32[1,128], index: 6, kind: input, shape index: {}]   ;;  %s7438_s7 = inlined_call_operand.vmem [shape: f32[8,128], index: 7, kind: output, shape index: {}]  }
   0x1   :  { %s22_s26 = sshll.u32 %s7432_s1, 4  ;;  %s23_s26 = int_to_ptr.vmem [resolvable:$true] %s22_s26 }
   0x2   :  { %13 = vsyncpa [#allocation7], 0  ;;  %s32_s29 = sshll.u32 %s7433_s2, 4  ;;  %s4470_s30 = scalar_lea.vmem %s23_s26, 128  ;;  %s33_s29 = int_to_ptr.vmem [resolvable:$true] %s32_s29 }
   0x3   :  { %p4471_p0 = scmp.ne.s32.totalorder %s23_s26, %s4470_s30  ;;  %p4475_p1 = scmp.lt.s32.totalorder %s23_s26, %s23_s26 }
   0x4   :  { %p4476_p2 = scmp.lt.s32.totalorder %s4470_s30, %s4470_s30 }
   0x6   :  { %p4477_p3 = por %p4476_p2, %p4475_p1 }
   0x8   :  { %p4478_p4 = pnand %p4477_p3, %p4471_p0 }
   0xa   :  { %4481 = shalt.err (!%p4478_p4)
}
   0xb   :  { %s4498_s8 = smov [#allocation4]   ;;  %s4482_s9 = scalar_lea.vmem %s33_s29, 16 }
   0xc   :  { %25 = dma.vmem_to_smem %s23_s26, 128, %s4498_s8, [#allocation5]  }
   0xd   :  { %p4483_p5 = scmp.ne.s32.totalorder %s33_s29, %s4482_s9  ;;  %p4487_p6 = scmp.lt.s32.totalorder %s33_s29, %s33_s29 }
   0xe   :  { %p4488_p7 = scmp.lt.s32.totalorder %s4482_s9, %s4482_s9 }
  0x10   :  { %p4489_p8 = por %p4488_p7, %p4487_p6 }
  0x12   :  { %p4490_p9 = pnand %p4489_p8, %p4483_p5 }
  0x14   :  { %4493 = shalt.err (!%p4490_p9)
}
  0x15   :  { %s4499_s1 = smov [#allocation6]  }
  0x16   :  { %35 = dma.vmem_to_smem %s33_s29, 16, %s4499_s1, [#allocation7]  }
  0x17   :  { %4494 = dma.done.wait [#allocation5], 128  }
  0x18   :  { %4495 = vsyncadd [#allocation5], 4294967168 }
  0x19   :  { %4496 = dma.done.wait [#allocation7], 16  }
  0x1a   :  { %4497 = vsyncadd [#allocation7], 4294967280 }
  0x1b   :  { %50 = sfence }
  0x1c   :  { %v4318_v0 = vld [vmem:[%s7434_s3 + $0x40] sm:$0xff]   ;;  %v4500_v3 = vmov 0   ;;  %v4322_v5 = vld [vmem:[%s7434_s3 + $0x48] sm:$0xff]   ;;  %v4326_v9 = vld [vmem:[%s7434_s3 + $0x50] sm:$0xff]   ;;  %vm56_vm0 = vcmask 556032   ;;  %s4820_s25 = sld [smem:[#allocation4]] }
  0x1d   :  { %v4319_v1 = vld [vmem:[%s7434_s3 + $0xc0] sm:$0xff]   ;;  %4108 = vmatprep.subr.bf16.mxu0 %v4318_v0  ;;  %303 = vst [vmem:[#allocation3] sm:$0xff] %v4500_v3  ;;  %304 = vst [vmem:[#allocation3 + $0x8] sm:$0xff] %v4500_v3  ;;  %v4323_v6 = vld [vmem:[%s7434_s3 + $0xc8] sm:$0xff]   ;;  %s4822_s26 = sld [smem:[#allocation4 + $0x1]]  ;;  %s4838_s8 = sld [smem:[#allocation4 + $0x2]] }
  0x1e   :  { %v4320_v2 = vld [vmem:[%s7434_s3] sm:$0xff]   ;;  %305 = vst [vmem:[#allocation3 + $0x10] sm:$0xff] %v4500_v3  ;;  %306 = vst [vmem:[#allocation3 + $0x18] sm:$0xff] %v4500_v3  ;;  %4130 = vmatprep.subr.bf16.mxu1 %v4319_v1  ;;  %v4324_v7 = vld [vmem:[%s7434_s3 + $0x8] sm:$0xff]   ;;  %s4840_s9 = sld [smem:[#allocation4 + $0x3]]  ;;  %s4886_s20 = sld [smem:[#allocation4 + $0x4]] }
  0x1f   :  { %307 = vst [vmem:[#allocation3 + $0x20] sm:$0xff] %v4500_v3  ;;  %308 = vst [vmem:[#allocation3 + $0x28] sm:$0xff] %v4500_v3  ;;  %v4321_v4 = vld [vmem:[%s7434_s3 + $0x80] sm:$0xff]   ;;  %4109 = vmatpush3.bf16.msra.mxu0 %v4320_v2  ;;  %v4325_v8 = vld [vmem:[%s7434_s3 + $0x88] sm:$0xff]   ;;  %s4888_s21 = sld [smem:[#allocation4 + $0x5]]  ;;  %s4912_s28 = sld [smem:[#allocation4 + $0x6]] }
  0x20   :  { %309 = vst [vmem:[#allocation3 + $0x30] sm:$0xff] %v4500_v3  ;;  %310 = vst [vmem:[#allocation3 + $0x38] sm:$0xff] %v4500_v3  ;;  %4131 = vmatpush3.bf16.msra.mxu1 %v4321_v4  ;;  %4110 = vmatprep.subr.bf16.mxu0 %v4322_v5  ;;  %v4327_v10 = vld [vmem:[%s7434_s3 + $0xd0] sm:$0xff]   ;;  %v4330_v13 = vld [vmem:[%s7434_s3 + $0x58] sm:$0xff]   ;;  %s4914_s29 = sld [smem:[#allocation4 + $0x7]]  ;;  %s5033_s30 = sld [smem:[#allocation4 + $0x81]] }
  0x21   :  { %4132 = vmatprep.subr.bf16.mxu1 %v4323_v6  ;;  %v4328_v11 = vld [vmem:[%s7434_s3 + $0x10] sm:$0xff]   ;;  %v4331_v14 = vld [vmem:[%s7434_s3 + $0xd8] sm:$0xff]   ;;  %v4334_v17 = vld [vmem:[%s7434_s3 + $0x60] sm:$0xff]   ;;  %s5091_s11 = sld [smem:[#allocation4 + $0x83]]  ;;  %s5208_s12 = sld [smem:[#allocation4 + $0x84]]  ;;  %vm557_vm1 = vcmask 1043456  }
  0x22   :  { %v4329_v12 = vld [vmem:[%s7434_s3 + $0x90] sm:$0xff]   ;;  %v4332_v15 = vld [vmem:[%s7434_s3 + $0x18] sm:$0xff]   ;;  %v4335_v18 = vld [vmem:[%s7434_s3 + $0xe0] sm:$0xff]   ;;  %s5212_s13 = sld [smem:[#allocation4 + $0x85]]  ;;  %s5230_s14 = sld [smem:[#allocation4 + $0x86]]  ;;  %vm558_vm2 = vcmask 556036  }
  0x23   :  { %4111 = vmatpush3.bf16.msra.mxu0 %v4324_v7  ;;  %v4333_v16 = vld [vmem:[%s7434_s3 + $0x98] sm:$0xff]   ;;  %v4336_v19 = vld [vmem:[%s7434_s3 + $0x20] sm:$0xff]   ;;  %v4338_v21 = vld [vmem:[%s7434_s3 + $0x68] sm:$0xff]   ;;  %s5232_s15 = sld [smem:[#allocation4 + $0x87]]  ;;  %s5249_s16 = sld [smem:[#allocation4 + $0x88]]  ;;  %vm4502_vm4 = vmmov 0  }
  0x24   :  { %4133 = vmatpush3.bf16.msra.mxu1 %v4325_v8  ;;  %4112 = vmatprep.subr.bf16.mxu0 %v4326_v9  ;;  %v4337_v20 = vld [vmem:[%s7434_s3 + $0xa0] sm:$0xff]   ;;  %v4339_v22 = vld [vmem:[%s7434_s3 + $0xe8] sm:$0xff]   ;;  %v4342_v25 = vld [vmem:[%s7434_s3 + $0x70] sm:$0xff]   ;;  %s5371_s19 = sld [smem:[#allocation6 + $0x1]]  ;;  %s5376_s22 = sld [smem:[#allocation4 + $0x100]] }
  0x25   :  { %4134 = vmatprep.subr.bf16.mxu1 %v4327_v10  ;;  %v4340_v23 = vld [vmem:[%s7434_s3 + $0x28] sm:$0xff]   ;;  %v4343_v26 = vld [vmem:[%s7434_s3 + $0xf0] sm:$0xff]   ;;  %v4346_v29 = vld [vmem:[%s7434_s3 + $0x78] sm:$0xff]   ;;  %s5386_s23 = sld [smem:[#allocation4 + $0x101]]  ;;  %s5388_s24 = sld [smem:[#allocation4 + $0x102]] }
  0x26   :  { %v4341_v24 = vld [vmem:[%s7434_s3 + $0xa8] sm:$0xff]   ;;  %v4344_v27 = vld [vmem:[%s7434_s3 + $0x30] sm:$0xff]   ;;  %v4347_v30 = vld [vmem:[%s7434_s3 + $0xf8] sm:$0xff]   ;;  %s5398_s27 = sld [smem:[#allocation4 + $0x103]]  ;;  %s5801_s17 = sld [smem:[#allocation4 + $0x181]] }
  0x27   :  { %4113 = vmatpush3.bf16.msra.mxu0 %v4328_v11  ;;  %v4345_v28 = vld [vmem:[%s7434_s3 + $0xb0] sm:$0xff]   ;;  %v4348_v31 = vld [vmem:[%s7434_s3 + $0x38] sm:$0xff]   ;;  %v52_v33 = vld [vmem:[%s7431_s0] sm:$0xff]  ;;  %s5886_s1 = sld [smem:[#allocation4 + $0x188]]  ;;  %s6532_s10 = sld [smem:[#allocation4 + $0x286]] }
  0x28   :  { %4135 = vmatpush3.bf16.msra.mxu1 %v4329_v12  ;;  %4114 = vmatprep.subr.bf16.mxu0 %v4330_v13  ;;  %v4349_v32 = vld [vmem:[%s7434_s3 + $0xb8] sm:$0xff]   ;;  %v3825_v34 = vld [vmem:[%s7431_s0 + $0x8] sm:$0xff]  ;;  %v4654_v35 = vld [vmem:[%s7431_s0 + $0x10] sm:$0xff]  ;;  %v4656_v36 = vunpack.c.l.bf16 %v52_v33  ;;  %v54_v37 = vunpack.c.h.bf16 %v52_v33  ;;  %s7159_s2 = sld [smem:[#allocation4 + $0x384]]  ;;  %s7212_s18 = sld [smem:[#allocation4 + $0x388]] }
  0x29   :  { %4136 = vmatprep.subr.bf16.mxu1 %v4331_v14  ;;  %v4658_v38 = vunpack.c.l.bf16 %v3825_v34  ;;  %v61_v39 = vunpack.c.h.bf16 %v3825_v34  ;;  %v4663_v40 = vld [vmem:[%s7431_s0 + $0x18] sm:$0xff]  ;;  %v3828_v41 = vld [vmem:[%s7431_s0 + $0x20] sm:$0xff]  ;;  %v3829_v42 = vld [vmem:[%s7431_s0 + $0x28] sm:$0xff]  ;;  %v7447_v43 = vunpack.c.l.bf16 %v4654_v35  ;;  %v68_v44 = vunpack.c.h.bf16 %v4654_v35 }
  0x2a   :  { %7593 = vst [vmem:[#allocation10_spill] sm:$0xff] %v4656_v36  ;;  %v7444_v45 = vunpack.c.l.bf16 %v4663_v40  ;;  %v75_v46 = vunpack.c.h.bf16 %v4663_v40  ;;  %v4678_v47 = vld [vmem:[%s7431_s0 + $0x30] sm:$0xff]  ;;  %v4683_v48 = vld [vmem:[%s7431_s0 + $0x38] sm:$0xff]  ;;  %v3832_v49 = vld [vmem:[%s7431_s0 + $0x40] sm:$0xff]  ;;  %v4692_v50 = vunpack.c.l.bf16 %v3828_v41  ;;  %v82_v51 = vunpack.c.h.bf16 %v3828_v41 }
  0x2b   :  { %4115 = vmatpush3.bf16.msra.mxu0 %v4332_v15  ;;  %7594 = vst [vmem:[#allocation11_spill] sm:$0xff] %v4658_v38  ;;  %55 = vst [vmem:[#allocation2] sm:$0xff] %v4656_v36  ;;  %v4694_v52 = vunpack.c.l.bf16 %v3829_v42  ;;  %v89_v53 = vunpack.c.h.bf16 %v3829_v42  ;;  %v3833_v54 = vld [vmem:[%s7431_s0 + $0x48] sm:$0xff]  ;;  %v4702_v55 = vld [vmem:[%s7431_s0 + $0x50] sm:$0xff]  ;;  %v7446_v57 = vunpack.c.l.bf16 %v4678_v47  ;;  %v96_v58 = vunpack.c.h.bf16 %v4678_v47 }
  0x2c   :  { %4137 = vmatpush3.bf16.msra.mxu1 %v4333_v16  ;;  %4116 = vmatprep.subr.bf16.mxu0 %v4334_v17  ;;  %57 = vst.msk [vmem:[#allocation2 + $0x8] sm:$0xff] %vm56_vm0, %v54_v37  ;;  %63 = vst [vmem:[#allocation2 + $0x10] sm:$0xff] %v4658_v38  ;;  %v4707_v56 = vld [vmem:[%s7431_s0 + $0x58] sm:$0xff]  ;;  %v7443_v59 = vunpack.c.l.bf16 %v4683_v48  ;;  %v103_v60 = vunpack.c.h.bf16 %v4683_v48  ;;  %v3836_v61 = vld [vmem:[%s7431_s0 + $0x60] sm:$0xff]  ;;  %v4729_v63 = vunpack.c.l.bf16 %v3832_v49  ;;  %v110_v0 = vunpack.c.h.bf16 %v3832_v49 }
  0x2d   :  { %4138 = vmatprep.subr.bf16.mxu1 %v4335_v18  ;;  %64 = vst.msk [vmem:[#allocation2 + $0x18] sm:$0xff] %vm56_vm0, %v61_v39  ;;  %7595 = vst [vmem:[#allocation12_spill] sm:$0xff] %v4692_v50  ;;  %v3837_v62 = vld [vmem:[%s7431_s0 + $0x68] sm:$0xff]  ;;  %v4731_v1 = vunpack.c.l.bf16 %v3833_v54  ;;  %v117_v2 = vunpack.c.h.bf16 %v3833_v54  ;;  %v3838_v3 = vld [vmem:[%s7431_s0 + $0x70] sm:$0xff]  ;;  %v7445_v5 = vunpack.c.l.bf16 %v4702_v55  ;;  %v124_v6 = vunpack.c.h.bf16 %v4702_v55 }
  0x2e   :  { %7596 = vst [vmem:[#allocation13_spill] sm:$0xff] %v4694_v52  ;;  %70 = vst [vmem:[#allocation2 + $0x20] sm:$0xff] %v7447_v43  ;;  %v4739_v4 = vld [vmem:[%s7431_s0 + $0x78] sm:$0xff]  ;;  %v7442_v7 = vunpack.c.l.bf16 %v4707_v56  ;;  %v131_v8 = vunpack.c.h.bf16 %v4707_v56  ;;  %v3840_v9 = vld [vmem:[%s7431_s0 + $0x80] sm:$0xff]  ;;  %v4761_v11 = vunpack.c.l.bf16 %v3836_v61  ;;  %v138_v12 = vunpack.c.h.bf16 %v3836_v61 }
  0x2f   :  { %4117 = vmatpush3.bf16.msra.mxu0 %v4336_v19  ;;  %71 = vst.msk [vmem:[#allocation2 + $0x28] sm:$0xff] %vm56_vm0, %v68_v44  ;;  %77 = vst [vmem:[#allocation2 + $0x30] sm:$0xff] %v7444_v45  ;;  %v3841_v10 = vld [vmem:[%s7431_s0 + $0x88] sm:$0xff]  ;;  %v4763_v13 = vunpack.c.l.bf16 %v3837_v62  ;;  %v145_v14 = vunpack.c.h.bf16 %v3837_v62  ;;  %v3842_v15 = vld [vmem:[%s7431_s0 + $0x90] sm:$0xff]  ;;  %v4779_v17 = vunpack.c.l.bf16 %v3838_v3  ;;  %v152_v18 = vunpack.c.h.bf16 %v3838_v3 }
  0x30   :  { %4139 = vmatpush3.bf16.msra.mxu1 %v4337_v20  ;;  %4118 = vmatprep.subr.bf16.mxu0 %v4338_v21  ;;  %78 = vst.msk [vmem:[#allocation2 + $0x38] sm:$0xff] %vm56_vm0, %v75_v46  ;;  %84 = vst [vmem:[#allocation2 + $0x40] sm:$0xff] %v4692_v50  ;;  %v4771_v16 = vld [vmem:[%s7431_s0 + $0x98] sm:$0xff]  ;;  %v7441_v19 = vunpack.c.l.bf16 %v4739_v4  ;;  %v159_v20 = vunpack.c.h.bf16 %v4739_v4  ;;  %v3844_v21 = vld [vmem:[%s7431_s0 + $0xa0] sm:$0xff]  ;;  %v5004_v43 = vstv %s4914_s29  ;;  %s5835_s29 = sld [smem:[#allocation4 + $0x184]] }
  0x31   :  { %4140 = vmatprep.subr.bf16.mxu1 %v4339_v22  ;;  %85 = vst.msk [vmem:[#allocation2 + $0x48] sm:$0xff] %vm56_vm0, %v82_v51  ;;  %91 = vst [vmem:[#allocation2 + $0x50] sm:$0xff] %v4694_v52  ;;  %v3845_v22 = vld [vmem:[%s7431_s0 + $0xa8] sm:$0xff]  ;;  %v3848_v33 = vld [vmem:[%s7431_s0 + $0xc0] sm:$0xff]  ;;  %v4828_v37 = vunpack.c.l.bf16 %v3844_v21  ;;  %v194_v39 = vunpack.c.h.bf16 %v3844_v21 }
  0x32   :  { %92 = vst.msk [vmem:[#allocation2 + $0x58] sm:$0xff] %vm56_vm0, %v89_v53  ;;  %7597 = vst [vmem:[#allocation14_spill] sm:$0xff] %v4729_v63  ;;  %v3849_v34 = vld [vmem:[%s7431_s0 + $0xc8] sm:$0xff]  ;;  %v4830_v41 = vunpack.c.l.bf16 %v3845_v22  ;;  %v201_v42 = vunpack.c.h.bf16 %v3845_v22  ;;  %v3850_v44 = vld [vmem:[%s7431_s0 + $0xd0] sm:$0xff]  ;;  %v4861_v61 = vunpack.c.l.bf16 %v3848_v33  ;;  %v222_v62 = vunpack.c.h.bf16 %v3848_v33 }
  0x33   :  { %4119 = vmatpush3.bf16.msra.mxu0 %v4340_v23  ;;  %7598 = vst [vmem:[#allocation15_spill] sm:$0xff] %v4731_v1  ;;  %98 = vst [vmem:[#allocation2 + $0x60] sm:$0xff] %v7446_v57  ;;  %v4793_v23 = vunpack.c.l.bf16 %v3840_v9  ;;  %v3851_v46 = vld [vmem:[%s7431_s0 + $0xd8] sm:$0xff]  ;;  %v3854_v3 = vld [vmem:[%s7431_s0 + $0xf0] sm:$0xff] }
  0x34   :  { %4141 = vmatpush3.bf16.msra.mxu1 %v4341_v24  ;;  %4120 = vmatprep.subr.bf16.mxu0 %v4342_v25  ;;  %99 = vst.msk [vmem:[#allocation2 + $0x68] sm:$0xff] %vm56_vm0, %v96_v58  ;;  %105 = vst [vmem:[#allocation2 + $0x70] sm:$0xff] %v7443_v59  ;;  %v166_v24 = vunpack.c.h.bf16 %v3840_v9  ;;  %v4795_v25 = vunpack.c.l.bf16 %v3841_v10  ;;  %v3852_v58 = vld [vmem:[%s7431_s0 + $0xe0] sm:$0xff]  ;;  %v236_v9 = vunpack.c.h.bf16 %v3850_v44 }
  0x35   :  { %4142 = vmatprep.subr.bf16.mxu1 %v4343_v26  ;;  %106 = vst.msk [vmem:[#allocation2 + $0x78] sm:$0xff] %vm56_vm0, %v103_v60  ;;  %112 = vst [vmem:[#allocation2 + $0x80] sm:$0xff] %v4729_v63  ;;  %v173_v26 = vunpack.c.h.bf16 %v3841_v10  ;;  %v3853_v60 = vld [vmem:[%s7431_s0 + $0xe8] sm:$0xff]  ;;  %v4878_v10 = vunpack.c.l.bf16 %v3851_v46 }
  0x36   :  { %113 = vst.msk [vmem:[#allocation2 + $0x88] sm:$0xff] %vm56_vm0, %v110_v0  ;;  %119 = vst [vmem:[#allocation2 + $0x90] sm:$0xff] %v4731_v1  ;;  %v4863_v0 = vunpack.c.l.bf16 %v3849_v34  ;;  %v4896_v21 = vunpack.c.l.bf16 %v3853_v60  ;;  %v257_v22 = vunpack.c.h.bf16 %v3853_v60 }
  0x37   :  { %4121 = vmatpush3.bf16.msra.mxu0 %v4344_v27  ;;  %120 = vst.msk [vmem:[#allocation2 + $0x98] sm:$0xff] %vm56_vm0, %v117_v2  ;;  %7599 = vst [vmem:[#allocation16_spill] sm:$0xff] %v4761_v11  ;;  %v3846_v27 = vld [vmem:[%s7431_s0 + $0xb0] sm:$0xff]  ;;  %v229_v2 = vunpack.c.h.bf16 %v3849_v34 }
  0x38   :  { %4143 = vmatpush3.bf16.msra.mxu1 %v4345_v28  ;;  %4122 = vmatprep.subr.bf16.mxu0 %v4346_v29  ;;  %7600 = vst [vmem:[#allocation17_spill] sm:$0xff] %v4763_v13  ;;  %126 = vst [vmem:[#allocation2 + $0xa0] sm:$0xff] %v7445_v5  ;;  %v4803_v28 = vld [vmem:[%s7431_s0 + $0xb8] sm:$0xff]  ;;  %v4810_v29 = vunpack.c.l.bf16 %v3842_v15  ;;  %v4847_v49 = vunpack.c.l.bf16 %v3846_v27  ;;  %v208_v51 = vunpack.c.h.bf16 %v3846_v27  ;;  %v4908_v27 = vunpack.c.l.bf16 %v3854_v3 }
  0x39   :  { %4144 = vmatprep.subr.bf16.mxu1 %v4347_v30  ;;  %127 = vst.msk [vmem:[#allocation2 + $0xa8] sm:$0xff] %vm56_vm0, %v124_v6  ;;  %133 = vst [vmem:[#allocation2 + $0xb0] sm:$0xff] %v7442_v7  ;;  %v180_v30 = vunpack.c.h.bf16 %v3842_v15  ;;  %v7439_v53 = vunpack.c.l.bf16 %v4803_v28  ;;  %v215_v54 = vunpack.c.h.bf16 %v4803_v28  ;;  %v3855_v6 = vld [vmem:[%s7431_s0 + $0xf8] sm:$0xff]  ;;  %v3857_v15 = vld [vmem:[%s7431_s0 + $0x108] sm:$0xff] }
  0x3a   :  { %134 = vst.msk [vmem:[#allocation2 + $0xb8] sm:$0xff] %vm56_vm0, %v131_v8  ;;  %140 = vst [vmem:[#allocation2 + $0xc0] sm:$0xff] %v4761_v11  ;;  %v4876_v8 = vunpack.c.l.bf16 %v3850_v44  ;;  %v271_v33 = vunpack.c.h.bf16 %v3855_v6  ;;  %v285_v44 = vunpack.c.h.bf16 %v3857_v15 }
  0x3b   :  { %4123 = vmatpush3.bf16.msra.mxu0 %v4348_v31  ;;  %141 = vst.msk [vmem:[#allocation2 + $0xc8] sm:$0xff] %vm56_vm0, %v138_v12  ;;  %147 = vst [vmem:[#allocation2 + $0xd0] sm:$0xff] %v4763_v13  ;;  %v7440_v31 = vunpack.c.l.bf16 %v4771_v16  ;;  %v243_v12 = vunpack.c.h.bf16 %v3851_v46  ;;  %v4924_v46 = vld [vmem:[#allocation2 + $0x8] sm:$0xff] }
  0x3c   :  { %4145 = vmatpush3.bf16.msra.mxu1 %v4349_v32  ;;  %148 = vst.msk [vmem:[#allocation2 + $0xd8] sm:$0xff] %vm56_vm0, %v145_v14  ;;  %7601 = vst [vmem:[#allocation18_spill] sm:$0xff] %v4793_v23  ;;  %v187_v32 = vunpack.c.h.bf16 %v4771_v16  ;;  %v3856_v14 = vld [vmem:[%s7431_s0 + $0x100] sm:$0xff] }
  0x3d   :  { %154 = vst [vmem:[#allocation2 + $0xe0] sm:$0xff] %v4779_v17  ;;  %155 = vst.msk [vmem:[#allocation2 + $0xe8] sm:$0xff] %vm56_vm0, %v152_v18  ;;  %v4894_v18 = vunpack.c.l.bf16 %v3852_v58  ;;  %v4920_v34 = vunpack.c.l.bf16 %v3856_v14 }
  0x3e   :  { %161 = vst [vmem:[#allocation2 + $0xf0] sm:$0xff] %v7441_v19  ;;  %162 = vst.msk [vmem:[#allocation2 + $0xf8] sm:$0xff] %vm56_vm0, %v159_v20  ;;  %v250_v20 = vunpack.c.h.bf16 %v3852_v58  ;;  %v4986_v19 = vstv %s4888_s21  ;;  %s5513_s21 = sld [smem:[#allocation4 + $0x108]] }
  0x3f   :  { %168 = vst [vmem:[#allocation2 + $0x100] sm:$0xff] %v4793_v23  ;;  %169 = vst.msk [vmem:[#allocation2 + $0x108] sm:$0xff] %vm56_vm0, %v166_v24  ;;  %v3858_v24 = vld [vmem:[%s7431_s0 + $0x110] sm:$0xff]  ;;  %v353_v5 = vmul.f32 %v4986_v19, %v4828_v37 }
  0x40   :  { %175 = vst [vmem:[#allocation2 + $0x110] sm:$0xff] %v4795_v25  ;;  %176 = vst.msk [vmem:[#allocation2 + $0x118] sm:$0xff] %vm56_vm0, %v173_v26  ;;  %v3859_v26 = vld [vmem:[%s7431_s0 + $0x118] sm:$0xff]  ;;  %v292_v58 = vunpack.c.h.bf16 %v3858_v24  ;;  %s4940_s0 = sld [smem:[#allocation4 + $0x8]] }
  0x41   :  { %7602 = vst [vmem:[#allocation19_spill] sm:$0xff] %v4828_v37  ;;  %182 = vst [vmem:[#allocation2 + $0x120] sm:$0xff] %v4810_v29  ;;  %v4934_v60 = vunpack.c.l.bf16 %v3859_v26 }
  0x42   :  { %183 = vst.msk [vmem:[#allocation2 + $0x128] sm:$0xff] %vm56_vm0, %v180_v30  ;;  %189 = vst [vmem:[#allocation2 + $0x130] sm:$0xff] %v7440_v31  ;;  %v264_v30 = vunpack.c.h.bf16 %v3854_v3  ;;  %v4938_v3 = vld [vmem:[#allocation2 + $0xc8] sm:$0xff]  ;;  %v4983_v31 = vstv %s4886_s20  ;;  %s6772_s20 = sld [smem:[#allocation4 + $0x303]] }
  0x43   :  { %190 = vst.msk [vmem:[#allocation2 + $0x138] sm:$0xff] %vm56_vm0, %v187_v32  ;;  %196 = vst [vmem:[#allocation2 + $0x140] sm:$0xff] %v4828_v37  ;;  %v4910_v32 = vunpack.c.l.bf16 %v3855_v6  ;;  %v4947_v6 = vstv %s4820_s25  ;;  %v345_v59 = vmul.f32 %v4983_v31, %v4793_v23  ;;  %s5020_s25 = sld [smem:[#allocation6]] }
  0x44   :  { %197 = vst.msk [vmem:[#allocation2 + $0x148] sm:$0xff] %vm56_vm0, %v194_v39  ;;  %203 = vst [vmem:[#allocation2 + $0x150] sm:$0xff] %v4830_v41  ;;  %v278_v39 = vunpack.c.h.bf16 %v3856_v14  ;;  %v4956_v14 = vstv %s4840_s9  ;;  %s5437_s9 = sld [smem:[#allocation4 + $0x107]] }
  0x45   :  { %204 = vst.msk [vmem:[#allocation2 + $0x158] sm:$0xff] %vm56_vm0, %v201_v42  ;;  %7603 = vst [vmem:[#allocation20_spill] sm:$0xff] %v4861_v61  ;;  %v4922_v42 = vunpack.c.l.bf16 %v3857_v15  ;;  %v315_v15 = vmul.f32 %v4947_v6, %v4656_v36  ;;  %v5077_v36 = vld [vmem:[#allocation2 + $0x28] sm:$0xff] }
  0x46   :  { %210 = vst [vmem:[#allocation2 + $0x160] sm:$0xff] %v4847_v49  ;;  %211 = vst.msk [vmem:[#allocation2 + $0x168] sm:$0xff] %vm56_vm0, %v208_v51  ;;  %v4926_v51 = vld [vmem:[#allocation2 + $0x48] sm:$0xff] }
  0x47   :  { %217 = vst [vmem:[#allocation2 + $0x170] sm:$0xff] %v7439_v53  ;;  %218 = vst.msk [vmem:[#allocation2 + $0x178] sm:$0xff] %vm56_vm0, %v215_v54  ;;  %v4932_v54 = vunpack.c.l.bf16 %v3858_v24 }
  0x48   :  { %224 = vst [vmem:[#allocation2 + $0x180] sm:$0xff] %v4861_v61  ;;  %225 = vst.msk [vmem:[#allocation2 + $0x188] sm:$0xff] %vm56_vm0, %v222_v62  ;;  %v299_v62 = vunpack.c.h.bf16 %v3859_v26  ;;  %v4970_v26 = vld [vmem:[#allocation2 + $0x108] sm:$0xff] }
  0x49   :  { %231 = vst [vmem:[#allocation2 + $0x190] sm:$0xff] %v4863_v0  ;;  %232 = vst.msk [vmem:[#allocation2 + $0x198] sm:$0xff] %vm56_vm0, %v229_v2  ;;  %v4936_v2 = vld [vmem:[#allocation2 + $0x88] sm:$0xff]  ;;  %v346_v45 = vmul.f32 %v4983_v31, %v4970_v26 }
  0x4a   :  { %7604 = vst [vmem:[#allocation21_spill] sm:$0xff] %v4894_v18  ;;  %7605 = vst [vmem:[#allocation22_spill] sm:$0xff] %v4896_v21 }
  0x4b   :  { %238 = vst [vmem:[#allocation2 + $0x1a0] sm:$0xff] %v4876_v8  ;;  %239 = vst.msk [vmem:[#allocation2 + $0x1a8] sm:$0xff] %vm56_vm0, %v236_v9  ;;  %v4950_v9 = vstv %s4822_s26  ;;  %s5022_s26 = sld [smem:[#allocation4 + $0x80]] }
  0x4c   :  { %245 = vst [vmem:[#allocation2 + $0x1b0] sm:$0xff] %v4878_v10  ;;  %246 = vst.msk [vmem:[#allocation2 + $0x1b8] sm:$0xff] %vm56_vm0, %v243_v12  ;;  %v4953_v12 = vstv %s4838_s8  ;;  %v322_v24 = vmul.f32 %v4950_v9, %v4926_v51  ;;  %s5047_s8 = sld [smem:[#allocation4 + $0x82]] }
  0x4d   :  { %7606 = vst [vmem:[#allocation23_spill] sm:$0xff] %v4908_v27  ;;  %252 = vst [vmem:[#allocation2 + $0x1c0] sm:$0xff] %v4894_v18 }
  0x4e   :  { %253 = vst.msk [vmem:[#allocation2 + $0x1c8] sm:$0xff] %vm56_vm0, %v250_v20  ;;  %259 = vst [vmem:[#allocation2 + $0x1d0] sm:$0xff] %v4896_v21  ;;  %v316_v20 = vmul.f32 %v4947_v6, %v4924_v46 }
  0x4f   :  { %260 = vst.msk [vmem:[#allocation2 + $0x1d8] sm:$0xff] %vm56_vm0, %v257_v22  ;;  %7607 = vst [vmem:[#allocation24_spill] sm:$0xff] %v4920_v34  ;;  %v321_v22 = vmul.f32 %v4950_v9, %v4692_v50  ;;  %v4988_v7 = vld [vmem:[#allocation2 + $0x188] sm:$0xff] }
  0x50   :  { %7608 = vst [vmem:[#allocation25_spill] sm:$0xff] %v4924_v46  ;;  %7609 = vst [vmem:[#allocation26_spill] sm:$0xff] %v4926_v51  ;;  %v324_v53 = vadd.f32 %v322_v24, %v316_v20  ;;  %v5053_v51 = vld [vmem:[#allocation2 + $0x198] sm:$0xff]  ;;  %v405_v46 = vmul.f32 %v4983_v31, %v4795_v25 }
  0x51   :  { %266 = vst [vmem:[#allocation2 + $0x1e0] sm:$0xff] %v4908_v27  ;;  %267 = vst.msk [vmem:[#allocation2 + $0x1e8] sm:$0xff] %vm56_vm0, %v264_v30  ;;  %v4972_v30 = vld [vmem:[#allocation2 + $0x148] sm:$0xff] }
  0x52   :  { %273 = vst [vmem:[#allocation2 + $0x1f0] sm:$0xff] %v4910_v32  ;;  %274 = vst.msk [vmem:[#allocation2 + $0x1f8] sm:$0xff] %vm56_vm0, %v271_v33  ;;  %v329_v33 = vmul.f32 %v4953_v12, %v4729_v63  ;;  %v354_v57 = vmul.f32 %v4986_v19, %v4972_v30 }
  0x53   :  { %7610 = vst [vmem:[#allocation27_spill] sm:$0xff] %v4934_v60  ;;  %7611 = vst [vmem:[#allocation28_spill] sm:$0xff] %v4936_v2 }
  0x54   :  { %7612 = vst [vmem:[#allocation29_spill] sm:$0xff] %v4938_v3  ;;  %280 = vst [vmem:[#allocation2 + $0x200] sm:$0xff] %v4920_v34 }
  0x55   :  { %281 = vst.msk [vmem:[#allocation2 + $0x208] sm:$0xff] %vm56_vm0, %v278_v39  ;;  %287 = vst [vmem:[#allocation2 + $0x210] sm:$0xff] %v4922_v42  ;;  %v330_v39 = vmul.f32 %v4953_v12, %v4936_v2  ;;  %v5001_v24 = vld [vmem:[#allocation2 + $0x1c8] sm:$0xff] }
  0x56   :  { %288 = vst.msk [vmem:[#allocation2 + $0x218] sm:$0xff] %vm56_vm0, %v285_v44  ;;  %294 = vst [vmem:[#allocation2 + $0x220] sm:$0xff] %v4932_v54  ;;  %v337_v44 = vmul.f32 %v4956_v14, %v4761_v11  ;;  %v5027_v11 = vstv %s4940_s0  ;;  %s6804_s0 = sld [smem:[#allocation4 + $0x306]] }
  0x57   :  { %295 = vst.msk [vmem:[#allocation2 + $0x228] sm:$0xff] %vm56_vm0, %v292_v58  ;;  %301 = vst [vmem:[#allocation2 + $0x230] sm:$0xff] %v4934_v60  ;;  %v338_v58 = vmul.f32 %v4956_v14, %v4938_v3  ;;  %v332_v20 = vadd.f32 %v330_v39, %v324_v53  ;;  %v5006_v3 = vld [vmem:[#allocation2 + $0x18] sm:$0xff]  ;;  %v370_v53 = vmul.f32 %v5004_v43, %v5001_v24 }
  0x58   :  { %302 = vst.msk [vmem:[#allocation2 + $0x238] sm:$0xff] %vm56_vm0, %v299_v62  ;;  %7613 = vst [vmem:[#allocation30_spill] sm:$0xff] %v4970_v26  ;;  %v323_v62 = vadd.f32 %v321_v22, %v315_v15  ;;  %v4999_v22 = vstv %s4912_s28  ;;  %v5018_v39 = vld [vmem:[#allocation2 + $0x98] sm:$0xff]  ;;  %s5400_s28 = sld [smem:[#allocation4 + $0x104]] }
  0x59   :  { %7614 = vst [vmem:[#allocation31_spill] sm:$0xff] %v4972_v30  ;;  %7615 = vst [vmem:[#allocation32_spill] sm:$0xff] %v4988_v7  ;;  %v361_v26 = vmul.f32 %v4999_v22, %v4861_v61  ;;  %v362_v37 = vmul.f32 %v4999_v22, %v4988_v7  ;;  %v369_v30 = vmul.f32 %v5004_v43, %v4894_v18  ;;  %v5031_v7 = vld [vmem:[#allocation2 + $0xd8] sm:$0xff] }
  0x5a   :  { %v331_v15 = vadd.f32 %v329_v33, %v323_v62  ;;  %7616 = vst [vmem:[#allocation33_spill] sm:$0xff] %v5001_v24  ;;  %7617 = vst [vmem:[#allocation34_spill] sm:$0xff] %v5006_v3  ;;  %v5016_v33 = vld [vmem:[#allocation2 + $0x58] sm:$0xff]  ;;  %v340_v23 = vadd.f32 %v338_v58, %v332_v20  ;;  %v383_v18 = vmul.f32 %v4947_v6, %v4658_v38 }
  0x5b   :  { %7618 = vst [vmem:[#allocation35_spill] sm:$0xff] %v5016_v33  ;;  %7619 = vst [vmem:[#allocation36_spill] sm:$0xff] %v5018_v39  ;;  %v377_v24 = vmul.f32 %v5027_v11, %v4920_v34  ;;  %v387_v58 = vmul.f32 %v4950_v9, %v4694_v52  ;;  %v5045_v20 = vld [vmem:[#allocation2 + $0x158] sm:$0xff]  ;;  %v388_v34 = vmul.f32 %v5016_v33, %v4950_v9  ;;  %v4354_v52 = vld [vmem:[%s7434_s3 + $0x140] sm:$0xff]  }
  0x5c   :  { %v339_v62 = vadd.f32 %v337_v44, %v331_v15  ;;  %v5024_v61 = vld [vmem:[#allocation2 + $0x208] sm:$0xff]  ;;  %7621 = vst [vmem:[#allocation38_spill] sm:$0xff] %v5031_v7  ;;  %v384_v44 = vmul.f32 %v5006_v3, %v4947_v6  ;;  %v5043_v15 = vld [vmem:[#allocation2 + $0x118] sm:$0xff]  ;;  %v348_v63 = vadd.f32 %v346_v45, %v340_v23  ;;  %7622 = vst [vmem:[#allocation39_spill] sm:$0xff] %v5053_v51  ;;  %4152 = vmatprep.subr.bf16.mxu0 %v4354_v52 }
  0x5d   :  { %7620 = vst [vmem:[#allocation37_spill] sm:$0xff] %v5024_v61  ;;  %v378_v2 = vmul.f32 %v5027_v11, %v5024_v61  ;;  %v393_v61 = vmul.f32 %v4953_v12, %v4731_v1  ;;  %v389_v3 = vadd.f32 %v387_v58, %v383_v18  ;;  %v394_v50 = vmul.f32 %v5018_v39, %v4953_v12  ;;  %v4355_v23 = vld [vmem:[%s7434_s3 + $0x1c0] sm:$0xff]   ;;  %v5069_v18 = vld [vmem:[#allocation2 + $0x1d8] sm:$0xff]  ;;  %vm5298_vm3 = vmor %vm558_vm2, %vm557_vm1 }
  0x5e   :  { %v347_v38 = vadd.f32 %v345_v59, %v339_v62  ;;  %v399_v59 = vmul.f32 %v4956_v14, %v4763_v13  ;;  %v400_v45 = vmul.f32 %v5031_v7, %v4956_v14  ;;  %v356_v1 = vadd.f32 %v354_v57, %v348_v63  ;;  %7623 = vst [vmem:[#allocation40_spill] sm:$0xff] %v5069_v18  ;;  %v5081_v52 = vld [vmem:[#allocation2 + $0x218] sm:$0xff] }
  0x5f   :  { %v390_v33 = vadd.f32 %v388_v34, %v384_v44  ;;  %v395_v58 = vadd.f32 %v393_v61, %v389_v3  ;;  %v406_v13 = vmul.f32 %v5043_v15, %v4983_v31  ;;  %v411_v7 = vmul.f32 %v4986_v19, %v4830_v41  ;;  %4174 = vmatprep.subr.bf16.mxu1 %v4355_v23  ;;  %v5083_v61 = vld [vmem:[#allocation2 + $0x68] sm:$0xff] }
  0x60   :  { %v355_v62 = vadd.f32 %v353_v5, %v347_v38  ;;  %v412_v39 = vmul.f32 %v5045_v20, %v4986_v19  ;;  %v364_v57 = vadd.f32 %v362_v37, %v356_v1  ;;  %v417_v5 = vmul.f32 %v4999_v22, %v4863_v0 }
  0x61   :  { %v396_v63 = vadd.f32 %v394_v50, %v390_v33  ;;  %v401_v34 = vadd.f32 %v399_v59, %v395_v58  ;;  %v418_v3 = vmul.f32 %v5053_v51, %v4999_v22  ;;  %v423_v44 = vmul.f32 %v5004_v43, %v4896_v21  ;;  %v5095_v33 = vld [vmem:[#allocation2 + $0xa8] sm:$0xff] }
  0x62   :  { %v363_v38 = vadd.f32 %v361_v26, %v355_v62  ;;  %v424_v23 = vmul.f32 %v5069_v18, %v5004_v43  ;;  %v372_v1 = vadd.f32 %v370_v53, %v364_v57  ;;  %v429_v26 = vmul.f32 %v5027_v11, %v4922_v42  ;;  %v5104_v51 = vld [vmem:[#allocation2 + $0xe8] sm:$0xff] }
  0x63   :  { %v402_v37 = vadd.f32 %v400_v45, %v396_v63  ;;  %v407_v59 = vadd.f32 %v405_v46, %v401_v34  ;;  %v430_v62 = vmul.f32 %v5081_v52, %v5027_v11  ;;  %v7624_v58 = vunpack.c.l.bf16 %v4654_v35  ;;  %7625 = vst [vmem:[#allocation41_spill] sm:$0xff] %v5104_v51  ;;  %v5113_v57 = vld [vmem:[#allocation2 + $0x128] sm:$0xff] }
  0x64   :  { %v371_v50 = vadd.f32 %v369_v30, %v363_v38  ;;  %v438_v18 = vmul.f32 %v5077_v36, %v4947_v6  ;;  %v5108_v53 = vadd.f32 %v378_v2, %v372_v1  ;;  %v7626_v38 = vunpack.c.l.bf16 %v4678_v47  ;;  %7627 = vst [vmem:[#allocation42_spill] sm:$0xff] %v5113_v57  ;;  %v5122_v2 = vld [vmem:[#allocation2 + $0x168] sm:$0xff] }
  0x65   :  { %v437_v21 = vmul.f32 %v4947_v6, %v7624_v58  ;;  %v408_v45 = vadd.f32 %v406_v13, %v402_v37  ;;  %v413_v63 = vadd.f32 %v411_v7, %v407_v59  ;;  %v442_v35 = vmul.f32 %v5083_v61, %v4950_v9  ;;  %7629 = vst [vmem:[#allocation43_spill] sm:$0xff] %v5122_v2  ;;  %v5128_v1 = vld [vmem:[#allocation2 + $0x1a8] sm:$0xff] }
  0x66   :  { %v5106_v30 = vadd.f32 %v377_v24, %v371_v50  ;;  %v441_v46 = vmul.f32 %v4950_v9, %v7626_v38  ;;  %v7628_v34 = vunpack.c.l.bf16 %v4702_v55  ;;  %v448_v24 = vmul.f32 %v5095_v33, %v4953_v12  ;;  %7630 = vst [vmem:[#allocation44_spill] sm:$0xff] %v5128_v1 }
  0x67   :  { %v414_v13 = vadd.f32 %v412_v39, %v408_v45  ;;  %v453_v47 = vmul.f32 %v4956_v14, %v4779_v17  ;;  %v454_v7 = vmul.f32 %v5104_v51, %v4956_v14  ;;  %v419_v37 = vadd.f32 %v417_v5, %v413_v63  ;;  %v5140_v51 = vld [vmem:[#allocation2 + $0x228] sm:$0xff] }
  0x68   :  { %v447_v58 = vmul.f32 %v4953_v12, %v7628_v34  ;;  %v443_v50 = vadd.f32 %v441_v46, %v437_v21  ;;  %v444_v59 = vadd.f32 %v442_v35, %v438_v18  ;;  %v459_v55 = vmul.f32 %v4983_v31, %v4810_v29  ;;  %v5134_v34 = vld [vmem:[#allocation2 + $0x1e8] sm:$0xff] }
  0x69   :  { %v460_v38 = vmul.f32 %v5113_v57, %v4983_v31  ;;  %7631 = vst [vmem:[#allocation45_spill] sm:$0xff] %v5134_v34  ;;  %v420_v39 = vadd.f32 %v418_v3, %v414_v13  ;;  %v465_v45 = vmul.f32 %v4986_v19, %v4847_v49  ;;  %v466_v46 = vmul.f32 %v5122_v2, %v4986_v19  ;;  %v5146_v57 = vld [vmem:[#allocation2 + $0x38] sm:$0xff] }
  0x6a   :  { %v449_v21 = vadd.f32 %v447_v58, %v443_v50  ;;  %v425_v5 = vadd.f32 %v423_v44, %v419_v37  ;;  %v450_v18 = vadd.f32 %v448_v24, %v444_v59  ;;  %v471_v63 = vmul.f32 %v4999_v22, %v4876_v8  ;;  %v5152_v2 = vld [vmem:[#allocation2 + $0x78] sm:$0xff] }
  0x6b   :  { %v472_v35 = vmul.f32 %v5128_v1, %v4999_v22  ;;  %v426_v3 = vadd.f32 %v424_v23, %v420_v39  ;;  %v477_v13 = vmul.f32 %v5004_v43, %v4908_v27  ;;  %v478_v50 = vmul.f32 %v5134_v34, %v5004_v43  ;;  %v5158_v1 = vld [vmem:[#allocation2 + $0xb8] sm:$0xff] }
  0x6c   :  { %v455_v58 = vadd.f32 %v453_v47, %v449_v21  ;;  %v431_v44 = vadd.f32 %v429_v26, %v425_v5  ;;  %v456_v24 = vadd.f32 %v454_v7, %v450_v18  ;;  %v483_v37 = vmul.f32 %v5027_v11, %v4932_v54  ;;  %v5165_v27 = vld [vmem:[#allocation2 + $0xf8] sm:$0xff] }
  0x6d   :  { %v484_v59 = vmul.f32 %v5140_v51, %v5027_v11  ;;  %v432_v23 = vadd.f32 %v430_v62, %v426_v3  ;;  %v7632_v39 = vunpack.c.l.bf16 %v4663_v40  ;;  %v492_v34 = vmul.f32 %v5146_v57, %v4947_v6 }
  0x6e   :  { %v461_v47 = vadd.f32 %v459_v55, %v455_v58  ;;  %v433_v26 = vmax.f32 %v5106_v30, %v431_v44  ;;  %v462_v7 = vadd.f32 %v460_v38, %v456_v24  ;;  %v7633_v5 = vunpack.c.l.bf16 %v4683_v48  ;;  %v5173_v55 = vld [vmem:[#allocation2 + $0x138] sm:$0xff] }
  0x6f   :  { %v491_v21 = vmul.f32 %v4947_v6, %v7632_v39  ;;  %v496_v62 = vmul.f32 %v5152_v2, %v4950_v9  ;;  %v434_v40 = vmax.f32 %v5108_v53, %v432_v23  ;;  %v7634_v58 = vunpack.c.l.bf16 %v4707_v56  ;;  %v5181_v38 = vld [vmem:[#allocation2 + $0x178] sm:$0xff] }
  0x70   :  { %v495_v18 = vmul.f32 %v4950_v9, %v7633_v5  ;;  %v467_v3 = vadd.f32 %v465_v45, %v461_v47  ;;  %v502_v30 = vmul.f32 %v5158_v1, %v4953_v12  ;;  %v468_v48 = vadd.f32 %v466_v46, %v462_v7  ;;  %v5186_v5 = vld [vmem:[#allocation2 + $0x1b8] sm:$0xff] }
  0x71   :  { %v501_v6 = vmul.f32 %v4953_v12, %v7634_v58  ;;  %v498_v24 = vadd.f32 %v496_v62, %v492_v34  ;;  %v7635_v39 = vunpack.c.l.bf16 %v4739_v4  ;;  %v508_v56 = vmul.f32 %v5165_v27, %v4956_v14  ;;  %v5195_v46 = vld [vmem:[#allocation2 + $0x1f8] sm:$0xff] }
  0x72   :  { %v497_v44 = vadd.f32 %v495_v18, %v491_v21  ;;  %v473_v53 = vadd.f32 %v471_v63, %v467_v3  ;;  %v7636_v45 = vunpack.c.l.bf16 %v4771_v16  ;;  %v514_v12 = vmul.f32 %v5173_v55, %v4983_v31  ;;  %7637 = vst [vmem:[#allocation46_spill] sm:$0xff] %v5195_v46  ;;  %v5200_v63 = vld [vmem:[#allocation2 + $0x238] sm:$0xff] }
  0x73   :  { %v507_v9 = vmul.f32 %v4956_v14, %v7635_v39  ;;  %v474_v34 = vadd.f32 %v472_v35, %v468_v48  ;;  %v504_v4 = vadd.f32 %v502_v30, %v498_v24  ;;  %v7638_v21 = vunpack.c.l.bf16 %v4803_v28  ;;  %7639 = vst [vmem:[#allocation47_spill] sm:$0xff] %v5200_v63 }
  0x74   :  { %v513_v23 = vmul.f32 %v4983_v31, %v7636_v45  ;;  %v503_v47 = vadd.f32 %v501_v6, %v497_v44  ;;  %v479_v18 = vadd.f32 %v477_v13, %v473_v53  ;;  %v520_v16 = vmul.f32 %v5181_v38, %v4986_v19  ;;  %v7642_v45 = vld [vmem:[#allocation12_spill] sm:$0xff] }
  0x75   :  { %v519_v7 = vmul.f32 %v4986_v19, %v7638_v21  ;;  %v525_v14 = vmul.f32 %v4999_v22, %v4878_v10  ;;  %v526_v31 = vmul.f32 %v5186_v5, %v4999_v22  ;;  %v480_v28 = vadd.f32 %v478_v50, %v474_v34 }
  0x76   :  { %v509_v35 = vadd.f32 %v507_v9, %v503_v47  ;;  %v510_v62 = vadd.f32 %v508_v56, %v504_v4  ;;  %v531_v13 = vmul.f32 %v5004_v43, %v4910_v32  ;;  %v485_v19 = vadd.f32 %v483_v37, %v479_v18  ;;  %v7641_v56 = vld [vmem:[#allocation25_spill] sm:$0xff]  ;;  %v7644_v47 = vld [vmem:[#allocation14_spill] sm:$0xff] }
  0x77   :  { %v532_v3 = vmul.f32 %v5195_v46, %v5004_v43  ;;  %v537_v22 = vmul.f32 %v5027_v11, %v4934_v60  ;;  %v538_v58 = vmul.f32 %v5200_v63, %v5027_v11  ;;  %v486_v6 = vadd.f32 %v484_v59, %v480_v28  ;;  %v7640_v11 = vld [vmem:[#allocation10_spill] sm:$0xff] }
  0x78   :  { %v515_v50 = vadd.f32 %v513_v23, %v509_v35  ;;  %v516_v30 = vadd.f32 %v514_v12, %v510_v62  ;;  %v544_v48 = vstv %s5020_s25  ;;  %v487_v44 = vmax.f32 %v433_v26, %v485_v19  ;;  %v7643_v12 = vld [vmem:[#allocation26_spill] sm:$0xff]  ;;  %v7646_v62 = vld [vmem:[#allocation16_spill] sm:$0xff]  ;;  %s5413_s25 = sld [smem:[#allocation4 + $0x105]] }
  0x79   :  { %v5222_v24 = vstv %s5022_s26  ;;  %v5225_v39 = vstv %s5033_s30  ;;  %v5228_v9 = vstv %s5047_s8  ;;  %v488_v43 = vmax.f32 %v434_v40, %v486_v6  ;;  %v7647_v6 = vld [vmem:[#allocation29_spill] sm:$0xff]  ;;  %v7668_v46 = vld [vmem:[#allocation38_spill] sm:$0xff]  ;;  %s5430_s8 = sld [smem:[#allocation4 + $0x106]]  ;;  %s5862_s26 = sld [smem:[#allocation4 + $0x185]] }
  0x7a   :  { %v521_v37 = vadd.f32 %v519_v7, %v515_v50  ;;  %v522_v53 = vadd.f32 %v520_v16, %v516_v30  ;;  %v565_v59 = vmul.f32 %v5222_v24, %v7640_v11  ;;  %v566_v26 = vmul.f32 %v5222_v24, %v7641_v56  ;;  %v7645_v7 = vld [vmem:[#allocation28_spill] sm:$0xff]  ;;  %v7648_v56 = vld [vmem:[#allocation18_spill] sm:$0xff]  ;;  %s5864_s30 = sld [smem:[#allocation4 + $0x186]] }
  0x7b   :  { %v571_v23 = vmul.f32 %v5225_v39, %v7642_v45  ;;  %v572_v34 = vmul.f32 %v5225_v39, %v7643_v12  ;;  %v579_v4 = vmul.f32 %v5228_v9, %v7644_v47  ;;  %v580_v18 = vmul.f32 %v5228_v9, %v7645_v7  ;;  %v7651_v7 = vld [vmem:[#allocation31_spill] sm:$0xff] }
  0x7c   :  { %v527_v40 = vadd.f32 %v525_v14, %v521_v37  ;;  %v528_v21 = vadd.f32 %v526_v31, %v522_v53  ;;  %v5247_v16 = vstv %s5091_s11  ;;  %v5256_v30 = vstv %s5208_s12  ;;  %s6534_s11 = sld [smem:[#allocation4 + $0x287]]  ;;  %s6742_s12 = sld [smem:[#allocation4 + $0x300]] }
  0x7d   :  { %v573_v28 = vadd.f32 %v571_v23, %v565_v59  ;;  %v574_v35 = vadd.f32 %v572_v34, %v566_v26  ;;  %v587_v19 = vmul.f32 %v5247_v16, %v7646_v62  ;;  %v588_v50 = vmul.f32 %v5247_v16, %v7647_v6  ;;  %v7649_v26 = vld [vmem:[#allocation30_spill] sm:$0xff]  ;;  %v7650_v34 = vld [vmem:[#allocation19_spill] sm:$0xff] }
  0x7e   :  { %v533_v14 = vadd.f32 %v531_v13, %v527_v40  ;;  %v534_v31 = vadd.f32 %v532_v3, %v528_v21  ;;  %v5259_v37 = vstv %s5212_s13  ;;  %v595_v59 = vmul.f32 %v5256_v30, %v7648_v56  ;;  %s6108_s13 = sld [smem:[#allocation4 + $0x203]] }
  0x7f   :  { %v581_v53 = vadd.f32 %v579_v4, %v573_v28  ;;  %v582_v11 = vadd.f32 %v580_v18, %v574_v35  ;;  %v596_v45 = vmul.f32 %v5256_v30, %v7649_v26  ;;  %v603_v47 = vmul.f32 %v5259_v37, %v7650_v34  ;;  %v7652_v35 = vld [vmem:[#allocation20_spill] sm:$0xff]  ;;  %v7655_v26 = vld [vmem:[#allocation33_spill] sm:$0xff] }
  0x80   :  { %v539_v23 = vadd.f32 %v537_v22, %v533_v14  ;;  %v540_v12 = vadd.f32 %v538_v58, %v534_v31  ;;  %v604_v13 = vmul.f32 %v5259_v37, %v7651_v7  ;;  %v5270_v21 = vstv %s5230_s14  ;;  %v7653_v22 = vld [vmem:[#allocation32_spill] sm:$0xff]  ;;  %v7654_v31 = vld [vmem:[#allocation21_spill] sm:$0xff]  ;;  %s6118_s14 = sld [smem:[#allocation4 + $0x204]] }
  0x81   :  { %v589_v3 = vadd.f32 %v587_v19, %v581_v53  ;;  %v590_v40 = vadd.f32 %v588_v50, %v582_v11  ;;  %v5273_v4 = vstv %s5232_s15  ;;  %v611_v62 = vmul.f32 %v5270_v21, %v7652_v35  ;;  %v7657_v34 = vld [vmem:[#allocation24_spill] sm:$0xff]  ;;  %v7659_v35 = vld [vmem:[#allocation34_spill] sm:$0xff]  ;;  %s5787_s15 = sld [smem:[#allocation6 + $0x2]] }
  0x82   :  { %v541_v18 = vmax.f32 %v487_v44, %v539_v23  ;;  %v542_v28 = vmax.f32 %v488_v43, %v540_v12  ;;  %v612_v58 = vmul.f32 %v5270_v21, %v7653_v22  ;;  %v619_v56 = vmul.f32 %v5273_v4, %v7654_v31  ;;  %v7656_v44 = vld [vmem:[#allocation11_spill] sm:$0xff] }
  0x83   :  { %v597_v6 = vadd.f32 %v595_v59, %v589_v3  ;;  %v598_v14 = vadd.f32 %v596_v45, %v590_v40  ;;  %v620_v19 = vmul.f32 %v5273_v4, %v7655_v26  ;;  %v5284_v11 = vstv %s5249_s16  ;;  %v7658_v59 = vld [vmem:[#allocation37_spill] sm:$0xff]  ;;  %v7665_v31 = vld [vmem:[#allocation15_spill] sm:$0xff]  ;;  %s5799_s16 = sld [smem:[#allocation4 + $0x180]] }
  0x84   :  { %v545_v50 = vadd.f32 %v544_v48, %v541_v18  ;;  %v546_v53 = vadd.f32 %v544_v48, %v542_v28  ;;  %v633_v43 = vmul.f32 %v5222_v24, %v7656_v44  ;;  %v627_v7 = vmul.f32 %v5284_v11, %v7657_v34  ;;  %v7660_v18 = vld [vmem:[#allocation13_spill] sm:$0xff]  ;;  %v7666_v44 = vld [vmem:[#allocation36_spill] sm:$0xff] }
  0x85   :  { %v605_v23 = vadd.f32 %v603_v47, %v597_v6  ;;  %v606_v12 = vadd.f32 %v604_v13, %v598_v14  ;;  %v628_v45 = vmul.f32 %v5284_v11, %v7658_v59  ;;  %v634_v22 = vmul.f32 %v5222_v24, %v7659_v35  ;;  %v7664_v6 = vld [vmem:[#allocation35_spill] sm:$0xff]  ;;  %v7667_v59 = vld [vmem:[#allocation17_spill] sm:$0xff] }
  0x86   :  { %v547_v3 = vmax.f32 %v545_v50, 0.0  ;;  %v548_v40 = vmax.f32 %v546_v53, 0.0  ;;  %v637_v48 = vmul.f32 %v5225_v39, %v7660_v18  ;;  %v7661_v28 = vmov 0 }
  0x87   :  { %v7662_v28 = vsel %vm5298_vm3, 4294967295, %v7661_v28  ;;  %v613_v47 = vadd.f32 %v611_v62, %v605_v23  ;;  %v614_v13 = vadd.f32 %v612_v58, %v606_v12  ;;  %v638_v14 = vmul.f32 %v5225_v39, %v7664_v6 }
  0x88   :  { %7663 = vst [vmem:[#allocation10_spill] sm:$0xff] %v7662_v28  ;;  %v643_v26 = vmul.f32 %v5228_v9, %v7665_v31  ;;  %v4100_v50 = vpack.c.bf16 %v548_v40, %v547_v3  ;;  %v639_v53 = vadd.f32 %v637_v48, %v633_v43  ;;  %v644_v34 = vmul.f32 %v5228_v9, %v7666_v44  ;;  %v5326_v40 = vld [vmem:[#allocation2 + $0x20] sm:$0xff]  ;;  %v5749_v28 = vld [vmem:[#allocation2 + $0x228] sm:$0xff] }
  0x89   :  { %v649_v35 = vmul.f32 %v5247_v16, %v7667_v59  ;;  %v621_v18 = vadd.f32 %v619_v56, %v613_v47  ;;  %v622_v63 = vadd.f32 %v620_v19, %v614_v13  ;;  %v640_v60 = vadd.f32 %v638_v14, %v634_v22  ;;  %v5328_v22 = vld [vmem:[#allocation2 + $0x60] sm:$0xff] }
  0x8a   :  { %v650_v62 = vmul.f32 %v5247_v16, %v7668_v46  ;;  %560 = vst.msk [vmem:[#allocation3] sm:$0xff] %vm5298_vm3, %v4100_v50  ;;  %v645_v58 = vadd.f32 %v643_v26, %v639_v53  ;;  %v655_v23 = vmul.f32 %v5256_v30, %v4795_v25  ;;  %v656_v43 = vmul.f32 %v5256_v30, %v5043_v15  ;;  %v7669_v15 = vld [vmem:[#allocation39_spill] sm:$0xff] }
  0x8b   :  { %v661_v12 = vmul.f32 %v5259_v37, %v4830_v41  ;;  %v5320_v3 = vadd.f32 %v627_v7, %v621_v18  ;;  %v5322_v56 = vadd.f32 %v628_v45, %v622_v63  ;;  %v646_v19 = vadd.f32 %v644_v34, %v640_v60  ;;  %v7670_v41 = vld [vmem:[#allocation22_spill] sm:$0xff]  ;;  %v7671_v45 = vld [vmem:[#allocation40_spill] sm:$0xff] }
  0x8c   :  { %v662_v46 = vmul.f32 %v5259_v37, %v5045_v20  ;;  %v651_v48 = vadd.f32 %v649_v35, %v645_v58  ;;  %v667_v25 = vmul.f32 %v5270_v21, %v4863_v0  ;;  %v668_v47 = vmul.f32 %v5270_v21, %v7669_v15  ;;  %v5336_v63 = vld [vmem:[#allocation2 + $0xa0] sm:$0xff]  ;;  %v7672_v35 = vld [vmem:[#allocation41_spill] sm:$0xff] }
  0x8d   :  { %v673_v7 = vmul.f32 %v5273_v4, %v7670_v41  ;;  %v652_v60 = vadd.f32 %v650_v62, %v646_v19  ;;  %v674_v20 = vmul.f32 %v5273_v4, %v7671_v45  ;;  %v679_v13 = vmul.f32 %v5284_v11, %v4922_v42 }
  0x8e   :  { %v680_v6 = vmul.f32 %v5284_v11, %v5081_v52  ;;  %v657_v14 = vadd.f32 %v655_v23, %v651_v48  ;;  %v687_v0 = vmul.f32 %v5326_v40, %v5222_v24  ;;  %v688_v31 = vmul.f32 %v5222_v24, %v5077_v36  ;;  %v7673_v23 = vld [vmem:[#allocation42_spill] sm:$0xff] }
  0x8f   :  { %v691_v26 = vmul.f32 %v5328_v22, %v5225_v39  ;;  %v658_v50 = vadd.f32 %v656_v43, %v652_v60  ;;  %v692_v53 = vmul.f32 %v5225_v39, %v5083_v61  ;;  %v697_v42 = vmul.f32 %v5336_v63, %v5228_v9  ;;  %v7674_v60 = vld [vmem:[#allocation43_spill] sm:$0xff] }
  0x90   :  { %v698_v52 = vmul.f32 %v5228_v9, %v5095_v33  ;;  %v663_v44 = vadd.f32 %v661_v12, %v657_v14  ;;  %v703_v59 = vmul.f32 %v5247_v16, %v4779_v17  ;;  %v704_v36 = vmul.f32 %v5247_v16, %v7672_v35  ;;  %v4356_v17 = vld [vmem:[%s7434_s3 + $0x100] sm:$0xff]  }
  0x91   :  { %v693_v34 = vadd.f32 %v691_v26, %v687_v0  ;;  %v2290_v18 = vld [vmem:[#allocation3] sm:$0xff]  ;;  %v664_v62 = vadd.f32 %v662_v46, %v658_v50  ;;  %v694_v58 = vadd.f32 %v692_v53, %v688_v31  ;;  %v709_v61 = vmul.f32 %v5256_v30, %v4810_v29  ;;  %v4358_v29 = vld [vmem:[%s7434_s3 + $0x148] sm:$0xff]   ;;  %v7675_v0 = vld [vmem:[#allocation44_spill] sm:$0xff] }
  0x92   :  { %v710_v43 = vmul.f32 %v5256_v30, %v7673_v23  ;;  %v3947_v19 = vcombine.low %v2290_v18, %v2290_v18  ;;  %v3948_v48 = vcombine.high %v2290_v18, %v2290_v18  ;;  %v669_v33 = vadd.f32 %v667_v25, %v663_v44  ;;  %v5382_v31 = vld [vmem:[#allocation2 + $0x30] sm:$0xff] }
  0x93   :  { %v699_v12 = vadd.f32 %v697_v42, %v693_v34  ;;  %v670_v15 = vadd.f32 %v668_v47, %v664_v62  ;;  %v700_v41 = vadd.f32 %v698_v52, %v694_v58  ;;  %v715_v46 = vmul.f32 %v5259_v37, %v4847_v49  ;;  %v5384_v26 = vld [vmem:[#allocation2 + $0x70] sm:$0xff]  ;;  %v7676_v42 = vld [vmem:[#allocation23_spill] sm:$0xff]  ;;  %v7677_v52 = vld [vmem:[#allocation45_spill] sm:$0xff] }
  0x94   :  { %v716_v45 = vmul.f32 %v5259_v37, %v7674_v60  ;;  %3417 = vmatprep.mubr.bf16.mxu0 %v3948_v48  ;;  %v675_v25 = vadd.f32 %v673_v7, %v669_v33  ;;  %v721_v47 = vmul.f32 %v5270_v21, %v4876_v8  ;;  %v722_v49 = vmul.f32 %v5270_v21, %v7675_v0  ;;  %v5394_v8 = vld [vmem:[#allocation2 + $0xb0] sm:$0xff]  ;;  %v4360_v62 = vld [vmem:[%s7434_s3 + $0x108] sm:$0xff]   ;;  %v5467_v0 = vld [vmem:[#allocation2] sm:$0xff] }
  0x95   :  { %v705_v14 = vadd.f32 %v703_v59, %v699_v12  ;;  %v676_v50 = vadd.f32 %v674_v20, %v670_v15  ;;  %v706_v53 = vadd.f32 %v704_v36, %v700_v41  ;;  %v727_v7 = vmul.f32 %v5273_v4, %v7676_v42  ;;  %v5396_v34 = vld [vmem:[#allocation2 + $0xf0] sm:$0xff]  ;;  %3418 = vmatmul.mubr.bf16.vlgmr.msra.gmra.mrb[0].mxu0 %v3947_v19 }
  0x96   :  { %v728_v44 = vmul.f32 %v5273_v4, %v7677_v52  ;;  %v5402_v59 = vadd.f32 %v679_v13, %v675_v25  ;;  %v733_v20 = vmul.f32 %v5284_v11, %v4932_v54  ;;  %v734_v36 = vmul.f32 %v5284_v11, %v5140_v51  ;;  %v5408_v18 = vld [vmem:[#allocation2 + $0x130] sm:$0xff]  ;;  %4153 = vmatpush3.bf16.msra.mxu0 %v4356_v17 }
  0x97   :  { %v711_v35 = vadd.f32 %v709_v61, %v705_v14  ;;  %v682_v58 = vadd.f32 %v680_v6, %v676_v50  ;;  %v712_v23 = vadd.f32 %v710_v43, %v706_v53  ;;  %v741_v13 = vmul.f32 %v5382_v31, %v5222_v24  ;;  %v5419_v61 = vld [vmem:[#allocation2 + $0x170] sm:$0xff]  ;;  %4154 = vmatprep.subr.bf16.mxu0 %v4358_v29 }
  0x98   :  { %v742_v54 = vmul.f32 %v5222_v24, %v5146_v57  ;;  %v4362_v51 = vld [vmem:[%s7434_s3 + $0x150] sm:$0xff]   ;;  %v683_v19 = vmax.f32 %v5320_v3, %v5402_v59  ;;  %v745_v6 = vmul.f32 %v5384_v26, %v5225_v39  ;;  %v746_v43 = vmul.f32 %v5225_v39, %v5152_v2 }
  0x99   :  { %v717_v48 = vadd.f32 %v715_v46, %v711_v35  ;;  %v684_v57 = vmax.f32 %v5322_v56, %v682_v58  ;;  %v718_v24 = vadd.f32 %v716_v45, %v712_v23  ;;  %v751_v33 = vmul.f32 %v5394_v8, %v5228_v9  ;;  %v4364_v2 = vld [vmem:[%s7434_s3 + $0x110] sm:$0xff]   ;;  %v4366_v46 = vld [vmem:[%s7434_s3 + $0x158] sm:$0xff]   ;;  %v7680_v35 = vld [vmem:[#allocation47_spill] sm:$0xff] }
  0x9a   :  { %v752_v12 = vmul.f32 %v5228_v9, %v5158_v1  ;;  %v747_v17 = vadd.f32 %v745_v6, %v741_v13  ;;  %v748_v15 = vadd.f32 %v746_v43, %v742_v54  ;;  %v757_v41 = vmul.f32 %v5396_v34, %v5247_v16  ;;  %4155 = vmatpush3.bf16.msra.mxu0 %v4360_v62  ;;  %v5493_v54 = vld [vmem:[#allocation2 + $0xc0] sm:$0xff]  ;;  %v5509_v6 = vld [vmem:[#allocation2 + $0xc8] sm:$0xff] }
  0x9b   :  { %v723_v3 = vadd.f32 %v721_v47, %v717_v48  ;;  %v724_v39 = vadd.f32 %v722_v49, %v718_v24  ;;  %v758_v56 = vmul.f32 %v5247_v16, %v5165_v27  ;;  %v763_v1 = vmul.f32 %v5408_v18, %v5256_v30  ;;  %4156 = vmatprep.subr.bf16.mxu0 %v4362_v51  ;;  %v4368_v27 = vld [vmem:[%s7434_s3 + $0x118] sm:$0xff]   ;;  %v4370_v47 = vld [vmem:[%s7434_s3 + $0x160] sm:$0xff]   ;;  %v5469_v49 = vld [vmem:[#allocation2 + $0x8] sm:$0xff] }
  0x9c   :  { %v764_v9 = vmul.f32 %v5256_v30, %v5173_v55  ;;  %v753_v45 = vadd.f32 %v751_v33, %v747_v17  ;;  %v754_v29 = vadd.f32 %v752_v12, %v748_v15  ;;  %v769_v25 = vmul.f32 %v5419_v61, %v5259_v37  ;;  %v5511_v43 = vld [vmem:[#allocation2 + $0x100] sm:$0xff] }
  0x9d   :  { %v729_v60 = vadd.f32 %v727_v7, %v723_v3  ;;  %v730_v16 = vadd.f32 %v728_v44, %v724_v39  ;;  %v770_v14 = vmul.f32 %v5259_v37, %v5181_v38  ;;  %v775_v55 = vmul.f32 %v5270_v21, %v4878_v10  ;;  %v5473_v10 = vld [vmem:[#allocation2 + $0x40] sm:$0xff]  ;;  %v5475_v37 = vld [vmem:[#allocation2 + $0x48] sm:$0xff]  ;;  %7681 = vst [vmem:[#allocation25_spill] sm:$0xff] %v5511_v43 }
  0x9e   :  { %v776_v30 = vmul.f32 %v5270_v21, %v5186_v5  ;;  %v759_v53 = vadd.f32 %v757_v41, %v753_v45  ;;  %v760_v42 = vadd.f32 %v758_v56, %v754_v29  ;;  %v781_v38 = vmul.f32 %v5273_v4, %v4910_v32  ;;  %4157 = vmatpush3.bf16.msra.mxu0 %v4364_v2  ;;  %v5477_v5 = vld [vmem:[#allocation2 + $0x80] sm:$0xff]  ;;  %v7679_v44 = vld [vmem:[#allocation27_spill] sm:$0xff] }
  0x9f   :  { %v735_v50 = vadd.f32 %v733_v20, %v729_v60  ;;  %v736_v21 = vadd.f32 %v734_v36, %v730_v16  ;;  %v7678_v7 = vld [vmem:[#allocation46_spill] sm:$0xff]  ;;  %v787_v59 = vmul.f32 %v5284_v11, %v7679_v44  ;;  %v788_v32 = vmul.f32 %v5284_v11, %v7680_v35  ;;  %4158 = vmatprep.subr.bf16.mxu0 %v4366_v46  ;;  %v5485_v20 = vld [vmem:[#allocation2 + $0x88] sm:$0xff] }
  0xa0   :  { %v782_v52 = vmul.f32 %v5273_v4, %v7678_v7  ;;  %v765_v58 = vadd.f32 %v763_v1, %v759_v53  ;;  %v766_v23 = vadd.f32 %v764_v9, %v760_v42  ;;  %v4372_v36 = vld [vmem:[%s7434_s3 + $0x120] sm:$0xff]   ;;  %v4374_v11 = vld [vmem:[%s7434_s3 + $0x168] sm:$0xff]   ;;  %v5501_v51 = vstv %s5376_s22  ;;  %s6164_s22 = sld [smem:[#allocation4 + $0x207]] }
  0xa1   :  { %v5487_v62 = vmax.f32 %v683_v19, %v735_v50  ;;  %v5495_v4 = vmax.f32 %v684_v57, %v736_v21  ;;  %v5504_v48 = vstv %s5386_s23  ;;  %v5507_v19 = vstv %s5388_s24  ;;  %v5519_v3 = vld [vmem:[#allocation2 + $0x108] sm:$0xff]  ;;  %v5529_v39 = vld [vmem:[#allocation2 + $0x140] sm:$0xff]  ;;  %s5823_s23 = sld [smem:[#allocation4 + $0x182]]  ;;  %s5825_s24 = sld [smem:[#allocation4 + $0x183]] }
  0xa2   :  { %v771_v24 = vadd.f32 %v769_v25, %v765_v58  ;;  %v772_v57 = vadd.f32 %v770_v14, %v766_v23  ;;  %4159 = vmatpush3.bf16.msra.mxu0 %v4368_v27  ;;  %v812_v33 = vmul.f32 %v5501_v51, %v5467_v0  ;;  %v813_v12 = vmul.f32 %v5501_v51, %v5469_v49  ;;  %v4376_v9 = vld [vmem:[%s7434_s3 + $0x128] sm:$0xff]   ;;  %v5542_v29 = vld [vmem:[#allocation2 + $0x180] sm:$0xff]  ;;  %v4378_v25 = vld [vmem:[%s7434_s3 + $0x170] sm:$0xff]  }
  0xa3   :  { %7682 = vst [vmem:[#allocation12_spill] sm:$0xff] %v5519_v3  ;;  %4160 = vmatprep.subr.bf16.mxu0 %v4370_v47  ;;  %v818_v17 = vmul.f32 %v5504_v48, %v5473_v10  ;;  %v819_v15 = vmul.f32 %v5504_v48, %v5475_v37  ;;  %v826_v41 = vmul.f32 %v5507_v19, %v5477_v5  ;;  %7683 = vst [vmem:[#allocation26_spill] sm:$0xff] %v5529_v39  ;;  %v5540_v45 = vld [vmem:[#allocation2 + $0x148] sm:$0xff]  ;;  %v5557_v21 = vld [vmem:[#allocation2 + $0x1c0] sm:$0xff] }
  0xa4   :  { %v827_v2 = vmul.f32 %v5507_v19, %v5485_v20  ;;  %v777_v56 = vadd.f32 %v775_v55, %v771_v24  ;;  %v778_v1 = vadd.f32 %v776_v30, %v772_v57  ;;  %v5535_v46 = vstv %s5398_s27  ;;  %7684 = vst [vmem:[#allocation14_spill] sm:$0xff] %v5540_v45  ;;  %7685 = vst [vmem:[#allocation28_spill] sm:$0xff] %v5542_v29  ;;  %v5551_v30 = vld [vmem:[#allocation2 + $0x188] sm:$0xff]  ;;  %v4380_v57 = vld [vmem:[%s7434_s3 + $0x130] sm:$0xff]   ;;  %s6181_s27 = sld [smem:[#allocation4 + $0x208]] }
  0xa5   :  { %v5538_v60 = vstv %s5400_s28  ;;  %v820_v27 = vadd.f32 %v818_v17, %v812_v33  ;;  %v821_v16 = vadd.f32 %v819_v15, %v813_v12  ;;  %v834_v14 = vmul.f32 %v5535_v46, %v5493_v54  ;;  %7686 = vst [vmem:[#allocation16_spill] sm:$0xff] %v5551_v30  ;;  %7687 = vst [vmem:[#allocation29_spill] sm:$0xff] %v5557_v21  ;;  %v5559_v7 = vld [vmem:[#allocation2 + $0x1c8] sm:$0xff]  ;;  %v5578_v12 = vld [vmem:[#allocation2 + $0x10] sm:$0xff]  ;;  %s6802_s28 = sld [smem:[#allocation4 + $0x305]] }
  0xa6   :  { %v835_v55 = vmul.f32 %v5535_v46, %v5509_v6  ;;  %v783_v47 = vadd.f32 %v781_v38, %v777_v56  ;;  %v784_v50 = vadd.f32 %v782_v52, %v778_v1  ;;  %4161 = vmatpush3.bf16.msra.mxu0 %v4372_v36  ;;  %v842_v53 = vmul.f32 %v5538_v60, %v5511_v43  ;;  %v5567_v38 = vld [vmem:[#allocation2 + $0x200] sm:$0xff]  ;;  %v5569_v52 = vld [vmem:[#allocation2 + $0x208] sm:$0xff]  ;;  %v5580_v17 = vld [vmem:[#allocation2 + $0x18] sm:$0xff] }
  0xa7   :  { %v843_v42 = vmul.f32 %v5538_v60, %v5519_v3  ;;  %7688 = vst [vmem:[#allocation18_spill] sm:$0xff] %v5559_v7  ;;  %4162 = vmatprep.subr.bf16.mxu0 %v4374_v11  ;;  %v828_v44 = vadd.f32 %v826_v41, %v820_v27  ;;  %v829_v35 = vadd.f32 %v827_v2, %v821_v16  ;;  %v5562_v58 = vstv %s5413_s25  ;;  %v5589_v56 = vld [vmem:[#allocation2 + $0x50] sm:$0xff]  ;;  %v5591_v1 = vld [vmem:[#allocation2 + $0x58] sm:$0xff]  ;;  %s6042_s25 = sld [smem:[#allocation4 + $0x200]] }
  0xa8   :  { %v5565_v23 = vstv %s5430_s8  ;;  %7689 = vst [vmem:[#allocation30_spill] sm:$0xff] %v5567_v38  ;;  %7690 = vst [vmem:[#allocation19_spill] sm:$0xff] %v5569_v52  ;;  %v789_v36 = vadd.f32 %v787_v59, %v783_v47  ;;  %v790_v24 = vadd.f32 %v788_v32, %v784_v50  ;;  %v850_v11 = vmul.f32 %v5562_v58, %v5529_v39  ;;  %v4382_v59 = vld [vmem:[%s7434_s3 + $0x178] sm:$0xff]  }
  0xa9   :  { %v851_v33 = vmul.f32 %v5562_v58, %v5540_v45  ;;  %7691 = vst [vmem:[#allocation31_spill] sm:$0xff] %v5578_v12  ;;  %7692 = vst [vmem:[#allocation20_spill] sm:$0xff] %v5580_v17  ;;  %v836_v32 = vadd.f32 %v834_v14, %v828_v44  ;;  %v837_v15 = vadd.f32 %v835_v55, %v829_v35  ;;  %v5596_v47 = vstv %s5437_s9  ;;  %v5601_v55 = vld [vmem:[#allocation2 + $0x90] sm:$0xff]  ;;  %v5603_v50 = vld [vmem:[#allocation2 + $0x98] sm:$0xff]  ;;  %s5884_s9 = sld [smem:[#allocation4 + $0x187]] }
  0xaa   :  { %v858_v41 = vmul.f32 %v5565_v23, %v5542_v29  ;;  %v859_v2 = vmul.f32 %v5565_v23, %v5551_v30  ;;  %7693 = vst [vmem:[#allocation32_spill] sm:$0xff] %v5589_v56  ;;  %7694 = vst [vmem:[#allocation21_spill] sm:$0xff] %v5591_v1  ;;  %v791_v27 = vmax.f32 %v5487_v62, %v789_v36  ;;  %4163 = vmatpush3.bf16.msra.mxu0 %v4376_v9  ;;  %v5609_v36 = vld [vmem:[#allocation2 + $0xd0] sm:$0xff]  ;;  %v4384_v29 = vld [vmem:[%s7434_s3 + $0x138] sm:$0xff]  }
  0xab   :  { %v792_v16 = vmax.f32 %v5495_v4, %v790_v24  ;;  %v5599_v14 = vstv %s5513_s21  ;;  %7695 = vst [vmem:[#allocation33_spill] sm:$0xff] %v5603_v50  ;;  %4164 = vmatprep.subr.bf16.mxu0 %v4378_v25  ;;  %v844_v44 = vadd.f32 %v842_v53, %v836_v32  ;;  %v845_v35 = vadd.f32 %v843_v42, %v837_v15  ;;  %v5622_v42 = vld [vmem:[#allocation2 + $0xd8] sm:$0xff]  ;;  %v5624_v32 = vld [vmem:[#allocation2 + $0x110] sm:$0xff]  ;;  %s6144_s21 = sld [smem:[#allocation4 + $0x206]] }
  0xac   :  { %v866_v13 = vmul.f32 %v5596_v47, %v5557_v21  ;;  %v867_v62 = vmul.f32 %v5596_v47, %v5559_v7  ;;  %v7696_v4 = vstv %s5371_s19  ;;  %v874_v25 = vmul.f32 %v5599_v14, %v5567_v38  ;;  %v5655_v43 = vld [vmem:[#allocation2 + $0x1d8] sm:$0xff]  ;;  %s6839_s19 = sld [smem:[#allocation4 + $0x308]] }
  0xad   :  { %v795_v9 = vadd.f32 %v7696_v4, %v791_v27  ;;  %v7697_v24 = vmov %v7696_v4  ;;  %v875_v53 = vmul.f32 %v5599_v14, %v5569_v52  ;;  %v852_v15 = vadd.f32 %v850_v11, %v844_v44  ;;  %v5630_v4 = vld [vmem:[#allocation2 + $0x118] sm:$0xff]  ;;  %v5640_v44 = vld [vmem:[#allocation2 + $0x190] sm:$0xff]  ;;  %7704 = vst [vmem:[#allocation15_spill] sm:$0xff] %v5655_v43 }
  0xae   :  { %v796_v30 = vadd.f32 %v7697_v24, %v792_v16  ;;  %v853_v7 = vadd.f32 %v851_v33, %v845_v35  ;;  %v880_v27 = vmul.f32 %v5578_v12, %v5501_v51  ;;  %v881_v16 = vmul.f32 %v5580_v17, %v5501_v51  ;;  %7698 = vst [vmem:[#allocation11_spill] sm:$0xff] %v5630_v4  ;;  %v5632_v24 = vld [vmem:[#allocation2 + $0x150] sm:$0xff]  ;;  %v5638_v33 = vld [vmem:[#allocation2 + $0x158] sm:$0xff]  ;;  %v4390_v35 = vld [vmem:[%s7434_s3 + $0x240] sm:$0xff]  }
  0xaf   :  { %7699 = vst [vmem:[#allocation24_spill] sm:$0xff] %v5632_v24  ;;  %v797_v38 = vmax.f32 %v795_v9, 0.0  ;;  %4165 = vmatpush3.bf16.msra.mxu0 %v4380_v57  ;;  %v884_v52 = vmul.f32 %v5589_v56, %v5504_v48  ;;  %v885_v11 = vmul.f32 %v5591_v1, %v5504_v48  ;;  %7700 = vst [vmem:[#allocation37_spill] sm:$0xff] %v5638_v33  ;;  %v5649_v9 = vld [vmem:[#allocation2 + $0x198] sm:$0xff]  ;;  %v5651_v1 = vld [vmem:[#allocation2 + $0x1d0] sm:$0xff] }
  0xb0   :  { %v798_v21 = vmax.f32 %v796_v30, 0.0  ;;  %7701 = vst [vmem:[#allocation34_spill] sm:$0xff] %v5640_v44  ;;  %4166 = vmatprep.subr.bf16.mxu0 %v4382_v59  ;;  %v860_v17 = vadd.f32 %v858_v41, %v852_v15  ;;  %v861_v12 = vadd.f32 %v859_v2, %v853_v7  ;;  %v890_v30 = vmul.f32 %v5601_v55, %v5507_v19  ;;  %v5657_v59 = vld [vmem:[#allocation2 + $0x210] sm:$0xff]  ;;  %v5659_v7 = vld [vmem:[#allocation2 + $0x218] sm:$0xff] }
  0xb1   :  { %v891_v57 = vmul.f32 %v5603_v50, %v5507_v19  ;;  %7702 = vst [vmem:[#allocation13_spill] sm:$0xff] %v5649_v9  ;;  %7703 = vst [vmem:[#allocation35_spill] sm:$0xff] %v5651_v1  ;;  %v886_v45 = vadd.f32 %v884_v52, %v880_v27  ;;  %v887_v39 = vadd.f32 %v885_v11, %v881_v16 }
  0xb2   :  { %v4101_v56 = vpack.c.bf16 %v798_v21, %v797_v38  ;;  %v896_v3 = vmul.f32 %v5609_v36, %v5535_v46  ;;  %7705 = vst [vmem:[#allocation36_spill] sm:$0xff] %v5657_v59  ;;  %7706 = vst [vmem:[#allocation17_spill] sm:$0xff] %v5659_v7  ;;  %v868_v41 = vadd.f32 %v866_v13, %v860_v17  ;;  %v5665_v21 = vld [vmem:[#allocation2 + $0x28] sm:$0xff] }
  0xb3   :  { %v869_v2 = vadd.f32 %v867_v62, %v861_v12  ;;  %v897_v15 = vmul.f32 %v5622_v42, %v5535_v46  ;;  %v902_v50 = vmul.f32 %v5624_v32, %v5538_v60  ;;  %7707 = vst [vmem:[#allocation38_spill] sm:$0xff] %v5665_v21  ;;  %4167 = vmatpush3.bf16.msra.mxu0 %v4384_v29  ;;  %v5673_v12 = vld [vmem:[#allocation2 + $0x68] sm:$0xff]  ;;  %v5677_v62 = vld [vmem:[#allocation2 + $0xe0] sm:$0xff] }
  0xb4   :  { %807 = vst.msk [vmem:[#allocation3 + $0x8] sm:$0xff] %vm5298_vm3, %v4101_v56  ;;  %v892_v38 = vadd.f32 %v890_v30, %v886_v45  ;;  %v893_v52 = vadd.f32 %v891_v57, %v887_v39  ;;  %v903_v27 = vmul.f32 %v5630_v4, %v5538_v60  ;;  %v908_v13 = vmul.f32 %v5632_v24, %v5562_v58  ;;  %v5675_v17 = vld [vmem:[#allocation2 + $0xa8] sm:$0xff]  ;;  %v5755_v4 = vld [vmem:[#allocation2 + $0x38] sm:$0xff] }
  0xb5   :  { %7708 = vst [vmem:[#allocation39_spill] sm:$0xff] %v5673_v12  ;;  %7709 = vst [vmem:[#allocation22_spill] sm:$0xff] %v5675_v17  ;;  %v5679_v16 = vadd.f32 %v874_v25, %v868_v41  ;;  %v5681_v11 = vadd.f32 %v875_v53, %v869_v2  ;;  %v909_v45 = vmul.f32 %v5638_v33, %v5562_v58  ;;  %v5687_v29 = vld [vmem:[#allocation2 + $0xe8] sm:$0xff]  ;;  %4196 = vmatprep.subr.bf16.mxu0 %v4390_v35  ;;  %v5693_v41 = vld [vmem:[#allocation2 + $0x120] sm:$0xff] }
  0xb6   :  { %7710 = vst [vmem:[#allocation40_spill] sm:$0xff] %v5677_v62  ;;  %v914_v39 = vmul.f32 %v5640_v44, %v5565_v23  ;;  %7711 = vst [vmem:[#allocation41_spill] sm:$0xff] %v5687_v29  ;;  %v898_v56 = vadd.f32 %v896_v3, %v892_v38  ;;  %v899_v30 = vadd.f32 %v897_v15, %v893_v52  ;;  %v5703_v35 = vld [vmem:[#allocation2 + $0x128] sm:$0xff] }
  0xb7   :  { %v915_v57 = vmul.f32 %v5649_v9, %v5565_v23  ;;  %v920_v25 = vmul.f32 %v5651_v1, %v5596_v47  ;;  %7712 = vst [vmem:[#allocation42_spill] sm:$0xff] %v5693_v41  ;;  %v921_v53 = vmul.f32 %v5655_v43, %v5596_v47  ;;  %v926_v2 = vmul.f32 %v5657_v59, %v5599_v14  ;;  %v5709_v43 = vld [vmem:[#allocation2 + $0x160] sm:$0xff] }
  0xb8   :  { %v927_v44 = vmul.f32 %v5659_v7, %v5599_v14  ;;  %v934_v3 = vmul.f32 %v5501_v51, %v5326_v40  ;;  %7713 = vst [vmem:[#allocation43_spill] sm:$0xff] %v5703_v35  ;;  %v904_v15 = vadd.f32 %v902_v50, %v898_v56  ;;  %v905_v38 = vadd.f32 %v903_v27, %v899_v30  ;;  %v5723_v9 = vld [vmem:[#allocation2 + $0x1a0] sm:$0xff] }
  0xb9   :  { %v935_v52 = vmul.f32 %v5665_v21, %v5501_v51  ;;  %v938_v1 = vmul.f32 %v5504_v48, %v5328_v22  ;;  %7714 = vst [vmem:[#allocation44_spill] sm:$0xff] %v5709_v43  ;;  %v939_v59 = vmul.f32 %v5673_v12, %v5504_v48  ;;  %v944_v7 = vmul.f32 %v5507_v19, %v5336_v63  ;;  %v5721_v21 = vld [vmem:[#allocation2 + $0x168] sm:$0xff] }
  0xba   :  { %v945_v40 = vmul.f32 %v5675_v17, %v5507_v19  ;;  %v950_v50 = vmul.f32 %v5677_v62, %v5535_v46  ;;  %v910_v27 = vadd.f32 %v908_v13, %v904_v15  ;;  %v911_v56 = vadd.f32 %v909_v45, %v905_v38  ;;  %v5731_v45 = vld [vmem:[#allocation2 + $0x1a8] sm:$0xff]  ;;  %v4357_v38 = vld [vmem:[%s7434_s3 + $0x180] sm:$0xff]  }
  0xbb   :  { %v940_v30 = vadd.f32 %v938_v1, %v934_v3  ;;  %v951_v22 = vmul.f32 %v5687_v29, %v5535_v46  ;;  %v2291_v12 = vld [vmem:[#allocation3 + $0x8] sm:$0xff]  ;;  %v941_v33 = vadd.f32 %v939_v59, %v935_v52  ;;  %v956_v63 = vmul.f32 %v5693_v41, %v5538_v60  ;;  %v5733_v1 = vld [vmem:[#allocation2 + $0x1e0] sm:$0xff] }
  0xbc   :  { %v957_v17 = vmul.f32 %v5703_v35, %v5538_v60  ;;  %v962_v13 = vmul.f32 %v5709_v43, %v5562_v58  ;;  %v3949_v3 = vcombine.low %v2291_v12, %v2291_v12  ;;  %v3950_v15 = vcombine.high %v2291_v12, %v2291_v12  ;;  %v5738_v29 = vld [vmem:[#allocation2 + $0x1e8] sm:$0xff]  ;;  %v5740_v41 = vld [vmem:[#allocation2 + $0x220] sm:$0xff] }
  0xbd   :  { %v916_v59 = vadd.f32 %v914_v39, %v910_v27  ;;  %v917_v52 = vadd.f32 %v915_v57, %v911_v56  ;;  %v4359_v43 = vld [vmem:[%s7434_s3 + $0x1c8] sm:$0xff]   ;;  %v946_v35 = vadd.f32 %v944_v7, %v940_v30  ;;  %v947_v62 = vadd.f32 %v945_v40, %v941_v33 }
  0xbe   :  { %v963_v24 = vmul.f32 %v5721_v21, %v5562_v58  ;;  %v968_v12 = vmul.f32 %v5723_v9, %v5565_v23  ;;  %3457 = vmatprep.mubr.bf16.mxu1 %v3950_v15  ;;  %v969_v27 = vmul.f32 %v5731_v45, %v5565_v23  ;;  %v974_v56 = vmul.f32 %v5733_v1, %v5596_v47 }
  0xbf   :  { %v922_v39 = vadd.f32 %v920_v25, %v916_v59  ;;  %v923_v57 = vadd.f32 %v921_v53, %v917_v52  ;;  %3458 = vmatmul.mubr.bf16.vlgmr.msra.gmra.mrb[0].mxu1 %v3949_v3  ;;  %v952_v33 = vadd.f32 %v950_v50, %v946_v35  ;;  %v953_v7 = vadd.f32 %v951_v22, %v947_v62  ;;  %v5763_v25 = vld [vmem:[#allocation2 + $0x78] sm:$0xff]  ;;  %v4361_v53 = vld [vmem:[%s7434_s3 + $0x188] sm:$0xff]   ;;  %v4363_v22 = vld [vmem:[%s7434_s3 + $0x1d0] sm:$0xff]  }
  0xc0   :  { %v975_v40 = vmul.f32 %v5738_v29, %v5596_v47  ;;  %v5761_v30 = vmul.f32 %v5740_v41, %v5599_v14  ;;  %4175 = vmatpush3.bf16.msra.mxu1 %v4357_v38  ;;  %v981_v62 = vmul.f32 %v5749_v28, %v5599_v14  ;;  %v988_v35 = vmul.f32 %v5501_v51, %v5382_v31  ;;  %v5776_v50 = vld [vmem:[#allocation2 + $0xb8] sm:$0xff] }
  0xc1   :  { %v5768_v15 = vadd.f32 %v926_v2, %v922_v39  ;;  %v5770_v59 = vadd.f32 %v927_v44, %v923_v57  ;;  %4176 = vmatprep.subr.bf16.mxu1 %v4359_v43  ;;  %v958_v3 = vadd.f32 %v956_v63, %v952_v33  ;;  %v959_v38 = vadd.f32 %v957_v17, %v953_v7  ;;  %v5785_v52 = vld [vmem:[#allocation2 + $0xf8] sm:$0xff]  ;;  %v5810_v33 = vld [vmem:[#allocation2 + $0x1b0] sm:$0xff] }
  0xc2   :  { %v989_v2 = vmul.f32 %v5755_v4, %v5501_v51  ;;  %v992_v44 = vmul.f32 %v5504_v48, %v5384_v26  ;;  %v993_v63 = vmul.f32 %v5763_v25, %v5504_v48  ;;  %v998_v17 = vmul.f32 %v5507_v19, %v5394_v8  ;;  %v5797_v51 = vld [vmem:[#allocation2 + $0x138] sm:$0xff]  ;;  %v4365_v26 = vld [vmem:[%s7434_s3 + $0x190] sm:$0xff]  }
  0xc3   :  { %v930_v31 = vmax.f32 %v5679_v16, %v5768_v15  ;;  %v931_v43 = vmax.f32 %v5681_v11, %v5770_v59  ;;  %v964_v16 = vadd.f32 %v962_v13, %v958_v3  ;;  %v965_v39 = vadd.f32 %v963_v24, %v959_v38  ;;  %v5808_v48 = vld [vmem:[#allocation2 + $0x178] sm:$0xff] }
  0xc4   :  { %v994_v57 = vadd.f32 %v992_v44, %v988_v35  ;;  %v999_v11 = vmul.f32 %v5776_v50, %v5507_v19  ;;  %4177 = vmatpush3.bf16.msra.mxu1 %v4361_v53  ;;  %v4367_v8 = vld [vmem:[%s7434_s3 + $0x1d8] sm:$0xff]   ;;  %v995_v7 = vadd.f32 %v993_v63, %v989_v2  ;;  %v1004_v15 = vmul.f32 %v5535_v46, %v5396_v34  ;;  %v5829_v34 = vld [vmem:[#allocation2 + $0x1f0] sm:$0xff] }
  0xc5   :  { %v1005_v24 = vmul.f32 %v5785_v52, %v5535_v46  ;;  %v1010_v13 = vmul.f32 %v5538_v60, %v5408_v18  ;;  %v5821_v19 = vld [vmem:[#allocation2 + $0x1b8] sm:$0xff]  ;;  %4178 = vmatprep.subr.bf16.mxu1 %v4363_v22  ;;  %v970_v53 = vadd.f32 %v968_v12, %v964_v16  ;;  %v971_v59 = vadd.f32 %v969_v27, %v965_v39  ;;  %v5833_v46 = vld [vmem:[#allocation2 + $0x230] sm:$0xff] }
  0xc6   :  { %v1000_v35 = vadd.f32 %v998_v17, %v994_v57  ;;  %v1011_v3 = vmul.f32 %v5797_v51, %v5538_v60  ;;  %v5831_v38 = vld [vmem:[#allocation2 + $0x1f8] sm:$0xff]  ;;  %v1001_v18 = vadd.f32 %v999_v11, %v995_v7  ;;  %v1016_v2 = vmul.f32 %v5562_v58, %v5419_v61 }
  0xc7   :  { %v1017_v12 = vmul.f32 %v5808_v48, %v5562_v58  ;;  %v1022_v27 = vmul.f32 %v5810_v33, %v5565_v23  ;;  %v5843_v22 = vld [vmem:[#allocation2 + $0x238] sm:$0xff]  ;;  %v976_v60 = vadd.f32 %v974_v56, %v970_v53  ;;  %v977_v44 = vadd.f32 %v975_v40, %v971_v59 }
  0xc8   :  { %v1006_v63 = vadd.f32 %v1004_v15, %v1000_v35  ;;  %v1023_v17 = vmul.f32 %v5821_v19, %v5565_v23  ;;  %4179 = vmatpush3.bf16.msra.mxu1 %v4365_v26  ;;  %v4369_v61 = vld [vmem:[%s7434_s3 + $0x198] sm:$0xff]   ;;  %v1007_v58 = vadd.f32 %v1005_v24, %v1001_v18  ;;  %v1028_v16 = vmul.f32 %v5829_v34, %v5596_v47  ;;  %v4371_v23 = vld [vmem:[%s7434_s3 + $0x1e0] sm:$0xff]  }
  0xc9   :  { %v1029_v56 = vmul.f32 %v5831_v38, %v5596_v47  ;;  %v1034_v40 = vmul.f32 %v5833_v46, %v5599_v14  ;;  %4180 = vmatprep.subr.bf16.mxu1 %v4367_v8  ;;  %v982_v26 = vadd.f32 %v5761_v30, %v976_v60  ;;  %v983_v39 = vadd.f32 %v981_v62, %v977_v44 }
  0xca   :  { %v1012_v57 = vadd.f32 %v1010_v13, %v1006_v63  ;;  %v1035_v11 = vmul.f32 %v5843_v22, %v5599_v14  ;;  %v1013_v47 = vadd.f32 %v1011_v3, %v1007_v58  ;;  %v1041_v7 = vstv %s5787_s15  ;;  %v4373_v14 = vld [vmem:[%s7434_s3 + $0x1a0] sm:$0xff]   ;;  %s7188_s15 = sld [smem:[#allocation4 + $0x386]] }
  0xcb   :  { %v5868_v15 = vstv %s5799_s16  ;;  %v5871_v8 = vstv %s5801_s17  ;;  %v984_v24 = vmax.f32 %v930_v31, %v982_v26  ;;  %v985_v53 = vmax.f32 %v931_v43, %v983_v39  ;;  %s6135_s17 = sld [smem:[#allocation4 + $0x205]]  ;;  %s6560_s16 = sld [smem:[#allocation4 + $0x288]] }
  0xcc   :  { %v1018_v30 = vadd.f32 %v1016_v2, %v1012_v57  ;;  %v1059_v62 = vmul.f32 %v5868_v15, %v5467_v0  ;;  %4181 = vmatpush3.bf16.msra.mxu1 %v4369_v61  ;;  %v1019_v13 = vadd.f32 %v1017_v12, %v1013_v47  ;;  %v1060_v59 = vmul.f32 %v5868_v15, %v5469_v49  ;;  %v4375_v0 = vld [vmem:[%s7434_s3 + $0x1e8] sm:$0xff]  }
  0xcd   :  { %v1065_v35 = vmul.f32 %v5871_v8, %v5473_v10  ;;  %v1066_v31 = vmul.f32 %v5871_v8, %v5475_v37  ;;  %4182 = vmatprep.subr.bf16.mxu1 %v4371_v23  ;;  %v5892_v3 = vstv %s5823_s23  ;;  %v5895_v18 = vstv %s5825_s24  ;;  %v7716_v23 = vld [vmem:[#allocation12_spill] sm:$0xff]  ;;  %s6032_s24 = sld [smem:[#allocation6 + $0x3]]  ;;  %s6459_s23 = sld [smem:[#allocation6 + $0x4]] }
  0xce   :  { %v1024_v43 = vadd.f32 %v1022_v27, %v1018_v30  ;;  %v5898_v49 = vstv %s5835_s29  ;;  %v1025_v10 = vadd.f32 %v1023_v17, %v1019_v13  ;;  %v1073_v37 = vmul.f32 %v5892_v3, %v5477_v5  ;;  %v4377_v17 = vld [vmem:[%s7434_s3 + $0x1a8] sm:$0xff]   ;;  %v4379_v5 = vld [vmem:[%s7434_s3 + $0x1f0] sm:$0xff]   ;;  %v7718_v13 = vld [vmem:[#allocation14_spill] sm:$0xff]  ;;  %s6461_s29 = sld [smem:[#allocation4 + $0x281]] }
  0xcf   :  { %v1067_v2 = vadd.f32 %v1065_v35, %v1059_v62  ;;  %v1068_v12 = vadd.f32 %v1066_v31, %v1060_v59  ;;  %v1074_v44 = vmul.f32 %v5892_v3, %v5485_v20  ;;  %v1081_v27 = vmul.f32 %v5895_v18, %v5493_v54  ;;  %v7717_v62 = vld [vmem:[#allocation26_spill] sm:$0xff] }
  0xd0   :  { %v1030_v60 = vadd.f32 %v1028_v16, %v1024_v43  ;;  %v1082_v63 = vmul.f32 %v5895_v18, %v5509_v6  ;;  %4183 = vmatpush3.bf16.msra.mxu1 %v4373_v14  ;;  %v1031_v61 = vadd.f32 %v1029_v56, %v1025_v10  ;;  %v7715_v16 = vld [vmem:[#allocation25_spill] sm:$0xff]  ;;  %v1090_v54 = vmul.f32 %v5898_v49, %v7716_v23  ;;  %v4381_v56 = vld [vmem:[%s7434_s3 + $0x1b0] sm:$0xff]  }
  0xd1   :  { %v1075_v58 = vadd.f32 %v1073_v37, %v1067_v2  ;;  %v1089_v20 = vmul.f32 %v5898_v49, %v7715_v16  ;;  %4184 = vmatprep.subr.bf16.mxu1 %v4375_v0  ;;  %v1076_v6 = vadd.f32 %v1074_v44, %v1068_v12  ;;  %v5919_v39 = vstv %s5862_s26  ;;  %v7719_v0 = vld [vmem:[#allocation28_spill] sm:$0xff]  ;;  %s6062_s26 = sld [smem:[#allocation4 + $0x201]] }
  0xd2   :  { %v1036_v26 = vadd.f32 %v1034_v40, %v1030_v60  ;;  %v5922_v57 = vstv %s5864_s30  ;;  %v1037_v47 = vadd.f32 %v1035_v11, %v1031_v61  ;;  %v1097_v14 = vmul.f32 %v5919_v39, %v7717_v62  ;;  %v4383_v40 = vld [vmem:[%s7434_s3 + $0x1f8] sm:$0xff]   ;;  %v7720_v10 = vld [vmem:[#allocation16_spill] sm:$0xff]  ;;  %s6485_s30 = sld [smem:[#allocation4 + $0x283]] }
  0xd3   :  { %v1083_v30 = vadd.f32 %v1081_v27, %v1075_v58  ;;  %v1098_v59 = vmul.f32 %v5919_v39, %v7718_v13  ;;  %v1084_v31 = vadd.f32 %v1082_v63, %v1076_v6  ;;  %v1105_v43 = vmul.f32 %v5922_v57, %v7719_v0  ;;  %v7721_v61 = vld [vmem:[#allocation29_spill] sm:$0xff]  ;;  %v7722_v63 = vld [vmem:[#allocation18_spill] sm:$0xff]  ;;  %v7726_v62 = vld [vmem:[#allocation20_spill] sm:$0xff] }
  0xd4   :  { %v1038_v35 = vmax.f32 %v984_v24, %v1036_v26  ;;  %v1106_v2 = vmul.f32 %v5922_v57, %v7720_v10  ;;  %4185 = vmatpush3.bf16.msra.mxu1 %v4377_v17  ;;  %v1039_v11 = vmax.f32 %v985_v53, %v1037_v47  ;;  %v5939_v37 = vstv %s5884_s9  ;;  %v7723_v26 = vld [vmem:[#allocation30_spill] sm:$0xff]  ;;  %v7724_v53 = vld [vmem:[#allocation19_spill] sm:$0xff]  ;;  %v7728_v0 = vld [vmem:[#allocation21_spill] sm:$0xff]  ;;  %s6508_s9 = sld [smem:[#allocation4 + $0x284]] }
  0xd5   :  { %v1091_v12 = vadd.f32 %v1089_v20, %v1083_v30  ;;  %v5942_v60 = vstv %s5886_s1  ;;  %4186 = vmatprep.subr.bf16.mxu1 %v4379_v5  ;;  %v1092_v27 = vadd.f32 %v1090_v54, %v1084_v31  ;;  %v1113_v24 = vmul.f32 %v5939_v37, %v7721_v61  ;;  %v4385_v5 = vld [vmem:[%s7434_s3 + $0x1b8] sm:$0xff]   ;;  %v7725_v47 = vld [vmem:[#allocation31_spill] sm:$0xff]  ;;  %s6078_s1 = sld [smem:[#allocation4 + $0x202]] }
  0xd6   :  { %v1042_v44 = vadd.f32 %v1041_v7, %v1038_v35  ;;  %v1114_v58 = vmul.f32 %v5939_v37, %v7722_v63  ;;  %v1043_v16 = vadd.f32 %v1041_v7, %v1039_v11  ;;  %v1121_v17 = vmul.f32 %v5942_v60, %v7723_v26  ;;  %v7727_v35 = vld [vmem:[#allocation32_spill] sm:$0xff]  ;;  %v4391_v11 = vld [vmem:[%s7434_s3 + $0x2c0] sm:$0xff]  }
  0xd7   :  { %v1099_v23 = vadd.f32 %v1097_v14, %v1091_v12  ;;  %v1122_v20 = vmul.f32 %v5942_v60, %v7724_v53  ;;  %v1100_v54 = vadd.f32 %v1098_v59, %v1092_v27  ;;  %v1127_v30 = vmul.f32 %v5868_v15, %v7725_v47  ;;  %v5984_v47 = vld [vmem:[#allocation2 + $0x20] sm:$0xff] }
  0xd8   :  { %v1044_v6 = vmax.f32 %v1042_v44, 0.0  ;;  %v1128_v13 = vmul.f32 %v5868_v15, %v7726_v62  ;;  %4187 = vmatpush3.bf16.msra.mxu1 %v4381_v56  ;;  %v1045_v7 = vmax.f32 %v1043_v16, 0.0  ;;  %v1131_v31 = vmul.f32 %v5871_v8, %v7727_v35  ;;  %v7729_v44 = vld [vmem:[#allocation33_spill] sm:$0xff]  ;;  %v7734_v62 = vld [vmem:[#allocation34_spill] sm:$0xff] }
  0xd9   :  { %v1107_v14 = vadd.f32 %v1105_v43, %v1099_v23  ;;  %v1132_v10 = vmul.f32 %v5871_v8, %v7728_v0  ;;  %4188 = vmatprep.subr.bf16.mxu1 %v4383_v40  ;;  %v1108_v59 = vadd.f32 %v1106_v2, %v1100_v54  ;;  %v1137_v12 = vmul.f32 %v5892_v3, %v5601_v55  ;;  %v7730_v2 = vld [vmem:[#allocation11_spill] sm:$0xff] }
  0xda   :  { %v1138_v56 = vmul.f32 %v5892_v3, %v7729_v44  ;;  %v1143_v43 = vmul.f32 %v5895_v18, %v5609_v36  ;;  %v4102_v27 = vpack.c.bf16 %v1045_v7, %v1044_v6  ;;  %v1133_v63 = vadd.f32 %v1131_v31, %v1127_v30  ;;  %v7732_v6 = vld [vmem:[#allocation24_spill] sm:$0xff]  ;;  %v7733_v30 = vld [vmem:[#allocation37_spill] sm:$0xff]  ;;  %v7738_v0 = vld [vmem:[#allocation35_spill] sm:$0xff] }
  0xdb   :  { %v1115_v61 = vadd.f32 %v1113_v24, %v1107_v14  ;;  %v1134_v16 = vadd.f32 %v1132_v10, %v1128_v13  ;;  %v1116_v23 = vadd.f32 %v1114_v58, %v1108_v59  ;;  %v1144_v26 = vmul.f32 %v5895_v18, %v5622_v42  ;;  %v7735_v13 = vld [vmem:[#allocation13_spill] sm:$0xff]  ;;  %v5996_v14 = vld [vmem:[#allocation2 + $0xa0] sm:$0xff]  ;;  %v7739_v10 = vld [vmem:[#allocation15_spill] sm:$0xff] }
  0xdc   :  { %v1149_v40 = vmul.f32 %v5898_v49, %v5624_v32  ;;  %v1150_v55 = vmul.f32 %v5898_v49, %v7730_v2  ;;  %4189 = vmatpush3.bf16.msra.mxu1 %v4385_v5  ;;  %1054 = vst.msk [vmem:[#allocation3 + $0x10] sm:$0xff] %vm5298_vm3, %v4102_v27  ;;  %v1139_v36 = vadd.f32 %v1137_v12, %v1133_v63  ;;  %7737 = vst [vmem:[#allocation45_spill] sm:$0xff] %v5996_v14  ;;  %v7740_v12 = vld [vmem:[#allocation36_spill] sm:$0xff]  ;;  %v7742_v63 = vld [vmem:[#allocation38_spill] sm:$0xff] }
  0xdd   :  { %v5980_v54 = vadd.f32 %v1121_v17, %v1115_v61  ;;  %v1140_v24 = vadd.f32 %v1138_v56, %v1134_v16  ;;  %v1155_v58 = vmul.f32 %v5919_v39, %v7732_v6  ;;  %v5986_v42 = vadd.f32 %v1122_v20, %v1116_v23  ;;  %v5994_v17 = vld [vmem:[#allocation2 + $0x60] sm:$0xff]  ;;  %4218 = vmatprep.subr.bf16.mxu1 %v4391_v11  ;;  %v7741_v56 = vld [vmem:[#allocation17_spill] sm:$0xff] }
  0xde   :  { %v1156_v32 = vmul.f32 %v5919_v39, %v7733_v30  ;;  %v1161_v5 = vmul.f32 %v5922_v57, %v7734_v62  ;;  %v1162_v7 = vmul.f32 %v5922_v57, %v7735_v13  ;;  %7736 = vst [vmem:[#allocation23_spill] sm:$0xff] %v5994_v17  ;;  %v1145_v35 = vadd.f32 %v1143_v43, %v1139_v36  ;;  %v7745_v30 = vld [vmem:[#allocation40_spill] sm:$0xff]  ;;  %v7746_v13 = vld [vmem:[#allocation41_spill] sm:$0xff] }
  0xdf   :  { %v1146_v31 = vadd.f32 %v1144_v26, %v1140_v24  ;;  %v1167_v20 = vmul.f32 %v5939_v37, %v7738_v0  ;;  %v1168_v59 = vmul.f32 %v5939_v37, %v7739_v10  ;;  %v1173_v44 = vmul.f32 %v5942_v60, %v7740_v12  ;;  %v7743_v26 = vld [vmem:[#allocation39_spill] sm:$0xff]  ;;  %v7744_v24 = vld [vmem:[#allocation22_spill] sm:$0xff] }
  0xe0   :  { %v1174_v27 = vmul.f32 %v5942_v60, %v7741_v56  ;;  %v1181_v61 = vmul.f32 %v5984_v47, %v5868_v15  ;;  %v1182_v11 = vmul.f32 %v5868_v15, %v7742_v63  ;;  %v1151_v43 = vadd.f32 %v1149_v40, %v1145_v35  ;;  %v7747_v12 = vld [vmem:[#allocation42_spill] sm:$0xff]  ;;  %v7748_v63 = vld [vmem:[#allocation43_spill] sm:$0xff] }
  0xe1   :  { %v1152_v16 = vadd.f32 %v1150_v55, %v1146_v31  ;;  %v1185_v23 = vmul.f32 %v5994_v17, %v5871_v8  ;;  %v1186_v2 = vmul.f32 %v5871_v8, %v7743_v26  ;;  %v1191_v36 = vmul.f32 %v5996_v14, %v5892_v3  ;;  %v7749_v14 = vld [vmem:[#allocation44_spill] sm:$0xff] }
  0xe2   :  { %v1192_v6 = vmul.f32 %v5892_v3, %v7744_v24  ;;  %v1197_v62 = vmul.f32 %v5895_v18, %v7745_v30  ;;  %v1198_v0 = vmul.f32 %v5895_v18, %v7746_v13  ;;  %v1157_v40 = vadd.f32 %v1155_v58, %v1151_v43  ;;  %v6030_v17 = vld [vmem:[#allocation2 + $0x30] sm:$0xff] }
  0xe3   :  { %v1158_v55 = vadd.f32 %v1156_v32, %v1152_v16  ;;  %v1187_v35 = vadd.f32 %v1185_v23, %v1181_v61  ;;  %v1188_v31 = vadd.f32 %v1186_v2, %v1182_v11  ;;  %v2292_v10 = vld [vmem:[#allocation3 + $0x10] sm:$0xff]  ;;  %v1203_v56 = vmul.f32 %v5898_v49, %v7747_v12  ;;  %v4392_v16 = vld [vmem:[%s7434_s3 + $0x200] sm:$0xff]  }
  0xe4   :  { %v1204_v26 = vmul.f32 %v5898_v49, %v7748_v63  ;;  %v1209_v24 = vmul.f32 %v5919_v39, %v7749_v14  ;;  %v1210_v30 = vmul.f32 %v5919_v39, %v5721_v21  ;;  %v3951_v58 = vcombine.low %v2292_v10, %v2292_v10  ;;  %v6034_v43 = vld [vmem:[#allocation2 + $0x70] sm:$0xff]  ;;  %v4394_v14 = vld [vmem:[%s7434_s3 + $0x248] sm:$0xff]  }
  0xe5   :  { %v3952_v32 = vcombine.high %v2292_v10, %v2292_v10  ;;  %v1163_v61 = vadd.f32 %v1161_v5, %v1157_v40  ;;  %v1164_v11 = vadd.f32 %v1162_v7, %v1158_v55  ;;  %v1193_v21 = vadd.f32 %v1191_v36, %v1187_v35  ;;  %v6048_v7 = vld [vmem:[#allocation2 + $0xb0] sm:$0xff] }
  0xe6   :  { %v1194_v23 = vadd.f32 %v1192_v6, %v1188_v31  ;;  %v1215_v2 = vmul.f32 %v5922_v57, %v5723_v9  ;;  %v1216_v5 = vmul.f32 %v5922_v57, %v5731_v45  ;;  %v1221_v55 = vmul.f32 %v5939_v37, %v5733_v1  ;;  %v6058_v45 = vld [vmem:[#allocation2 + $0xf0] sm:$0xff] }
  0xe7   :  { %3497 = vmatprep.mubr.bf16.mxu0 %v3952_v32  ;;  %v1169_v13 = vadd.f32 %v1167_v20, %v1163_v61  ;;  %v1170_v40 = vadd.f32 %v1168_v59, %v1164_v11  ;;  %v1222_v10 = vmul.f32 %v5939_v37, %v5738_v29  ;;  %v1199_v12 = vadd.f32 %v1197_v62, %v1193_v21  ;;  %v6060_v35 = vld [vmem:[#allocation2 + $0x130] sm:$0xff] }
  0xe8   :  { %v1200_v36 = vadd.f32 %v1198_v0, %v1194_v23  ;;  %v1227_v6 = vmul.f32 %v5942_v60, %v5740_v41  ;;  %v1228_v9 = vmul.f32 %v5942_v60, %v5749_v28  ;;  %3498 = vmatmul.mubr.bf16.vlgmr.msra.gmra.mrb[4].mxu0 %v3951_v58  ;;  %v1235_v29 = vmul.f32 %v6030_v17, %v5868_v15  ;;  %v4396_v28 = vld [vmem:[%s7434_s3 + $0x208] sm:$0xff]   ;;  %v4398_v59 = vld [vmem:[%s7434_s3 + $0x250] sm:$0xff]  }
  0xe9   :  { %v6064_v20 = vadd.f32 %v1173_v44, %v1169_v13  ;;  %v6066_v1 = vadd.f32 %v1174_v27, %v1170_v40  ;;  %v1236_v41 = vmul.f32 %v5868_v15, %v5755_v4  ;;  %4197 = vmatpush3.bf16.msra.mxu0 %v4392_v16  ;;  %v1205_v44 = vadd.f32 %v1203_v56, %v1199_v12  ;;  %v6092_v61 = vld [vmem:[#allocation2 + $0x170] sm:$0xff]  ;;  %v6142_v40 = vld [vmem:[#allocation2 + $0x48] sm:$0xff] }
  0xea   :  { %v1206_v27 = vadd.f32 %v1204_v26, %v1200_v36  ;;  %v1239_v62 = vmul.f32 %v6034_v43, %v5871_v8  ;;  %v1240_v0 = vmul.f32 %v5871_v8, %v5763_v25  ;;  %4198 = vmatprep.subr.bf16.mxu0 %v4394_v14  ;;  %v1245_v31 = vmul.f32 %v6048_v7, %v5892_v3  ;;  %v6153_v36 = vld [vmem:[#allocation2 + $0x80] sm:$0xff] }
  0xeb   :  { %v1177_v4 = vmax.f32 %v5980_v54, %v6064_v20  ;;  %v1178_v15 = vmax.f32 %v5986_v42, %v6066_v1  ;;  %v1246_v56 = vmul.f32 %v5892_v3, %v5776_v50  ;;  %v1211_v63 = vadd.f32 %v1209_v24, %v1205_v44  ;;  %v4400_v50 = vld [vmem:[%s7434_s3 + $0x210] sm:$0xff]   ;;  %v4402_v3 = vld [vmem:[%s7434_s3 + $0x258] sm:$0xff]  }
  0xec   :  { %v1212_v26 = vadd.f32 %v1210_v30, %v1206_v27  ;;  %v1241_v58 = vadd.f32 %v1239_v62, %v1235_v29  ;;  %v1242_v32 = vadd.f32 %v1240_v0, %v1236_v41  ;;  %v1251_v25 = vmul.f32 %v6058_v45, %v5895_v18  ;;  %v6177_v0 = vld [vmem:[#allocation2 + $0xc0] sm:$0xff] }
  0xed   :  { %v1252_v8 = vmul.f32 %v5895_v18, %v5785_v52  ;;  %v1257_v54 = vmul.f32 %v6060_v35, %v5898_v49  ;;  %v1258_v42 = vmul.f32 %v5898_v49, %v5797_v51  ;;  %4199 = vmatpush3.bf16.msra.mxu0 %v4396_v28  ;;  %v1217_v24 = vadd.f32 %v1215_v2, %v1211_v63  ;;  %v4408_v28 = vld [vmem:[%s7434_s3 + $0x220] sm:$0xff]  }
  0xee   :  { %v1218_v30 = vadd.f32 %v1216_v5, %v1212_v26  ;;  %v1247_v52 = vadd.f32 %v1245_v31, %v1241_v58  ;;  %v1248_v18 = vadd.f32 %v1246_v56, %v1242_v32  ;;  %4200 = vmatprep.subr.bf16.mxu0 %v4398_v59  ;;  %v1263_v11 = vmul.f32 %v6092_v61, %v5919_v39  ;;  %v4410_v56 = vld [vmem:[%s7434_s3 + $0x268] sm:$0xff]   ;;  %v6190_v58 = vld [vmem:[#allocation2 + $0x100] sm:$0xff] }
  0xef   :  { %v1264_v51 = vmul.f32 %v5919_v39, %v5808_v48  ;;  %v1269_v49 = vmul.f32 %v5922_v57, %v5810_v33  ;;  %v1270_v16 = vmul.f32 %v5922_v57, %v5821_v19  ;;  %v1223_v14 = vadd.f32 %v1221_v55, %v1217_v24  ;;  %v4404_v19 = vld [vmem:[%s7434_s3 + $0x218] sm:$0xff]   ;;  %v6131_v39 = vld [vmem:[#allocation2] sm:$0xff]  ;;  %7751 = vst [vmem:[#allocation27_spill] sm:$0xff] %v6190_v58  ;;  %v6192_v32 = vld [vmem:[#allocation2 + $0x108] sm:$0xff] }
  0xf0   :  { %v1224_v21 = vadd.f32 %v1222_v10, %v1218_v30  ;;  %v1253_v23 = vadd.f32 %v1251_v25, %v1247_v52  ;;  %v1254_v2 = vadd.f32 %v1252_v8, %v1248_v18  ;;  %v1275_v5 = vmul.f32 %v5939_v37, %v5829_v34  ;;  %v6133_v34 = vld [vmem:[#allocation2 + $0x8] sm:$0xff]  ;;  %7752 = vst [vmem:[#allocation47_spill] sm:$0xff] %v6192_v32  ;;  %v6204_v52 = vld [vmem:[#allocation2 + $0x140] sm:$0xff] }
  0xf1   :  { %v1276_v13 = vmul.f32 %v5939_v37, %v5831_v38  ;;  %v1281_v48 = vmul.f32 %v5942_v60, %v5833_v46  ;;  %v1282_v33 = vmul.f32 %v5942_v60, %v5843_v22  ;;  %4201 = vmatpush3.bf16.msra.mxu0 %v4400_v50  ;;  %v1229_v38 = vadd.f32 %v1227_v6, %v1223_v14  ;;  %v4406_v22 = vld [vmem:[%s7434_s3 + $0x260] sm:$0xff]   ;;  %v6155_v6 = vld [vmem:[#allocation2 + $0x88] sm:$0xff] }
  0xf2   :  { %v1230_v46 = vadd.f32 %v1228_v9, %v1224_v21  ;;  %v1259_v57 = vadd.f32 %v1257_v54, %v1253_v23  ;;  %v1260_v37 = vadd.f32 %v1258_v42, %v1254_v2  ;;  %4202 = vmatprep.subr.bf16.mxu0 %v4402_v3  ;;  %v6140_v60 = vld [vmem:[#allocation2 + $0x40] sm:$0xff]  ;;  %v1288_v55 = vstv %s6032_s24  ;;  %7753 = vst [vmem:[#allocation25_spill] sm:$0xff] %v6204_v52  ;;  %v6206_v18 = vld [vmem:[#allocation2 + $0x148] sm:$0xff] }
  0xf3   :  { %v6148_v10 = vstv %s6042_s25  ;;  %v6151_v12 = vstv %s6062_s26  ;;  %v6158_v9 = vstv %s6078_s1  ;;  %v6160_v20 = vmax.f32 %v1177_v4, %v1229_v38  ;;  %v6179_v4 = vld [vmem:[#allocation2 + $0xc8] sm:$0xff]  ;;  %7754 = vst [vmem:[#allocation12_spill] sm:$0xff] %v6206_v18  ;;  %v6215_v21 = vld [vmem:[#allocation2 + $0x180] sm:$0xff]  ;;  %s6483_s26 = sld [smem:[#allocation4 + $0x282]]  ;;  %s6510_s1 = sld [smem:[#allocation4 + $0x285]] }
  0xf4   :  { %v6162_v1 = vmax.f32 %v1178_v15, %v1230_v46  ;;  %v1265_v29 = vadd.f32 %v1263_v11, %v1259_v57  ;;  %v1266_v41 = vadd.f32 %v1264_v51, %v1260_v37  ;;  %v1306_v59 = vmul.f32 %v6148_v10, %v6131_v39  ;;  %7750 = vst [vmem:[#allocation46_spill] sm:$0xff] %v6179_v4  ;;  %v4412_v11 = vld [vmem:[%s7434_s3 + $0x228] sm:$0xff]   ;;  %s6826_s25 = sld [smem:[#allocation4 + $0x307]] }
  0xf5   :  { %4203 = vmatpush3.bf16.msra.mxu0 %v4404_v19  ;;  %v1307_v44 = vmul.f32 %v6148_v10, %v6133_v34  ;;  %v1312_v27 = vmul.f32 %v6151_v12, %v6140_v60  ;;  %v1313_v62 = vmul.f32 %v6151_v12, %v6142_v40  ;;  %v1320_v63 = vmul.f32 %v6158_v9, %v6153_v36  ;;  %v6217_v23 = vld [vmem:[#allocation2 + $0x188] sm:$0xff] }
  0xf6   :  { %v1271_v15 = vadd.f32 %v1269_v49, %v1265_v29  ;;  %v1272_v31 = vadd.f32 %v1270_v16, %v1266_v41  ;;  %4204 = vmatprep.subr.bf16.mxu0 %v4406_v22  ;;  %v1321_v26 = vmul.f32 %v6158_v9, %v6155_v6  ;;  %v6195_v54 = vstv %s6108_s13  ;;  %7755 = vst [vmem:[#allocation26_spill] sm:$0xff] %v6215_v21  ;;  %v6234_v22 = vld [vmem:[#allocation2 + $0x1c8] sm:$0xff]  ;;  %s6752_s13 = sld [smem:[#allocation4 + $0x301]] }
  0xf7   :  { %v1314_v25 = vadd.f32 %v1312_v27, %v1306_v59  ;;  %v1315_v8 = vadd.f32 %v1313_v62, %v1307_v44  ;;  %v6198_v42 = vstv %s6118_s14  ;;  %v1328_v24 = vmul.f32 %v6195_v54, %v6177_v0  ;;  %7756 = vst [vmem:[#allocation14_spill] sm:$0xff] %v6217_v23  ;;  %7758 = vst [vmem:[#allocation16_spill] sm:$0xff] %v6234_v22  ;;  %v6242_v44 = vld [vmem:[#allocation2 + $0x200] sm:$0xff]  ;;  %v6244_v27 = vld [vmem:[#allocation2 + $0x208] sm:$0xff]  ;;  %s6754_s14 = sld [smem:[#allocation4 + $0x302]] }
  0xf8   :  { %v1277_v50 = vadd.f32 %v1275_v5, %v1271_v15  ;;  %v1278_v3 = vadd.f32 %v1276_v13, %v1272_v31  ;;  %v1329_v30 = vmul.f32 %v6195_v54, %v6179_v4  ;;  %v1336_v16 = vmul.f32 %v6198_v42, %v6190_v58  ;;  %v4414_v13 = vld [vmem:[%s7434_s3 + $0x270] sm:$0xff]   ;;  %7759 = vst [vmem:[#allocation29_spill] sm:$0xff] %v6242_v44 }
  0xf9   :  { %4205 = vmatpush3.bf16.msra.mxu0 %v4408_v28  ;;  %v1322_v51 = vadd.f32 %v1320_v63, %v1314_v25  ;;  %v1323_v49 = vadd.f32 %v1321_v26, %v1315_v8  ;;  %v1337_v14 = vmul.f32 %v6198_v42, %v6192_v32  ;;  %v6223_v19 = vstv %s6135_s17  ;;  %7760 = vst [vmem:[#allocation18_spill] sm:$0xff] %v6244_v27  ;;  %v4416_v62 = vld [vmem:[%s7434_s3 + $0x230] sm:$0xff]   ;;  %v6257_v63 = vld [vmem:[#allocation2 + $0x18] sm:$0xff]  ;;  %v6408_v32 = vld [vmem:[#allocation2 + $0x228] sm:$0xff]  ;;  %s7210_s17 = sld [smem:[#allocation4 + $0x387]] }
  0xfa   :  { %v1283_v2 = vadd.f32 %v1281_v48, %v1277_v50  ;;  %v1284_v5 = vadd.f32 %v1282_v33, %v1278_v3  ;;  %4206 = vmatprep.subr.bf16.mxu0 %v4410_v56  ;;  %v6226_v38 = vstv %s6144_s21  ;;  %v1344_v37 = vmul.f32 %v6223_v19, %v6204_v52  ;;  %v6232_v33 = vld [vmem:[#allocation2 + $0x1c0] sm:$0xff]  ;;  %v6255_v56 = vld [vmem:[#allocation2 + $0x10] sm:$0xff]  ;;  %7762 = vst [vmem:[#allocation19_spill] sm:$0xff] %v6257_v63  ;;  %v4418_v8 = vld [vmem:[%s7434_s3 + $0x278] sm:$0xff]   ;;  %s6774_s21 = sld [smem:[#allocation4 + $0x304]] }
  0xfb   :  { %v1330_v46 = vadd.f32 %v1328_v24, %v1322_v51  ;;  %v1331_v57 = vadd.f32 %v1329_v30, %v1323_v49  ;;  %v1345_v48 = vmul.f32 %v6223_v19, %v6206_v18  ;;  %7757 = vst [vmem:[#allocation28_spill] sm:$0xff] %v6232_v33  ;;  %v1352_v28 = vmul.f32 %v6226_v38, %v6215_v21  ;;  %v6270_v24 = vld [vmem:[#allocation2 + $0x50] sm:$0xff]  ;;  %v6272_v30 = vld [vmem:[#allocation2 + $0x58] sm:$0xff] }
  0xfc   :  { %v1285_v29 = vmax.f32 %v6160_v20, %v1283_v2  ;;  %v1286_v41 = vmax.f32 %v6162_v1, %v1284_v5  ;;  %v1353_v59 = vmul.f32 %v6226_v38, %v6217_v23  ;;  %v6250_v20 = vstv %s6164_s22  ;;  %7761 = vst [vmem:[#allocation30_spill] sm:$0xff] %v6255_v56  ;;  %7763 = vst [vmem:[#allocation31_spill] sm:$0xff] %v6270_v24  ;;  %v6282_v2 = vld [vmem:[#allocation2 + $0xd0] sm:$0xff]  ;;  %s6450_s22 = sld [smem:[#allocation4 + $0x280]] }
  0xfd   :  { %4207 = vmatpush3.bf16.msra.mxu0 %v4412_v11  ;;  %v1338_v15 = vadd.f32 %v1336_v16, %v1330_v46  ;;  %v1339_v31 = vadd.f32 %v1337_v14, %v1331_v57  ;;  %v6253_v1 = vstv %s6181_s27  ;;  %v1360_v50 = vmul.f32 %v6250_v20, %v6232_v33  ;;  %7764 = vst [vmem:[#allocation20_spill] sm:$0xff] %v6272_v30  ;;  %v6278_v16 = vld [vmem:[#allocation2 + $0x90] sm:$0xff]  ;;  %v6280_v14 = vld [vmem:[#allocation2 + $0x98] sm:$0xff] }
  0xfe   :  { %v1289_v26 = vadd.f32 %v1288_v55, %v1285_v29  ;;  %v1290_v25 = vadd.f32 %v1288_v55, %v1286_v41  ;;  %4208 = vmatprep.subr.bf16.mxu0 %v4414_v13  ;;  %v1361_v3 = vmul.f32 %v6250_v20, %v6234_v22  ;;  %v1368_v55 = vmul.f32 %v6253_v1, %v6242_v44  ;;  %v4420_v46 = vld [vmem:[%s7434_s3 + $0x238] sm:$0xff]  }
  0xff   :  { %v1346_v11 = vadd.f32 %v1344_v37, %v1338_v15  ;;  %v1347_v51 = vadd.f32 %v1345_v48, %v1339_v31  ;;  %v1369_v49 = vmul.f32 %v6253_v1, %v6244_v27  ;;  %7765 = vst [vmem:[#allocation32_spill] sm:$0xff] %v6278_v16  ;;  %7766 = vst [vmem:[#allocation21_spill] sm:$0xff] %v6280_v14  ;;  %v6291_v48 = vld [vmem:[#allocation2 + $0xd8] sm:$0xff]  ;;  %v6301_v27 = vld [vmem:[#allocation2 + $0x150] sm:$0xff] }
 0x100   :  { %7767 = vst [vmem:[#allocation33_spill] sm:$0xff] %v6282_v2  ;;  %v1291_v5 = vmax.f32 %v1289_v26, 0.0  ;;  %v1292_v13 = vmax.f32 %v1290_v25, 0.0  ;;  %v1374_v57 = vmul.f32 %v6255_v56, %v6148_v10  ;;  %v1375_v37 = vmul.f32 %v6257_v63, %v6148_v10  ;;  %7768 = vst [vmem:[#allocation11_spill] sm:$0xff] %v6291_v48  ;;  %v6297_v26 = vld [vmem:[#allocation2 + $0x110] sm:$0xff]  ;;  %v6299_v25 = vld [vmem:[#allocation2 + $0x118] sm:$0xff] }
 0x101   :  { %4209 = vmatpush3.bf16.msra.mxu0 %v4416_v62  ;;  %v1354_v29 = vadd.f32 %v1352_v28, %v1346_v11  ;;  %v1355_v41 = vadd.f32 %v1353_v59, %v1347_v51  ;;  %v1378_v15 = vmul.f32 %v6270_v24, %v6151_v12  ;;  %v1379_v31 = vmul.f32 %v6272_v30, %v6151_v12  ;;  %v6309_v62 = vld [vmem:[#allocation2 + $0x158] sm:$0xff]  ;;  %v4426_v11 = vld [vmem:[%s7434_s3 + $0x340] sm:$0xff]   ;;  %v6384_v56 = vld [vmem:[#allocation2 + $0x1a8] sm:$0xff] }
 0x102   :  { %7769 = vst [vmem:[#allocation24_spill] sm:$0xff] %v6297_v26  ;;  %7770 = vst [vmem:[#allocation37_spill] sm:$0xff] %v6299_v25  ;;  %v4103_v44 = vpack.c.bf16 %v1292_v13, %v1291_v5  ;;  %4210 = vmatprep.subr.bf16.mxu0 %v4418_v8  ;;  %v1384_v63 = vmul.f32 %v6278_v16, %v6158_v9  ;;  %v1385_v28 = vmul.f32 %v6280_v14, %v6158_v9  ;;  %v6314_v8 = vld [vmem:[#allocation2 + $0x190] sm:$0xff]  ;;  %v6316_v13 = vld [vmem:[#allocation2 + $0x198] sm:$0xff] }
 0x103   :  { %7771 = vst [vmem:[#allocation34_spill] sm:$0xff] %v6301_v27  ;;  %v1390_v59 = vmul.f32 %v6282_v2, %v6195_v54  ;;  %7772 = vst [vmem:[#allocation13_spill] sm:$0xff] %v6309_v62  ;;  %v1362_v51 = vadd.f32 %v1360_v50, %v1354_v29  ;;  %v1363_v30 = vadd.f32 %v1361_v3, %v1355_v41  ;;  %v6318_v16 = vld [vmem:[#allocation2 + $0x1d0] sm:$0xff] }
 0x104   :  { %v1380_v24 = vadd.f32 %v1378_v15, %v1374_v57  ;;  %v1381_v5 = vadd.f32 %v1379_v31, %v1375_v37  ;;  %7773 = vst [vmem:[#allocation35_spill] sm:$0xff] %v6314_v8  ;;  %7774 = vst [vmem:[#allocation15_spill] sm:$0xff] %v6316_v13  ;;  %v1391_v2 = vmul.f32 %v6291_v48, %v6195_v54  ;;  %v6330_v57 = vld [vmem:[#allocation2 + $0x1d8] sm:$0xff]  ;;  %v6332_v37 = vld [vmem:[#allocation2 + $0x210] sm:$0xff] }
 0x105   :  { %7775 = vst [vmem:[#allocation36_spill] sm:$0xff] %v6318_v16  ;;  %1301 = vst.msk [vmem:[#allocation3 + $0x18] sm:$0xff] %vm5298_vm3, %v4103_v44  ;;  %v1396_v14 = vmul.f32 %v6297_v26, %v6198_v42  ;;  %v1397_v50 = vmul.f32 %v6299_v25, %v6198_v42  ;;  %v1402_v3 = vmul.f32 %v6301_v27, %v6223_v19  ;;  %4211 = vmatpush3.bf16.msra.mxu0 %v4420_v46  ;;  %v6338_v31 = vld [vmem:[#allocation2 + $0x218] sm:$0xff]  ;;  %v6340_v26 = vld [vmem:[#allocation2 + $0x28] sm:$0xff] }
 0x106   :  { %7776 = vst [vmem:[#allocation17_spill] sm:$0xff] %v6330_v57  ;;  %7777 = vst [vmem:[#allocation38_spill] sm:$0xff] %v6332_v37  ;;  %v6334_v29 = vadd.f32 %v1368_v55, %v1362_v51  ;;  %v6336_v44 = vadd.f32 %v1369_v49, %v1363_v30  ;;  %v1386_v41 = vadd.f32 %v1384_v63, %v1380_v24  ;;  %v6350_v30 = vld [vmem:[#allocation2 + $0x68] sm:$0xff]  ;;  %4240 = vmatprep.subr.bf16.mxu0 %v4426_v11  ;;  %v6358_v51 = vld [vmem:[#allocation2 + $0xe0] sm:$0xff] }
 0x107   :  { %v1387_v15 = vadd.f32 %v1385_v28, %v1381_v5  ;;  %7778 = vst [vmem:[#allocation39_spill] sm:$0xff] %v6338_v31  ;;  %7779 = vst [vmem:[#allocation22_spill] sm:$0xff] %v6340_v26  ;;  %v1403_v25 = vmul.f32 %v6309_v62, %v6223_v19  ;;  %v1408_v27 = vmul.f32 %v6314_v8, %v6226_v38  ;;  %v6356_v28 = vld [vmem:[#allocation2 + $0xa8] sm:$0xff]  ;;  %v7785_v62 = vld [vmem:[#allocation45_spill] sm:$0xff] }
 0x108   :  { %v1409_v53 = vmul.f32 %v6316_v13, %v6226_v38  ;;  %v1414_v55 = vmul.f32 %v6318_v16, %v6250_v20  ;;  %7780 = vst [vmem:[#allocation40_spill] sm:$0xff] %v6350_v30  ;;  %v1392_v63 = vadd.f32 %v1390_v59, %v1386_v41  ;;  %v1415_v49 = vmul.f32 %v6330_v57, %v6250_v20  ;;  %v6360_v5 = vld [vmem:[#allocation2 + $0xe8] sm:$0xff]  ;;  %v6374_v57 = vld [vmem:[#allocation2 + $0x160] sm:$0xff] }
 0x109   :  { %v1393_v24 = vadd.f32 %v1391_v2, %v1387_v15  ;;  %v1420_v46 = vmul.f32 %v6332_v37, %v6253_v1  ;;  %7781 = vst [vmem:[#allocation41_spill] sm:$0xff] %v6356_v28  ;;  %7782 = vst [vmem:[#allocation42_spill] sm:$0xff] %v6358_v51  ;;  %v1421_v16 = vmul.f32 %v6338_v31, %v6253_v1  ;;  %v7784_v59 = vld [vmem:[#allocation23_spill] sm:$0xff]  ;;  %v6370_v15 = vld [vmem:[#allocation2 + $0x120] sm:$0xff] }
 0x10a   :  { %7783 = vst [vmem:[#allocation43_spill] sm:$0xff] %v6360_v5  ;;  %v1428_v11 = vmul.f32 %v6148_v10, %v5984_v47  ;;  %v1429_v2 = vmul.f32 %v6340_v26, %v6148_v10  ;;  %v1432_v41 = vmul.f32 %v6151_v12, %v7784_v59  ;;  %v6372_v37 = vld [vmem:[#allocation2 + $0x128] sm:$0xff]  ;;  %v1398_v13 = vadd.f32 %v1396_v14, %v1392_v63  ;;  %v6382_v26 = vld [vmem:[#allocation2 + $0x1a0] sm:$0xff] }
 0x10b   :  { %v1399_v8 = vadd.f32 %v1397_v50, %v1393_v24  ;;  %v1433_v31 = vmul.f32 %v6350_v30, %v6151_v12  ;;  %v1438_v47 = vmul.f32 %v6158_v9, %v7785_v62  ;;  %v6380_v48 = vld [vmem:[#allocation2 + $0x168] sm:$0xff]  ;;  %v4393_v59 = vld [vmem:[%s7434_s3 + $0x280] sm:$0xff]   ;;  %v1439_v14 = vmul.f32 %v6356_v28, %v6158_v9 }
 0x10c   :  { %v1434_v22 = vadd.f32 %v1432_v41, %v1428_v11  ;;  %v1444_v50 = vmul.f32 %v6358_v51, %v6195_v54  ;;  %v1445_v62 = vmul.f32 %v6360_v5, %v6195_v54  ;;  %v6395_v63 = vld [vmem:[#allocation2 + $0x1e0] sm:$0xff]  ;;  %v2293_v24 = vld [vmem:[#allocation3 + $0x18] sm:$0xff]  ;;  %v4395_v30 = vld [vmem:[%s7434_s3 + $0x2c8] sm:$0xff]   ;;  %v1404_v33 = vadd.f32 %v1402_v3, %v1398_v13 }
 0x10d   :  { %v1405_v23 = vadd.f32 %v1403_v25, %v1399_v8  ;;  %v1435_v21 = vadd.f32 %v1433_v31, %v1429_v2  ;;  %v1450_v11 = vmul.f32 %v6370_v15, %v6198_v42  ;;  %v6402_v41 = vld [vmem:[#allocation2 + $0x1e8] sm:$0xff]  ;;  %v6404_v28 = vld [vmem:[#allocation2 + $0x220] sm:$0xff]  ;;  %v3953_v51 = vcombine.low %v2293_v24, %v2293_v24  ;;  %v6412_v8 = vld [vmem:[#allocation2 + $0x38] sm:$0xff] }
 0x10e   :  { %v3954_v18 = vcombine.high %v2293_v24, %v2293_v24  ;;  %v1440_v5 = vadd.f32 %v1438_v47, %v1434_v22  ;;  %v1451_v52 = vmul.f32 %v6372_v37, %v6198_v42  ;;  %v1410_v58 = vadd.f32 %v1408_v27, %v1404_v33  ;;  %v6420_v47 = vld [vmem:[#allocation2 + $0x78] sm:$0xff] }
 0x10f   :  { %v1411_v4 = vadd.f32 %v1409_v53, %v1405_v23  ;;  %v1441_v13 = vadd.f32 %v1439_v14, %v1435_v21  ;;  %v1456_v25 = vmul.f32 %v6374_v57, %v6223_v19  ;;  %v1457_v31 = vmul.f32 %v6380_v48, %v6223_v19 }
 0x110   :  { %3537 = vmatprep.mubr.bf16.mxu1 %v3954_v18  ;;  %v1446_v3 = vadd.f32 %v1444_v50, %v1440_v5  ;;  %v1462_v22 = vmul.f32 %v6382_v26, %v6226_v38  ;;  %v1463_v2 = vmul.f32 %v6384_v56, %v6226_v38  ;;  %v1416_v53 = vadd.f32 %v1414_v55, %v1410_v58  ;;  %v4397_v18 = vld [vmem:[%s7434_s3 + $0x288] sm:$0xff]   ;;  %v6440_v50 = vld [vmem:[#allocation2 + $0xb8] sm:$0xff] }
 0x111   :  { %3538 = vmatmul.mubr.bf16.vlgmr.msra.gmra.mrb[4].mxu1 %v3953_v51  ;;  %v1417_v21 = vadd.f32 %v1415_v49, %v1411_v4  ;;  %v1447_v23 = vadd.f32 %v1445_v62, %v1441_v13  ;;  %v1468_v33 = vmul.f32 %v6395_v63, %v6250_v20  ;;  %v1469_v5 = vmul.f32 %v6402_v41, %v6250_v20  ;;  %v4399_v4 = vld [vmem:[%s7434_s3 + $0x2d0] sm:$0xff]   ;;  %v6448_v13 = vld [vmem:[#allocation2 + $0xf8] sm:$0xff] }
 0x112   :  { %4219 = vmatpush3.bf16.msra.mxu1 %v4393_v59  ;;  %v1452_v27 = vadd.f32 %v1450_v11, %v1446_v3  ;;  %v1474_v14 = vmul.f32 %v6404_v28, %v6253_v1  ;;  %v1475_v58 = vmul.f32 %v6408_v32, %v6253_v1  ;;  %v1422_v55 = vadd.f32 %v1420_v46, %v1416_v53  ;;  %v6468_v3 = vld [vmem:[#allocation2 + $0x178] sm:$0xff] }
 0x113   :  { %4220 = vmatprep.subr.bf16.mxu1 %v4395_v30  ;;  %v6436_v49 = vadd.f32 %v1421_v16, %v1417_v21  ;;  %v1453_v51 = vadd.f32 %v1451_v52, %v1447_v23  ;;  %v1482_v59 = vmul.f32 %v6148_v10, %v6030_v17  ;;  %v1483_v24 = vmul.f32 %v6412_v8, %v6148_v10  ;;  %v6457_v10 = vld [vmem:[#allocation2 + $0x138] sm:$0xff] }
 0x114   :  { %v1458_v62 = vadd.f32 %v1456_v25, %v1452_v27  ;;  %v1486_v30 = vmul.f32 %v6151_v12, %v6034_v43  ;;  %v1487_v11 = vmul.f32 %v6420_v47, %v6151_v12  ;;  %v1424_v52 = vmax.f32 %v6334_v29, %v1422_v55  ;;  %v4401_v43 = vld [vmem:[%s7434_s3 + $0x290] sm:$0xff]  }
 0x115   :  { %v1425_v17 = vmax.f32 %v6336_v44, %v6436_v49  ;;  %v1459_v16 = vadd.f32 %v1457_v31, %v1453_v51  ;;  %v1492_v46 = vmul.f32 %v6158_v9, %v6048_v7  ;;  %v1493_v44 = vmul.f32 %v6440_v50, %v6158_v9  ;;  %v6470_v7 = vld [vmem:[#allocation2 + $0x1b0] sm:$0xff]  ;;  %v4403_v31 = vld [vmem:[%s7434_s3 + $0x2d8] sm:$0xff]  }
 0x116   :  { %4221 = vmatpush3.bf16.msra.mxu1 %v4397_v18  ;;  %v1464_v12 = vadd.f32 %v1462_v22, %v1458_v62  ;;  %v1488_v29 = vadd.f32 %v1486_v30, %v1482_v59  ;;  %v1489_v25 = vadd.f32 %v1487_v11, %v1483_v24  ;;  %v1498_v21 = vmul.f32 %v6195_v54, %v6058_v45  ;;  %v6481_v9 = vld [vmem:[#allocation2 + $0x1b8] sm:$0xff]  ;;  %v6489_v55 = vld [vmem:[#allocation2 + $0x1f0] sm:$0xff] }
 0x117   :  { %4222 = vmatprep.subr.bf16.mxu1 %v4399_v4  ;;  %v1465_v53 = vadd.f32 %v1463_v2, %v1459_v16  ;;  %v1499_v22 = vmul.f32 %v6448_v13, %v6195_v54  ;;  %v1504_v23 = vmul.f32 %v6198_v42, %v6060_v35  ;;  %v1505_v2 = vmul.f32 %v6457_v10, %v6198_v42  ;;  %v6491_v45 = vld [vmem:[#allocation2 + $0x1f8] sm:$0xff]  ;;  %v6493_v54 = vld [vmem:[#allocation2 + $0x230] sm:$0xff] }
 0x118   :  { %v1470_v18 = vadd.f32 %v1468_v33, %v1464_v12  ;;  %v1494_v27 = vadd.f32 %v1492_v46, %v1488_v29  ;;  %v1495_v4 = vadd.f32 %v1493_v44, %v1489_v25  ;;  %v1510_v35 = vmul.f32 %v6223_v19, %v6092_v61  ;;  %v6501_v59 = vld [vmem:[#allocation2 + $0x238] sm:$0xff] }
 0x119   :  { %v1471_v49 = vadd.f32 %v1469_v5, %v1465_v53  ;;  %v1511_v51 = vmul.f32 %v6468_v3, %v6223_v19  ;;  %v1516_v33 = vmul.f32 %v6470_v7, %v6226_v38  ;;  %v4405_v42 = vld [vmem:[%s7434_s3 + $0x298] sm:$0xff]   ;;  %v1517_v61 = vmul.f32 %v6481_v9, %v6226_v38  ;;  %v4407_v19 = vld [vmem:[%s7434_s3 + $0x2e0] sm:$0xff]   ;;  %v4411_v53 = vld [vmem:[%s7434_s3 + $0x2e8] sm:$0xff]  }
 0x11a   :  { %4223 = vmatpush3.bf16.msra.mxu1 %v4401_v43  ;;  %v1476_v62 = vadd.f32 %v1474_v14, %v1470_v18  ;;  %v1500_v24 = vadd.f32 %v1498_v21, %v1494_v27  ;;  %v1501_v5 = vadd.f32 %v1499_v22, %v1495_v4  ;;  %v1522_v14 = vmul.f32 %v6489_v55, %v6250_v20 }
 0x11b   :  { %4224 = vmatprep.subr.bf16.mxu1 %v4403_v31  ;;  %v1477_v30 = vadd.f32 %v1475_v58, %v1471_v49  ;;  %v1523_v11 = vmul.f32 %v6491_v45, %v6250_v20  ;;  %v1528_v38 = vmul.f32 %v6493_v54, %v6253_v1  ;;  %v1529_v12 = vmul.f32 %v6501_v59, %v6253_v1  ;;  %v4409_v20 = vld [vmem:[%s7434_s3 + $0x2a0] sm:$0xff]  }
 0x11c   :  { %v6521_v16 = vmax.f32 %v1424_v52, %v1476_v62  ;;  %v1506_v46 = vadd.f32 %v1504_v23, %v1500_v24  ;;  %v1507_v43 = vadd.f32 %v1505_v2, %v1501_v5  ;;  %v1535_v25 = vstv %s6459_s23  ;;  %v7786_v49 = vld [vmem:[#allocation46_spill] sm:$0xff]  ;;  %v7787_v5 = vld [vmem:[#allocation27_spill] sm:$0xff] }
 0x11d   :  { %v1479_v29 = vmax.f32 %v1425_v17, %v1477_v30  ;;  %v6527_v58 = vstv %s6450_s22  ;;  %v6530_v44 = vstv %s6461_s29  ;;  %v6551_v23 = vstv %s6483_s26 }
 0x11e   :  { %4225 = vmatpush3.bf16.msra.mxu1 %v4405_v42  ;;  %v1512_v52 = vadd.f32 %v1510_v35, %v1506_v46  ;;  %v1513_v31 = vadd.f32 %v1511_v51, %v1507_v43  ;;  %v1553_v1 = vmul.f32 %v6527_v58, %v6131_v39  ;;  %v1554_v17 = vmul.f32 %v6527_v58, %v6133_v34  ;;  %v4413_v51 = vld [vmem:[%s7434_s3 + $0x2a8] sm:$0xff]   ;;  %v7789_v46 = vld [vmem:[#allocation25_spill] sm:$0xff] }
 0x11f   :  { %4226 = vmatprep.subr.bf16.mxu1 %v4407_v19  ;;  %v1559_v21 = vmul.f32 %v6530_v44, %v6140_v60  ;;  %v1560_v22 = vmul.f32 %v6530_v44, %v6142_v40  ;;  %v6554_v18 = vstv %s6485_s30  ;;  %v1567_v34 = vmul.f32 %v6551_v23, %v6153_v36  ;;  %v7788_v19 = vld [vmem:[#allocation47_spill] sm:$0xff] }
 0x120   :  { %v1518_v39 = vadd.f32 %v1516_v33, %v1512_v52  ;;  %v1519_v27 = vadd.f32 %v1517_v61, %v1513_v31  ;;  %v1568_v4 = vmul.f32 %v6551_v23, %v6155_v6  ;;  %v1575_v40 = vmul.f32 %v6554_v18, %v6177_v0  ;;  %v4415_v0 = vld [vmem:[%s7434_s3 + $0x2f0] sm:$0xff]  }
 0x121   :  { %v1561_v60 = vadd.f32 %v1559_v21, %v1553_v1  ;;  %v1562_v2 = vadd.f32 %v1560_v22, %v1554_v17  ;;  %v1576_v35 = vmul.f32 %v6554_v18, %v7786_v49  ;;  %v6570_v6 = vstv %s6508_s9  ;;  %v4417_v21 = vld [vmem:[%s7434_s3 + $0x2b0] sm:$0xff]   ;;  %v7791_v22 = vld [vmem:[#allocation26_spill] sm:$0xff]  ;;  %s7147_s9 = sld [smem:[#allocation4 + $0x382]] }
 0x122   :  { %4227 = vmatpush3.bf16.msra.mxu1 %v4409_v20  ;;  %v1524_v33 = vadd.f32 %v1522_v14, %v1518_v39  ;;  %v1525_v36 = vadd.f32 %v1523_v11, %v1519_v27  ;;  %v6573_v42 = vstv %s6510_s1  ;;  %v1583_v61 = vmul.f32 %v6570_v6, %v7787_v5  ;;  %v7790_v20 = vld [vmem:[#allocation12_spill] sm:$0xff]  ;;  %v7792_v27 = vld [vmem:[#allocation14_spill] sm:$0xff]  ;;  %v7796_v5 = vld [vmem:[#allocation29_spill] sm:$0xff]  ;;  %s7149_s1 = sld [smem:[#allocation4 + $0x383]] }
 0x123   :  { %4228 = vmatprep.subr.bf16.mxu1 %v4411_v53  ;;  %v1569_v62 = vadd.f32 %v1567_v34, %v1561_v60  ;;  %v1570_v24 = vadd.f32 %v1568_v4, %v1562_v2  ;;  %v1584_v30 = vmul.f32 %v6570_v6, %v7788_v19  ;;  %v1591_v43 = vmul.f32 %v6573_v42, %v7789_v46  ;;  %v4419_v4 = vld [vmem:[%s7434_s3 + $0x2f8] sm:$0xff]   ;;  %v7798_v46 = vld [vmem:[#allocation19_spill] sm:$0xff] }
 0x124   :  { %v1530_v14 = vadd.f32 %v1528_v38, %v1524_v33  ;;  %v1531_v11 = vadd.f32 %v1529_v12, %v1525_v36  ;;  %v1592_v52 = vmul.f32 %v6573_v42, %v7790_v20  ;;  %v6587_v17 = vstv %s6532_s10  ;;  %v7795_v36 = vld [vmem:[#allocation30_spill] sm:$0xff] }
 0x125   :  { %v1577_v31 = vadd.f32 %v1575_v40, %v1569_v62  ;;  %v1578_v1 = vadd.f32 %v1576_v35, %v1570_v24  ;;  %v6590_v53 = vstv %s6534_s11  ;;  %v1599_v39 = vmul.f32 %v6587_v17, %v7791_v22  ;;  %v7793_v40 = vld [vmem:[#allocation28_spill] sm:$0xff]  ;;  %s6740_s11 = sld [smem:[#allocation6 + $0x5]] }
 0x126   :  { %4229 = vmatpush3.bf16.msra.mxu1 %v4413_v51  ;;  %v1532_v38 = vmax.f32 %v6521_v16, %v1530_v14  ;;  %v1533_v12 = vmax.f32 %v1479_v29, %v1531_v11  ;;  %v1600_v34 = vmul.f32 %v6587_v17, %v7792_v27  ;;  %v1607_v49 = vmul.f32 %v6590_v53, %v7793_v40  ;;  %v7794_v35 = vld [vmem:[#allocation16_spill] sm:$0xff]  ;;  %v4421_v14 = vld [vmem:[%s7434_s3 + $0x2b8] sm:$0xff]   ;;  %v4427_v27 = vld [vmem:[%s7434_s3 + $0x3c0] sm:$0xff]  }
 0x127   :  { %4230 = vmatprep.subr.bf16.mxu1 %v4415_v0  ;;  %v1585_v60 = vadd.f32 %v1583_v61, %v1577_v31  ;;  %v1586_v2 = vadd.f32 %v1584_v30, %v1578_v1  ;;  %v1608_v16 = vmul.f32 %v6590_v53, %v7794_v35  ;;  %v6608_v33 = vstv %s6560_s16  ;;  %v7797_v61 = vld [vmem:[#allocation18_spill] sm:$0xff]  ;;  %v7799_v31 = vld [vmem:[#allocation31_spill] sm:$0xff]  ;;  %v7801_v22 = vld [vmem:[#allocation32_spill] sm:$0xff] }
 0x128   :  { %v1536_v29 = vadd.f32 %v1535_v25, %v1532_v38  ;;  %v1537_v51 = vadd.f32 %v1535_v25, %v1533_v12  ;;  %v1621_v62 = vmul.f32 %v6527_v58, %v7795_v36  ;;  %v1615_v19 = vmul.f32 %v6608_v33, %v7796_v5  ;;  %v7800_v38 = vld [vmem:[#allocation20_spill] sm:$0xff]  ;;  %v7802_v40 = vld [vmem:[#allocation21_spill] sm:$0xff]  ;;  %v7804_v36 = vld [vmem:[#allocation11_spill] sm:$0xff] }
 0x129   :  { %v1593_v0 = vadd.f32 %v1591_v43, %v1585_v60  ;;  %v1594_v24 = vadd.f32 %v1592_v52, %v1586_v2  ;;  %v1616_v30 = vmul.f32 %v6608_v33, %v7797_v61  ;;  %v1622_v20 = vmul.f32 %v6527_v58, %v7798_v46  ;;  %v7806_v61 = vld [vmem:[#allocation24_spill] sm:$0xff]  ;;  %v7808_v46 = vld [vmem:[#allocation34_spill] sm:$0xff] }
 0x12a   :  { %4231 = vmatpush3.bf16.msra.mxu1 %v4417_v21  ;;  %v1538_v11 = vmax.f32 %v1536_v29, 0.0  ;;  %v1539_v25 = vmax.f32 %v1537_v51, 0.0  ;;  %v1625_v43 = vmul.f32 %v6530_v44, %v7799_v31  ;;  %v1626_v12 = vmul.f32 %v6530_v44, %v7800_v38  ;;  %v7803_v29 = vld [vmem:[#allocation33_spill] sm:$0xff] }
 0x12b   :  { %4232 = vmatprep.subr.bf16.mxu1 %v4419_v4  ;;  %v1601_v52 = vadd.f32 %v1599_v39, %v1593_v0  ;;  %v1602_v1 = vadd.f32 %v1600_v34, %v1594_v24  ;;  %v1631_v21 = vmul.f32 %v6551_v23, %v7801_v22  ;;  %v1632_v35 = vmul.f32 %v6551_v23, %v7802_v40  ;;  %v7031_v24 = vld [vmem:[#allocation2 + $0x128] sm:$0xff] }
 0x12c   :  { %v4104_v60 = vpack.c.bf16 %v1539_v25, %v1538_v11  ;;  %v1627_v2 = vadd.f32 %v1625_v43, %v1621_v62  ;;  %v1637_v4 = vmul.f32 %v6554_v18, %v7803_v29  ;;  %v1628_v51 = vadd.f32 %v1626_v12, %v1622_v20  ;;  %v7807_v11 = vld [vmem:[#allocation37_spill] sm:$0xff]  ;;  %v7812_v12 = vld [vmem:[#allocation35_spill] sm:$0xff] }
 0x12d   :  { %v1609_v39 = vadd.f32 %v1607_v49, %v1601_v52  ;;  %v1610_v34 = vadd.f32 %v1608_v16, %v1602_v1  ;;  %v1638_v0 = vmul.f32 %v6554_v18, %v7804_v36  ;;  %v1643_v62 = vmul.f32 %v6570_v6, %v7806_v61  ;;  %v7809_v43 = vld [vmem:[#allocation13_spill] sm:$0xff]  ;;  %v6650_v52 = vld [vmem:[#allocation2 + $0x20] sm:$0xff] }
 0x12e   :  { %4233 = vmatpush3.bf16.msra.mxu1 %v4421_v14  ;;  %1548 = vst.msk [vmem:[#allocation3 + $0x20] sm:$0xff] %vm5298_vm3, %v4104_v60  ;;  %v1633_v5 = vadd.f32 %v1631_v21, %v1627_v2  ;;  %v1644_v25 = vmul.f32 %v6570_v6, %v7807_v11  ;;  %v1649_v31 = vmul.f32 %v6573_v42, %v7808_v46  ;;  %7810 = vst [vmem:[#allocation44_spill] sm:$0xff] %v6650_v52  ;;  %v6652_v1 = vld [vmem:[#allocation2 + $0x60] sm:$0xff]  ;;  %v7813_v21 = vld [vmem:[#allocation15_spill] sm:$0xff] }
 0x12f   :  { %v6644_v49 = vadd.f32 %v1615_v19, %v1609_v39  ;;  %v6646_v16 = vadd.f32 %v1616_v30, %v1610_v34  ;;  %v1634_v20 = vadd.f32 %v1632_v35, %v1628_v51  ;;  %v1650_v14 = vmul.f32 %v6573_v42, %v7809_v43  ;;  %7811 = vst [vmem:[#allocation23_spill] sm:$0xff] %v6652_v1  ;;  %v7814_v19 = vld [vmem:[#allocation36_spill] sm:$0xff]  ;;  %v6660_v2 = vld [vmem:[#allocation2 + $0xa0] sm:$0xff]  ;;  %v7816_v35 = vld [vmem:[#allocation17_spill] sm:$0xff] }
 0x130   :  { %4262 = vmatprep.subr.bf16.mxu1 %v4427_v27  ;;  %v1639_v38 = vadd.f32 %v1637_v4, %v1633_v5  ;;  %v1655_v22 = vmul.f32 %v6587_v17, %v7812_v12  ;;  %v1656_v60 = vmul.f32 %v6587_v17, %v7813_v21  ;;  %v1661_v30 = vmul.f32 %v6590_v53, %v7814_v19  ;;  %v7817_v39 = vld [vmem:[#allocation38_spill] sm:$0xff]  ;;  %v7818_v27 = vld [vmem:[#allocation39_spill] sm:$0xff]  ;;  %v7820_v46 = vld [vmem:[#allocation40_spill] sm:$0xff] }
 0x131   :  { %7815 = vst [vmem:[#allocation45_spill] sm:$0xff] %v6660_v2  ;;  %v1640_v40 = vadd.f32 %v1638_v0, %v1634_v20  ;;  %v1662_v29 = vmul.f32 %v6590_v53, %v7816_v35  ;;  %v1667_v34 = vmul.f32 %v6608_v33, %v7817_v39  ;;  %v1668_v4 = vmul.f32 %v6608_v33, %v7818_v27  ;;  %v7819_v5 = vld [vmem:[#allocation22_spill] sm:$0xff]  ;;  %v7821_v12 = vld [vmem:[#allocation41_spill] sm:$0xff]  ;;  %v7823_v39 = vld [vmem:[#allocation43_spill] sm:$0xff] }
 0x132   :  { %v1645_v51 = vadd.f32 %v1643_v62, %v1639_v38  ;;  %v1675_v36 = vmul.f32 %v6650_v52, %v6527_v58  ;;  %v1676_v61 = vmul.f32 %v6527_v58, %v7819_v5  ;;  %v1679_v11 = vmul.f32 %v6652_v1, %v6530_v44  ;;  %v7822_v19 = vld [vmem:[#allocation42_spill] sm:$0xff]  ;;  %7856 = vst [vmem:[#allocation40_spill] sm:$0xff] %v7031_v24 }
 0x133   :  { %v1646_v0 = vadd.f32 %v1644_v25, %v1640_v40  ;;  %v1680_v20 = vmul.f32 %v6530_v44, %v7820_v46  ;;  %v1685_v43 = vmul.f32 %v6660_v2, %v6551_v23  ;;  %v1686_v21 = vmul.f32 %v6551_v23, %v7821_v12 }
 0x134   :  { %v1651_v62 = vadd.f32 %v1649_v31, %v1645_v51  ;;  %v1681_v38 = vadd.f32 %v1679_v11, %v1675_v36  ;;  %v1691_v35 = vmul.f32 %v6554_v18, %v7822_v19  ;;  %v1692_v27 = vmul.f32 %v6554_v18, %v7823_v39  ;;  %v4428_v51 = vld [vmem:[%s7434_s3 + $0x300] sm:$0xff]   ;;  %v6738_v39 = vld [vmem:[#allocation2 + $0x130] sm:$0xff] }
 0x135   :  { %v2294_v5 = vld [vmem:[#allocation3 + $0x20] sm:$0xff]  ;;  %v1652_v1 = vadd.f32 %v1650_v14, %v1646_v0  ;;  %v1682_v25 = vadd.f32 %v1680_v20, %v1676_v61  ;;  %v1697_v40 = vmul.f32 %v6570_v6, %v6370_v15  ;;  %v1698_v46 = vmul.f32 %v6570_v6, %v6372_v37  ;;  %v4430_v37 = vld [vmem:[%s7434_s3 + $0x348] sm:$0xff]  }
 0x136   :  { %v3955_v2 = vcombine.low %v2294_v5, %v2294_v5  ;;  %v3956_v52 = vcombine.high %v2294_v5, %v2294_v5  ;;  %v1657_v12 = vadd.f32 %v1655_v22, %v1651_v62  ;;  %v1687_v31 = vadd.f32 %v1685_v43, %v1681_v38  ;;  %v6750_v5 = vld [vmem:[#allocation2 + $0x170] sm:$0xff] }
 0x137   :  { %v1658_v36 = vadd.f32 %v1656_v60, %v1652_v1  ;;  %v1688_v11 = vadd.f32 %v1686_v21, %v1682_v25  ;;  %v1703_v14 = vmul.f32 %v6573_v42, %v6374_v57  ;;  %v1704_v61 = vmul.f32 %v6573_v42, %v6380_v48  ;;  %v6702_v60 = vld [vmem:[#allocation2 + $0x30] sm:$0xff] }
 0x138   :  { %3577 = vmatprep.mubr.bf16.mxu0 %v3956_v52  ;;  %v1663_v15 = vadd.f32 %v1661_v30, %v1657_v12  ;;  %v1693_v22 = vadd.f32 %v1691_v35, %v1687_v31  ;;  %v1709_v0 = vmul.f32 %v6587_v17, %v6382_v26  ;;  %v1710_v1 = vmul.f32 %v6587_v17, %v6384_v56  ;;  %v6708_v21 = vld [vmem:[#allocation2 + $0x70] sm:$0xff]  ;;  %v4438_v31 = vld [vmem:[%s7434_s3 + $0x358] sm:$0xff]  }
 0x139   :  { %v1664_v20 = vadd.f32 %v1662_v29, %v1658_v36  ;;  %v1694_v57 = vadd.f32 %v1692_v27, %v1688_v11  ;;  %v1715_v48 = vmul.f32 %v6590_v53, %v6395_v63  ;;  %v1716_v43 = vmul.f32 %v6590_v53, %v6402_v41  ;;  %3578 = vmatmul.mubr.bf16.vlgmr.msra.gmra.mrb[8].mxu0 %v3955_v2  ;;  %v6716_v29 = vld [vmem:[#allocation2 + $0xb0] sm:$0xff]  ;;  %v4432_v63 = vld [vmem:[%s7434_s3 + $0x308] sm:$0xff]  }
 0x13a   :  { %v6710_v52 = vadd.f32 %v1667_v34, %v1663_v15  ;;  %v1699_v30 = vadd.f32 %v1697_v40, %v1693_v22  ;;  %v1721_v26 = vmul.f32 %v6608_v33, %v6404_v28  ;;  %v1722_v56 = vmul.f32 %v6608_v33, %v6408_v32  ;;  %4241 = vmatpush3.bf16.msra.mxu0 %v4428_v51  ;;  %v6727_v28 = vld [vmem:[#allocation2 + $0xf0] sm:$0xff] }
 0x13b   :  { %v6721_v41 = vadd.f32 %v1668_v4, %v1664_v20  ;;  %v1700_v62 = vadd.f32 %v1698_v46, %v1694_v57  ;;  %v1729_v2 = vmul.f32 %v6702_v60, %v6527_v58  ;;  %v1730_v34 = vmul.f32 %v6527_v58, %v6412_v8  ;;  %4242 = vmatprep.subr.bf16.mxu0 %v4430_v37  ;;  %v4434_v32 = vld [vmem:[%s7434_s3 + $0x350] sm:$0xff]   ;;  %v6800_v20 = vld [vmem:[#allocation2 + $0x40] sm:$0xff] }
 0x13c   :  { %v1671_v38 = vmax.f32 %v6644_v49, %v6710_v52  ;;  %v1705_v19 = vadd.f32 %v1703_v14, %v1699_v30  ;;  %v1733_v4 = vmul.f32 %v6708_v21, %v6530_v44  ;;  %v1734_v35 = vmul.f32 %v6530_v44, %v6420_v47 }
 0x13d   :  { %v1672_v8 = vmax.f32 %v6646_v16, %v6721_v41  ;;  %v1706_v58 = vadd.f32 %v1704_v61, %v1700_v62  ;;  %v1739_v49 = vmul.f32 %v6716_v29, %v6551_v23  ;;  %v1740_v27 = vmul.f32 %v6551_v23, %v6440_v50  ;;  %v4436_v16 = vld [vmem:[%s7434_s3 + $0x310] sm:$0xff]   ;;  %v4444_v41 = vld [vmem:[%s7434_s3 + $0x320] sm:$0xff]  }
 0x13e   :  { %v1711_v47 = vadd.f32 %v1709_v0, %v1705_v19  ;;  %v1735_v44 = vadd.f32 %v1733_v4, %v1729_v2  ;;  %v1736_v25 = vadd.f32 %v1734_v35, %v1730_v34  ;;  %v1745_v40 = vmul.f32 %v6727_v28, %v6554_v18  ;;  %4243 = vmatpush3.bf16.msra.mxu0 %v4432_v63  ;;  %v4440_v0 = vld [vmem:[%s7434_s3 + $0x318] sm:$0xff]   ;;  %v6835_v34 = vld [vmem:[#allocation2 + $0xc0] sm:$0xff] }
 0x13f   :  { %v1712_v46 = vadd.f32 %v1710_v1, %v1706_v58  ;;  %v1746_v50 = vmul.f32 %v6554_v18, %v6448_v13  ;;  %v1751_v23 = vmul.f32 %v6738_v39, %v6570_v6  ;;  %v1752_v12 = vmul.f32 %v6570_v6, %v6457_v10  ;;  %4244 = vmatprep.subr.bf16.mxu0 %v4434_v32  ;;  %v6787_v1 = vld [vmem:[#allocation2] sm:$0xff]  ;;  %v6837_v32 = vld [vmem:[#allocation2 + $0xc8] sm:$0xff] }
 0x140   :  { %v1717_v51 = vadd.f32 %v1715_v48, %v1711_v47  ;;  %v1741_v36 = vadd.f32 %v1739_v49, %v1735_v44  ;;  %v1742_v11 = vadd.f32 %v1740_v27, %v1736_v25  ;;  %v1757_v14 = vmul.f32 %v6750_v5, %v6573_v42  ;;  %v6809_v48 = vld [vmem:[#allocation2 + $0x48] sm:$0xff]  ;;  %v6852_v58 = vld [vmem:[#allocation2 + $0x100] sm:$0xff] }
 0x141   :  { %v1718_v13 = vadd.f32 %v1716_v43, %v1712_v46  ;;  %v1758_v18 = vmul.f32 %v6573_v42, %v6468_v3  ;;  %v1763_v10 = vmul.f32 %v6587_v17, %v6470_v7  ;;  %v1764_v6 = vmul.f32 %v6587_v17, %v6481_v9  ;;  %v6789_v3 = vld [vmem:[#allocation2 + $0x8] sm:$0xff]  ;;  %v4442_v17 = vld [vmem:[%s7434_s3 + $0x360] sm:$0xff]  }
 0x142   :  { %v1723_v61 = vadd.f32 %v1721_v26, %v1717_v51  ;;  %v1747_v37 = vadd.f32 %v1745_v40, %v1741_v36  ;;  %v1748_v15 = vadd.f32 %v1746_v50, %v1742_v11  ;;  %v1769_v22 = vmul.f32 %v6590_v53, %v6489_v55  ;;  %4245 = vmatpush3.bf16.msra.mxu0 %v4436_v16  ;;  %v6854_v49 = vld [vmem:[#allocation2 + $0x108] sm:$0xff] }
 0x143   :  { %v1724_v7 = vadd.f32 %v1722_v56, %v1718_v13  ;;  %v1770_v9 = vmul.f32 %v6590_v53, %v6491_v45  ;;  %v1775_v42 = vmul.f32 %v6608_v33, %v6493_v54  ;;  %v1776_v55 = vmul.f32 %v6608_v33, %v6501_v59  ;;  %4246 = vmatprep.subr.bf16.mxu0 %v4438_v31  ;;  %v6811_v59 = vld [vmem:[#allocation2 + $0x80] sm:$0xff]  ;;  %v6813_v33 = vld [vmem:[#allocation2 + $0x88] sm:$0xff] }
 0x144   :  { %v6806_v45 = vmax.f32 %v1671_v38, %v1723_v61  ;;  %v1753_v53 = vadd.f32 %v1751_v23, %v1747_v37  ;;  %v1754_v54 = vadd.f32 %v1752_v12, %v1748_v15  ;;  %v1782_v57 = vstv %s6740_s11  ;;  %v4446_v38 = vld [vmem:[%s7434_s3 + $0x368] sm:$0xff]   ;;  %v6866_v23 = vld [vmem:[#allocation2 + $0x140] sm:$0xff] }
 0x145   :  { %v6815_v43 = vmax.f32 %v1672_v8, %v1724_v7  ;;  %v6818_v52 = vstv %s6742_s12  ;;  %v6821_v30 = vstv %s6752_s13  ;;  %v6824_v26 = vstv %s6754_s14  ;;  %v6868_v12 = vld [vmem:[#allocation2 + $0x148] sm:$0xff]  ;;  %v6877_v13 = vld [vmem:[#allocation2 + $0x180] sm:$0xff]  ;;  %s7186_s14 = sld [smem:[#allocation4 + $0x385]] }
 0x146   :  { %v1759_v56 = vadd.f32 %v1757_v14, %v1753_v53  ;;  %v1760_v63 = vadd.f32 %v1758_v18, %v1754_v54  ;;  %4247 = vmatpush3.bf16.msra.mxu0 %v4440_v0  ;;  %v1800_v62 = vmul.f32 %v6818_v52, %v6787_v1  ;;  %v1801_v2 = vmul.f32 %v6818_v52, %v6789_v3  ;;  %v4448_v36 = vld [vmem:[%s7434_s3 + $0x328] sm:$0xff]  }
 0x147   :  { %4248 = vmatprep.subr.bf16.mxu0 %v4442_v17  ;;  %v1806_v19 = vmul.f32 %v6821_v30, %v6800_v20  ;;  %v1807_v4 = vmul.f32 %v6821_v30, %v6809_v48  ;;  %v1814_v35 = vmul.f32 %v6824_v26, %v6811_v59  ;;  %v1815_v8 = vmul.f32 %v6824_v26, %v6813_v33  ;;  %v6879_v18 = vld [vmem:[#allocation2 + $0x188] sm:$0xff]  ;;  %v6894_v17 = vld [vmem:[#allocation2 + $0x1c0] sm:$0xff] }
 0x148   :  { %v1765_v27 = vadd.f32 %v1763_v10, %v1759_v56  ;;  %v1766_v47 = vadd.f32 %v1764_v6, %v1760_v63  ;;  %v6857_v44 = vstv %s6772_s20  ;;  %v6860_v25 = vstv %s6774_s21  ;;  %7824 = vst [vmem:[#allocation46_spill] sm:$0xff] %v6877_v13  ;;  %7825 = vst [vmem:[#allocation27_spill] sm:$0xff] %v6879_v18  ;;  %v4450_v10 = vld [vmem:[%s7434_s3 + $0x370] sm:$0xff]   ;;  %v6896_v53 = vld [vmem:[#allocation2 + $0x1c8] sm:$0xff] }
 0x149   :  { %v1808_v40 = vadd.f32 %v1806_v19, %v1800_v62  ;;  %v1809_v16 = vadd.f32 %v1807_v4, %v1801_v2  ;;  %v1822_v46 = vmul.f32 %v6857_v44, %v6835_v34  ;;  %v1823_v50 = vmul.f32 %v6857_v44, %v6837_v32  ;;  %7826 = vst [vmem:[#allocation47_spill] sm:$0xff] %v6894_v17 }
 0x14a   :  { %v1771_v31 = vadd.f32 %v1769_v22, %v1765_v27  ;;  %v1772_v51 = vadd.f32 %v1770_v9, %v1766_v47  ;;  %4249 = vmatpush3.bf16.msra.mxu0 %v4444_v41  ;;  %v1830_v11 = vmul.f32 %v6860_v25, %v6852_v58  ;;  %v1831_v14 = vmul.f32 %v6860_v25, %v6854_v49  ;;  %v6904_v41 = vld [vmem:[#allocation2 + $0x208] sm:$0xff] }
 0x14b   :  { %4250 = vmatprep.subr.bf16.mxu0 %v4446_v38  ;;  %v1816_v6 = vadd.f32 %v1814_v35, %v1808_v40  ;;  %v1817_v61 = vadd.f32 %v1815_v8, %v1809_v16  ;;  %v6885_v37 = vstv %s6802_s28  ;;  %v6888_v15 = vstv %s6804_s0  ;;  %7827 = vst [vmem:[#allocation25_spill] sm:$0xff] %v6896_v53  ;;  %7829 = vst [vmem:[#allocation26_spill] sm:$0xff] %v6904_v41  ;;  %v4452_v38 = vld [vmem:[%s7434_s3 + $0x330] sm:$0xff]   ;;  %v6919_v8 = vld [vmem:[#allocation2 + $0x18] sm:$0xff]  ;;  %s7111_s28 = sld [smem:[#allocation4 + $0x380]]  ;;  %s7123_s0 = sld [smem:[#allocation6 + $0x6]] }
 0x14c   :  { %v1777_v22 = vadd.f32 %v1775_v42, %v1771_v31  ;;  %v1778_v0 = vadd.f32 %v1776_v55, %v1772_v51  ;;  %v1838_v7 = vmul.f32 %v6885_v37, %v6866_v23  ;;  %v1839_v9 = vmul.f32 %v6885_v37, %v6868_v12  ;;  %v6902_v55 = vld [vmem:[#allocation2 + $0x200] sm:$0xff]  ;;  %v6917_v35 = vld [vmem:[#allocation2 + $0x10] sm:$0xff]  ;;  %7831 = vst [vmem:[#allocation28_spill] sm:$0xff] %v6919_v8 }
 0x14d   :  { %v1824_v54 = vadd.f32 %v1822_v46, %v1816_v6  ;;  %v1825_v56 = vadd.f32 %v1823_v50, %v1817_v61  ;;  %v1846_v63 = vmul.f32 %v6888_v15, %v6877_v13  ;;  %v1847_v42 = vmul.f32 %v6888_v15, %v6879_v18  ;;  %7828 = vst [vmem:[#allocation12_spill] sm:$0xff] %v6902_v55  ;;  %v6928_v16 = vld [vmem:[#allocation2 + $0x50] sm:$0xff]  ;;  %v6930_v46 = vld [vmem:[#allocation2 + $0x58] sm:$0xff]  ;;  %v7073_v18 = vld [vmem:[#allocation2 + $0x228] sm:$0xff] }
 0x14e   :  { %v1779_v62 = vmax.f32 %v6806_v45, %v1777_v22  ;;  %v1780_v2 = vmax.f32 %v6815_v43, %v1778_v0  ;;  %4251 = vmatpush3.bf16.msra.mxu0 %v4448_v36  ;;  %v6912_v19 = vstv %s6826_s25  ;;  %v6915_v4 = vstv %s6839_s19  ;;  %7830 = vst [vmem:[#allocation14_spill] sm:$0xff] %v6917_v35  ;;  %v4454_v45 = vld [vmem:[%s7434_s3 + $0x378] sm:$0xff]   ;;  %7832 = vst [vmem:[#allocation16_spill] sm:$0xff] %v6928_v16  ;;  %v6948_v0 = vld [vmem:[#allocation2 + $0xd0] sm:$0xff]  ;;  %s7125_s25 = sld [smem:[#allocation4 + $0x381]] }
 0x14f   :  { %4252 = vmatprep.subr.bf16.mxu0 %v4450_v10  ;;  %v1832_v43 = vadd.f32 %v1830_v11, %v1824_v54  ;;  %v1833_v27 = vadd.f32 %v1831_v14, %v1825_v56  ;;  %v1854_v47 = vmul.f32 %v6912_v19, %v6894_v17  ;;  %v1855_v40 = vmul.f32 %v6912_v19, %v6896_v53  ;;  %v6940_v11 = vld [vmem:[#allocation2 + $0x90] sm:$0xff]  ;;  %v6942_v14 = vld [vmem:[#allocation2 + $0x98] sm:$0xff] }
 0x150   :  { %7833 = vst [vmem:[#allocation30_spill] sm:$0xff] %v6930_v46  ;;  %v1783_v50 = vadd.f32 %v1782_v57, %v1779_v62  ;;  %v1784_v31 = vadd.f32 %v1782_v57, %v1780_v2  ;;  %v1862_v51 = vmul.f32 %v6915_v4, %v6902_v55  ;;  %v1863_v36 = vmul.f32 %v6915_v4, %v6904_v41  ;;  %v4456_v56 = vld [vmem:[%s7434_s3 + $0x338] sm:$0xff]   ;;  %v6959_v2 = vld [vmem:[#allocation2 + $0x110] sm:$0xff] }
 0x151   :  { %7834 = vst [vmem:[#allocation29_spill] sm:$0xff] %v6940_v11  ;;  %7835 = vst [vmem:[#allocation18_spill] sm:$0xff] %v6942_v14  ;;  %v1840_v10 = vadd.f32 %v1838_v7, %v1832_v43  ;;  %v1841_v6 = vadd.f32 %v1839_v9, %v1833_v27  ;;  %v1868_v61 = vmul.f32 %v6917_v35, %v6818_v52  ;;  %v6957_v9 = vld [vmem:[#allocation2 + $0xd8] sm:$0xff] }
 0x152   :  { %v1869_v22 = vmul.f32 %v6919_v8, %v6818_v52  ;;  %7836 = vst [vmem:[#allocation19_spill] sm:$0xff] %v6948_v0  ;;  %v1785_v57 = vmax.f32 %v1783_v50, 0.0  ;;  %v1786_v54 = vmax.f32 %v1784_v31, 0.0  ;;  %4253 = vmatpush3.bf16.msra.mxu0 %v4452_v38  ;;  %v1872_v62 = vmul.f32 %v6928_v16, %v6821_v30  ;;  %7837 = vst [vmem:[#allocation31_spill] sm:$0xff] %v6957_v9  ;;  %v6965_v31 = vld [vmem:[#allocation2 + $0x118] sm:$0xff]  ;;  %v6967_v8 = vld [vmem:[#allocation2 + $0x150] sm:$0xff] }
 0x153   :  { %v1873_v7 = vmul.f32 %v6930_v46, %v6821_v30  ;;  %7838 = vst [vmem:[#allocation20_spill] sm:$0xff] %v6959_v2  ;;  %4254 = vmatprep.subr.bf16.mxu0 %v4454_v45  ;;  %v1848_v43 = vadd.f32 %v1846_v63, %v1840_v10  ;;  %v1849_v27 = vadd.f32 %v1847_v42, %v1841_v6  ;;  %7839 = vst [vmem:[#allocation32_spill] sm:$0xff] %v6965_v31  ;;  %v6971_v55 = vld [vmem:[#allocation2 + $0x158] sm:$0xff]  ;;  %v6973_v63 = vld [vmem:[#allocation2 + $0x190] sm:$0xff] }
 0x154   :  { %v1878_v38 = vmul.f32 %v6940_v11, %v6824_v26  ;;  %v1879_v50 = vmul.f32 %v6942_v14, %v6824_v26  ;;  %7840 = vst [vmem:[#allocation21_spill] sm:$0xff] %v6967_v8  ;;  %v4105_v16 = vpack.c.bf16 %v1786_v54, %v1785_v57  ;;  %v1874_v35 = vadd.f32 %v1872_v62, %v1868_v61  ;;  %v6979_v14 = vld [vmem:[#allocation2 + $0x198] sm:$0xff]  ;;  %v6981_v57 = vld [vmem:[#allocation2 + $0x1d0] sm:$0xff]  ;;  %v7047_v11 = vld [vmem:[#allocation2 + $0x1a0] sm:$0xff] }
 0x155   :  { %v1875_v46 = vadd.f32 %v1873_v7, %v1869_v22  ;;  %v1884_v41 = vmul.f32 %v6948_v0, %v6857_v44  ;;  %7841 = vst [vmem:[#allocation33_spill] sm:$0xff] %v6971_v55  ;;  %7842 = vst [vmem:[#allocation11_spill] sm:$0xff] %v6973_v63  ;;  %v1856_v42 = vadd.f32 %v1854_v47, %v1848_v43  ;;  %v6989_v54 = vld [vmem:[#allocation2 + $0x1d8] sm:$0xff]  ;;  %v6991_v62 = vld [vmem:[#allocation2 + $0x210] sm:$0xff] }
 0x156   :  { %v1857_v45 = vadd.f32 %v1855_v40, %v1849_v27  ;;  %v1885_v10 = vmul.f32 %v6957_v9, %v6857_v44  ;;  %v1890_v6 = vmul.f32 %v6959_v2, %v6860_v25  ;;  %7843 = vst [vmem:[#allocation24_spill] sm:$0xff] %v6979_v14  ;;  %7844 = vst [vmem:[#allocation37_spill] sm:$0xff] %v6981_v57  ;;  %4255 = vmatpush3.bf16.msra.mxu0 %v4456_v56  ;;  %v6993_v7 = vld [vmem:[#allocation2 + $0x218] sm:$0xff]  ;;  %v7045_v0 = vld [vmem:[#allocation2 + $0x168] sm:$0xff] }
 0x157   :  { %1795 = vst.msk [vmem:[#allocation3 + $0x28] sm:$0xff] %vm5298_vm3, %v4105_v16  ;;  %v1880_v61 = vadd.f32 %v1878_v38, %v1874_v35  ;;  %v1881_v22 = vadd.f32 %v1879_v50, %v1875_v46  ;;  %v1891_v47 = vmul.f32 %v6965_v31, %v6860_v25  ;;  %v1896_v40 = vmul.f32 %v6967_v8, %v6885_v37  ;;  %v7003_v46 = vld [vmem:[#allocation2 + $0x28] sm:$0xff]  ;;  %v7079_v13 = vld [vmem:[#allocation2 + $0x38] sm:$0xff] }
 0x158   :  { %7845 = vst [vmem:[#allocation34_spill] sm:$0xff] %v6989_v54  ;;  %7846 = vst [vmem:[#allocation13_spill] sm:$0xff] %v6991_v62  ;;  %v6995_v43 = vadd.f32 %v1862_v51, %v1856_v42  ;;  %v6997_v27 = vadd.f32 %v1863_v36, %v1857_v45  ;;  %v1897_v35 = vmul.f32 %v6971_v55, %v6885_v37  ;;  %v7009_v51 = vld [vmem:[#allocation2 + $0x68] sm:$0xff]  ;;  %v7013_v42 = vld [vmem:[#allocation2 + $0xe0] sm:$0xff] }
 0x159   :  { %7847 = vst [vmem:[#allocation35_spill] sm:$0xff] %v6993_v7  ;;  %v1902_v16 = vmul.f32 %v6973_v63, %v6888_v15  ;;  %7848 = vst [vmem:[#allocation15_spill] sm:$0xff] %v7003_v46  ;;  %v1886_v56 = vadd.f32 %v1884_v41, %v1880_v61  ;;  %v1887_v38 = vadd.f32 %v1885_v10, %v1881_v22  ;;  %v7011_v36 = vld [vmem:[#allocation2 + $0xa8] sm:$0xff]  ;;  %v7852_v10 = vld [vmem:[#allocation44_spill] sm:$0xff] }
 0x15a   :  { %v1903_v50 = vmul.f32 %v6979_v14, %v6888_v15  ;;  %v1908_v8 = vmul.f32 %v6981_v57, %v6912_v19  ;;  %7849 = vst [vmem:[#allocation36_spill] sm:$0xff] %v7009_v51  ;;  %7850 = vst [vmem:[#allocation17_spill] sm:$0xff] %v7011_v36  ;;  %v1909_v45 = vmul.f32 %v6989_v54, %v6912_v19  ;;  %v7023_v22 = vld [vmem:[#allocation2 + $0xe8] sm:$0xff]  ;;  %v7029_v54 = vld [vmem:[#allocation2 + $0x120] sm:$0xff] }
 0x15b   :  { %7851 = vst [vmem:[#allocation38_spill] sm:$0xff] %v7013_v42  ;;  %v1914_v63 = vmul.f32 %v6991_v62, %v6915_v4  ;;  %v1915_v41 = vmul.f32 %v6993_v7, %v6915_v4  ;;  %v1922_v61 = vmul.f32 %v6818_v52, %v7852_v10  ;;  %7853 = vst [vmem:[#allocation39_spill] sm:$0xff] %v7023_v22  ;;  %v7854_v31 = vld [vmem:[#allocation23_spill] sm:$0xff]  ;;  %v7033_v62 = vld [vmem:[#allocation2 + $0x160] sm:$0xff] }
 0x15c   :  { %v1892_v57 = vadd.f32 %v1890_v6, %v1886_v56  ;;  %v1893_v14 = vadd.f32 %v1891_v47, %v1887_v38  ;;  %v1923_v55 = vmul.f32 %v7003_v46, %v6818_v52  ;;  %v1926_v2 = vmul.f32 %v6821_v30, %v7854_v31  ;;  %7855 = vst [vmem:[#allocation22_spill] sm:$0xff] %v7029_v54  ;;  %v7858_v10 = vld [vmem:[#allocation45_spill] sm:$0xff] }
 0x15d   :  { %7857 = vst [vmem:[#allocation41_spill] sm:$0xff] %v7033_v62  ;;  %v1927_v7 = vmul.f32 %v7009_v51, %v6821_v30  ;;  %v1932_v9 = vmul.f32 %v6824_v26, %v7858_v10  ;;  %v1933_v6 = vmul.f32 %v7011_v36, %v6824_v26  ;;  %v1938_v47 = vmul.f32 %v7013_v42, %v6857_v44 }
 0x15e   :  { %v1898_v56 = vadd.f32 %v1896_v40, %v1892_v57  ;;  %v1899_v31 = vadd.f32 %v1897_v35, %v1893_v14  ;;  %v1928_v38 = vadd.f32 %v1926_v2, %v1922_v61  ;;  %v1939_v46 = vmul.f32 %v7023_v22, %v6857_v44  ;;  %v2295_v51 = vld [vmem:[#allocation3 + $0x28] sm:$0xff]  ;;  %v7057_v2 = vld [vmem:[#allocation2 + $0x1e0] sm:$0xff] }
 0x15f   :  { %v1929_v53 = vadd.f32 %v1927_v7, %v1923_v55  ;;  %v1944_v10 = vmul.f32 %v7029_v54, %v6860_v25  ;;  %v1945_v36 = vmul.f32 %v7031_v24, %v6860_v25  ;;  %v1950_v57 = vmul.f32 %v7033_v62, %v6885_v37  ;;  %v7055_v14 = vld [vmem:[#allocation2 + $0x1a8] sm:$0xff]  ;;  %v4429_v61 = vld [vmem:[%s7434_s3 + $0x380] sm:$0xff]  }
 0x160   :  { %v3957_v40 = vcombine.low %v2295_v51, %v2295_v51  ;;  %v3958_v35 = vcombine.high %v2295_v51, %v2295_v51  ;;  %v1904_v55 = vadd.f32 %v1902_v16, %v1898_v56  ;;  %v1905_v7 = vadd.f32 %v1903_v50, %v1899_v31  ;;  %v7062_v22 = vld [vmem:[#allocation2 + $0x1e8] sm:$0xff]  ;;  %v7064_v54 = vld [vmem:[#allocation2 + $0x220] sm:$0xff] }
 0x161   :  { %v4431_v62 = vld [vmem:[%s7434_s3 + $0x3c8] sm:$0xff]   ;;  %v1934_v24 = vadd.f32 %v1932_v9, %v1928_v38  ;;  %v1935_v42 = vadd.f32 %v1933_v6, %v1929_v53  ;;  %v1951_v17 = vmul.f32 %v7045_v0, %v6885_v37  ;;  %v1956_v51 = vmul.f32 %v7047_v11, %v6888_v15 }
 0x162   :  { %3617 = vmatprep.mubr.bf16.mxu1 %v3958_v35  ;;  %v1910_v16 = vadd.f32 %v1908_v8, %v1904_v55  ;;  %v1911_v50 = vadd.f32 %v1909_v45, %v1905_v7  ;;  %v1957_v56 = vmul.f32 %v7055_v14, %v6888_v15  ;;  %v1962_v31 = vmul.f32 %v7057_v2, %v6912_v19  ;;  %v7087_v8 = vld [vmem:[#allocation2 + $0x78] sm:$0xff]  ;;  %v4433_v45 = vld [vmem:[%s7434_s3 + $0x388] sm:$0xff]  }
 0x163   :  { %3618 = vmatmul.mubr.bf16.vlgmr.msra.gmra.mrb[8].mxu1 %v3957_v40  ;;  %v1940_v53 = vadd.f32 %v1938_v47, %v1934_v24  ;;  %v1941_v9 = vadd.f32 %v1939_v46, %v1935_v42  ;;  %v1963_v6 = vmul.f32 %v7062_v22, %v6912_v19  ;;  %v7085_v38 = vmul.f32 %v7064_v54, %v6915_v4  ;;  %v7100_v42 = vld [vmem:[#allocation2 + $0xb8] sm:$0xff]  ;;  %v4435_v47 = vld [vmem:[%s7434_s3 + $0x3d0] sm:$0xff]  }
 0x164   :  { %4263 = vmatpush3.bf16.msra.mxu1 %v4429_v61  ;;  %v7092_v35 = vadd.f32 %v1914_v63, %v1910_v16  ;;  %v7094_v55 = vadd.f32 %v1915_v41, %v1911_v50  ;;  %v1969_v24 = vmul.f32 %v7073_v18, %v6915_v4  ;;  %v1976_v46 = vmul.f32 %v6818_v52, %v6702_v60  ;;  %v7109_v7 = vld [vmem:[#allocation2 + $0xf8] sm:$0xff] }
 0x165   :  { %4264 = vmatprep.subr.bf16.mxu1 %v4431_v62  ;;  %v1946_v40 = vadd.f32 %v1944_v10, %v1940_v53  ;;  %v1947_v61 = vadd.f32 %v1945_v36, %v1941_v9  ;;  %v1977_v63 = vmul.f32 %v7079_v13, %v6818_v52  ;;  %v1980_v41 = vmul.f32 %v6821_v30, %v6708_v21  ;;  %v7121_v52 = vld [vmem:[#allocation2 + $0x138] sm:$0xff]  ;;  %v4437_v21 = vld [vmem:[%s7434_s3 + $0x390] sm:$0xff]  }
 0x166   :  { %v1918_v60 = vmax.f32 %v6995_v43, %v7092_v35  ;;  %v1919_v62 = vmax.f32 %v6997_v27, %v7094_v55  ;;  %v1981_v10 = vmul.f32 %v7087_v8, %v6821_v30  ;;  %v1986_v36 = vmul.f32 %v6824_v26, %v6716_v29  ;;  %v7132_v30 = vld [vmem:[#allocation2 + $0x178] sm:$0xff]  ;;  %v7134_v53 = vld [vmem:[#allocation2 + $0x1b0] sm:$0xff] }
 0x167   :  { %v1952_v43 = vadd.f32 %v1950_v57, %v1946_v40  ;;  %v1953_v16 = vadd.f32 %v1951_v17, %v1947_v61  ;;  %v1982_v50 = vadd.f32 %v1980_v41, %v1976_v46  ;;  %v1987_v27 = vmul.f32 %v7100_v42, %v6824_v26  ;;  %v4439_v29 = vld [vmem:[%s7434_s3 + $0x3d8] sm:$0xff]  }
 0x168   :  { %4265 = vmatpush3.bf16.msra.mxu1 %v4433_v45  ;;  %v1983_v9 = vadd.f32 %v1981_v10, %v1977_v63  ;;  %v1992_v35 = vmul.f32 %v6857_v44, %v6727_v28  ;;  %v1993_v17 = vmul.f32 %v7109_v7, %v6857_v44  ;;  %v1998_v57 = vmul.f32 %v6860_v25, %v6738_v39  ;;  %v7145_v26 = vld [vmem:[#allocation2 + $0x1b8] sm:$0xff]  ;;  %v7153_v28 = vld [vmem:[#allocation2 + $0x1f0] sm:$0xff] }
 0x169   :  { %4266 = vmatprep.subr.bf16.mxu1 %v4435_v47  ;;  %v1958_v45 = vadd.f32 %v1956_v51, %v1952_v43  ;;  %v1959_v55 = vadd.f32 %v1957_v56, %v1953_v16  ;;  %v1988_v46 = vadd.f32 %v1986_v36, %v1982_v50  ;;  %v1999_v40 = vmul.f32 %v7121_v52, %v6860_v25  ;;  %v7155_v61 = vld [vmem:[#allocation2 + $0x1f8] sm:$0xff]  ;;  %v7157_v44 = vld [vmem:[#allocation2 + $0x230] sm:$0xff] }
 0x16a   :  { %v1989_v39 = vadd.f32 %v1987_v27, %v1983_v9  ;;  %v2004_v63 = vmul.f32 %v6885_v37, %v6750_v5  ;;  %v2005_v51 = vmul.f32 %v7132_v30, %v6885_v37  ;;  %v2010_v56 = vmul.f32 %v7134_v53, %v6888_v15  ;;  %v7167_v47 = vld [vmem:[#allocation2 + $0x238] sm:$0xff] }
 0x16b   :  { %v1964_v25 = vadd.f32 %v1962_v31, %v1958_v45  ;;  %v1965_v41 = vadd.f32 %v1963_v6, %v1959_v55  ;;  %v1994_v10 = vadd.f32 %v1992_v35, %v1988_v46  ;;  %v2011_v36 = vmul.f32 %v7145_v26, %v6888_v15  ;;  %v4441_v5 = vld [vmem:[%s7434_s3 + $0x398] sm:$0xff]   ;;  %v4443_v15 = vld [vmem:[%s7434_s3 + $0x3e0] sm:$0xff]  }
 0x16c   :  { %4267 = vmatpush3.bf16.msra.mxu1 %v4437_v21  ;;  %v1995_v37 = vadd.f32 %v1993_v17, %v1989_v39  ;;  %v2016_v43 = vmul.f32 %v7153_v28, %v6912_v19  ;;  %v2017_v31 = vmul.f32 %v7155_v61, %v6912_v19  ;;  %v2022_v6 = vmul.f32 %v7157_v44, %v6915_v4 }
 0x16d   :  { %4268 = vmatprep.subr.bf16.mxu1 %v4439_v29  ;;  %v1970_v21 = vadd.f32 %v7085_v38, %v1964_v25  ;;  %v1971_v16 = vadd.f32 %v1969_v24, %v1965_v41  ;;  %v2000_v50 = vadd.f32 %v1998_v57, %v1994_v10  ;;  %v2023_v27 = vmul.f32 %v7167_v47, %v6915_v4  ;;  %v7199_v4 = vpop.f32.mrb[0].mxu0  ;;  %v4445_v24 = vld [vmem:[%s7434_s3 + $0x3a0] sm:$0xff]  }
 0x16e   :  { %v2001_v19 = vadd.f32 %v1999_v40, %v1995_v37  ;;  %v2029_v9 = vstv %s7123_s0  ;;  %v7192_v35 = vstv %s7111_s28  ;;  %v7195_v29 = vstv %s7125_s25  ;;  %v4447_v40 = vld [vmem:[%s7434_s3 + $0x3e8] sm:$0xff]  }
 0x16f   :  { %v1972_v17 = vmax.f32 %v1918_v60, %v1970_v21  ;;  %v1973_v45 = vmax.f32 %v1919_v62, %v1971_v16  ;;  %v2006_v55 = vadd.f32 %v2004_v63, %v2000_v50  ;;  %v2047_v38 = vmul.f32 %v7192_v35, %v6787_v1  ;;  %v7214_v1 = vpop.f32.mrb[1].mxu0 }
 0x170   :  { %4269 = vmatpush3.bf16.msra.mxu1 %v4441_v5  ;;  %v2007_v57 = vadd.f32 %v2005_v51, %v2001_v19  ;;  %v2048_v46 = vmul.f32 %v7192_v35, %v6789_v3  ;;  %v2053_v60 = vmul.f32 %v7195_v29, %v6800_v20  ;;  %v2054_v62 = vmul.f32 %v7195_v29, %v6809_v48  ;;  %v4127_v51 = vpop.f32.mrb[2].mxu0 }
 0x171   :  { %4270 = vmatprep.subr.bf16.mxu1 %v4443_v15  ;;  %v2012_v39 = vadd.f32 %v2010_v56, %v2006_v55  ;;  %v7220_v63 = vstv %s7147_s9  ;;  %v7223_v3 = vstv %s7149_s1  ;;  %v7226_v20 = vstv %s7159_s2  ;;  %v4128_v5 = vpop.f32.mrb[3].mxu0  ;;  %s3944_s9 = sld [smem:[#allocation6 + $0x7]] }
 0x172   :  { %v2013_v48 = vadd.f32 %v2011_v36, %v2007_v57  ;;  %v2055_v25 = vadd.f32 %v2053_v60, %v2047_v38  ;;  %v2056_v41 = vadd.f32 %v2054_v62, %v2048_v46  ;;  %v2061_v10 = vmul.f32 %v7220_v63, %v6811_v59  ;;  %v4449_v36 = vld [vmem:[%s7434_s3 + $0x3a8] sm:$0xff]  }
 0x173   :  { %v2018_v37 = vadd.f32 %v2016_v43, %v2012_v39  ;;  %v2062_v56 = vmul.f32 %v7220_v63, %v6813_v33  ;;  %v2069_v15 = vmul.f32 %v7223_v3, %v6835_v34  ;;  %v2070_v21 = vmul.f32 %v7223_v3, %v6837_v32  ;;  %v4451_v33 = vld [vmem:[%s7434_s3 + $0x3f0] sm:$0xff]   ;;  %v7860_v60 = vld [vmem:[#allocation27_spill] sm:$0xff] }
 0x174   :  { %4271 = vmatpush3.bf16.msra.mxu1 %v4445_v24  ;;  %v2019_v16 = vadd.f32 %v2017_v31, %v2013_v48  ;;  %v2063_v59 = vadd.f32 %v2061_v10, %v2055_v25  ;;  %v2077_v50 = vmul.f32 %v7226_v20, %v6852_v58  ;;  %v2078_v43 = vmul.f32 %v7226_v20, %v6854_v49  ;;  %v7861_v25 = vld [vmem:[#allocation47_spill] sm:$0xff]  ;;  %v7862_v10 = vld [vmem:[#allocation25_spill] sm:$0xff] }
 0x175   :  { %4272 = vmatprep.subr.bf16.mxu1 %v4447_v40  ;;  %v2024_v34 = vadd.f32 %v2022_v6, %v2018_v37  ;;  %v2064_v32 = vadd.f32 %v2062_v56, %v2056_v41  ;;  %v7247_v19 = vstv %s7186_s14  ;;  %v7250_v55 = vstv %s7188_s15  ;;  %v7859_v6 = vld [vmem:[#allocation46_spill] sm:$0xff]  ;;  %v7863_v56 = vld [vmem:[#allocation12_spill] sm:$0xff] }
 0x176   :  { %v2025_v31 = vadd.f32 %v2023_v27, %v2019_v16  ;;  %v2071_v38 = vadd.f32 %v2069_v15, %v2063_v59  ;;  %v2085_v58 = vmul.f32 %v7247_v19, %v6866_v23  ;;  %v2086_v49 = vmul.f32 %v7247_v19, %v6868_v12  ;;  %v4453_v27 = vld [vmem:[%s7434_s3 + $0x3b0] sm:$0xff]   ;;  %v4455_v12 = vld [vmem:[%s7434_s3 + $0x3f8] sm:$0xff]  }
 0x177   :  { %v2026_v24 = vmax.f32 %v1972_v17, %v2024_v34  ;;  %v2072_v57 = vadd.f32 %v2070_v21, %v2064_v32  ;;  %v2093_v46 = vmul.f32 %v7250_v55, %v7859_v6  ;;  %v2094_v62 = vmul.f32 %v7250_v55, %v7860_v60  ;;  %v7864_v21 = vld [vmem:[#allocation26_spill] sm:$0xff]  ;;  %v7869_v6 = vld [vmem:[#allocation29_spill] sm:$0xff] }
 0x178   :  { %4273 = vmatpush3.bf16.msra.mxu1 %v4449_v36  ;;  %v2027_v40 = vmax.f32 %v1973_v45, %v2025_v31  ;;  %v2079_v39 = vadd.f32 %v2077_v50, %v2071_v38  ;;  %v7264_v23 = vstv %s7210_s17  ;;  %v7267_v51 = vstv %s7212_s18  ;;  %v7865_v50 = vld [vmem:[#allocation14_spill] sm:$0xff]  ;;  %v7867_v38 = vld [vmem:[#allocation16_spill] sm:$0xff] }
 0x179   :  { %4274 = vmatprep.subr.bf16.mxu1 %v4451_v33  ;;  %v2030_v17 = vadd.f32 %v2029_v9, %v2026_v24  ;;  %v2080_v48 = vadd.f32 %v2078_v43, %v2072_v57  ;;  %v2101_v41 = vmul.f32 %v7264_v23, %v7861_v25  ;;  %v2102_v5 = vmul.f32 %v7264_v23, %v7862_v10  ;;  %v7866_v33 = vld [vmem:[#allocation28_spill] sm:$0xff]  ;;  %v7868_v24 = vld [vmem:[#allocation30_spill] sm:$0xff] }
 0x17a   :  { %v2031_v45 = vadd.f32 %v2029_v9, %v2027_v40  ;;  %v2087_v37 = vadd.f32 %v2085_v58, %v2079_v39  ;;  %v2109_v15 = vmul.f32 %v7267_v51, %v7863_v56  ;;  %v2110_v36 = vmul.f32 %v7267_v51, %v7864_v21  ;;  %v4457_v9 = vld [vmem:[%s7434_s3 + $0x3b8] sm:$0xff]   ;;  %v7870_v40 = vld [vmem:[#allocation18_spill] sm:$0xff]  ;;  %v7871_v39 = vld [vmem:[#allocation19_spill] sm:$0xff] }
 0x17b   :  { %v2032_v16 = vmax.f32 %v2030_v17, 0.0  ;;  %v2088_v59 = vadd.f32 %v2086_v49, %v2080_v48  ;;  %v2115_v43 = vmul.f32 %v7192_v35, %v7865_v50  ;;  %v2116_v34 = vmul.f32 %v7192_v35, %v7866_v33  ;;  %v7875_v33 = vld [vmem:[#allocation32_spill] sm:$0xff] }
 0x17c   :  { %4275 = vmatpush3.bf16.msra.mxu1 %v4453_v27  ;;  %v2033_v32 = vmax.f32 %v2031_v45, 0.0  ;;  %v2095_v31 = vadd.f32 %v2093_v46, %v2087_v37  ;;  %v2119_v58 = vmul.f32 %v7195_v29, %v7867_v38  ;;  %v2120_v57 = vmul.f32 %v7195_v29, %v7868_v24  ;;  %v7872_v37 = vld [vmem:[#allocation31_spill] sm:$0xff] }
 0x17d   :  { %4276 = vmatprep.subr.bf16.mxu1 %v4455_v12  ;;  %v2096_v49 = vadd.f32 %v2094_v62, %v2088_v59  ;;  %v2125_v60 = vmul.f32 %v7220_v63, %v7869_v6  ;;  %v2126_v27 = vmul.f32 %v7220_v63, %v7870_v40  ;;  %v2131_v17 = vmul.f32 %v7223_v3, %v7871_v39  ;;  %v7874_v59 = vld [vmem:[#allocation20_spill] sm:$0xff] }
 0x17e   :  { %v4106_v48 = vpack.c.bf16 %v2033_v32, %v2032_v16  ;;  %v2103_v25 = vadd.f32 %v2101_v41, %v2095_v31  ;;  %v2121_v46 = vadd.f32 %v2119_v58, %v2115_v43  ;;  %v2122_v10 = vadd.f32 %v2120_v57, %v2116_v34  ;;  %v2167_v16 = vld [vmem:[#allocation2 + $0x20] sm:$0xff]  ;;  %v7876_v43 = vld [vmem:[#allocation21_spill] sm:$0xff] }
 0x17f   :  { %v2104_v45 = vadd.f32 %v2102_v5, %v2096_v49  ;;  %v2132_v56 = vmul.f32 %v7223_v3, %v7872_v37  ;;  %v2137_v50 = vmul.f32 %v7226_v20, %v7874_v59  ;;  %v2138_v38 = vmul.f32 %v7226_v20, %v7875_v33  ;;  %v2171_v34 = vld [vmem:[#allocation2 + $0x60] sm:$0xff]  ;;  %v7877_v58 = vld [vmem:[#allocation33_spill] sm:$0xff]  ;;  %v7878_v49 = vld [vmem:[#allocation11_spill] sm:$0xff] }
 0x180   :  { %4277 = vmatpush3.bf16.msra.mxu1 %v4457_v9  ;;  %2042 = vst.msk [vmem:[#allocation3 + $0x30] sm:$0xff] %vm5298_vm3, %v4106_v48  ;;  %v2127_v62 = vadd.f32 %v2125_v60, %v2121_v46  ;;  %v2128_v21 = vadd.f32 %v2126_v27, %v2122_v10  ;;  %v7309_v41 = vadd.f32 %v2109_v15, %v2103_v25  ;;  %v2177_v57 = vld [vmem:[#allocation2 + $0xa0] sm:$0xff]  ;;  %v7879_v60 = vld [vmem:[#allocation24_spill] sm:$0xff]  ;;  %v7880_v27 = vld [vmem:[#allocation15_spill] sm:$0xff] }
 0x181   :  { %v2143_v5 = vmul.f32 %v7247_v19, %v7876_v43  ;;  %v7313_v32 = vadd.f32 %v2110_v36, %v2104_v45  ;;  %v2144_v24 = vmul.f32 %v7247_v19, %v7877_v58  ;;  %v2149_v6 = vmul.f32 %v7250_v55, %v7878_v49  ;;  %v7881_v25 = vld [vmem:[#allocation36_spill] sm:$0xff]  ;;  %v7882_v10 = vld [vmem:[#allocation37_spill] sm:$0xff]  ;;  %v7883_v37 = vld [vmem:[#allocation34_spill] sm:$0xff] }
 0x182   :  { %v2133_v9 = vadd.f32 %v2131_v17, %v2127_v62  ;;  %v2134_v31 = vadd.f32 %v2132_v56, %v2128_v21  ;;  %v2150_v40 = vmul.f32 %v7250_v55, %v7879_v60  ;;  %v2169_v15 = vmul.f32 %v2167_v16, %v7192_v35  ;;  %v7884_v21 = vld [vmem:[#allocation17_spill] sm:$0xff]  ;;  %v7887_v49 = vld [vmem:[#allocation38_spill] sm:$0xff] }
 0x183   :  { %v2170_v39 = vmul.f32 %v7192_v35, %v7880_v27  ;;  %v2173_v17 = vmul.f32 %v2171_v34, %v7195_v29  ;;  %v2174_v46 = vmul.f32 %v7195_v29, %v7881_v25  ;;  %v2155_v45 = vmul.f32 %v7264_v23, %v7882_v10  ;;  %v7885_v34 = vld [vmem:[#allocation13_spill] sm:$0xff]  ;;  %v7888_v27 = vld [vmem:[#allocation39_spill] sm:$0xff] }
 0x184   :  { %v2139_v48 = vadd.f32 %v2137_v50, %v2133_v9  ;;  %v2140_v36 = vadd.f32 %v2138_v38, %v2134_v31  ;;  %v2156_v56 = vmul.f32 %v7264_v23, %v7883_v37  ;;  %v2179_v62 = vmul.f32 %v2177_v57, %v7220_v63  ;;  %v7886_v31 = vld [vmem:[#allocation35_spill] sm:$0xff] }
 0x185   :  { %v2180_v59 = vmul.f32 %v7220_v63, %v7884_v21  ;;  %v2175_v50 = vadd.f32 %v2173_v17, %v2169_v15  ;;  %v2176_v38 = vadd.f32 %v2174_v46, %v2170_v39  ;;  %v2161_v9 = vmul.f32 %v7267_v51, %v7885_v34  ;;  %v7889_v39 = vld [vmem:[#allocation22_spill] sm:$0xff]  ;;  %v2221_v46 = vld [vmem:[#allocation2 + $0x30] sm:$0xff]  ;;  %v7891_v34 = vld [vmem:[#allocation41_spill] sm:$0xff] }
 0x186   :  { %v2145_v33 = vadd.f32 %v2143_v5, %v2139_v48  ;;  %v2146_v16 = vadd.f32 %v2144_v24, %v2140_v36  ;;  %v2162_v58 = vmul.f32 %v7267_v51, %v7886_v31  ;;  %v2185_v60 = vmul.f32 %v7223_v3, %v7887_v49  ;;  %v7890_v36 = vld [vmem:[#allocation40_spill] sm:$0xff] }
 0x187   :  { %v2296_v43 = vld [vmem:[#allocation3 + $0x30] sm:$0xff]  ;;  %v2186_v57 = vmul.f32 %v7223_v3, %v7888_v27  ;;  %v2181_v24 = vadd.f32 %v2179_v62, %v2175_v50  ;;  %v2182_v15 = vadd.f32 %v2180_v59, %v2176_v38  ;;  %v2191_v48 = vmul.f32 %v7226_v20, %v7889_v39 }
 0x188   :  { %v3959_v25 = vcombine.low %v2296_v43, %v2296_v43  ;;  %v3960_v10 = vcombine.high %v2296_v43, %v2296_v43  ;;  %v2151_v37 = vadd.f32 %v2149_v6, %v2145_v33  ;;  %v2152_v5 = vadd.f32 %v2150_v40, %v2146_v16  ;;  %v2225_v40 = vld [vmem:[#allocation2 + $0x70] sm:$0xff] }
 0x189   :  { %v2192_v17 = vmul.f32 %v7226_v20, %v7890_v36  ;;  %v2197_v31 = vmul.f32 %v7247_v19, %v7891_v34  ;;  %v2198_v49 = vmul.f32 %v7247_v19, %v7045_v0  ;;  %v2203_v6 = vmul.f32 %v7250_v55, %v7047_v11  ;;  %v2231_v50 = vld [vmem:[#allocation2 + $0xb0] sm:$0xff] }
 0x18a   :  { %3657 = vmatprep.mubr.bf16.mxu0 %v3960_v10  ;;  %v2157_v21 = vadd.f32 %v2155_v45, %v2151_v37  ;;  %v2158_v62 = vadd.f32 %v2156_v56, %v2152_v5  ;;  %v2187_v59 = vadd.f32 %v2185_v60, %v2181_v24  ;;  %v2188_v33 = vadd.f32 %v2186_v57, %v2182_v15  ;;  %v2237_v27 = vld [vmem:[#allocation2 + $0xf0] sm:$0xff] }
 0x18b   :  { %v2204_v16 = vmul.f32 %v7250_v55, %v7055_v14  ;;  %3658 = vmatmul.mubr.bf16.vlgmr.msra.gmra.mrb[12].mxu0 %v3959_v25  ;;  %v2209_v45 = vmul.f32 %v7264_v23, %v7057_v2  ;;  %v2210_v38 = vmul.f32 %v7264_v23, %v7062_v22  ;;  %v2223_v0 = vmul.f32 %v2221_v46, %v7192_v35  ;;  %v2243_v57 = vld [vmem:[#allocation2 + $0x130] sm:$0xff] }
 0x18c   :  { %v2224_v11 = vmul.f32 %v7192_v35, %v7079_v13  ;;  %v2193_v43 = vadd.f32 %v2191_v48, %v2187_v59  ;;  %v2194_v56 = vadd.f32 %v2192_v17, %v2188_v33  ;;  %v2227_v60 = vmul.f32 %v2225_v40, %v7195_v29  ;;  %v2249_v24 = vld [vmem:[#allocation2 + $0x170] sm:$0xff] }
 0x18d   :  { %v2228_v14 = vmul.f32 %v7195_v29, %v7087_v8  ;;  %v2163_v25 = vadd.f32 %v2161_v9, %v2157_v21  ;;  %v2215_v2 = vmul.f32 %v7267_v51, %v7064_v54  ;;  %v2233_v22 = vmul.f32 %v2231_v50, %v7220_v63 }
 0x18e   :  { %v2234_v10 = vmul.f32 %v7220_v63, %v7100_v42  ;;  %v2199_v37 = vadd.f32 %v2197_v31, %v2193_v43  ;;  %v2200_v13 = vadd.f32 %v2198_v49, %v2194_v56  ;;  %v2229_v35 = vadd.f32 %v2227_v60, %v2223_v0 }
 0x18f   :  { %v2230_v5 = vadd.f32 %v2228_v14, %v2224_v11  ;;  %v2239_v15 = vmul.f32 %v2237_v27, %v7223_v3  ;;  %v2240_v8 = vmul.f32 %v7223_v3, %v7109_v7  ;;  %v2245_v29 = vmul.f32 %v2243_v57, %v7226_v20 }
 0x190   :  { %v2246_v54 = vmul.f32 %v7226_v20, %v7121_v52  ;;  %v2205_v9 = vadd.f32 %v2203_v6, %v2199_v37  ;;  %v2206_v39 = vadd.f32 %v2204_v16, %v2200_v13  ;;  %v2235_v48 = vadd.f32 %v2233_v22, %v2229_v35  ;;  %v4462_v37 = vld [vmem:[%s7436_s5] sm:$0xff]   ;;  %v4463_v35 = vld [vmem:[%s7436_s5 + $0x8] sm:$0xff]  }
 0x191   :  { %v2236_v36 = vadd.f32 %v2234_v10, %v2230_v5  ;;  %v2164_v42 = vadd.f32 %v2162_v58, %v2158_v62  ;;  %v2216_v63 = vmul.f32 %v7267_v51, %v7073_v18  ;;  %v2251_v17 = vmul.f32 %v2249_v24, %v7247_v19  ;;  %v3946_v18 = vld [vmem:[%s7435_s4] ss:$0 sm:$0xff]  ;;  %v4464_v24 = vld [vmem:[%s7436_s5 + $0x10] sm:$0xff]  }
 0x192   :  { %v2252_v46 = vmul.f32 %v7247_v19, %v7132_v30  ;;  %v2211_v21 = vadd.f32 %v2209_v45, %v2205_v9  ;;  %v2212_v7 = vadd.f32 %v2210_v38, %v2206_v39  ;;  %v2241_v3 = vadd.f32 %v2239_v15, %v2235_v48  ;;  %v4465_v9 = vld [vmem:[%s7436_s5 + $0x18] sm:$0xff]   ;;  %v4466_v39 = vld [vmem:[%s7436_s5 + $0x20] sm:$0xff]  }
 0x193   :  { %v2242_v34 = vadd.f32 %v2240_v8, %v2236_v36  ;;  %v2165_v31 = vmax.f32 %v7309_v41, %v2163_v25  ;;  %v2257_v49 = vmul.f32 %v7250_v55, %v7134_v53  ;;  %v2258_v58 = vmul.f32 %v7250_v55, %v7145_v26  ;;  %v4146_v55 = vpop.f32.mrb[0].mxu1 }
 0x194   :  { %v2247_v52 = vadd.f32 %v2245_v29, %v2241_v3  ;;  %v2166_v30 = vmax.f32 %v7313_v32, %v2164_v42  ;;  %v2217_v19 = vadd.f32 %v2215_v2, %v2211_v21  ;;  %v2263_v6 = vmul.f32 %v7264_v23, %v7153_v28  ;;  %v4147_v32 = vpop.f32.mrb[1].mxu1  ;;  %v4467_v21 = vld [vmem:[%s7436_s5 + $0x28] sm:$0xff]   ;;  %v4469_v3 = vld [vmem:[%s7436_s5 + $0x38] sm:$0xff]  }
 0x195   :  { %v2248_v20 = vadd.f32 %v2246_v54, %v2242_v34  ;;  %v4126_v41 = vadd.f32 %v7214_v1, %v7199_v4  ;;  %v2218_v40 = vadd.f32 %v2216_v63, %v2212_v7  ;;  %v2264_v26 = vmul.f32 %v7264_v23, %v7155_v61  ;;  %v4149_v38 = vpop.f32.mrb[2].mxu1  ;;  %v4468_v7 = vld [vmem:[%s7436_s5 + $0x30] sm:$0xff]  }
 0x196   :  { %v2253_v62 = vadd.f32 %v2251_v17, %v2247_v52  ;;  %v2269_v59 = vmul.f32 %v7267_v51, %v7157_v44  ;;  %v2270_v28 = vmul.f32 %v7267_v51, %v7167_v47  ;;  %v4148_v45 = vadd.f32 %v4147_v32, %v4146_v55  ;;  %v4150_v1 = vpop.f32.mrb[3].mxu1 }
 0x197   :  { %v2254_v53 = vadd.f32 %v2252_v46, %v2248_v20  ;;  %v3420_v33 = vadd.f32 %v4126_v41, %v3946_v18  ;;  %v2219_v4 = vmax.f32 %v2165_v31, %v2217_v19  ;;  %v2220_v0 = vmax.f32 %v2166_v30, %v2218_v40 }
 0x198   :  { %v2259_v16 = vadd.f32 %v2257_v49, %v2253_v62  ;;  %v2276_v60 = vstv %s3944_s9  ;;  %v4501_v13 = vmov 0.0  }
 0x199   :  { %v2260_v50 = vadd.f32 %v2258_v58, %v2254_v53  ;;  %v3460_v56 = vadd.f32 %v4148_v45, %v3420_v33  ;;  %4293 = vmatprep.subr.bf16.mxu0 %v4501_v13  ;;  %4309 = vmatprep.mubr.msk.bf16.mxu0 %vm4502_vm4, %v4501_v13 }
 0x19a   :  { %v2265_v11 = vadd.f32 %v2263_v6, %v2259_v16  ;;  %4294 = vmatpush3.bf16.msra.mxu0 %v4462_v37 }
 0x19b   :  { %v2266_v43 = vadd.f32 %v2264_v26, %v2260_v50  ;;  %4295 = vmatprep.subr.bf16.mxu0 %v4501_v13 }
 0x19c   :  { %v2271_v61 = vadd.f32 %v2269_v59, %v2265_v11 }
 0x19d   :  { %v2272_v23 = vadd.f32 %v2270_v28, %v2266_v43 }
 0x19e   :  { %v2273_v14 = vmax.f32 %v2219_v4, %v2271_v61  ;;  %4296 = vmatpush3.bf16.msra.mxu0 %v4463_v35 }
 0x19f   :  { %v2274_v44 = vmax.f32 %v2220_v0, %v2272_v23  ;;  %4297 = vmatprep.subr.bf16.mxu0 %v4501_v13  ;;  %v4091_v0 = vld [vmem:[%s7437_s6] ss:$0 sm:$0xff] }
 0x1a0   :  { %v2277_v27 = vadd.f32 %v2276_v60, %v2273_v14 }
 0x1a1   :  { %v2278_v57 = vadd.f32 %v2276_v60, %v2274_v44 }
 0x1a2   :  { %v2279_v25 = vmax.f32 %v2277_v27, 0.0  ;;  %4298 = vmatpush3.bf16.msra.mxu0 %v4464_v24 }
 0x1a3   :  { %v2280_v2 = vmax.f32 %v2278_v57, 0.0  ;;  %4299 = vmatprep.subr.bf16.mxu0 %v4501_v13 }
 0x1a5   :  { %v4107_v22 = vpack.c.bf16 %v2280_v2, %v2279_v25 }
 0x1a6   :  { %4300 = vmatpush3.bf16.msra.mxu0 %v4465_v9 }
 0x1a7   :  { %2289 = vst.msk [vmem:[#allocation3 + $0x38] sm:$0xff] %vm5298_vm3, %v4107_v22  ;;  %4301 = vmatprep.subr.bf16.mxu0 %v4501_v13 }
 0x1aa   :  { %4302 = vmatpush3.bf16.msra.mxu0 %v4466_v39 }
 0x1ab   :  { %4303 = vmatprep.subr.bf16.mxu0 %v4501_v13 }
 0x1ae   :  { %v2297_v47 = vld [vmem:[#allocation3 + $0x38] sm:$0xff]  ;;  %4304 = vmatpush3.bf16.msra.mxu0 %v4467_v21 }
 0x1af   :  { %v3961_v51 = vcombine.low %v2297_v47, %v2297_v47  ;;  %v3962_v10 = vcombine.high %v2297_v47, %v2297_v47  ;;  %4305 = vmatprep.subr.bf16.mxu0 %v4501_v13 }
 0x1b1   :  { %3697 = vmatprep.mubr.bf16.mxu1 %v3962_v10 }
 0x1b2   :  { %3698 = vmatmul.mubr.bf16.vlgmr.msra.gmra.mrb[12].mxu1 %v3961_v51  ;;  %4306 = vmatpush3.bf16.msra.mxu0 %v4468_v7 }
 0x1b3   :  { %4307 = vmatprep.subr.bf16.mxu0 %v4501_v13 }
 0x1b6   :  { %4308 = vmatpush3.bf16.msra.mxu0 %v4469_v3 }
 0x1bb   :  { %v4168_v5 = vpop.f32.mrb[4].mxu0 }
 0x1bc   :  { %v4169_v12 = vpop.f32.mrb[5].mxu0 }
 0x1bd   :  { %v4170_v15 = vadd.f32 %v4169_v12, %v4168_v5  ;;  %v4171_v8 = vpop.f32.mrb[6].mxu0 }
 0x1be   :  { %v4172_v29 = vpop.f32.mrb[7].mxu0 }
 0x1bf   :  { %v3500_v54 = vadd.f32 %v4170_v15, %v3460_v56 }
 0x1e4   :  { %v4190_v48 = vpop.f32.mrb[4].mxu1 }
 0x1e5   :  { %v4191_v36 = vpop.f32.mrb[5].mxu1 }
 0x1e6   :  { %v4192_v42 = vadd.f32 %v4191_v36, %v4190_v48  ;;  %v4193_v63 = vpop.f32.mrb[6].mxu1 }
 0x1e7   :  { %v4194_v17 = vpop.f32.mrb[7].mxu1 }
 0x1e8   :  { %v3540_v46 = vadd.f32 %v4192_v42, %v3500_v54 }
 0x20c   :  { %v4212_v34 = vpop.f32.mrb[8].mxu0 }
 0x20d   :  { %v4213_v31 = vpop.f32.mrb[9].mxu0 }
 0x20e   :  { %v4214_v52 = vadd.f32 %v4213_v31, %v4212_v34  ;;  %v4215_v20 = vpop.f32.mrb[10].mxu0 }
 0x20f   :  { %v4216_v49 = vpop.f32.mrb[11].mxu0 }
 0x210   :  { %v3580_v58 = vadd.f32 %v4214_v52, %v3540_v46 }
 0x236   :  { %v4234_v18 = vpop.f32.mrb[8].mxu1 }
 0x237   :  { %v4235_v30 = vpop.f32.mrb[9].mxu1 }
 0x238   :  { %v4236_v19 = vadd.f32 %v4235_v30, %v4234_v18  ;;  %v4237_v6 = vpop.f32.mrb[10].mxu1 }
 0x239   :  { %v4238_v41 = vpop.f32.mrb[11].mxu1 }
 0x23a   :  { %v3620_v40 = vadd.f32 %v4236_v19, %v3580_v58 }
 0x25e   :  { %v4256_v62 = vpop.f32.mrb[12].mxu0 }
 0x25f   :  { %v4257_v53 = vpop.f32.mrb[13].mxu0 }
 0x260   :  { %v4258_v26 = vadd.f32 %v4257_v53, %v4256_v62  ;;  %v4259_v55 = vpop.f32.mrb[14].mxu0 }
 0x261   :  { %v4260_v59 = vpop.f32.mrb[15].mxu0 }
 0x262   :  { %v3660_v33 = vadd.f32 %v4258_v26, %v3620_v40 }
 0x285   :  { %v4278_v32 = vpop.f32.mrb[12].mxu1 }
 0x286   :  { %v4279_v16 = vpop.f32.mrb[13].mxu1 }
 0x287   :  { %v4280_v50 = vadd.f32 %v4279_v16, %v4278_v32  ;;  %v4281_v28 = vpop.f32.mrb[14].mxu1 }
 0x288   :  { %v4282_v45 = vpop.f32.mrb[15].mxu1 }
 0x289   :  { %v3700_v38 = vadd.f32 %v4280_v50, %v3660_v33 }
 0x28b   :  { %v3705_v4 = vmax.f32 %v3700_v38, 0.0 }
 0x28d   :  { %v3706_v1 = vpack.c.bf16 %v3705_v4, %v3705_v4 }
 0x28f   :  { %4310 = vmatmul.mubr.bf16.vlgmr.msra.gmra.mrb[16].mxu0 %v3706_v1 }
 0x362   :  { %v3812_v11 = vpop.f32.mrb[16].mxu0 }
 0x363   :  { %v3813_v43 = vadd.f32 %v4091_v0, %v3812_v11  ;;  %v4311_v56 = vpop.f32.mrb[17].mxu0 }
 0x364   :  { %v3815_v61 = vpop.f32.mrb[18].mxu0 }
 0x365   :  { %3818 = vst [vmem:[%s7438_s7] sm:$0xff] %v3813_v43  ;;  %v4312_v23 = vpop.f32.mrb[19].mxu0 }
 0x366   :  { %3823 = vsyncpa [#allocation5], 1 }
 0x367   :  { %3824 = vsyncpa [#allocation7], 1 }

</bundles_post_ra>
